<compile_context>
chip_gen: v5e
topology: v5e:2x2
jax: 0.10.0
libtpu: 0.0.40
codegen_flags: <defaults>
</compile_context>

<pallas_src>
import math
from functools import partial

import jax
import jax.numpy as jnp
from jax import lax
from jax.experimental import pallas as pl
from jax.experimental.pallas import tpu as pltpu


# ----------------------------------------------------------------------------
# Tiling helper
# ----------------------------------------------------------------------------

def _pick_tile(dim, target, mult):
    """Largest multiple of `mult` that divides `dim` and is <= target (else full dim)."""
    if dim <= target:
        return dim
    t = (target // mult) * mult
    while t >= mult:
        if dim % t == 0:
            return t
        t -= mult
    return dim  # no aligned divisor; fall back to the full dim


# ----------------------------------------------------------------------------
# Fused [LN + adaLN mod] -> matmul -> bias -> act -> [gated residual] kernel
# ----------------------------------------------------------------------------

def _linear_kernel(*refs, apply_ln, eps, act, pre_silu, has_res, has_gate):
    idx = 0
    x_ref = refs[idx]; idx += 1
    if apply_ln:
        scale_ref = refs[idx]; shift_ref = refs[idx + 1]; idx += 2
    w_ref = refs[idx]; b_ref = refs[idx + 1]; idx += 2
    if has_res:
        res_ref = refs[idx]; idx += 1
    if has_gate:
        gate_ref = refs[idx]; idx += 1
    o_ref = refs[idx]
    acc_ref = refs[idx + 1]

    kk = pl.program_id(3)
    nk = pl.num_programs(3)

    @pl.when(kk == 0)
    def _():
        acc_ref[...] = jnp.zeros_like(acc_ref)

    x = x_ref[0].astype(jnp.float32)                       # (tl, tk)
    if apply_ln:
        # LayerNorm over the full feature dim (tk == K here), then adaLN modulation.
        mean = jnp.mean(x, axis=-1, keepdims=True)
        xc = x - mean
        var = jnp.mean(xc * xc, axis=-1, keepdims=True)
        xn = xc * lax.rsqrt(var + eps)
        x = xn * (1.0 + scale_ref[0].astype(jnp.float32)) + shift_ref[0].astype(jnp.float32)
    if pre_silu:                                           # SiLU on the *input* (adaLN branch)
        x = x * jax.nn.sigmoid(x)

    acc_ref[...] += jnp.dot(x.astype(w_ref.dtype), w_ref[...],
                            preferred_element_type=jnp.float32)

    @pl.when(kk == nk - 1)
    def _():
        y = acc_ref[...] + b_ref[...].astype(jnp.float32)  # (tl, tn) + (1, tn)
        if act == "silu":
            y = y * jax.nn.sigmoid(y)
        elif act == "gelu_tanh":
            y = jax.nn.gelu(y, approximate=True)           # matches nn.GELU(approximate="tanh")
        if has_res:
            r = res_ref[0].astype(jnp.float32)
            if has_gate:
                y = r + gate_ref[0].astype(jnp.float32) * y
            else:
                y = r + y
        o_ref[0] = y.astype(o_ref.dtype)


def fused_linear(x, w, b, *, scale=None, shift=None, res=None, gate=None,
                 apply_ln=False, ln_eps=1e-6, act="none", pre_silu=False,
                 res_bcast=False, tl=256, tn=512, tk=1024):
    """out = [res + gate *] act([LN_mod](x) @ w + b).

    x:(B,L,K), w:(K,N), b:(N,), scale/shift:(B,1,K), res:(B or 1,L,N), gate:(B,1,N).
    """
    B, L, K = x.shape
    N = w.shape[1]
    if gate is not None:
        assert res is not None

    tl_ = _pick_tile(L, tl, 8)
    tn_ = _pick_tile(N, tn, 128)
    tk_ = K if apply_ln else _pick_tile(K, tk, 128)        # LN prologue needs full rows
    grid = (B, L // tl_, N // tn_, K // tk_)

    in_specs = [pl.BlockSpec((1, tl_, tk_), lambda bb, ll, nn, qq: (bb, ll, qq))]
    args = [x]
    if apply_ln:
        in_specs += [pl.BlockSpec((1, 1, K), lambda bb, ll, nn, qq: (bb, 0, 0)),
                     pl.BlockSpec((1, 1, K), lambda bb, ll, nn, qq: (bb, 0, 0))]
        args += [scale, shift]
    in_specs += [pl.BlockSpec((tk_, tn_), lambda bb, ll, nn, qq: (qq, nn)),
                 pl.BlockSpec((1, tn_), lambda bb, ll, nn, qq: (0, nn))]
    args += [w, b.reshape(1, N)]
    if res is not None:
        if res_bcast:
            in_specs.append(pl.BlockSpec((1, tl_, tn_), lambda bb, ll, nn, qq: (0, ll, nn)))
        else:
            in_specs.append(pl.BlockSpec((1, tl_, tn_), lambda bb, ll, nn, qq: (bb, ll, nn)))
        args.append(res)
    if gate is not None:
        in_specs.append(pl.BlockSpec((1, 1, tn_), lambda bb, ll, nn, qq: (bb, 0, nn)))
        args.append(gate)

    return pl.pallas_call(
        partial(_linear_kernel, apply_ln=apply_ln, eps=ln_eps, act=act,
                pre_silu=pre_silu, has_res=res is not None, has_gate=gate is not None),
        out_shape=jax.ShapeDtypeStruct((B, L, N), x.dtype),
        grid=grid,
        in_specs=in_specs,
        out_specs=pl.BlockSpec((1, tl_, tn_), lambda bb, ll, nn, qq: (bb, ll, nn)),
        scratch_shapes=[pltpu.VMEM((tl_, tn_), jnp.float32)],
        compiler_params=pltpu.CompilerParams(
            dimension_semantics=("parallel", "parallel", "parallel", "arbitrary")),
    )(*args)


# ----------------------------------------------------------------------------
# Flash attention (online softmax) with fused output projection + residual
# ----------------------------------------------------------------------------

def _flash_kernel(q_ref, k_ref, v_ref, wo_ref, bo_ref, res_ref, *rest,
                  num_heads, head_dim, scale, has_gate):
    if has_gate:
        gate_ref, o_ref, m_sc, l_sc, acc_sc = rest
    else:
        o_ref, m_sc, l_sc, acc_sc = rest

    j = pl.program_id(2)
    nj = pl.num_programs(2)

    @pl.when(j == 0)
    def _():
        m_sc[...] = jnp.full_like(m_sc, -jnp.inf)
        l_sc[...] = jnp.zeros_like(l_sc)
        acc_sc[...] = jnp.zeros_like(acc_sc)

    q = q_ref[0]                                           # (tq, C)
    k = k_ref[0]                                           # (tk, C)
    v = v_ref[0]                                           # (tk, C)

    for h in range(num_heads):                             # static unroll over heads
        sl = slice(h * head_dim, (h + 1) * head_dim)
        # scores: contract on head_dim directly (no k.T), accumulate in f32 on the MXU.
        s = lax.dot_general(q[:, sl], k[:, sl], (((1,), (1,)), ((), ())),
                            preferred_element_type=jnp.float32) * scale     # (tq, tk)
        m_prev = m_sc[h]                                   # (tq, 1)
        m_new = jnp.maximum(m_prev, jnp.max(s, axis=-1, keepdims=True))
        alpha = jnp.exp(m_prev - m_new)
        p = jnp.exp(s - m_new)
        l_sc[h] = alpha * l_sc[h] + jnp.sum(p, axis=-1, keepdims=True)
        vh = v[:, sl]
        pv = jnp.dot(p.astype(vh.dtype), vh, preferred_element_type=jnp.float32)
        acc_sc[h] = alpha * acc_sc[h] + pv
        m_sc[h] = m_new

    @pl.when(j == nj - 1)
    def _():
        # normalize each head (EUP reciprocal) and re-pack heads into a lane-dense (tq, C)
        o = jnp.concatenate(
            [acc_sc[h] * pl.reciprocal(l_sc[h], approx=True) for h in range(num_heads)],
            axis=-1)
        # fused output projection + (gated) residual epilogue -> lane-dense store
        y = jnp.dot(o.astype(wo_ref.dtype), wo_ref[...],
                    preferred_element_type=jnp.float32) + bo_ref[...].astype(jnp.float32)
        r = res_ref[0].astype(jnp.float32)
        if has_gate:
            y = r + gate_ref[0].astype(jnp.float32) * y
        else:
            y = r + y
        o_ref[0] = y.astype(o_ref.dtype)


def flash_attention(q, k, v, wo, bo, res, gate=None, *, num_heads, tq=256, tk=256):
    """out = res [+ gate] * (softmax(q k^T / sqrt(Dh)) v) @ wo + bo.

    q:(B,Lq,C), k/v:(B,Lk,C) (heads packed along C), wo:(C,C), bo:(C,),
    res:(B,Lq,C), gate:(B,1,C) or None (plain residual add).
    """
    B, Lq, C = q.shape
    Lk = k.shape[1]
    assert C % num_heads == 0
    Dh = C // num_heads
    tq_ = _pick_tile(Lq, tq, 8)
    tk_ = _pick_tile(Lk, tk, 8)
    scale = 1.0 / math.sqrt(Dh)

    in_specs = [
        pl.BlockSpec((1, tq_, C), lambda b, i, j: (b, i, 0)),
        pl.BlockSpec((1, tk_, C), lambda b, i, j: (b, j, 0)),
        pl.BlockSpec((1, tk_, C), lambda b, i, j: (b, j, 0)),
        pl.BlockSpec((C, C), lambda b, i, j: (0, 0)),
        pl.BlockSpec((1, C), lambda b, i, j: (0, 0)),
        pl.BlockSpec((1, tq_, C), lambda b, i, j: (b, i, 0)),
    ]
    args = [q, k, v, wo, bo.reshape(1, C), res]
    if gate is not None:
        in_specs.append(pl.BlockSpec((1, 1, C), lambda b, i, j: (b, 0, 0)))
        args.append(gate)

    return pl.pallas_call(
        partial(_flash_kernel, num_heads=num_heads, head_dim=Dh, scale=scale,
                has_gate=gate is not None),
        out_shape=jax.ShapeDtypeStruct((B, Lq, C), res.dtype),
        grid=(B, Lq // tq_, Lk // tk_),
        in_specs=in_specs,
        out_specs=pl.BlockSpec((1, tq_, C), lambda b, i, j: (b, i, 0)),
        scratch_shapes=[pltpu.VMEM((num_heads, tq_, 1), jnp.float32),
                        pltpu.VMEM((num_heads, tq_, 1), jnp.float32),
                        pltpu.VMEM((num_heads, tq_, Dh), jnp.float32)],
        compiler_params=pltpu.CompilerParams(
            dimension_semantics=("parallel", "parallel", "arbitrary")),
    )(*args)


# ----------------------------------------------------------------------------
# Glue: sinusoidal tables, patchify / unpatchify (pure reshapes)
# ----------------------------------------------------------------------------

def timestep_embedding(t, dim=256, max_period=10000):
    half = dim // 2
    freqs = jnp.exp(-math.log(max_period) * jnp.arange(half, dtype=jnp.float32) / half)
    args = t[:, None].astype(jnp.float32) * freqs[None, :]
    return jnp.concatenate([jnp.cos(args), jnp.sin(args)], axis=-1)   # cos first (torch code)


def absolute_pos_emb(channels, res):
    freq_dim = channels // 3 // 2
    freqs = 1.0 / (10000.0 ** (jnp.arange(freq_dim, dtype=jnp.float32) / freq_dim))
    coords = jnp.stack(
        jnp.meshgrid(*([jnp.arange(res)] * 3), indexing="ij"), axis=-1
    ).reshape(-1, 3)                                                   # (L, 3), order (i,j,k)
    flat = coords.reshape(-1).astype(jnp.float32)                      # (3L,)
    out = flat[:, None] * freqs[None, :]                               # (3L, freq_dim)
    emb = jnp.concatenate([jnp.sin(out), jnp.cos(out)], axis=-1)       # (3L, 2*freq_dim)
    emb = emb.reshape(coords.shape[0], -1)                             # (L, 6*freq_dim)
    if emb.shape[1] < channels:
        pad = jnp.zeros((emb.shape[0], channels - emb.shape[1]), jnp.float32)
        emb = jnp.concatenate([emb, pad], axis=-1)
    return emb


# ----------------------------------------------------------------------------
# Model forward
# ----------------------------------------------------------------------------

def block_forward(h, t_emb, cond, prm, num_heads):
    B, _, C = h.shape

    # adaLN modulation: Linear(SiLU(t_emb)) -> chunk(6)
    mod = fused_linear(t_emb, prm["ada_w"], prm["ada_b"], pre_silu=True)        # (B,1,6C)
    shift_msa, scale_msa, gate_msa, shift_mlp, scale_mlp, gate_mlp = jnp.split(mod, 6, axis=-1)

    # --- self attention: LN+mod fused into the q/k/v projections, out-proj + gated
    #     residual fused into the flash-attention epilogue ---
    q = fused_linear(h, prm["sa_q_w"], prm["sa_q_b"], apply_ln=True,
                     scale=scale_msa, shift=shift_msa)
    k = fused_linear(h, prm["sa_k_w"], prm["sa_k_b"], apply_ln=True,
                     scale=scale_msa, shift=shift_msa)
    v = fused_linear(h, prm["sa_v_w"], prm["sa_v_b"], apply_ln=True,
                     scale=scale_msa, shift=shift_msa)
    h = flash_attention(q, k, v, prm["attn_out_w"], prm["attn_out_b"],
                        res=h, gate=gate_msa, num_heads=num_heads)

    # --- cross attention (norm2 affine folded into scale/shift; residual is a plain add) ---
    g2 = jnp.broadcast_to((prm["norm2_g"] - 1.0)[None, None, :], (B, 1, C)).astype(h.dtype)
    b2 = jnp.broadcast_to(prm["norm2_b"][None, None, :], (B, 1, C)).astype(h.dtype)
    qc = fused_linear(h, prm["ca_q_w"], prm["ca_q_b"], apply_ln=True, scale=g2, shift=b2)
    kc = fused_linear(cond, prm["ca_k_w"], prm["ca_k_b"])
    vc = fused_linear(cond, prm["ca_v_w"], prm["ca_v_b"])
    h = flash_attention(qc, kc, vc, prm["cross_out_w"], prm["cross_out_b"],
                        res=h, gate=None, num_heads=num_heads)

    # --- MLP: LN+mod fused into mlp0, gated residual fused into mlp1 ---
    m = fused_linear(h, prm["mlp0_w"], prm["mlp0_b"], apply_ln=True,
                     scale=scale_mlp, shift=shift_mlp, act="gelu_tanh")
    h = fused_linear(m, prm["mlp1_w"], prm["mlp1_b"], res=h, gate=gate_mlp)
    return h


def model_forward(params, x, t, cond, *, patch_size, num_heads, model_channels):
    B, Cin, R = x.shape[0], x.shape[1], x.shape[2]
    p = patch_size
    Rp = R // p
    L = Rp ** 3
    C = model_channels

    # Patchify (torch: reshape -> permute(0,1,3,5,7,2,4,6) -> flatten -> permute(0,2,1))
    h = x.reshape(B, Cin, Rp, p, Rp, p, Rp, p)
    h = h.transpose(0, 1, 3, 5, 7, 2, 4, 6)
    h = h.reshape(B, Cin * p ** 3, L).transpose(0, 2, 1)                        # (B, L, Cin*p^3)

    # input projection with fused absolute-position-embedding add
    pos = params["pos_emb"].reshape(1, L, C).astype(x.dtype)
    h = fused_linear(h, params["in_w"], params["in_b"], res=pos, res_bcast=True)

    # timestep embedder: sinusoid(256) -> Linear -> SiLU -> Linear
    t_freq = timestep_embedding(t, 256).reshape(B, 1, 256).astype(x.dtype)
    te = fused_linear(t_freq, params["t0_w"], params["t0_b"], act="silu")
    t_emb = fused_linear(te, params["t1_w"], params["t1_b"])                    # (B,1,C)

    for prm in params["blocks"]:
        h = block_forward(h, t_emb, cond, prm, num_heads)

    # final LayerNorm (functional.layer_norm, eps=1e-5, no affine) fused with out projection
    zeros = jnp.zeros((B, 1, C), h.dtype)
    h = fused_linear(h, params["out_w"], params["out_b"], apply_ln=True,
                     scale=zeros, shift=zeros, ln_eps=1e-5)                     # (B, L, Co*p^3)

    # Unpatchify
    Co_p3 = params["out_w"].shape[1]
    h = h.transpose(0, 2, 1).reshape(B, Co_p3, Rp, Rp, Rp)
    Co = Co_p3 // p ** 3
    h = h.reshape(B, Co, p, p, p, Rp, Rp, Rp)
    h = h.transpose(0, 1, 5, 2, 6, 3, 7, 4)
    h = h.reshape(B, Co, R, R, R)
    return h


# ----------------------------------------------------------------------------
# Deterministic synthetic parameter initialization (shapes from __init__)
# ----------------------------------------------------------------------------

def init_params(key, cfg):
    C = cfg["model_channels"]
    Cin = cfg["in_channels"]
    Cc = cfg["cond_channels"]
    Co = cfg["out_channels"]
    p = cfg["patch_size"]
    nb = cfg["num_blocks"]
    hidden = int(C * cfg["mlp_ratio"])
    Rp = cfg["resolution"] // p

    def w(k, shape, std=0.02):
        return std * jax.random.normal(k, shape, jnp.float32)

    keys = jax.random.split(key, 8 + nb)
    # NOTE: torch init zeros out out_layer / adaLN weights; we use small random
    # weights here so the synthetic kernel produces non-trivial outputs.
    params = {
        "in_w": w(keys[0], (Cin * p ** 3, C)),
        "in_b": jnp.zeros((C,), jnp.float32),
        "t0_w": w(keys[1], (256, C)),
        "t0_b": jnp.zeros((C,), jnp.float32),
        "t1_w": w(keys[2], (C, C)),
        "t1_b": jnp.zeros((C,), jnp.float32),
        "out_w": w(keys[3], (C, Co * p ** 3)),
        "out_b": jnp.zeros((Co * p ** 3,), jnp.float32),
        "pos_emb": absolute_pos_emb(C, Rp),
        "blocks": [],
    }
    for i in range(nb):
        bk = jax.random.split(keys[8 + i], 11)
        params["blocks"].append({
            "ada_w": w(bk[0], (C, 6 * C)),
            "ada_b": jnp.zeros((6 * C,), jnp.float32),
            # self-attn qkv weight pre-split along its output dim (== torch qkv.chunk(3))
            "sa_q_w": w(bk[1], (C, C)), "sa_q_b": jnp.zeros((C,), jnp.float32),
            "sa_k_w": w(bk[2], (C, C)), "sa_k_b": jnp.zeros((C,), jnp.float32),
            "sa_v_w": w(bk[3], (C, C)), "sa_v_b": jnp.zeros((C,), jnp.float32),
            "attn_out_w": w(bk[4], (C, C)),
            "attn_out_b": jnp.zeros((C,), jnp.float32),
            "norm2_g": jnp.ones((C,), jnp.float32),
            "norm2_b": jnp.zeros((C,), jnp.float32),
            "ca_q_w": w(bk[5], (C, C)), "ca_q_b": jnp.zeros((C,), jnp.float32),
            # cross-attn kv weight pre-split along its output dim
            "ca_k_w": w(bk[6], (Cc, C)), "ca_k_b": jnp.zeros((C,), jnp.float32),
            "ca_v_w": w(bk[7], (Cc, C)), "ca_v_b": jnp.zeros((C,), jnp.float32),
            "cross_out_w": w(bk[8], (C, C)),
            "cross_out_b": jnp.zeros((C,), jnp.float32),
            "mlp0_w": w(bk[9], (C, hidden)),
            "mlp0_b": jnp.zeros((hidden,), jnp.float32),
            "mlp1_w": w(bk[10], (hidden, C)),
            "mlp1_b": jnp.zeros((C,), jnp.float32),
        })
    return params


# ----------------------------------------------------------------------------
# Main
# ----------------------------------------------------------------------------

if __name__ == "__main__":
    cfg = dict(
        resolution=8,
        in_channels=4,
        model_channels=64,
        cond_channels=32,
        out_channels=4,
        num_blocks=2,
        num_heads=2,       # head_dim = 32
        mlp_ratio=4,
        patch_size=2,
    )
    B, Lc = 2, 8

    key = jax.random.PRNGKey(0)
    kp, kx, kt, kc = jax.random.split(key, 4)
    params = init_params(kp, cfg)

    x = jax.random.normal(kx, (B, cfg["in_channels"],
                               cfg["resolution"], cfg["resolution"], cfg["resolution"]),
                          jnp.float32)
    t = jax.random.uniform(kt, (B,), jnp.float32) * 1000.0
    cond = jax.random.normal(kc, (B, Lc, cfg["cond_channels"]), jnp.float32)

    fwd = jax.jit(partial(model_forward,
                          patch_size=cfg["patch_size"],
                          num_heads=cfg["num_heads"],
                          model_channels=cfg["model_channels"]))
    out = fwd(params, x, t, cond)
    jax.block_until_ready(out)

    assert out.shape == (B, cfg["out_channels"],
                         cfg["resolution"], cfg["resolution"], cfg["resolution"]), out.shape
    assert bool(jnp.all(jnp.isfinite(out)))
    print("KERNEL_OK")
</pallas_src>

<mosaic_0001>
module attributes {stable_mosaic.version = 11 : i64} {
  func.func @_linear_kernel(%arg0: i32, %arg1: i32, %arg2: i32, %arg3: i32, %arg4: memref<1x64x32xf32, #tpu.memory_space<vmem>>, %arg5: memref<32x64xf32, #tpu.memory_space<vmem>>, %arg6: memref<1x64xf32, #tpu.memory_space<vmem>>, %arg7: memref<1x64x64xf32, #tpu.memory_space<vmem>>, %arg8: memref<1x64x64xf32, #tpu.memory_space<vmem>>, %arg9: memref<64x64xf32, #tpu.memory_space<vmem>>) attributes {dimension_semantics = [#tpu.dimension_semantics<parallel>, #tpu.dimension_semantics<parallel>, #tpu.dimension_semantics<parallel>, #tpu.dimension_semantics<arbitrary>], iteration_bounds = array<i64: 2, 1, 1, 1>, scalar_prefetch = 0 : i64, scratch_operands = 1 : i64, tpu.core_type = #tpu.core_type<tc>, window_params = [{transform_indices = @transform_0, window_bounds = array<i64: 1, 64, 32>}, {transform_indices = @transform_1, window_bounds = array<i64: 32, 64>}, {transform_indices = @transform_2, window_bounds = array<i64: 1, 64>}, {transform_indices = @transform_3, window_bounds = array<i64: 1, 64, 64>}, {transform_indices = @transform_4, window_bounds = array<i64: 1, 64, 64>}]} {
    %c0_i32 = arith.constant 0 : i32
    %0 = arith.cmpi eq, %arg3, %c0_i32 : i32
    %1 = arith.extui %0 : i1 to i32
    %c0_i32_0 = arith.constant 0 : i32
    %2 = arith.cmpi ne, %1, %c0_i32_0 : i32
    scf.if %2 {
      %cst_11 = arith.constant 0.000000e+00 : f32
      %13 = vector.broadcast %cst_11 : f32 to vector<64x64xf32>
      %c0_12 = arith.constant 0 : index
      %c0_13 = arith.constant 0 : index
      %14 = vector.load %arg9[%c0_12, %c0_13] : memref<64x64xf32, #tpu.memory_space<vmem>>, vector<64x64xf32>
      tpu.vector_store %arg9[%c0_12, %c0_13], %13 {strides = array<i32>} : memref<64x64xf32, #tpu.memory_space<vmem>>, vector<64x64xf32>,
    } else {
    }
    %c0 = arith.constant 0 : index
    %c0_1 = arith.constant 0 : index
    %c0_2 = arith.constant 0 : index
    %3 = vector.load %arg4[%c0, %c0_1, %c0_2] : memref<1x64x32xf32, #tpu.memory_space<vmem>>, vector<1x64x32xf32>
    %4 = vector.shape_cast %3 : vector<1x64x32xf32> to vector<64x32xf32>
    %c0_3 = arith.constant 0 : index
    %c0_4 = arith.constant 0 : index
    %5 = vector.load %arg9[%c0_3, %c0_4] : memref<64x64xf32, #tpu.memory_space<vmem>>, vector<64x64xf32>
    %c0_5 = arith.constant 0 : index
    %c0_6 = arith.constant 0 : index
    %6 = vector.load %arg5[%c0_5, %c0_6] : memref<32x64xf32, #tpu.memory_space<vmem>>, vector<32x64xf32>
    %cst = arith.constant dense<0.000000e+00> : vector<64x64xf32>
    %7 = tpu.matmul %4, %6, %cst {dimension_numbers = #tpu.dot_dimension_numbers<[1], [0], [0], [1], [0, 0, 1, 1], [], []>} : vector<64x32xf32>, vector<32x64xf32>, vector<64x64xf32> -> vector<64x64xf32>
    %8 = arith.addf %5, %7 : vector<64x64xf32>
    %c0_7 = arith.constant 0 : index
    %c0_8 = arith.constant 0 : index
    %9 = vector.load %arg9[%c0_7, %c0_8] : memref<64x64xf32, #tpu.memory_space<vmem>>, vector<64x64xf32>
    tpu.vector_store %arg9[%c0_7, %c0_8], %8 {strides = array<i32>} : memref<64x64xf32, #tpu.memory_space<vmem>>, vector<64x64xf32>,
    %c0_i32_9 = arith.constant 0 : i32
    %10 = arith.cmpi eq, %arg3, %c0_i32_9 : i32
    %11 = arith.extui %10 : i1 to i32
    %c0_i32_10 = arith.constant 0 : i32
    %12 = arith.cmpi ne, %11, %c0_i32_10 : i32
    scf.if %12 {
      %c0_11 = arith.constant 0 : index
      %c0_12 = arith.constant 0 : index
      %13 = vector.load %arg9[%c0_11, %c0_12] : memref<64x64xf32, #tpu.memory_space<vmem>>, vector<64x64xf32>
      %c0_13 = arith.constant 0 : index
      %c0_14 = arith.constant 0 : index
      %14 = vector.load %arg6[%c0_13, %c0_14] : memref<1x64xf32, #tpu.memory_space<vmem>>, vector<1x64xf32>
      %15 = vector.broadcast %14 : vector<1x64xf32> to vector<64x64xf32>
      %16 = arith.addf %13, %15 : vector<64x64xf32>
      %c0_15 = arith.constant 0 : index
      %c0_16 = arith.constant 0 : index
      %c0_17 = arith.constant 0 : index
      %17 = vector.load %arg7[%c0_15, %c0_16, %c0_17] : memref<1x64x64xf32, #tpu.memory_space<vmem>>, vector<1x64x64xf32>
      %18 = vector.shape_cast %17 : vector<1x64x64xf32> to vector<64x64xf32>
      %19 = arith.addf %18, %16 : vector<64x64xf32>
      %c0_18 = arith.constant 0 : index
      %c0_19 = arith.constant 0 : index
      %c0_20 = arith.constant 0 : index
      %20 = vector.load %arg8[%c0_18, %c0_19, %c0_20] : memref<1x64x64xf32, #tpu.memory_space<vmem>>, vector<1x64x64xf32>
      %21 = vector.shape_cast %20 : vector<1x64x64xf32> to vector<64x64xf32>
      %22 = vector.shape_cast %19 : vector<64x64xf32> to vector<1x64x64xf32>
      tpu.vector_store %arg8[%c0_18, %c0_19, %c0_20], %22 {strides = array<i32>} : memref<1x64x64xf32, #tpu.memory_space<vmem>>, vector<1x64x64xf32>,
    } else {
    }
    return
  }
  func.func @transform_0(%arg0: i32, %arg1: i32, %arg2: i32, %arg3: i32) -> (i32, i32, i32) {
    %c0_i32 = arith.constant 0 : i32
    return %arg0, %arg1, %arg3 : i32, i32, i32
  }
  func.func @transform_1(%arg0: i32, %arg1: i32, %arg2: i32, %arg3: i32) -> (i32, i32) {
    %c0_i32 = arith.constant 0 : i32
    return %arg3, %arg2 : i32, i32
  }
  func.func @transform_2(%arg0: i32, %arg1: i32, %arg2: i32, %arg3: i32) -> (i32, i32) {
    %c0_i32 = arith.constant 0 : i32
    %c0_i32_0 = arith.constant 0 : i32
    return %c0_i32, %arg2 : i32, i32
  }
  func.func @transform_3(%arg0: i32, %arg1: i32, %arg2: i32, %arg3: i32) -> (i32, i32, i32) {
    %c0_i32 = arith.constant 0 : i32
    %c0_i32_0 = arith.constant 0 : i32
    return %c0_i32, %arg1, %arg2 : i32, i32, i32
  }
  func.func @transform_4(%arg0: i32, %arg1: i32, %arg2: i32, %arg3: i32) -> (i32, i32, i32) {
    %c0_i32 = arith.constant 0 : i32
    return %arg0, %arg1, %arg2 : i32, i32, i32
  }
}

module attributes {stable_mosaic.version = 11 : i64} {
  func.func @_linear_kernel(%arg0: i32, %arg1: i32, %arg2: i32, %arg3: i32, %arg4: memref<1x1x256xf32, #tpu.memory_space<vmem>>, %arg5: memref<256x64xf32, #tpu.memory_space<vmem>>, %arg6: memref<1x64xf32, #tpu.memory_space<vmem>>, %arg7: memref<1x1x64xf32, #tpu.memory_space<vmem>>, %arg8: memref<1x64xf32, #tpu.memory_space<vmem>>) attributes {dimension_semantics = [#tpu.dimension_semantics<parallel>, #tpu.dimension_semantics<parallel>, #tpu.dimension_semantics<parallel>, #tpu.dimension_semantics<arbitrary>], iteration_bounds = array<i64: 2, 1, 1, 1>, scalar_prefetch = 0 : i64, scratch_operands = 1 : i64, tpu.core_type = #tpu.core_type<tc>, window_params = [{transform_indices = @transform_0, window_bounds = array<i64: 1, 1, 256>}, {transform_indices = @transform_1, window_bounds = array<i64: 256, 64>}, {transform_indices = @transform_2, window_bounds = array<i64: 1, 64>}, {transform_indices = @transform_3, window_bounds = array<i64: 1, 1, 64>}]} {
    %c0_i32 = arith.constant 0 : i32
    %0 = arith.cmpi eq, %arg3, %c0_i32 : i32
    %1 = arith.extui %0 : i1 to i32
    %c0_i32_0 = arith.constant 0 : i32
    %2 = arith.cmpi ne, %1, %c0_i32_0 : i32
    scf.if %2 {
      %cst_11 = arith.constant 0.000000e+00 : f32
      %13 = vector.broadcast %cst_11 : f32 to vector<1x64xf32>
      %c0_12 = arith.constant 0 : index
      %c0_13 = arith.constant 0 : index
      %14 = vector.load %arg8[%c0_12, %c0_13] : memref<1x64xf32, #tpu.memory_space<vmem>>, vector<1x64xf32>
      tpu.vector_store %arg8[%c0_12, %c0_13], %13 {strides = array<i32>} : memref<1x64xf32, #tpu.memory_space<vmem>>, vector<1x64xf32>,
    } else {
    }
    %c0 = arith.constant 0 : index
    %c0_1 = arith.constant 0 : index
    %c0_2 = arith.constant 0 : index
    %3 = vector.load %arg4[%c0, %c0_1, %c0_2] : memref<1x1x256xf32, #tpu.memory_space<vmem>>, vector<1x1x256xf32>
    %4 = vector.shape_cast %3 : vector<1x1x256xf32> to vector<1x256xf32>
    %c0_3 = arith.constant 0 : index
    %c0_4 = arith.constant 0 : index
    %5 = vector.load %arg8[%c0_3, %c0_4] : memref<1x64xf32, #tpu.memory_space<vmem>>, vector<1x64xf32>
    %c0_5 = arith.constant 0 : index
    %c0_6 = arith.constant 0 : index
    %6 = vector.load %arg5[%c0_5, %c0_6] : memref<256x64xf32, #tpu.memory_space<vmem>>, vector<256x64xf32>
    %cst = arith.constant dense<0.000000e+00> : vector<1x64xf32>
    %7 = tpu.matmul %4, %6, %cst {dimension_numbers = #tpu.dot_dimension_numbers<[1], [0], [0], [1], [0, 0, 1, 1], [], []>} : vector<1x256xf32>, vector<256x64xf32>, vector<1x64xf32> -> vector<1x64xf32>
    %8 = arith.addf %5, %7 : vector<1x64xf32>
    %c0_7 = arith.constant 0 : index
    %c0_8 = arith.constant 0 : index
    %9 = vector.load %arg8[%c0_7, %c0_8] : memref<1x64xf32, #tpu.memory_space<vmem>>, vector<1x64xf32>
    tpu.vector_store %arg8[%c0_7, %c0_8], %8 {strides = array<i32>} : memref<1x64xf32, #tpu.memory_space<vmem>>, vector<1x64xf32>,
    %c0_i32_9 = arith.constant 0 : i32
    %10 = arith.cmpi eq, %arg3, %c0_i32_9 : i32
    %11 = arith.extui %10 : i1 to i32
    %c0_i32_10 = arith.constant 0 : i32
    %12 = arith.cmpi ne, %11, %c0_i32_10 : i32
    scf.if %12 {
      %c0_11 = arith.constant 0 : index
      %c0_12 = arith.constant 0 : index
      %13 = vector.load %arg8[%c0_11, %c0_12] : memref<1x64xf32, #tpu.memory_space<vmem>>, vector<1x64xf32>
      %c0_13 = arith.constant 0 : index
      %c0_14 = arith.constant 0 : index
      %14 = vector.load %arg6[%c0_13, %c0_14] : memref<1x64xf32, #tpu.memory_space<vmem>>, vector<1x64xf32>
      %15 = arith.addf %13, %14 : vector<1x64xf32>
      %16 = arith.negf %15 : vector<1x64xf32>
      %17 = math.exp %16 : vector<1x64xf32>
      %cst_15 = arith.constant 1.000000e+00 : f32
      %18 = vector.broadcast %cst_15 : f32 to vector<1x64xf32>
      %19 = arith.addf %18, %17 : vector<1x64xf32>
      %20 = arith.divf %18, %19 : vector<1x64xf32>
      %21 = arith.mulf %15, %20 : vector<1x64xf32>
      %c0_16 = arith.constant 0 : index
      %c0_17 = arith.constant 0 : index
      %c0_18 = arith.constant 0 : index
      %22 = vector.load %arg7[%c0_16, %c0_17, %c0_18] : memref<1x1x64xf32, #tpu.memory_space<vmem>>, vector<1x1x64xf32>
      %23 = vector.shape_cast %22 : vector<1x1x64xf32> to vector<1x64xf32>
      %24 = vector.shape_cast %21 : vector<1x64xf32> to vector<1x1x64xf32>
      tpu.vector_store %arg7[%c0_16, %c0_17, %c0_18], %24 {strides = array<i32>} : memref<1x1x64xf32, #tpu.memory_space<vmem>>, vector<1x1x64xf32>,
    } else {
    }
    return
  }
  func.func @transform_0(%arg0: i32, %arg1: i32, %arg2: i32, %arg3: i32) -> (i32, i32, i32) {
    %c0_i32 = arith.constant 0 : i32
    return %arg0, %arg1, %arg3 : i32, i32, i32
  }
  func.func @transform_1(%arg0: i32, %arg1: i32, %arg2: i32, %arg3: i32) -> (i32, i32) {
    %c0_i32 = arith.constant 0 : i32
    return %arg3, %arg2 : i32, i32
  }
  func.func @transform_2(%arg0: i32, %arg1: i32, %arg2: i32, %arg3: i32) -> (i32, i32) {
    %c0_i32 = arith.constant 0 : i32
    %c0_i32_0 = arith.constant 0 : i32
    return %c0_i32, %arg2 : i32, i32
  }
  func.func @transform_3(%arg0: i32, %arg1: i32, %arg2: i32, %arg3: i32) -> (i32, i32, i32) {
    %c0_i32 = arith.constant 0 : i32
    return %arg0, %arg1, %arg2 : i32, i32, i32
  }
}

module attributes {stable_mosaic.version = 11 : i64} {
  func.func @_linear_kernel(%arg0: i32, %arg1: i32, %arg2: i32, %arg3: i32, %arg4: memref<1x1x64xf32, #tpu.memory_space<vmem>>, %arg5: memref<64x64xf32, #tpu.memory_space<vmem>>, %arg6: memref<1x64xf32, #tpu.memory_space<vmem>>, %arg7: memref<1x1x64xf32, #tpu.memory_space<vmem>>, %arg8: memref<1x64xf32, #tpu.memory_space<vmem>>) attributes {dimension_semantics = [#tpu.dimension_semantics<parallel>, #tpu.dimension_semantics<parallel>, #tpu.dimension_semantics<parallel>, #tpu.dimension_semantics<arbitrary>], iteration_bounds = array<i64: 2, 1, 1, 1>, scalar_prefetch = 0 : i64, scratch_operands = 1 : i64, tpu.core_type = #tpu.core_type<tc>, window_params = [{transform_indices = @transform_0, window_bounds = array<i64: 1, 1, 64>}, {transform_indices = @transform_1, window_bounds = array<i64: 64, 64>}, {transform_indices = @transform_2, window_bounds = array<i64: 1, 64>}, {transform_indices = @transform_3, window_bounds = array<i64: 1, 1, 64>}]} {
    %c0_i32 = arith.constant 0 : i32
    %0 = arith.cmpi eq, %arg3, %c0_i32 : i32
    %1 = arith.extui %0 : i1 to i32
    %c0_i32_0 = arith.constant 0 : i32
    %2 = arith.cmpi ne, %1, %c0_i32_0 : i32
    scf.if %2 {
      %cst_11 = arith.constant 0.000000e+00 : f32
      %13 = vector.broadcast %cst_11 : f32 to vector<1x64xf32>
      %c0_12 = arith.constant 0 : index
      %c0_13 = arith.constant 0 : index
      %14 = vector.load %arg8[%c0_12, %c0_13] : memref<1x64xf32, #tpu.memory_space<vmem>>, vector<1x64xf32>
      tpu.vector_store %arg8[%c0_12, %c0_13], %13 {strides = array<i32>} : memref<1x64xf32, #tpu.memory_space<vmem>>, vector<1x64xf32>,
    } else {
    }
    %c0 = arith.constant 0 : index
    %c0_1 = arith.constant 0 : index
    %c0_2 = arith.constant 0 : index
    %3 = vector.load %arg4[%c0, %c0_1, %c0_2] : memref<1x1x64xf32, #tpu.memory_space<vmem>>, vector<1x1x64xf32>
    %4 = vector.shape_cast %3 : vector<1x1x64xf32> to vector<1x64xf32>
    %c0_3 = arith.constant 0 : index
    %c0_4 = arith.constant 0 : index
    %5 = vector.load %arg8[%c0_3, %c0_4] : memref<1x64xf32, #tpu.memory_space<vmem>>, vector<1x64xf32>
    %c0_5 = arith.constant 0 : index
    %c0_6 = arith.constant 0 : index
    %6 = vector.load %arg5[%c0_5, %c0_6] : memref<64x64xf32, #tpu.memory_space<vmem>>, vector<64x64xf32>
    %cst = arith.constant dense<0.000000e+00> : vector<1x64xf32>
    %7 = tpu.matmul %4, %6, %cst {dimension_numbers = #tpu.dot_dimension_numbers<[1], [0], [0], [1], [0, 0, 1, 1], [], []>} : vector<1x64xf32>, vector<64x64xf32>, vector<1x64xf32> -> vector<1x64xf32>
    %8 = arith.addf %5, %7 : vector<1x64xf32>
    %c0_7 = arith.constant 0 : index
    %c0_8 = arith.constant 0 : index
    %9 = vector.load %arg8[%c0_7, %c0_8] : memref<1x64xf32, #tpu.memory_space<vmem>>, vector<1x64xf32>
    tpu.vector_store %arg8[%c0_7, %c0_8], %8 {strides = array<i32>} : memref<1x64xf32, #tpu.memory_space<vmem>>, vector<1x64xf32>,
    %c0_i32_9 = arith.constant 0 : i32
    %10 = arith.cmpi eq, %arg3, %c0_i32_9 : i32
    %11 = arith.extui %10 : i1 to i32
    %c0_i32_10 = arith.constant 0 : i32
    %12 = arith.cmpi ne, %11, %c0_i32_10 : i32
    scf.if %12 {
      %c0_11 = arith.constant 0 : index
      %c0_12 = arith.constant 0 : index
      %13 = vector.load %arg8[%c0_11, %c0_12] : memref<1x64xf32, #tpu.memory_space<vmem>>, vector<1x64xf32>
      %c0_13 = arith.constant 0 : index
      %c0_14 = arith.constant 0 : index
      %14 = vector.load %arg6[%c0_13, %c0_14] : memref<1x64xf32, #tpu.memory_space<vmem>>, vector<1x64xf32>
      %15 = arith.addf %13, %14 : vector<1x64xf32>
      %c0_15 = arith.constant 0 : index
      %c0_16 = arith.constant 0 : index
      %c0_17 = arith.constant 0 : index
      %16 = vector.load %arg7[%c0_15, %c0_16, %c0_17] : memref<1x1x64xf32, #tpu.memory_space<vmem>>, vector<1x1x64xf32>
      %17 = vector.shape_cast %16 : vector<1x1x64xf32> to vector<1x64xf32>
      %18 = vector.shape_cast %15 : vector<1x64xf32> to vector<1x1x64xf32>
      tpu.vector_store %arg7[%c0_15, %c0_16, %c0_17], %18 {strides = array<i32>} : memref<1x1x64xf32, #tpu.memory_space<vmem>>, vector<1x1x64xf32>,
    } else {
    }
    return
  }
  func.func @transform_0(%arg0: i32, %arg1: i32, %arg2: i32, %arg3: i32) -> (i32, i32, i32) {
    %c0_i32 = arith.constant 0 : i32
    return %arg0, %arg1, %arg3 : i32, i32, i32
  }
  func.func @transform_1(%arg0: i32, %arg1: i32, %arg2: i32, %arg3: i32) -> (i32, i32) {
    %c0_i32 = arith.constant 0 : i32
    return %arg3, %arg2 : i32, i32
  }
  func.func @transform_2(%arg0: i32, %arg1: i32, %arg2: i32, %arg3: i32) -> (i32, i32) {
    %c0_i32 = arith.constant 0 : i32
    %c0_i32_0 = arith.constant 0 : i32
    return %c0_i32, %arg2 : i32, i32
  }
  func.func @transform_3(%arg0: i32, %arg1: i32, %arg2: i32, %arg3: i32) -> (i32, i32, i32) {
    %c0_i32 = arith.constant 0 : i32
    return %arg0, %arg1, %arg2 : i32, i32, i32
  }
}

module attributes {stable_mosaic.version = 11 : i64} {
  func.func @_flash_kernel(%arg0: i32, %arg1: i32, %arg2: i32, %arg3: memref<1x64x64xf32, #tpu.memory_space<vmem>>, %arg4: memref<1x64x64xf32, #tpu.memory_space<vmem>>, %arg5: memref<1x64x64xf32, #tpu.memory_space<vmem>>, %arg6: memref<64x64xf32, #tpu.memory_space<vmem>>, %arg7: memref<1x64xf32, #tpu.memory_space<vmem>>, %arg8: memref<1x64x64xf32, #tpu.memory_space<vmem>>, %arg9: memref<1x1x64xf32, #tpu.memory_space<vmem>>, %arg10: memref<1x64x64xf32, #tpu.memory_space<vmem>>, %arg11: memref<2x64x1xf32, #tpu.memory_space<vmem>>, %arg12: memref<2x64x1xf32, #tpu.memory_space<vmem>>, %arg13: memref<2x64x32xf32, #tpu.memory_space<vmem>>) attributes {dimension_semantics = [#tpu.dimension_semantics<parallel>, #tpu.dimension_semantics<parallel>, #tpu.dimension_semantics<arbitrary>], iteration_bounds = array<i64: 2, 1, 1>, scalar_prefetch = 0 : i64, scratch_operands = 3 : i64, tpu.core_type = #tpu.core_type<tc>, window_params = [{transform_indices = @transform_0, window_bounds = array<i64: 1, 64, 64>}, {transform_indices = @transform_1, window_bounds = array<i64: 1, 64, 64>}, {transform_indices = @transform_2, window_bounds = array<i64: 1, 64, 64>}, {pipeline_mode = #tpu.pipeline_mode<synchronous>, transform_indices = @transform_3, window_bounds = array<i64: 64, 64>}, {pipeline_mode = #tpu.pipeline_mode<synchronous>, transform_indices = @transform_4, window_bounds = array<i64: 1, 64>}, {transform_indices = @transform_5, window_bounds = array<i64: 1, 64, 64>}, {transform_indices = @transform_6, window_bounds = array<i64: 1, 1, 64>}, {transform_indices = @transform_7, window_bounds = array<i64: 1, 64, 64>}]} {
    %c0_i32 = arith.constant 0 : i32
    %0 = arith.cmpi eq, %arg2, %c0_i32 : i32
    %1 = arith.extui %0 : i1 to i32
    %c0_i32_0 = arith.constant 0 : i32
    %2 = arith.cmpi ne, %1, %c0_i32_0 : i32
    scf.if %2 {
      %cst_55 = arith.constant 0xFF800000 : f32
      %86 = vector.broadcast %cst_55 : f32 to vector<2x64x1xf32>
      %c0_56 = arith.constant 0 : index
      %c0_57 = arith.constant 0 : index
      %c0_58 = arith.constant 0 : index
      %87 = vector.load %arg11[%c0_56, %c0_57, %c0_58] : memref<2x64x1xf32, #tpu.memory_space<vmem>>, vector<2x64x1xf32>
      tpu.vector_store %arg11[%c0_56, %c0_57, %c0_58], %86 {strides = array<i32>} : memref<2x64x1xf32, #tpu.memory_space<vmem>>, vector<2x64x1xf32>,
      %cst_59 = arith.constant 0.000000e+00 : f32
      %88 = vector.broadcast %cst_59 : f32 to vector<2x64x1xf32>
      %c0_60 = arith.constant 0 : index
      %c0_61 = arith.constant 0 : index
      %c0_62 = arith.constant 0 : index
      %89 = vector.load %arg12[%c0_60, %c0_61, %c0_62] : memref<2x64x1xf32, #tpu.memory_space<vmem>>, vector<2x64x1xf32>
      tpu.vector_store %arg12[%c0_60, %c0_61, %c0_62], %88 {strides = array<i32>} : memref<2x64x1xf32, #tpu.memory_space<vmem>>, vector<2x64x1xf32>,
      %cst_63 = arith.constant 0.000000e+00 : f32
      %90 = vector.broadcast %cst_63 : f32 to vector<2x64x32xf32>
      %c0_64 = arith.constant 0 : index
      %c0_65 = arith.constant 0 : index
      %c0_66 = arith.constant 0 : index
      %91 = vector.load %arg13[%c0_64, %c0_65, %c0_66] : memref<2x64x32xf32, #tpu.memory_space<vmem>>, vector<2x64x32xf32>
      tpu.vector_store %arg13[%c0_64, %c0_65, %c0_66], %90 {strides = array<i32>} : memref<2x64x32xf32, #tpu.memory_space<vmem>>, vector<2x64x32xf32>,
    } else {
    }
    %c0 = arith.constant 0 : index
    %c0_1 = arith.constant 0 : index
    %c0_2 = arith.constant 0 : index
    %3 = vector.load %arg3[%c0, %c0_1, %c0_2] : memref<1x64x64xf32, #tpu.memory_space<vmem>>, vector<1x64x64xf32>
    %4 = vector.shape_cast %3 : vector<1x64x64xf32> to vector<64x64xf32>
    %c0_3 = arith.constant 0 : index
    %c0_4 = arith.constant 0 : index
    %c0_5 = arith.constant 0 : index
    %5 = vector.load %arg4[%c0_3, %c0_4, %c0_5] : memref<1x64x64xf32, #tpu.memory_space<vmem>>, vector<1x64x64xf32>
    %6 = vector.shape_cast %5 : vector<1x64x64xf32> to vector<64x64xf32>
    %c0_6 = arith.constant 0 : index
    %c0_7 = arith.constant 0 : index
    %c0_8 = arith.constant 0 : index
    %7 = vector.load %arg5[%c0_6, %c0_7, %c0_8] : memref<1x64x64xf32, #tpu.memory_space<vmem>>, vector<1x64x64xf32>
    %8 = vector.shape_cast %7 : vector<1x64x64xf32> to vector<64x64xf32>
    %9 = vector.extract_strided_slice %4 {offsets = [0, 0], sizes = [64, 32], strides = [1, 1]} : vector<64x64xf32> to vector<64x32xf32>
    %10 = vector.extract_strided_slice %6 {offsets = [0, 0], sizes = [64, 32], strides = [1, 1]} : vector<64x64xf32> to vector<64x32xf32>
    %cst = arith.constant dense<0.000000e+00> : vector<64x64xf32>
    %11 = tpu.matmul %9, %10, %cst {dimension_numbers = #tpu.dot_dimension_numbers<[1], [1], [0], [0], [0, 0, 1, 0], [], []>} : vector<64x32xf32>, vector<64x32xf32>, vector<64x64xf32> -> vector<64x64xf32>
    %cst_9 = arith.constant 0.176776692 : f32
    %12 = vector.broadcast %cst_9 : f32 to vector<64x64xf32>
    %13 = arith.mulf %11, %12 : vector<64x64xf32>
    %c0_10 = arith.constant 0 : index
    %c0_11 = arith.constant 0 : index
    %c0_12 = arith.constant 0 : index
    %14 = vector.load %arg11[%c0_10, %c0_11, %c0_12] : memref<2x64x1xf32, #tpu.memory_space<vmem>>, vector<1x64x1xf32>
    %15 = vector.shape_cast %14 : vector<1x64x1xf32> to vector<64x1xf32>
    %cst_13 = arith.constant dense<0xFF800000> : vector<64xf32>
    %16 = vector.multi_reduction <maximumf>, %13, %cst_13 [1] : vector<64x64xf32> to vector<64xf32>
    %17 = vector.shape_cast %16 : vector<64xf32> to vector<64x1xf32>
    %18 = arith.maximumf %15, %17 : vector<64x1xf32>
    %19 = arith.subf %15, %18 : vector<64x1xf32>
    %20 = math.exp %19 : vector<64x1xf32>
    %21 = vector.broadcast %18 : vector<64x1xf32> to vector<64x64xf32>
    %22 = arith.subf %13, %21 : vector<64x64xf32>
    %23 = math.exp %22 : vector<64x64xf32>
    %c0_14 = arith.constant 0 : index
    %c0_15 = arith.constant 0 : index
    %c0_16 = arith.constant 0 : index
    %24 = vector.load %arg12[%c0_14, %c0_15, %c0_16] : memref<2x64x1xf32, #tpu.memory_space<vmem>>, vector<1x64x1xf32>
    %25 = vector.shape_cast %24 : vector<1x64x1xf32> to vector<64x1xf32>
    %26 = arith.mulf %20, %25 : vector<64x1xf32>
    %cst_17 = arith.constant dense<0.000000e+00> : vector<64xf32>
    %27 = vector.multi_reduction <add>, %23, %cst_17 [1] : vector<64x64xf32> to vector<64xf32>
    %28 = vector.shape_cast %27 : vector<64xf32> to vector<64x1xf32>
    %29 = arith.addf %26, %28 : vector<64x1xf32>
    %c0_18 = arith.constant 0 : index
    %c0_19 = arith.constant 0 : index
    %c0_20 = arith.constant 0 : index
    %30 = vector.load %arg12[%c0_18, %c0_19, %c0_20] : memref<2x64x1xf32, #tpu.memory_space<vmem>>, vector<1x64x1xf32>
    %31 = vector.shape_cast %30 : vector<1x64x1xf32> to vector<64x1xf32>
    %32 = vector.shape_cast %29 : vector<64x1xf32> to vector<1x64x1xf32>
    tpu.vector_store %arg12[%c0_18, %c0_19, %c0_20], %32 {strides = array<i32>} : memref<2x64x1xf32, #tpu.memory_space<vmem>>, vector<1x64x1xf32>,
    %33 = vector.extract_strided_slice %8 {offsets = [0, 0], sizes = [64, 32], strides = [1, 1]} : vector<64x64xf32> to vector<64x32xf32>
    %cst_21 = arith.constant dense<0.000000e+00> : vector<64x32xf32>
    %34 = tpu.matmul %23, %33, %cst_21 {dimension_numbers = #tpu.dot_dimension_numbers<[1], [0], [0], [1], [0, 0, 1, 1], [], []>} : vector<64x64xf32>, vector<64x32xf32>, vector<64x32xf32> -> vector<64x32xf32>
    %c0_22 = arith.constant 0 : index
    %c0_23 = arith.constant 0 : index
    %c0_24 = arith.constant 0 : index
    %35 = vector.load %arg13[%c0_22, %c0_23, %c0_24] : memref<2x64x32xf32, #tpu.memory_space<vmem>>, vector<1x64x32xf32>
    %36 = vector.shape_cast %35 : vector<1x64x32xf32> to vector<64x32xf32>
    %37 = vector.broadcast %20 : vector<64x1xf32> to vector<64x32xf32>
    %38 = arith.mulf %37, %36 : vector<64x32xf32>
    %39 = arith.addf %38, %34 : vector<64x32xf32>
    %c0_25 = arith.constant 0 : index
    %c0_26 = arith.constant 0 : index
    %c0_27 = arith.constant 0 : index
    %40 = vector.load %arg13[%c0_25, %c0_26, %c0_27] : memref<2x64x32xf32, #tpu.memory_space<vmem>>, vector<1x64x32xf32>
    %41 = vector.shape_cast %40 : vector<1x64x32xf32> to vector<64x32xf32>
    %42 = vector.shape_cast %39 : vector<64x32xf32> to vector<1x64x32xf32>
    tpu.vector_store %arg13[%c0_25, %c0_26, %c0_27], %42 {strides = array<i32>} : memref<2x64x32xf32, #tpu.memory_space<vmem>>, vector<1x64x32xf32>,
    %c0_28 = arith.constant 0 : index
    %c0_29 = arith.constant 0 : index
    %c0_30 = arith.constant 0 : index
    %43 = vector.load %arg11[%c0_28, %c0_29, %c0_30] : memref<2x64x1xf32, #tpu.memory_space<vmem>>, vector<1x64x1xf32>
    %44 = vector.shape_cast %43 : vector<1x64x1xf32> to vector<64x1xf32>
    %45 = vector.shape_cast %18 : vector<64x1xf32> to vector<1x64x1xf32>
    tpu.vector_store %arg11[%c0_28, %c0_29, %c0_30], %45 {strides = array<i32>} : memref<2x64x1xf32, #tpu.memory_space<vmem>>, vector<1x64x1xf32>,
    %46 = vector.extract_strided_slice %4 {offsets = [0, 32], sizes = [64, 32], strides = [1, 1]} : vector<64x64xf32> to vector<64x32xf32>
    %47 = vector.extract_strided_slice %6 {offsets = [0, 32], sizes = [64, 32], strides = [1, 1]} : vector<64x64xf32> to vector<64x32xf32>
    %cst_31 = arith.constant dense<0.000000e+00> : vector<64x64xf32>
    %48 = tpu.matmul %46, %47, %cst_31 {dimension_numbers = #tpu.dot_dimension_numbers<[1], [1], [0], [0], [0, 0, 1, 0], [], []>} : vector<64x32xf32>, vector<64x32xf32>, vector<64x64xf32> -> vector<64x64xf32>
    %cst_32 = arith.constant 0.176776692 : f32
    %49 = vector.broadcast %cst_32 : f32 to vector<64x64xf32>
    %50 = arith.mulf %48, %49 : vector<64x64xf32>
    %c1 = arith.constant 1 : index
    %c0_33 = arith.constant 0 : index
    %c0_34 = arith.constant 0 : index
    %51 = vector.load %arg11[%c1, %c0_33, %c0_34] : memref<2x64x1xf32, #tpu.memory_space<vmem>>, vector<1x64x1xf32>
    %52 = vector.shape_cast %51 : vector<1x64x1xf32> to vector<64x1xf32>
    %cst_35 = arith.constant dense<0xFF800000> : vector<64xf32>
    %53 = vector.multi_reduction <maximumf>, %50, %cst_35 [1] : vector<64x64xf32> to vector<64xf32>
    %54 = vector.shape_cast %53 : vector<64xf32> to vector<64x1xf32>
    %55 = arith.maximumf %52, %54 : vector<64x1xf32>
    %56 = arith.subf %52, %55 : vector<64x1xf32>
    %57 = math.exp %56 : vector<64x1xf32>
    %58 = vector.broadcast %55 : vector<64x1xf32> to vector<64x64xf32>
    %59 = arith.subf %50, %58 : vector<64x64xf32>
    %60 = math.exp %59 : vector<64x64xf32>
    %c1_36 = arith.constant 1 : index
    %c0_37 = arith.constant 0 : index
    %c0_38 = arith.constant 0 : index
    %61 = vector.load %arg12[%c1_36, %c0_37, %c0_38] : memref<2x64x1xf32, #tpu.memory_space<vmem>>, vector<1x64x1xf32>
    %62 = vector.shape_cast %61 : vector<1x64x1xf32> to vector<64x1xf32>
    %63 = arith.mulf %57, %62 : vector<64x1xf32>
    %cst_39 = arith.constant dense<0.000000e+00> : vector<64xf32>
    %64 = vector.multi_reduction <add>, %60, %cst_39 [1] : vector<64x64xf32> to vector<64xf32>
    %65 = vector.shape_cast %64 : vector<64xf32> to vector<64x1xf32>
    %66 = arith.addf %63, %65 : vector<64x1xf32>
    %c1_40 = arith.constant 1 : index
    %c0_41 = arith.constant 0 : index
    %c0_42 = arith.constant 0 : index
    %67 = vector.load %arg12[%c1_40, %c0_41, %c0_42] : memref<2x64x1xf32, #tpu.memory_space<vmem>>, vector<1x64x1xf32>
    %68 = vector.shape_cast %67 : vector<1x64x1xf32> to vector<64x1xf32>
    %69 = vector.shape_cast %66 : vector<64x1xf32> to vector<1x64x1xf32>
    tpu.vector_store %arg12[%c1_40, %c0_41, %c0_42], %69 {strides = array<i32>} : memref<2x64x1xf32, #tpu.memory_space<vmem>>, vector<1x64x1xf32>,
    %70 = vector.extract_strided_slice %8 {offsets = [0, 32], sizes = [64, 32], strides = [1, 1]} : vector<64x64xf32> to vector<64x32xf32>
    %cst_43 = arith.constant dense<0.000000e+00> : vector<64x32xf32>
    %71 = tpu.matmul %60, %70, %cst_43 {dimension_numbers = #tpu.dot_dimension_numbers<[1], [0], [0], [1], [0, 0, 1, 1], [], []>} : vector<64x64xf32>, vector<64x32xf32>, vector<64x32xf32> -> vector<64x32xf32>
    %c1_44 = arith.constant 1 : index
    %c0_45 = arith.constant 0 : index
    %c0_46 = arith.constant 0 : index
    %72 = vector.load %arg13[%c1_44, %c0_45, %c0_46] : memref<2x64x32xf32, #tpu.memory_space<vmem>>, vector<1x64x32xf32>
    %73 = vector.shape_cast %72 : vector<1x64x32xf32> to vector<64x32xf32>
    %74 = vector.broadcast %57 : vector<64x1xf32> to vector<64x32xf32>
    %75 = arith.mulf %74, %73 : vector<64x32xf32>
    %76 = arith.addf %75, %71 : vector<64x32xf32>
    %c1_47 = arith.constant 1 : index
    %c0_48 = arith.constant 0 : index
    %c0_49 = arith.constant 0 : index
    %77 = vector.load %arg13[%c1_47, %c0_48, %c0_49] : memref<2x64x32xf32, #tpu.memory_space<vmem>>, vector<1x64x32xf32>
    %78 = vector.shape_cast %77 : vector<1x64x32xf32> to vector<64x32xf32>
    %79 = vector.shape_cast %76 : vector<64x32xf32> to vector<1x64x32xf32>
    tpu.vector_store %arg13[%c1_47, %c0_48, %c0_49], %79 {strides = array<i32>} : memref<2x64x32xf32, #tpu.memory_space<vmem>>, vector<1x64x32xf32>,
    %c1_50 = arith.constant 1 : index
    %c0_51 = arith.constant 0 : index
    %c0_52 = arith.constant 0 : index
    %80 = vector.load %arg11[%c1_50, %c0_51, %c0_52] : memref<2x64x1xf32, #tpu.memory_space<vmem>>, vector<1x64x1xf32>
    %81 = vector.shape_cast %80 : vector<1x64x1xf32> to vector<64x1xf32>
    %82 = vector.shape_cast %55 : vector<64x1xf32> to vector<1x64x1xf32>
    tpu.vector_store %arg11[%c1_50, %c0_51, %c0_52], %82 {strides = array<i32>} : memref<2x64x1xf32, #tpu.memory_space<vmem>>, vector<1x64x1xf32>,
    %c0_i32_53 = arith.constant 0 : i32
    %83 = arith.cmpi eq, %arg2, %c0_i32_53 : i32
    %84 = arith.extui %83 : i1 to i32
    %c0_i32_54 = arith.constant 0 : i32
    %85 = arith.cmpi ne, %84, %c0_i32_54 : i32
    scf.if %85 {
      %c0_55 = arith.constant 0 : index
      %c0_56 = arith.constant 0 : index
      %c0_57 = arith.constant 0 : index
      %86 = vector.load %arg13[%c0_55, %c0_56, %c0_57] : memref<2x64x32xf32, #tpu.memory_space<vmem>>, vector<1x64x32xf32>
      %87 = vector.shape_cast %86 : vector<1x64x32xf32> to vector<64x32xf32>
      %c0_58 = arith.constant 0 : index
      %c0_59 = arith.constant 0 : index
      %c0_60 = arith.constant 0 : index
      %88 = vector.load %arg12[%c0_58, %c0_59, %c0_60] : memref<2x64x1xf32, #tpu.memory_space<vmem>>, vector<1x64x1xf32>
      %89 = vector.shape_cast %88 : vector<1x64x1xf32> to vector<64x1xf32>
      %90 = tpu.reciprocal %89 {approx = true} : vector<64x1xf32> -> vector<64x1xf32>
      %91 = vector.broadcast %90 : vector<64x1xf32> to vector<64x32xf32>
      %92 = arith.mulf %87, %91 : vector<64x32xf32>
      %c1_61 = arith.constant 1 : index
      %c0_62 = arith.constant 0 : index
      %c0_63 = arith.constant 0 : index
      %93 = vector.load %arg13[%c1_61, %c0_62, %c0_63] : memref<2x64x32xf32, #tpu.memory_space<vmem>>, vector<1x64x32xf32>
      %94 = vector.shape_cast %93 : vector<1x64x32xf32> to vector<64x32xf32>
      %c1_64 = arith.constant 1 : index
      %c0_65 = arith.constant 0 : index
      %c0_66 = arith.constant 0 : index
      %95 = vector.load %arg12[%c1_64, %c0_65, %c0_66] : memref<2x64x1xf32, #tpu.memory_space<vmem>>, vector<1x64x1xf32>
      %96 = vector.shape_cast %95 : vector<1x64x1xf32> to vector<64x1xf32>
      %97 = tpu.reciprocal %96 {approx = true} : vector<64x1xf32> -> vector<64x1xf32>
      %98 = vector.broadcast %97 : vector<64x1xf32> to vector<64x32xf32>
      %99 = arith.mulf %94, %98 : vector<64x32xf32>
      %100 = tpu.concatenate %92, %99 in 1 : vector<64x32xf32>, vector<64x32xf32> -> vector<64x64xf32>
      %c0_67 = arith.constant 0 : index
      %c0_68 = arith.constant 0 : index
      %101 = vector.load %arg6[%c0_67, %c0_68] : memref<64x64xf32, #tpu.memory_space<vmem>>, vector<64x64xf32>
      %cst_69 = arith.constant dense<0.000000e+00> : vector<64x64xf32>
      %102 = tpu.matmul %100, %101, %cst_69 {dimension_numbers = #tpu.dot_dimension_numbers<[1], [0], [0], [1], [0, 0, 1, 1], [], []>} : vector<64x64xf32>, vector<64x64xf32>, vector<64x64xf32> -> vector<64x64xf32>
      %c0_70 = arith.constant 0 : index
      %c0_71 = arith.constant 0 : index
      %103 = vector.load %arg7[%c0_70, %c0_71] : memref<1x64xf32, #tpu.memory_space<vmem>>, vector<1x64xf32>
      %104 = vector.broadcast %103 : vector<1x64xf32> to vector<64x64xf32>
      %105 = arith.addf %102, %104 : vector<64x64xf32>
      %c0_72 = arith.constant 0 : index
      %c0_73 = arith.constant 0 : index
      %c0_74 = arith.constant 0 : index
      %106 = vector.load %arg8[%c0_72, %c0_73, %c0_74] : memref<1x64x64xf32, #tpu.memory_space<vmem>>, vector<1x64x64xf32>
      %107 = vector.shape_cast %106 : vector<1x64x64xf32> to vector<64x64xf32>
      %c0_75 = arith.constant 0 : index
      %c0_76 = arith.constant 0 : index
      %c0_77 = arith.constant 0 : index
      %108 = vector.load %arg9[%c0_75, %c0_76, %c0_77] : memref<1x1x64xf32, #tpu.memory_space<vmem>>, vector<1x1x64xf32>
      %109 = vector.shape_cast %108 : vector<1x1x64xf32> to vector<1x64xf32>
      %110 = vector.broadcast %109 : vector<1x64xf32> to vector<64x64xf32>
      %111 = arith.mulf %110, %105 : vector<64x64xf32>
      %112 = arith.addf %107, %111 : vector<64x64xf32>
      %c0_78 = arith.constant 0 : index
      %c0_79 = arith.constant 0 : index
      %c0_80 = arith.constant 0 : index
      %113 = vector.load %arg10[%c0_78, %c0_79, %c0_80] : memref<1x64x64xf32, #tpu.memory_space<vmem>>, vector<1x64x64xf32>
      %114 = vector.shape_cast %113 : vector<1x64x64xf32> to vector<64x64xf32>
      %115 = vector.shape_cast %112 : vector<64x64xf32> to vector<1x64x64xf32>
      tpu.vector_store %arg10[%c0_78, %c0_79, %c0_80], %115 {strides = array<i32>} : memref<1x64x64xf32, #tpu.memory_space<vmem>>, vector<1x64x64xf32>,
    } else {
    }
    return
  }
  func.func @transform_0(%arg0: i32, %arg1: i32, %arg2: i32) -> (i32, i32, i32) {
    %c0_i32 = arith.constant 0 : i32
    %c0_i32_0 = arith.constant 0 : i32
    return %arg0, %arg1, %c0_i32 : i32, i32, i32
  }
  func.func @transform_1(%arg0: i32, %arg1: i32, %arg2: i32) -> (i32, i32, i32) {
    %c0_i32 = arith.constant 0 : i32
    %c0_i32_0 = arith.constant 0 : i32
    return %arg0, %arg2, %c0_i32 : i32, i32, i32
  }
  func.func @transform_2(%arg0: i32, %arg1: i32, %arg2: i32) -> (i32, i32, i32) {
    %c0_i32 = arith.constant 0 : i32
    %c0_i32_0 = arith.constant 0 : i32
    return %arg0, %arg2, %c0_i32 : i32, i32, i32
  }
  func.func @transform_3(%arg0: i32, %arg1: i32, %arg2: i32) -> (i32, i32) {
    %c0_i32 = arith.constant 0 : i32
    %c0_i32_0 = arith.constant 0 : i32
    %c0_i32_1 = arith.constant 0 : i32
    return %c0_i32, %c0_i32_0 : i32, i32
  }
  func.func @transform_4(%arg0: i32, %arg1: i32, %arg2: i32) -> (i32, i32) {
    %c0_i32 = arith.constant 0 : i32
    %c0_i32_0 = arith.constant 0 : i32
    %c0_i32_1 = arith.constant 0 : i32
    return %c0_i32, %c0_i32_0 : i32, i32
  }
  func.func @transform_5(%arg0: i32, %arg1: i32, %arg2: i32) -> (i32, i32, i32) {
    %c0_i32 = arith.constant 0 : i32
    %c0_i32_0 = arith.constant 0 : i32
    return %arg0, %arg1, %c0_i32 : i32, i32, i32
  }
  func.func @transform_6(%arg0: i32, %arg1: i32, %arg2: i32) -> (i32, i32, i32) {
    %c0_i32 = arith.constant 0 : i32
    %c0_i32_0 = arith.constant 0 : i32
    %c0_i32_1 = arith.constant 0 : i32
    return %arg0, %c0_i32, %c0_i32_0 : i32, i32, i32
  }
  func.func @transform_7(%arg0: i32, %arg1: i32, %arg2: i32) -> (i32, i32, i32) {
    %c0_i32 = arith.constant 0 : i32
    %c0_i32_0 = arith.constant 0 : i32
    return %arg0, %arg1, %c0_i32 : i32, i32, i32
  }
}

module attributes {stable_mosaic.version = 11 : i64} {
  func.func @_linear_kernel(%arg0: i32, %arg1: i32, %arg2: i32, %arg3: i32, %arg4: memref<1x1x64xf32, #tpu.memory_space<vmem>>, %arg5: memref<64x384xf32, #tpu.memory_space<vmem>>, %arg6: memref<1x384xf32, #tpu.memory_space<vmem>>, %arg7: memref<1x1x384xf32, #tpu.memory_space<vmem>>, %arg8: memref<1x384xf32, #tpu.memory_space<vmem>>) attributes {dimension_semantics = [#tpu.dimension_semantics<parallel>, #tpu.dimension_semantics<parallel>, #tpu.dimension_semantics<parallel>, #tpu.dimension_semantics<arbitrary>], iteration_bounds = array<i64: 2, 1, 1, 1>, scalar_prefetch = 0 : i64, scratch_operands = 1 : i64, tpu.core_type = #tpu.core_type<tc>, window_params = [{transform_indices = @transform_0, window_bounds = array<i64: 1, 1, 64>}, {transform_indices = @transform_1, window_bounds = array<i64: 64, 384>}, {transform_indices = @transform_2, window_bounds = array<i64: 1, 384>}, {transform_indices = @transform_3, window_bounds = array<i64: 1, 1, 384>}]} {
    %c0_i32 = arith.constant 0 : i32
    %0 = arith.cmpi eq, %arg3, %c0_i32 : i32
    %1 = arith.extui %0 : i1 to i32
    %c0_i32_0 = arith.constant 0 : i32
    %2 = arith.cmpi ne, %1, %c0_i32_0 : i32
    scf.if %2 {
      %cst_12 = arith.constant 0.000000e+00 : f32
      %19 = vector.broadcast %cst_12 : f32 to vector<1x384xf32>
      %c0_13 = arith.constant 0 : index
      %c0_14 = arith.constant 0 : index
      %20 = vector.load %arg8[%c0_13, %c0_14] : memref<1x384xf32, #tpu.memory_space<vmem>>, vector<1x384xf32>
      tpu.vector_store %arg8[%c0_13, %c0_14], %19 {strides = array<i32>} : memref<1x384xf32, #tpu.memory_space<vmem>>, vector<1x384xf32>,
    } else {
    }
    %c0 = arith.constant 0 : index
    %c0_1 = arith.constant 0 : index
    %c0_2 = arith.constant 0 : index
    %3 = vector.load %arg4[%c0, %c0_1, %c0_2] : memref<1x1x64xf32, #tpu.memory_space<vmem>>, vector<1x1x64xf32>
    %4 = vector.shape_cast %3 : vector<1x1x64xf32> to vector<1x64xf32>
    %5 = arith.negf %4 : vector<1x64xf32>
    %6 = math.exp %5 : vector<1x64xf32>
    %cst = arith.constant 1.000000e+00 : f32
    %7 = vector.broadcast %cst : f32 to vector<1x64xf32>
    %8 = arith.addf %7, %6 : vector<1x64xf32>
    %9 = arith.divf %7, %8 : vector<1x64xf32>
    %10 = arith.mulf %4, %9 : vector<1x64xf32>
    %c0_3 = arith.constant 0 : index
    %c0_4 = arith.constant 0 : index
    %11 = vector.load %arg8[%c0_3, %c0_4] : memref<1x384xf32, #tpu.memory_space<vmem>>, vector<1x384xf32>
    %c0_5 = arith.constant 0 : index
    %c0_6 = arith.constant 0 : index
    %12 = vector.load %arg5[%c0_5, %c0_6] : memref<64x384xf32, #tpu.memory_space<vmem>>, vector<64x384xf32>
    %cst_7 = arith.constant dense<0.000000e+00> : vector<1x384xf32>
    %13 = tpu.matmul %10, %12, %cst_7 {dimension_numbers = #tpu.dot_dimension_numbers<[1], [0], [0], [1], [0, 0, 1, 1], [], []>} : vector<1x64xf32>, vector<64x384xf32>, vector<1x384xf32> -> vector<1x384xf32>
    %14 = arith.addf %11, %13 : vector<1x384xf32>
    %c0_8 = arith.constant 0 : index
    %c0_9 = arith.constant 0 : index
    %15 = vector.load %arg8[%c0_8, %c0_9] : memref<1x384xf32, #tpu.memory_space<vmem>>, vector<1x384xf32>
    tpu.vector_store %arg8[%c0_8, %c0_9], %14 {strides = array<i32>} : memref<1x384xf32, #tpu.memory_space<vmem>>, vector<1x384xf32>,
    %c0_i32_10 = arith.constant 0 : i32
    %16 = arith.cmpi eq, %arg3, %c0_i32_10 : i32
    %17 = arith.extui %16 : i1 to i32
    %c0_i32_11 = arith.constant 0 : i32
    %18 = arith.cmpi ne, %17, %c0_i32_11 : i32
    scf.if %18 {
      %c0_12 = arith.constant 0 : index
      %c0_13 = arith.constant 0 : index
      %19 = vector.load %arg8[%c0_12, %c0_13] : memref<1x384xf32, #tpu.memory_space<vmem>>, vector<1x384xf32>
      %c0_14 = arith.constant 0 : index
      %c0_15 = arith.constant 0 : index
      %20 = vector.load %arg6[%c0_14, %c0_15] : memref<1x384xf32, #tpu.memory_space<vmem>>, vector<1x384xf32>
      %21 = arith.addf %19, %20 : vector<1x384xf32>
      %c0_16 = arith.constant 0 : index
      %c0_17 = arith.constant 0 : index
      %c0_18 = arith.constant 0 : index
      %22 = vector.load %arg7[%c0_16, %c0_17, %c0_18] : memref<1x1x384xf32, #tpu.memory_space<vmem>>, vector<1x1x384xf32>
      %23 = vector.shape_cast %22 : vector<1x1x384xf32> to vector<1x384xf32>
      %24 = vector.shape_cast %21 : vector<1x384xf32> to vector<1x1x384xf32>
      tpu.vector_store %arg7[%c0_16, %c0_17, %c0_18], %24 {strides = array<i32>} : memref<1x1x384xf32, #tpu.memory_space<vmem>>, vector<1x1x384xf32>,
    } else {
    }
    return
  }
  func.func @transform_0(%arg0: i32, %arg1: i32, %arg2: i32, %arg3: i32) -> (i32, i32, i32) {
    %c0_i32 = arith.constant 0 : i32
    return %arg0, %arg1, %arg3 : i32, i32, i32
  }
  func.func @transform_1(%arg0: i32, %arg1: i32, %arg2: i32, %arg3: i32) -> (i32, i32) {
    %c0_i32 = arith.constant 0 : i32
    return %arg3, %arg2 : i32, i32
  }
  func.func @transform_2(%arg0: i32, %arg1: i32, %arg2: i32, %arg3: i32) -> (i32, i32) {
    %c0_i32 = arith.constant 0 : i32
    %c0_i32_0 = arith.constant 0 : i32
    return %c0_i32, %arg2 : i32, i32
  }
  func.func @transform_3(%arg0: i32, %arg1: i32, %arg2: i32, %arg3: i32) -> (i32, i32, i32) {
    %c0_i32 = arith.constant 0 : i32
    return %arg0, %arg1, %arg2 : i32, i32, i32
  }
}

module attributes {stable_mosaic.version = 11 : i64} {
  func.func @_linear_kernel(%arg0: i32, %arg1: i32, %arg2: i32, %arg3: i32, %arg4: memref<1x64x64xf32, #tpu.memory_space<vmem>>, %arg5: memref<1x1x64xf32, #tpu.memory_space<vmem>>, %arg6: memref<1x1x64xf32, #tpu.memory_space<vmem>>, %arg7: memref<64x64xf32, #tpu.memory_space<vmem>>, %arg8: memref<1x64xf32, #tpu.memory_space<vmem>>, %arg9: memref<1x64x64xf32, #tpu.memory_space<vmem>>, %arg10: memref<64x64xf32, #tpu.memory_space<vmem>>) attributes {dimension_semantics = [#tpu.dimension_semantics<parallel>, #tpu.dimension_semantics<parallel>, #tpu.dimension_semantics<parallel>, #tpu.dimension_semantics<arbitrary>], iteration_bounds = array<i64: 2, 1, 1, 1>, scalar_prefetch = 0 : i64, scratch_operands = 1 : i64, tpu.core_type = #tpu.core_type<tc>, window_params = [{transform_indices = @transform_0, window_bounds = array<i64: 1, 64, 64>}, {transform_indices = @transform_1, window_bounds = array<i64: 1, 1, 64>}, {transform_indices = @transform_2, window_bounds = array<i64: 1, 1, 64>}, {transform_indices = @transform_3, window_bounds = array<i64: 64, 64>}, {transform_indices = @transform_4, window_bounds = array<i64: 1, 64>}, {transform_indices = @transform_5, window_bounds = array<i64: 1, 64, 64>}]} {
    %c0_i32 = arith.constant 0 : i32
    %0 = arith.cmpi eq, %arg3, %c0_i32 : i32
    %1 = arith.extui %0 : i1 to i32
    %c0_i32_0 = arith.constant 0 : i32
    %2 = arith.cmpi ne, %1, %c0_i32_0 : i32
    scf.if %2 {
      %cst_23 = arith.constant 0.000000e+00 : f32
      %39 = vector.broadcast %cst_23 : f32 to vector<64x64xf32>
      %c0_24 = arith.constant 0 : index
      %c0_25 = arith.constant 0 : index
      %40 = vector.load %arg10[%c0_24, %c0_25] : memref<64x64xf32, #tpu.memory_space<vmem>>, vector<64x64xf32>
      tpu.vector_store %arg10[%c0_24, %c0_25], %39 {strides = array<i32>} : memref<64x64xf32, #tpu.memory_space<vmem>>, vector<64x64xf32>,
    } else {
    }
    %c0 = arith.constant 0 : index
    %c0_1 = arith.constant 0 : index
    %c0_2 = arith.constant 0 : index
    %3 = vector.load %arg4[%c0, %c0_1, %c0_2] : memref<1x64x64xf32, #tpu.memory_space<vmem>>, vector<1x64x64xf32>
    %4 = vector.shape_cast %3 : vector<1x64x64xf32> to vector<64x64xf32>
    %cst = arith.constant dense<0.000000e+00> : vector<64xf32>
    %5 = vector.multi_reduction <add>, %4, %cst [1] : vector<64x64xf32> to vector<64xf32>
    %6 = vector.shape_cast %5 : vector<64xf32> to vector<64x1xf32>
    %cst_3 = arith.constant 6.400000e+01 : f32
    %7 = vector.broadcast %cst_3 : f32 to vector<64x1xf32>
    %8 = arith.divf %6, %7 : vector<64x1xf32>
    %9 = vector.broadcast %8 : vector<64x1xf32> to vector<64x64xf32>
    %10 = arith.subf %4, %9 : vector<64x64xf32>
    %11 = arith.mulf %10, %10 : vector<64x64xf32>
    %cst_4 = arith.constant dense<0.000000e+00> : vector<64xf32>
    %12 = vector.multi_reduction <add>, %11, %cst_4 [1] : vector<64x64xf32> to vector<64xf32>
    %13 = vector.shape_cast %12 : vector<64xf32> to vector<64x1xf32>
    %cst_5 = arith.constant 6.400000e+01 : f32
    %14 = vector.broadcast %cst_5 : f32 to vector<64x1xf32>
    %15 = arith.divf %13, %14 : vector<64x1xf32>
    %cst_6 = arith.constant 9.99999997E-7 : f32
    %16 = vector.broadcast %cst_6 : f32 to vector<64x1xf32>
    %17 = arith.addf %15, %16 : vector<64x1xf32>
    %18 = math.rsqrt %17 : vector<64x1xf32>
    %19 = vector.broadcast %18 : vector<64x1xf32> to vector<64x64xf32>
    %20 = arith.mulf %10, %19 : vector<64x64xf32>
    %c0_7 = arith.constant 0 : index
    %c0_8 = arith.constant 0 : index
    %c0_9 = arith.constant 0 : index
    %21 = vector.load %arg5[%c0_7, %c0_8, %c0_9] : memref<1x1x64xf32, #tpu.memory_space<vmem>>, vector<1x1x64xf32>
    %22 = vector.shape_cast %21 : vector<1x1x64xf32> to vector<1x64xf32>
    %cst_10 = arith.constant 1.000000e+00 : f32
    %23 = vector.broadcast %cst_10 : f32 to vector<1x64xf32>
    %24 = arith.addf %23, %22 : vector<1x64xf32>
    %25 = vector.broadcast %24 : vector<1x64xf32> to vector<64x64xf32>
    %26 = arith.mulf %20, %25 : vector<64x64xf32>
    %c0_11 = arith.constant 0 : index
    %c0_12 = arith.constant 0 : index
    %c0_13 = arith.constant 0 : index
    %27 = vector.load %arg6[%c0_11, %c0_12, %c0_13] : memref<1x1x64xf32, #tpu.memory_space<vmem>>, vector<1x1x64xf32>
    %28 = vector.shape_cast %27 : vector<1x1x64xf32> to vector<1x64xf32>
    %29 = vector.broadcast %28 : vector<1x64xf32> to vector<64x64xf32>
    %30 = arith.addf %26, %29 : vector<64x64xf32>
    %c0_14 = arith.constant 0 : index
    %c0_15 = arith.constant 0 : index
    %31 = vector.load %arg10[%c0_14, %c0_15] : memref<64x64xf32, #tpu.memory_space<vmem>>, vector<64x64xf32>
    %c0_16 = arith.constant 0 : index
    %c0_17 = arith.constant 0 : index
    %32 = vector.load %arg7[%c0_16, %c0_17] : memref<64x64xf32, #tpu.memory_space<vmem>>, vector<64x64xf32>
    %cst_18 = arith.constant dense<0.000000e+00> : vector<64x64xf32>
    %33 = tpu.matmul %30, %32, %cst_18 {dimension_numbers = #tpu.dot_dimension_numbers<[1], [0], [0], [1], [0, 0, 1, 1], [], []>} : vector<64x64xf32>, vector<64x64xf32>, vector<64x64xf32> -> vector<64x64xf32>
    %34 = arith.addf %31, %33 : vector<64x64xf32>
    %c0_19 = arith.constant 0 : index
    %c0_20 = arith.constant 0 : index
    %35 = vector.load %arg10[%c0_19, %c0_20] : memref<64x64xf32, #tpu.memory_space<vmem>>, vector<64x64xf32>
    tpu.vector_store %arg10[%c0_19, %c0_20], %34 {strides = array<i32>} : memref<64x64xf32, #tpu.memory_space<vmem>>, vector<64x64xf32>,
    %c0_i32_21 = arith.constant 0 : i32
    %36 = arith.cmpi eq, %arg3, %c0_i32_21 : i32
    %37 = arith.extui %36 : i1 to i32
    %c0_i32_22 = arith.constant 0 : i32
    %38 = arith.cmpi ne, %37, %c0_i32_22 : i32
    scf.if %38 {
      %c0_23 = arith.constant 0 : index
      %c0_24 = arith.constant 0 : index
      %39 = vector.load %arg10[%c0_23, %c0_24] : memref<64x64xf32, #tpu.memory_space<vmem>>, vector<64x64xf32>
      %c0_25 = arith.constant 0 : index
      %c0_26 = arith.constant 0 : index
      %40 = vector.load %arg8[%c0_25, %c0_26] : memref<1x64xf32, #tpu.memory_space<vmem>>, vector<1x64xf32>
      %41 = vector.broadcast %40 : vector<1x64xf32> to vector<64x64xf32>
      %42 = arith.addf %39, %41 : vector<64x64xf32>
      %c0_27 = arith.constant 0 : index
      %c0_28 = arith.constant 0 : index
      %c0_29 = arith.constant 0 : index
      %43 = vector.load %arg9[%c0_27, %c0_28, %c0_29] : memref<1x64x64xf32, #tpu.memory_space<vmem>>, vector<1x64x64xf32>
      %44 = vector.shape_cast %43 : vector<1x64x64xf32> to vector<64x64xf32>
      %45 = vector.shape_cast %42 : vector<64x64xf32> to vector<1x64x64xf32>
      tpu.vector_store %arg9[%c0_27, %c0_28, %c0_29], %45 {strides = array<i32>} : memref<1x64x64xf32, #tpu.memory_space<vmem>>, vector<1x64x64xf32>,
    } else {
    }
    return
  }
  func.func @transform_0(%arg0: i32, %arg1: i32, %arg2: i32, %arg3: i32) -> (i32, i32, i32) {
    %c0_i32 = arith.constant 0 : i32
    return %arg0, %arg1, %arg3 : i32, i32, i32
  }
  func.func @transform_1(%arg0: i32, %arg1: i32, %arg2: i32, %arg3: i32) -> (i32, i32, i32) {
    %c0_i32 = arith.constant 0 : i32
    %c0_i32_0 = arith.constant 0 : i32
    %c0_i32_1 = arith.constant 0 : i32
    return %arg0, %c0_i32, %c0_i32_0 : i32, i32, i32
  }
  func.func @transform_2(%arg0: i32, %arg1: i32, %arg2: i32, %arg3: i32) -> (i32, i32, i32) {
    %c0_i32 = arith.constant 0 : i32
    %c0_i32_0 = arith.constant 0 : i32
    %c0_i32_1 = arith.constant 0 : i32
    return %arg0, %c0_i32, %c0_i32_0 : i32, i32, i32
  }
  func.func @transform_3(%arg0: i32, %arg1: i32, %arg2: i32, %arg3: i32) -> (i32, i32) {
    %c0_i32 = arith.constant 0 : i32
    return %arg3, %arg2 : i32, i32
  }
  func.func @transform_4(%arg0: i32, %arg1: i32, %arg2: i32, %arg3: i32) -> (i32, i32) {
    %c0_i32 = arith.constant 0 : i32
    %c0_i32_0 = arith.constant 0 : i32
    return %c0_i32, %arg2 : i32, i32
  }
  func.func @transform_5(%arg0: i32, %arg1: i32, %arg2: i32, %arg3: i32) -> (i32, i32, i32) {
    %c0_i32 = arith.constant 0 : i32
    return %arg0, %arg1, %arg2 : i32, i32, i32
  }
}

module attributes {stable_mosaic.version = 11 : i64} {
  func.func @_flash_kernel(%arg0: i32, %arg1: i32, %arg2: i32, %arg3: memref<1x64x64xf32, #tpu.memory_space<vmem>>, %arg4: memref<1x8x64xf32, #tpu.memory_space<vmem>>, %arg5: memref<1x8x64xf32, #tpu.memory_space<vmem>>, %arg6: memref<64x64xf32, #tpu.memory_space<vmem>>, %arg7: memref<1x64xf32, #tpu.memory_space<vmem>>, %arg8: memref<1x64x64xf32, #tpu.memory_space<vmem>>, %arg9: memref<1x64x64xf32, #tpu.memory_space<vmem>>, %arg10: memref<2x64x1xf32, #tpu.memory_space<vmem>>, %arg11: memref<2x64x1xf32, #tpu.memory_space<vmem>>, %arg12: memref<2x64x32xf32, #tpu.memory_space<vmem>>) attributes {dimension_semantics = [#tpu.dimension_semantics<parallel>, #tpu.dimension_semantics<parallel>, #tpu.dimension_semantics<arbitrary>], iteration_bounds = array<i64: 2, 1, 1>, scalar_prefetch = 0 : i64, scratch_operands = 3 : i64, tpu.core_type = #tpu.core_type<tc>, window_params = [{transform_indices = @transform_0, window_bounds = array<i64: 1, 64, 64>}, {transform_indices = @transform_1, window_bounds = array<i64: 1, 8, 64>}, {transform_indices = @transform_2, window_bounds = array<i64: 1, 8, 64>}, {pipeline_mode = #tpu.pipeline_mode<synchronous>, transform_indices = @transform_3, window_bounds = array<i64: 64, 64>}, {pipeline_mode = #tpu.pipeline_mode<synchronous>, transform_indices = @transform_4, window_bounds = array<i64: 1, 64>}, {transform_indices = @transform_5, window_bounds = array<i64: 1, 64, 64>}, {transform_indices = @transform_6, window_bounds = array<i64: 1, 64, 64>}]} {
    %c0_i32 = arith.constant 0 : i32
    %0 = arith.cmpi eq, %arg2, %c0_i32 : i32
    %1 = arith.extui %0 : i1 to i32
    %c0_i32_0 = arith.constant 0 : i32
    %2 = arith.cmpi ne, %1, %c0_i32_0 : i32
    scf.if %2 {
      %cst_55 = arith.constant 0xFF800000 : f32
      %86 = vector.broadcast %cst_55 : f32 to vector<2x64x1xf32>
      %c0_56 = arith.constant 0 : index
      %c0_57 = arith.constant 0 : index
      %c0_58 = arith.constant 0 : index
      %87 = vector.load %arg10[%c0_56, %c0_57, %c0_58] : memref<2x64x1xf32, #tpu.memory_space<vmem>>, vector<2x64x1xf32>
      tpu.vector_store %arg10[%c0_56, %c0_57, %c0_58], %86 {strides = array<i32>} : memref<2x64x1xf32, #tpu.memory_space<vmem>>, vector<2x64x1xf32>,
      %cst_59 = arith.constant 0.000000e+00 : f32
      %88 = vector.broadcast %cst_59 : f32 to vector<2x64x1xf32>
      %c0_60 = arith.constant 0 : index
      %c0_61 = arith.constant 0 : index
      %c0_62 = arith.constant 0 : index
      %89 = vector.load %arg11[%c0_60, %c0_61, %c0_62] : memref<2x64x1xf32, #tpu.memory_space<vmem>>, vector<2x64x1xf32>
      tpu.vector_store %arg11[%c0_60, %c0_61, %c0_62], %88 {strides = array<i32>} : memref<2x64x1xf32, #tpu.memory_space<vmem>>, vector<2x64x1xf32>,
      %cst_63 = arith.constant 0.000000e+00 : f32
      %90 = vector.broadcast %cst_63 : f32 to vector<2x64x32xf32>
      %c0_64 = arith.constant 0 : index
      %c0_65 = arith.constant 0 : index
      %c0_66 = arith.constant 0 : index
      %91 = vector.load %arg12[%c0_64, %c0_65, %c0_66] : memref<2x64x32xf32, #tpu.memory_space<vmem>>, vector<2x64x32xf32>
      tpu.vector_store %arg12[%c0_64, %c0_65, %c0_66], %90 {strides = array<i32>} : memref<2x64x32xf32, #tpu.memory_space<vmem>>, vector<2x64x32xf32>,
    } else {
    }
    %c0 = arith.constant 0 : index
    %c0_1 = arith.constant 0 : index
    %c0_2 = arith.constant 0 : index
    %3 = vector.load %arg3[%c0, %c0_1, %c0_2] : memref<1x64x64xf32, #tpu.memory_space<vmem>>, vector<1x64x64xf32>
    %4 = vector.shape_cast %3 : vector<1x64x64xf32> to vector<64x64xf32>
    %c0_3 = arith.constant 0 : index
    %c0_4 = arith.constant 0 : index
    %c0_5 = arith.constant 0 : index
    %5 = vector.load %arg4[%c0_3, %c0_4, %c0_5] : memref<1x8x64xf32, #tpu.memory_space<vmem>>, vector<1x8x64xf32>
    %6 = vector.shape_cast %5 : vector<1x8x64xf32> to vector<8x64xf32>
    %c0_6 = arith.constant 0 : index
    %c0_7 = arith.constant 0 : index
    %c0_8 = arith.constant 0 : index
    %7 = vector.load %arg5[%c0_6, %c0_7, %c0_8] : memref<1x8x64xf32, #tpu.memory_space<vmem>>, vector<1x8x64xf32>
    %8 = vector.shape_cast %7 : vector<1x8x64xf32> to vector<8x64xf32>
    %9 = vector.extract_strided_slice %4 {offsets = [0, 0], sizes = [64, 32], strides = [1, 1]} : vector<64x64xf32> to vector<64x32xf32>
    %10 = vector.extract_strided_slice %6 {offsets = [0, 0], sizes = [8, 32], strides = [1, 1]} : vector<8x64xf32> to vector<8x32xf32>
    %cst = arith.constant dense<0.000000e+00> : vector<64x8xf32>
    %11 = tpu.matmul %9, %10, %cst {dimension_numbers = #tpu.dot_dimension_numbers<[1], [1], [0], [0], [0, 0, 1, 0], [], []>} : vector<64x32xf32>, vector<8x32xf32>, vector<64x8xf32> -> vector<64x8xf32>
    %cst_9 = arith.constant 0.176776692 : f32
    %12 = vector.broadcast %cst_9 : f32 to vector<64x8xf32>
    %13 = arith.mulf %11, %12 : vector<64x8xf32>
    %c0_10 = arith.constant 0 : index
    %c0_11 = arith.constant 0 : index
    %c0_12 = arith.constant 0 : index
    %14 = vector.load %arg10[%c0_10, %c0_11, %c0_12] : memref<2x64x1xf32, #tpu.memory_space<vmem>>, vector<1x64x1xf32>
    %15 = vector.shape_cast %14 : vector<1x64x1xf32> to vector<64x1xf32>
    %cst_13 = arith.constant dense<0xFF800000> : vector<64xf32>
    %16 = vector.multi_reduction <maximumf>, %13, %cst_13 [1] : vector<64x8xf32> to vector<64xf32>
    %17 = vector.shape_cast %16 : vector<64xf32> to vector<64x1xf32>
    %18 = arith.maximumf %15, %17 : vector<64x1xf32>
    %19 = arith.subf %15, %18 : vector<64x1xf32>
    %20 = math.exp %19 : vector<64x1xf32>
    %21 = vector.broadcast %18 : vector<64x1xf32> to vector<64x8xf32>
    %22 = arith.subf %13, %21 : vector<64x8xf32>
    %23 = math.exp %22 : vector<64x8xf32>
    %c0_14 = arith.constant 0 : index
    %c0_15 = arith.constant 0 : index
    %c0_16 = arith.constant 0 : index
    %24 = vector.load %arg11[%c0_14, %c0_15, %c0_16] : memref<2x64x1xf32, #tpu.memory_space<vmem>>, vector<1x64x1xf32>
    %25 = vector.shape_cast %24 : vector<1x64x1xf32> to vector<64x1xf32>
    %26 = arith.mulf %20, %25 : vector<64x1xf32>
    %cst_17 = arith.constant dense<0.000000e+00> : vector<64xf32>
    %27 = vector.multi_reduction <add>, %23, %cst_17 [1] : vector<64x8xf32> to vector<64xf32>
    %28 = vector.shape_cast %27 : vector<64xf32> to vector<64x1xf32>
    %29 = arith.addf %26, %28 : vector<64x1xf32>
    %c0_18 = arith.constant 0 : index
    %c0_19 = arith.constant 0 : index
    %c0_20 = arith.constant 0 : index
    %30 = vector.load %arg11[%c0_18, %c0_19, %c0_20] : memref<2x64x1xf32, #tpu.memory_space<vmem>>, vector<1x64x1xf32>
    %31 = vector.shape_cast %30 : vector<1x64x1xf32> to vector<64x1xf32>
    %32 = vector.shape_cast %29 : vector<64x1xf32> to vector<1x64x1xf32>
    tpu.vector_store %arg11[%c0_18, %c0_19, %c0_20], %32 {strides = array<i32>} : memref<2x64x1xf32, #tpu.memory_space<vmem>>, vector<1x64x1xf32>,
    %33 = vector.extract_strided_slice %8 {offsets = [0, 0], sizes = [8, 32], strides = [1, 1]} : vector<8x64xf32> to vector<8x32xf32>
    %cst_21 = arith.constant dense<0.000000e+00> : vector<64x32xf32>
    %34 = tpu.matmul %23, %33, %cst_21 {dimension_numbers = #tpu.dot_dimension_numbers<[1], [0], [0], [1], [0, 0, 1, 1], [], []>} : vector<64x8xf32>, vector<8x32xf32>, vector<64x32xf32> -> vector<64x32xf32>
    %c0_22 = arith.constant 0 : index
    %c0_23 = arith.constant 0 : index
    %c0_24 = arith.constant 0 : index
    %35 = vector.load %arg12[%c0_22, %c0_23, %c0_24] : memref<2x64x32xf32, #tpu.memory_space<vmem>>, vector<1x64x32xf32>
    %36 = vector.shape_cast %35 : vector<1x64x32xf32> to vector<64x32xf32>
    %37 = vector.broadcast %20 : vector<64x1xf32> to vector<64x32xf32>
    %38 = arith.mulf %37, %36 : vector<64x32xf32>
    %39 = arith.addf %38, %34 : vector<64x32xf32>
    %c0_25 = arith.constant 0 : index
    %c0_26 = arith.constant 0 : index
    %c0_27 = arith.constant 0 : index
    %40 = vector.load %arg12[%c0_25, %c0_26, %c0_27] : memref<2x64x32xf32, #tpu.memory_space<vmem>>, vector<1x64x32xf32>
    %41 = vector.shape_cast %40 : vector<1x64x32xf32> to vector<64x32xf32>
    %42 = vector.shape_cast %39 : vector<64x32xf32> to vector<1x64x32xf32>
    tpu.vector_store %arg12[%c0_25, %c0_26, %c0_27], %42 {strides = array<i32>} : memref<2x64x32xf32, #tpu.memory_space<vmem>>, vector<1x64x32xf32>,
    %c0_28 = arith.constant 0 : index
    %c0_29 = arith.constant 0 : index
    %c0_30 = arith.constant 0 : index
    %43 = vector.load %arg10[%c0_28, %c0_29, %c0_30] : memref<2x64x1xf32, #tpu.memory_space<vmem>>, vector<1x64x1xf32>
    %44 = vector.shape_cast %43 : vector<1x64x1xf32> to vector<64x1xf32>
    %45 = vector.shape_cast %18 : vector<64x1xf32> to vector<1x64x1xf32>
    tpu.vector_store %arg10[%c0_28, %c0_29, %c0_30], %45 {strides = array<i32>} : memref<2x64x1xf32, #tpu.memory_space<vmem>>, vector<1x64x1xf32>,
    %46 = vector.extract_strided_slice %4 {offsets = [0, 32], sizes = [64, 32], strides = [1, 1]} : vector<64x64xf32> to vector<64x32xf32>
    %47 = vector.extract_strided_slice %6 {offsets = [0, 32], sizes = [8, 32], strides = [1, 1]} : vector<8x64xf32> to vector<8x32xf32>
    %cst_31 = arith.constant dense<0.000000e+00> : vector<64x8xf32>
    %48 = tpu.matmul %46, %47, %cst_31 {dimension_numbers = #tpu.dot_dimension_numbers<[1], [1], [0], [0], [0, 0, 1, 0], [], []>} : vector<64x32xf32>, vector<8x32xf32>, vector<64x8xf32> -> vector<64x8xf32>
    %cst_32 = arith.constant 0.176776692 : f32
    %49 = vector.broadcast %cst_32 : f32 to vector<64x8xf32>
    %50 = arith.mulf %48, %49 : vector<64x8xf32>
    %c1 = arith.constant 1 : index
    %c0_33 = arith.constant 0 : index
    %c0_34 = arith.constant 0 : index
    %51 = vector.load %arg10[%c1, %c0_33, %c0_34] : memref<2x64x1xf32, #tpu.memory_space<vmem>>, vector<1x64x1xf32>
    %52 = vector.shape_cast %51 : vector<1x64x1xf32> to vector<64x1xf32>
    %cst_35 = arith.constant dense<0xFF800000> : vector<64xf32>
    %53 = vector.multi_reduction <maximumf>, %50, %cst_35 [1] : vector<64x8xf32> to vector<64xf32>
    %54 = vector.shape_cast %53 : vector<64xf32> to vector<64x1xf32>
    %55 = arith.maximumf %52, %54 : vector<64x1xf32>
    %56 = arith.subf %52, %55 : vector<64x1xf32>
    %57 = math.exp %56 : vector<64x1xf32>
    %58 = vector.broadcast %55 : vector<64x1xf32> to vector<64x8xf32>
    %59 = arith.subf %50, %58 : vector<64x8xf32>
    %60 = math.exp %59 : vector<64x8xf32>
    %c1_36 = arith.constant 1 : index
    %c0_37 = arith.constant 0 : index
    %c0_38 = arith.constant 0 : index
    %61 = vector.load %arg11[%c1_36, %c0_37, %c0_38] : memref<2x64x1xf32, #tpu.memory_space<vmem>>, vector<1x64x1xf32>
    %62 = vector.shape_cast %61 : vector<1x64x1xf32> to vector<64x1xf32>
    %63 = arith.mulf %57, %62 : vector<64x1xf32>
    %cst_39 = arith.constant dense<0.000000e+00> : vector<64xf32>
    %64 = vector.multi_reduction <add>, %60, %cst_39 [1] : vector<64x8xf32> to vector<64xf32>
    %65 = vector.shape_cast %64 : vector<64xf32> to vector<64x1xf32>
    %66 = arith.addf %63, %65 : vector<64x1xf32>
    %c1_40 = arith.constant 1 : index
    %c0_41 = arith.constant 0 : index
    %c0_42 = arith.constant 0 : index
    %67 = vector.load %arg11[%c1_40, %c0_41, %c0_42] : memref<2x64x1xf32, #tpu.memory_space<vmem>>, vector<1x64x1xf32>
    %68 = vector.shape_cast %67 : vector<1x64x1xf32> to vector<64x1xf32>
    %69 = vector.shape_cast %66 : vector<64x1xf32> to vector<1x64x1xf32>
    tpu.vector_store %arg11[%c1_40, %c0_41, %c0_42], %69 {strides = array<i32>} : memref<2x64x1xf32, #tpu.memory_space<vmem>>, vector<1x64x1xf32>,
    %70 = vector.extract_strided_slice %8 {offsets = [0, 32], sizes = [8, 32], strides = [1, 1]} : vector<8x64xf32> to vector<8x32xf32>
    %cst_43 = arith.constant dense<0.000000e+00> : vector<64x32xf32>
    %71 = tpu.matmul %60, %70, %cst_43 {dimension_numbers = #tpu.dot_dimension_numbers<[1], [0], [0], [1], [0, 0, 1, 1], [], []>} : vector<64x8xf32>, vector<8x32xf32>, vector<64x32xf32> -> vector<64x32xf32>
    %c1_44 = arith.constant 1 : index
    %c0_45 = arith.constant 0 : index
    %c0_46 = arith.constant 0 : index
    %72 = vector.load %arg12[%c1_44, %c0_45, %c0_46] : memref<2x64x32xf32, #tpu.memory_space<vmem>>, vector<1x64x32xf32>
    %73 = vector.shape_cast %72 : vector<1x64x32xf32> to vector<64x32xf32>
    %74 = vector.broadcast %57 : vector<64x1xf32> to vector<64x32xf32>
    %75 = arith.mulf %74, %73 : vector<64x32xf32>
    %76 = arith.addf %75, %71 : vector<64x32xf32>
    %c1_47 = arith.constant 1 : index
    %c0_48 = arith.constant 0 : index
    %c0_49 = arith.constant 0 : index
    %77 = vector.load %arg12[%c1_47, %c0_48, %c0_49] : memref<2x64x32xf32, #tpu.memory_space<vmem>>, vector<1x64x32xf32>
    %78 = vector.shape_cast %77 : vector<1x64x32xf32> to vector<64x32xf32>
    %79 = vector.shape_cast %76 : vector<64x32xf32> to vector<1x64x32xf32>
    tpu.vector_store %arg12[%c1_47, %c0_48, %c0_49], %79 {strides = array<i32>} : memref<2x64x32xf32, #tpu.memory_space<vmem>>, vector<1x64x32xf32>,
    %c1_50 = arith.constant 1 : index
    %c0_51 = arith.constant 0 : index
    %c0_52 = arith.constant 0 : index
    %80 = vector.load %arg10[%c1_50, %c0_51, %c0_52] : memref<2x64x1xf32, #tpu.memory_space<vmem>>, vector<1x64x1xf32>
    %81 = vector.shape_cast %80 : vector<1x64x1xf32> to vector<64x1xf32>
    %82 = vector.shape_cast %55 : vector<64x1xf32> to vector<1x64x1xf32>
    tpu.vector_store %arg10[%c1_50, %c0_51, %c0_52], %82 {strides = array<i32>} : memref<2x64x1xf32, #tpu.memory_space<vmem>>, vector<1x64x1xf32>,
    %c0_i32_53 = arith.constant 0 : i32
    %83 = arith.cmpi eq, %arg2, %c0_i32_53 : i32
    %84 = arith.extui %83 : i1 to i32
    %c0_i32_54 = arith.constant 0 : i32
    %85 = arith.cmpi ne, %84, %c0_i32_54 : i32
    scf.if %85 {
      %c0_55 = arith.constant 0 : index
      %c0_56 = arith.constant 0 : index
      %c0_57 = arith.constant 0 : index
      %86 = vector.load %arg12[%c0_55, %c0_56, %c0_57] : memref<2x64x32xf32, #tpu.memory_space<vmem>>, vector<1x64x32xf32>
      %87 = vector.shape_cast %86 : vector<1x64x32xf32> to vector<64x32xf32>
      %c0_58 = arith.constant 0 : index
      %c0_59 = arith.constant 0 : index
      %c0_60 = arith.constant 0 : index
      %88 = vector.load %arg11[%c0_58, %c0_59, %c0_60] : memref<2x64x1xf32, #tpu.memory_space<vmem>>, vector<1x64x1xf32>
      %89 = vector.shape_cast %88 : vector<1x64x1xf32> to vector<64x1xf32>
      %90 = tpu.reciprocal %89 {approx = true} : vector<64x1xf32> -> vector<64x1xf32>
      %91 = vector.broadcast %90 : vector<64x1xf32> to vector<64x32xf32>
      %92 = arith.mulf %87, %91 : vector<64x32xf32>
      %c1_61 = arith.constant 1 : index
      %c0_62 = arith.constant 0 : index
      %c0_63 = arith.constant 0 : index
      %93 = vector.load %arg12[%c1_61, %c0_62, %c0_63] : memref<2x64x32xf32, #tpu.memory_space<vmem>>, vector<1x64x32xf32>
      %94 = vector.shape_cast %93 : vector<1x64x32xf32> to vector<64x32xf32>
      %c1_64 = arith.constant 1 : index
      %c0_65 = arith.constant 0 : index
      %c0_66 = arith.constant 0 : index
      %95 = vector.load %arg11[%c1_64, %c0_65, %c0_66] : memref<2x64x1xf32, #tpu.memory_space<vmem>>, vector<1x64x1xf32>
      %96 = vector.shape_cast %95 : vector<1x64x1xf32> to vector<64x1xf32>
      %97 = tpu.reciprocal %96 {approx = true} : vector<64x1xf32> -> vector<64x1xf32>
      %98 = vector.broadcast %97 : vector<64x1xf32> to vector<64x32xf32>
      %99 = arith.mulf %94, %98 : vector<64x32xf32>
      %100 = tpu.concatenate %92, %99 in 1 : vector<64x32xf32>, vector<64x32xf32> -> vector<64x64xf32>
      %c0_67 = arith.constant 0 : index
      %c0_68 = arith.constant 0 : index
      %101 = vector.load %arg6[%c0_67, %c0_68] : memref<64x64xf32, #tpu.memory_space<vmem>>, vector<64x64xf32>
      %cst_69 = arith.constant dense<0.000000e+00> : vector<64x64xf32>
      %102 = tpu.matmul %100, %101, %cst_69 {dimension_numbers = #tpu.dot_dimension_numbers<[1], [0], [0], [1], [0, 0, 1, 1], [], []>} : vector<64x64xf32>, vector<64x64xf32>, vector<64x64xf32> -> vector<64x64xf32>
      %c0_70 = arith.constant 0 : index
      %c0_71 = arith.constant 0 : index
      %103 = vector.load %arg7[%c0_70, %c0_71] : memref<1x64xf32, #tpu.memory_space<vmem>>, vector<1x64xf32>
      %104 = vector.broadcast %103 : vector<1x64xf32> to vector<64x64xf32>
      %105 = arith.addf %102, %104 : vector<64x64xf32>
      %c0_72 = arith.constant 0 : index
      %c0_73 = arith.constant 0 : index
      %c0_74 = arith.constant 0 : index
      %106 = vector.load %arg8[%c0_72, %c0_73, %c0_74] : memref<1x64x64xf32, #tpu.memory_space<vmem>>, vector<1x64x64xf32>
      %107 = vector.shape_cast %106 : vector<1x64x64xf32> to vector<64x64xf32>
      %108 = arith.addf %107, %105 : vector<64x64xf32>
      %c0_75 = arith.constant 0 : index
      %c0_76 = arith.constant 0 : index
      %c0_77 = arith.constant 0 : index
      %109 = vector.load %arg9[%c0_75, %c0_76, %c0_77] : memref<1x64x64xf32, #tpu.memory_space<vmem>>, vector<1x64x64xf32>
      %110 = vector.shape_cast %109 : vector<1x64x64xf32> to vector<64x64xf32>
      %111 = vector.shape_cast %108 : vector<64x64xf32> to vector<1x64x64xf32>
      tpu.vector_store %arg9[%c0_75, %c0_76, %c0_77], %111 {strides = array<i32>} : memref<1x64x64xf32, #tpu.memory_space<vmem>>, vector<1x64x64xf32>,
    } else {
    }
    return
  }
  func.func @transform_0(%arg0: i32, %arg1: i32, %arg2: i32) -> (i32, i32, i32) {
    %c0_i32 = arith.constant 0 : i32
    %c0_i32_0 = arith.constant 0 : i32
    return %arg0, %arg1, %c0_i32 : i32, i32, i32
  }
  func.func @transform_1(%arg0: i32, %arg1: i32, %arg2: i32) -> (i32, i32, i32) {
    %c0_i32 = arith.constant 0 : i32
    %c0_i32_0 = arith.constant 0 : i32
    return %arg0, %arg2, %c0_i32 : i32, i32, i32
  }
  func.func @transform_2(%arg0: i32, %arg1: i32, %arg2: i32) -> (i32, i32, i32) {
    %c0_i32 = arith.constant 0 : i32
    %c0_i32_0 = arith.constant 0 : i32
    return %arg0, %arg2, %c0_i32 : i32, i32, i32
  }
  func.func @transform_3(%arg0: i32, %arg1: i32, %arg2: i32) -> (i32, i32) {
    %c0_i32 = arith.constant 0 : i32
    %c0_i32_0 = arith.constant 0 : i32
    %c0_i32_1 = arith.constant 0 : i32
    return %c0_i32, %c0_i32_0 : i32, i32
  }
  func.func @transform_4(%arg0: i32, %arg1: i32, %arg2: i32) -> (i32, i32) {
    %c0_i32 = arith.constant 0 : i32
    %c0_i32_0 = arith.constant 0 : i32
    %c0_i32_1 = arith.constant 0 : i32
    return %c0_i32, %c0_i32_0 : i32, i32
  }
  func.func @transform_5(%arg0: i32, %arg1: i32, %arg2: i32) -> (i32, i32, i32) {
    %c0_i32 = arith.constant 0 : i32
    %c0_i32_0 = arith.constant 0 : i32
    return %arg0, %arg1, %c0_i32 : i32, i32, i32
  }
  func.func @transform_6(%arg0: i32, %arg1: i32, %arg2: i32) -> (i32, i32, i32) {
    %c0_i32 = arith.constant 0 : i32
    %c0_i32_0 = arith.constant 0 : i32
    return %arg0, %arg1, %c0_i32 : i32, i32, i32
  }
}

module attributes {stable_mosaic.version = 11 : i64} {
  func.func @_linear_kernel(%arg0: i32, %arg1: i32, %arg2: i32, %arg3: i32, %arg4: memref<1x8x32xf32, #tpu.memory_space<vmem>>, %arg5: memref<32x64xf32, #tpu.memory_space<vmem>>, %arg6: memref<1x64xf32, #tpu.memory_space<vmem>>, %arg7: memref<1x8x64xf32, #tpu.memory_space<vmem>>, %arg8: memref<8x64xf32, #tpu.memory_space<vmem>>) attributes {dimension_semantics = [#tpu.dimension_semantics<parallel>, #tpu.dimension_semantics<parallel>, #tpu.dimension_semantics<parallel>, #tpu.dimension_semantics<arbitrary>], iteration_bounds = array<i64: 2, 1, 1, 1>, scalar_prefetch = 0 : i64, scratch_operands = 1 : i64, tpu.core_type = #tpu.core_type<tc>, window_params = [{transform_indices = @transform_0, window_bounds = array<i64: 1, 8, 32>}, {transform_indices = @transform_1, window_bounds = array<i64: 32, 64>}, {transform_indices = @transform_2, window_bounds = array<i64: 1, 64>}, {transform_indices = @transform_3, window_bounds = array<i64: 1, 8, 64>}]} {
    %c0_i32 = arith.constant 0 : i32
    %0 = arith.cmpi eq, %arg3, %c0_i32 : i32
    %1 = arith.extui %0 : i1 to i32
    %c0_i32_0 = arith.constant 0 : i32
    %2 = arith.cmpi ne, %1, %c0_i32_0 : i32
    scf.if %2 {
      %cst_11 = arith.constant 0.000000e+00 : f32
      %13 = vector.broadcast %cst_11 : f32 to vector<8x64xf32>
      %c0_12 = arith.constant 0 : index
      %c0_13 = arith.constant 0 : index
      %14 = vector.load %arg8[%c0_12, %c0_13] : memref<8x64xf32, #tpu.memory_space<vmem>>, vector<8x64xf32>
      tpu.vector_store %arg8[%c0_12, %c0_13], %13 {strides = array<i32>} : memref<8x64xf32, #tpu.memory_space<vmem>>, vector<8x64xf32>,
    } else {
    }
    %c0 = arith.constant 0 : index
    %c0_1 = arith.constant 0 : index
    %c0_2 = arith.constant 0 : index
    %3 = vector.load %arg4[%c0, %c0_1, %c0_2] : memref<1x8x32xf32, #tpu.memory_space<vmem>>, vector<1x8x32xf32>
    %4 = vector.shape_cast %3 : vector<1x8x32xf32> to vector<8x32xf32>
    %c0_3 = arith.constant 0 : index
    %c0_4 = arith.constant 0 : index
    %5 = vector.load %arg8[%c0_3, %c0_4] : memref<8x64xf32, #tpu.memory_space<vmem>>, vector<8x64xf32>
    %c0_5 = arith.constant 0 : index
    %c0_6 = arith.constant 0 : index
    %6 = vector.load %arg5[%c0_5, %c0_6] : memref<32x64xf32, #tpu.memory_space<vmem>>, vector<32x64xf32>
    %cst = arith.constant dense<0.000000e+00> : vector<8x64xf32>
    %7 = tpu.matmul %4, %6, %cst {dimension_numbers = #tpu.dot_dimension_numbers<[1], [0], [0], [1], [0, 0, 1, 1], [], []>} : vector<8x32xf32>, vector<32x64xf32>, vector<8x64xf32> -> vector<8x64xf32>
    %8 = arith.addf %5, %7 : vector<8x64xf32>
    %c0_7 = arith.constant 0 : index
    %c0_8 = arith.constant 0 : index
    %9 = vector.load %arg8[%c0_7, %c0_8] : memref<8x64xf32, #tpu.memory_space<vmem>>, vector<8x64xf32>
    tpu.vector_store %arg8[%c0_7, %c0_8], %8 {strides = array<i32>} : memref<8x64xf32, #tpu.memory_space<vmem>>, vector<8x64xf32>,
    %c0_i32_9 = arith.constant 0 : i32
    %10 = arith.cmpi eq, %arg3, %c0_i32_9 : i32
    %11 = arith.extui %10 : i1 to i32
    %c0_i32_10 = arith.constant 0 : i32
    %12 = arith.cmpi ne, %11, %c0_i32_10 : i32
    scf.if %12 {
      %c0_11 = arith.constant 0 : index
      %c0_12 = arith.constant 0 : index
      %13 = vector.load %arg8[%c0_11, %c0_12] : memref<8x64xf32, #tpu.memory_space<vmem>>, vector<8x64xf32>
      %c0_13 = arith.constant 0 : index
      %c0_14 = arith.constant 0 : index
      %14 = vector.load %arg6[%c0_13, %c0_14] : memref<1x64xf32, #tpu.memory_space<vmem>>, vector<1x64xf32>
      %15 = vector.broadcast %14 : vector<1x64xf32> to vector<8x64xf32>
      %16 = arith.addf %13, %15 : vector<8x64xf32>
      %c0_15 = arith.constant 0 : index
      %c0_16 = arith.constant 0 : index
      %c0_17 = arith.constant 0 : index
      %17 = vector.load %arg7[%c0_15, %c0_16, %c0_17] : memref<1x8x64xf32, #tpu.memory_space<vmem>>, vector<1x8x64xf32>
      %18 = vector.shape_cast %17 : vector<1x8x64xf32> to vector<8x64xf32>
      %19 = vector.shape_cast %16 : vector<8x64xf32> to vector<1x8x64xf32>
      tpu.vector_store %arg7[%c0_15, %c0_16, %c0_17], %19 {strides = array<i32>} : memref<1x8x64xf32, #tpu.memory_space<vmem>>, vector<1x8x64xf32>,
    } else {
    }
    return
  }
  func.func @transform_0(%arg0: i32, %arg1: i32, %arg2: i32, %arg3: i32) -> (i32, i32, i32) {
    %c0_i32 = arith.constant 0 : i32
    return %arg0, %arg1, %arg3 : i32, i32, i32
  }
  func.func @transform_1(%arg0: i32, %arg1: i32, %arg2: i32, %arg3: i32) -> (i32, i32) {
    %c0_i32 = arith.constant 0 : i32
    return %arg3, %arg2 : i32, i32
  }
  func.func @transform_2(%arg0: i32, %arg1: i32, %arg2: i32, %arg3: i32) -> (i32, i32) {
    %c0_i32 = arith.constant 0 : i32
    %c0_i32_0 = arith.constant 0 : i32
    return %c0_i32, %arg2 : i32, i32
  }
  func.func @transform_3(%arg0: i32, %arg1: i32, %arg2: i32, %arg3: i32) -> (i32, i32, i32) {
    %c0_i32 = arith.constant 0 : i32
    return %arg0, %arg1, %arg2 : i32, i32, i32
  }
}

module attributes {stable_mosaic.version = 11 : i64} {
  func.func @_linear_kernel(%arg0: i32, %arg1: i32, %arg2: i32, %arg3: i32, %arg4: memref<1x64x64xf32, #tpu.memory_space<vmem>>, %arg5: memref<1x1x64xf32, #tpu.memory_space<vmem>>, %arg6: memref<1x1x64xf32, #tpu.memory_space<vmem>>, %arg7: memref<64x256xf32, #tpu.memory_space<vmem>>, %arg8: memref<1x256xf32, #tpu.memory_space<vmem>>, %arg9: memref<1x64x256xf32, #tpu.memory_space<vmem>>, %arg10: memref<64x256xf32, #tpu.memory_space<vmem>>) attributes {dimension_semantics = [#tpu.dimension_semantics<parallel>, #tpu.dimension_semantics<parallel>, #tpu.dimension_semantics<parallel>, #tpu.dimension_semantics<arbitrary>], iteration_bounds = array<i64: 2, 1, 1, 1>, scalar_prefetch = 0 : i64, scratch_operands = 1 : i64, tpu.core_type = #tpu.core_type<tc>, window_params = [{transform_indices = @transform_0, window_bounds = array<i64: 1, 64, 64>}, {transform_indices = @transform_1, window_bounds = array<i64: 1, 1, 64>}, {transform_indices = @transform_2, window_bounds = array<i64: 1, 1, 64>}, {transform_indices = @transform_3, window_bounds = array<i64: 64, 256>}, {transform_indices = @transform_4, window_bounds = array<i64: 1, 256>}, {transform_indices = @transform_5, window_bounds = array<i64: 1, 64, 256>}]} {
    %c0_i32 = arith.constant 0 : i32
    %0 = arith.cmpi eq, %arg3, %c0_i32 : i32
    %1 = arith.extui %0 : i1 to i32
    %c0_i32_0 = arith.constant 0 : i32
    %2 = arith.cmpi ne, %1, %c0_i32_0 : i32
    scf.if %2 {
      %cst_23 = arith.constant 0.000000e+00 : f32
      %39 = vector.broadcast %cst_23 : f32 to vector<64x256xf32>
      %c0_24 = arith.constant 0 : index
      %c0_25 = arith.constant 0 : index
      %40 = vector.load %arg10[%c0_24, %c0_25] : memref<64x256xf32, #tpu.memory_space<vmem>>, vector<64x256xf32>
      tpu.vector_store %arg10[%c0_24, %c0_25], %39 {strides = array<i32>} : memref<64x256xf32, #tpu.memory_space<vmem>>, vector<64x256xf32>,
    } else {
    }
    %c0 = arith.constant 0 : index
    %c0_1 = arith.constant 0 : index
    %c0_2 = arith.constant 0 : index
    %3 = vector.load %arg4[%c0, %c0_1, %c0_2] : memref<1x64x64xf32, #tpu.memory_space<vmem>>, vector<1x64x64xf32>
    %4 = vector.shape_cast %3 : vector<1x64x64xf32> to vector<64x64xf32>
    %cst = arith.constant dense<0.000000e+00> : vector<64xf32>
    %5 = vector.multi_reduction <add>, %4, %cst [1] : vector<64x64xf32> to vector<64xf32>
    %6 = vector.shape_cast %5 : vector<64xf32> to vector<64x1xf32>
    %cst_3 = arith.constant 6.400000e+01 : f32
    %7 = vector.broadcast %cst_3 : f32 to vector<64x1xf32>
    %8 = arith.divf %6, %7 : vector<64x1xf32>
    %9 = vector.broadcast %8 : vector<64x1xf32> to vector<64x64xf32>
    %10 = arith.subf %4, %9 : vector<64x64xf32>
    %11 = arith.mulf %10, %10 : vector<64x64xf32>
    %cst_4 = arith.constant dense<0.000000e+00> : vector<64xf32>
    %12 = vector.multi_reduction <add>, %11, %cst_4 [1] : vector<64x64xf32> to vector<64xf32>
    %13 = vector.shape_cast %12 : vector<64xf32> to vector<64x1xf32>
    %cst_5 = arith.constant 6.400000e+01 : f32
    %14 = vector.broadcast %cst_5 : f32 to vector<64x1xf32>
    %15 = arith.divf %13, %14 : vector<64x1xf32>
    %cst_6 = arith.constant 9.99999997E-7 : f32
    %16 = vector.broadcast %cst_6 : f32 to vector<64x1xf32>
    %17 = arith.addf %15, %16 : vector<64x1xf32>
    %18 = math.rsqrt %17 : vector<64x1xf32>
    %19 = vector.broadcast %18 : vector<64x1xf32> to vector<64x64xf32>
    %20 = arith.mulf %10, %19 : vector<64x64xf32>
    %c0_7 = arith.constant 0 : index
    %c0_8 = arith.constant 0 : index
    %c0_9 = arith.constant 0 : index
    %21 = vector.load %arg5[%c0_7, %c0_8, %c0_9] : memref<1x1x64xf32, #tpu.memory_space<vmem>>, vector<1x1x64xf32>
    %22 = vector.shape_cast %21 : vector<1x1x64xf32> to vector<1x64xf32>
    %cst_10 = arith.constant 1.000000e+00 : f32
    %23 = vector.broadcast %cst_10 : f32 to vector<1x64xf32>
    %24 = arith.addf %23, %22 : vector<1x64xf32>
    %25 = vector.broadcast %24 : vector<1x64xf32> to vector<64x64xf32>
    %26 = arith.mulf %20, %25 : vector<64x64xf32>
    %c0_11 = arith.constant 0 : index
    %c0_12 = arith.constant 0 : index
    %c0_13 = arith.constant 0 : index
    %27 = vector.load %arg6[%c0_11, %c0_12, %c0_13] : memref<1x1x64xf32, #tpu.memory_space<vmem>>, vector<1x1x64xf32>
    %28 = vector.shape_cast %27 : vector<1x1x64xf32> to vector<1x64xf32>
    %29 = vector.broadcast %28 : vector<1x64xf32> to vector<64x64xf32>
    %30 = arith.addf %26, %29 : vector<64x64xf32>
    %c0_14 = arith.constant 0 : index
    %c0_15 = arith.constant 0 : index
    %31 = vector.load %arg10[%c0_14, %c0_15] : memref<64x256xf32, #tpu.memory_space<vmem>>, vector<64x256xf32>
    %c0_16 = arith.constant 0 : index
    %c0_17 = arith.constant 0 : index
    %32 = vector.load %arg7[%c0_16, %c0_17] : memref<64x256xf32, #tpu.memory_space<vmem>>, vector<64x256xf32>
    %cst_18 = arith.constant dense<0.000000e+00> : vector<64x256xf32>
    %33 = tpu.matmul %30, %32, %cst_18 {dimension_numbers = #tpu.dot_dimension_numbers<[1], [0], [0], [1], [0, 0, 1, 1], [], []>} : vector<64x64xf32>, vector<64x256xf32>, vector<64x256xf32> -> vector<64x256xf32>
    %34 = arith.addf %31, %33 : vector<64x256xf32>
    %c0_19 = arith.constant 0 : index
    %c0_20 = arith.constant 0 : index
    %35 = vector.load %arg10[%c0_19, %c0_20] : memref<64x256xf32, #tpu.memory_space<vmem>>, vector<64x256xf32>
    tpu.vector_store %arg10[%c0_19, %c0_20], %34 {strides = array<i32>} : memref<64x256xf32, #tpu.memory_space<vmem>>, vector<64x256xf32>,
    %c0_i32_21 = arith.constant 0 : i32
    %36 = arith.cmpi eq, %arg3, %c0_i32_21 : i32
    %37 = arith.extui %36 : i1 to i32
    %c0_i32_22 = arith.constant 0 : i32
    %38 = arith.cmpi ne, %37, %c0_i32_22 : i32
    scf.if %38 {
      %c0_23 = arith.constant 0 : index
      %c0_24 = arith.constant 0 : index
      %39 = vector.load %arg10[%c0_23, %c0_24] : memref<64x256xf32, #tpu.memory_space<vmem>>, vector<64x256xf32>
      %c0_25 = arith.constant 0 : index
      %c0_26 = arith.constant 0 : index
      %40 = vector.load %arg8[%c0_25, %c0_26] : memref<1x256xf32, #tpu.memory_space<vmem>>, vector<1x256xf32>
      %41 = vector.broadcast %40 : vector<1x256xf32> to vector<64x256xf32>
      %42 = arith.addf %39, %41 : vector<64x256xf32>
      %43 = arith.mulf %42, %42 : vector<64x256xf32>
      %44 = arith.mulf %42, %43 : vector<64x256xf32>
      %cst_27 = arith.constant 4.471500e-02 : f32
      %45 = vector.broadcast %cst_27 : f32 to vector<64x256xf32>
      %46 = arith.mulf %45, %44 : vector<64x256xf32>
      %47 = arith.addf %42, %46 : vector<64x256xf32>
      %cst_28 = arith.constant 0.797884583 : f32
      %48 = vector.broadcast %cst_28 : f32 to vector<64x256xf32>
      %49 = arith.mulf %48, %47 : vector<64x256xf32>
      %50 = math.tanh %49 : vector<64x256xf32>
      %cst_29 = arith.constant 1.000000e+00 : f32
      %51 = vector.broadcast %cst_29 : f32 to vector<64x256xf32>
      %52 = arith.addf %51, %50 : vector<64x256xf32>
      %cst_30 = arith.constant 5.000000e-01 : f32
      %53 = vector.broadcast %cst_30 : f32 to vector<64x256xf32>
      %54 = arith.mulf %53, %52 : vector<64x256xf32>
      %55 = arith.mulf %42, %54 : vector<64x256xf32>
      %c0_31 = arith.constant 0 : index
      %c0_32 = arith.constant 0 : index
      %c0_33 = arith.constant 0 : index
      %56 = vector.load %arg9[%c0_31, %c0_32, %c0_33] : memref<1x64x256xf32, #tpu.memory_space<vmem>>, vector<1x64x256xf32>
      %57 = vector.shape_cast %56 : vector<1x64x256xf32> to vector<64x256xf32>
      %58 = vector.shape_cast %55 : vector<64x256xf32> to vector<1x64x256xf32>
      tpu.vector_store %arg9[%c0_31, %c0_32, %c0_33], %58 {strides = array<i32>} : memref<1x64x256xf32, #tpu.memory_space<vmem>>, vector<1x64x256xf32>,
    } else {
    }
    return
  }
  func.func @transform_0(%arg0: i32, %arg1: i32, %arg2: i32, %arg3: i32) -> (i32, i32, i32) {
    %c0_i32 = arith.constant 0 : i32
    return %arg0, %arg1, %arg3 : i32, i32, i32
  }
  func.func @transform_1(%arg0: i32, %arg1: i32, %arg2: i32, %arg3: i32) -> (i32, i32, i32) {
    %c0_i32 = arith.constant 0 : i32
    %c0_i32_0 = arith.constant 0 : i32
    %c0_i32_1 = arith.constant 0 : i32
    return %arg0, %c0_i32, %c0_i32_0 : i32, i32, i32
  }
  func.func @transform_2(%arg0: i32, %arg1: i32, %arg2: i32, %arg3: i32) -> (i32, i32, i32) {
    %c0_i32 = arith.constant 0 : i32
    %c0_i32_0 = arith.constant 0 : i32
    %c0_i32_1 = arith.constant 0 : i32
    return %arg0, %c0_i32, %c0_i32_0 : i32, i32, i32
  }
  func.func @transform_3(%arg0: i32, %arg1: i32, %arg2: i32, %arg3: i32) -> (i32, i32) {
    %c0_i32 = arith.constant 0 : i32
    return %arg3, %arg2 : i32, i32
  }
  func.func @transform_4(%arg0: i32, %arg1: i32, %arg2: i32, %arg3: i32) -> (i32, i32) {
    %c0_i32 = arith.constant 0 : i32
    %c0_i32_0 = arith.constant 0 : i32
    return %c0_i32, %arg2 : i32, i32
  }
  func.func @transform_5(%arg0: i32, %arg1: i32, %arg2: i32, %arg3: i32) -> (i32, i32, i32) {
    %c0_i32 = arith.constant 0 : i32
    return %arg0, %arg1, %arg2 : i32, i32, i32
  }
}

module attributes {stable_mosaic.version = 11 : i64} {
  func.func @_linear_kernel(%arg0: i32, %arg1: i32, %arg2: i32, %arg3: i32, %arg4: memref<1x64x256xf32, #tpu.memory_space<vmem>>, %arg5: memref<256x64xf32, #tpu.memory_space<vmem>>, %arg6: memref<1x64xf32, #tpu.memory_space<vmem>>, %arg7: memref<1x64x64xf32, #tpu.memory_space<vmem>>, %arg8: memref<1x1x64xf32, #tpu.memory_space<vmem>>, %arg9: memref<1x64x64xf32, #tpu.memory_space<vmem>>, %arg10: memref<64x64xf32, #tpu.memory_space<vmem>>) attributes {dimension_semantics = [#tpu.dimension_semantics<parallel>, #tpu.dimension_semantics<parallel>, #tpu.dimension_semantics<parallel>, #tpu.dimension_semantics<arbitrary>], iteration_bounds = array<i64: 2, 1, 1, 1>, scalar_prefetch = 0 : i64, scratch_operands = 1 : i64, tpu.core_type = #tpu.core_type<tc>, window_params = [{transform_indices = @transform_0, window_bounds = array<i64: 1, 64, 256>}, {transform_indices = @transform_1, window_bounds = array<i64: 256, 64>}, {transform_indices = @transform_2, window_bounds = array<i64: 1, 64>}, {transform_indices = @transform_3, window_bounds = array<i64: 1, 64, 64>}, {transform_indices = @transform_4, window_bounds = array<i64: 1, 1, 64>}, {transform_indices = @transform_5, window_bounds = array<i64: 1, 64, 64>}]} {
    %c0_i32 = arith.constant 0 : i32
    %0 = arith.cmpi eq, %arg3, %c0_i32 : i32
    %1 = arith.extui %0 : i1 to i32
    %c0_i32_0 = arith.constant 0 : i32
    %2 = arith.cmpi ne, %1, %c0_i32_0 : i32
    scf.if %2 {
      %cst_11 = arith.constant 0.000000e+00 : f32
      %13 = vector.broadcast %cst_11 : f32 to vector<64x64xf32>
      %c0_12 = arith.constant 0 : index
      %c0_13 = arith.constant 0 : index
      %14 = vector.load %arg10[%c0_12, %c0_13] : memref<64x64xf32, #tpu.memory_space<vmem>>, vector<64x64xf32>
      tpu.vector_store %arg10[%c0_12, %c0_13], %13 {strides = array<i32>} : memref<64x64xf32, #tpu.memory_space<vmem>>, vector<64x64xf32>,
    } else {
    }
    %c0 = arith.constant 0 : index
    %c0_1 = arith.constant 0 : index
    %c0_2 = arith.constant 0 : index
    %3 = vector.load %arg4[%c0, %c0_1, %c0_2] : memref<1x64x256xf32, #tpu.memory_space<vmem>>, vector<1x64x256xf32>
    %4 = vector.shape_cast %3 : vector<1x64x256xf32> to vector<64x256xf32>
    %c0_3 = arith.constant 0 : index
    %c0_4 = arith.constant 0 : index
    %5 = vector.load %arg10[%c0_3, %c0_4] : memref<64x64xf32, #tpu.memory_space<vmem>>, vector<64x64xf32>
    %c0_5 = arith.constant 0 : index
    %c0_6 = arith.constant 0 : index
    %6 = vector.load %arg5[%c0_5, %c0_6] : memref<256x64xf32, #tpu.memory_space<vmem>>, vector<256x64xf32>
    %cst = arith.constant dense<0.000000e+00> : vector<64x64xf32>
    %7 = tpu.matmul %4, %6, %cst {dimension_numbers = #tpu.dot_dimension_numbers<[1], [0], [0], [1], [0, 0, 1, 1], [], []>} : vector<64x256xf32>, vector<256x64xf32>, vector<64x64xf32> -> vector<64x64xf32>
    %8 = arith.addf %5, %7 : vector<64x64xf32>
    %c0_7 = arith.constant 0 : index
    %c0_8 = arith.constant 0 : index
    %9 = vector.load %arg10[%c0_7, %c0_8] : memref<64x64xf32, #tpu.memory_space<vmem>>, vector<64x64xf32>
    tpu.vector_store %arg10[%c0_7, %c0_8], %8 {strides = array<i32>} : memref<64x64xf32, #tpu.memory_space<vmem>>, vector<64x64xf32>,
    %c0_i32_9 = arith.constant 0 : i32
    %10 = arith.cmpi eq, %arg3, %c0_i32_9 : i32
    %11 = arith.extui %10 : i1 to i32
    %c0_i32_10 = arith.constant 0 : i32
    %12 = arith.cmpi ne, %11, %c0_i32_10 : i32
    scf.if %12 {
      %c0_11 = arith.constant 0 : index
      %c0_12 = arith.constant 0 : index
      %13 = vector.load %arg10[%c0_11, %c0_12] : memref<64x64xf32, #tpu.memory_space<vmem>>, vector<64x64xf32>
      %c0_13 = arith.constant 0 : index
      %c0_14 = arith.constant 0 : index
      %14 = vector.load %arg6[%c0_13, %c0_14] : memref<1x64xf32, #tpu.memory_space<vmem>>, vector<1x64xf32>
      %15 = vector.broadcast %14 : vector<1x64xf32> to vector<64x64xf32>
      %16 = arith.addf %13, %15 : vector<64x64xf32>
      %c0_15 = arith.constant 0 : index
      %c0_16 = arith.constant 0 : index
      %c0_17 = arith.constant 0 : index
      %17 = vector.load %arg7[%c0_15, %c0_16, %c0_17] : memref<1x64x64xf32, #tpu.memory_space<vmem>>, vector<1x64x64xf32>
      %18 = vector.shape_cast %17 : vector<1x64x64xf32> to vector<64x64xf32>
      %c0_18 = arith.constant 0 : index
      %c0_19 = arith.constant 0 : index
      %c0_20 = arith.constant 0 : index
      %19 = vector.load %arg8[%c0_18, %c0_19, %c0_20] : memref<1x1x64xf32, #tpu.memory_space<vmem>>, vector<1x1x64xf32>
      %20 = vector.shape_cast %19 : vector<1x1x64xf32> to vector<1x64xf32>
      %21 = vector.broadcast %20 : vector<1x64xf32> to vector<64x64xf32>
      %22 = arith.mulf %21, %16 : vector<64x64xf32>
      %23 = arith.addf %18, %22 : vector<64x64xf32>
      %c0_21 = arith.constant 0 : index
      %c0_22 = arith.constant 0 : index
      %c0_23 = arith.constant 0 : index
      %24 = vector.load %arg9[%c0_21, %c0_22, %c0_23] : memref<1x64x64xf32, #tpu.memory_space<vmem>>, vector<1x64x64xf32>
      %25 = vector.shape_cast %24 : vector<1x64x64xf32> to vector<64x64xf32>
      %26 = vector.shape_cast %23 : vector<64x64xf32> to vector<1x64x64xf32>
      tpu.vector_store %arg9[%c0_21, %c0_22, %c0_23], %26 {strides = array<i32>} : memref<1x64x64xf32, #tpu.memory_space<vmem>>, vector<1x64x64xf32>,
    } else {
    }
    return
  }
  func.func @transform_0(%arg0: i32, %arg1: i32, %arg2: i32, %arg3: i32) -> (i32, i32, i32) {
    %c0_i32 = arith.constant 0 : i32
    return %arg0, %arg1, %arg3 : i32, i32, i32
  }
  func.func @transform_1(%arg0: i32, %arg1: i32, %arg2: i32, %arg3: i32) -> (i32, i32) {
    %c0_i32 = arith.constant 0 : i32
    return %arg3, %arg2 : i32, i32
  }
  func.func @transform_2(%arg0: i32, %arg1: i32, %arg2: i32, %arg3: i32) -> (i32, i32) {
    %c0_i32 = arith.constant 0 : i32
    %c0_i32_0 = arith.constant 0 : i32
    return %c0_i32, %arg2 : i32, i32
  }
  func.func @transform_3(%arg0: i32, %arg1: i32, %arg2: i32, %arg3: i32) -> (i32, i32, i32) {
    %c0_i32 = arith.constant 0 : i32
    return %arg0, %arg1, %arg2 : i32, i32, i32
  }
  func.func @transform_4(%arg0: i32, %arg1: i32, %arg2: i32, %arg3: i32) -> (i32, i32, i32) {
    %c0_i32 = arith.constant 0 : i32
    %c0_i32_0 = arith.constant 0 : i32
    return %arg0, %c0_i32, %arg2 : i32, i32, i32
  }
  func.func @transform_5(%arg0: i32, %arg1: i32, %arg2: i32, %arg3: i32) -> (i32, i32, i32) {
    %c0_i32 = arith.constant 0 : i32
    return %arg0, %arg1, %arg2 : i32, i32, i32
  }
}

module attributes {stable_mosaic.version = 11 : i64} {
  func.func @_linear_kernel(%arg0: i32, %arg1: i32, %arg2: i32, %arg3: i32, %arg4: memref<1x64x256xf32, #tpu.memory_space<vmem>>, %arg5: memref<256x64xf32, #tpu.memory_space<vmem>>, %arg6: memref<1x64xf32, #tpu.memory_space<vmem>>, %arg7: memref<1x64x64xf32, #tpu.memory_space<vmem>>, %arg8: memref<1x1x64xf32, #tpu.memory_space<vmem>>, %arg9: memref<1x64x64xf32, #tpu.memory_space<vmem>>, %arg10: memref<64x64xf32, #tpu.memory_space<vmem>>) attributes {dimension_semantics = [#tpu.dimension_semantics<parallel>, #tpu.dimension_semantics<parallel>, #tpu.dimension_semantics<parallel>, #tpu.dimension_semantics<arbitrary>], iteration_bounds = array<i64: 2, 1, 1, 1>, scalar_prefetch = 0 : i64, scratch_operands = 1 : i64, tpu.core_type = #tpu.core_type<tc>, window_params = [{transform_indices = @transform_0, window_bounds = array<i64: 1, 64, 256>}, {transform_indices = @transform_1, window_bounds = array<i64: 256, 64>}, {transform_indices = @transform_2, window_bounds = array<i64: 1, 64>}, {transform_indices = @transform_3, window_bounds = array<i64: 1, 64, 64>}, {transform_indices = @transform_4, window_bounds = array<i64: 1, 1, 64>}, {transform_indices = @transform_5, window_bounds = array<i64: 1, 64, 64>}]} {
    %c0_i32 = arith.constant 0 : i32
    %0 = arith.cmpi eq, %arg3, %c0_i32 : i32
    %1 = arith.extui %0 : i1 to i32
    %c0_i32_0 = arith.constant 0 : i32
    %2 = arith.cmpi ne, %1, %c0_i32_0 : i32
    scf.if %2 {
      %cst_11 = arith.constant 0.000000e+00 : f32
      %13 = vector.broadcast %cst_11 : f32 to vector<64x64xf32>
      %c0_12 = arith.constant 0 : index
      %c0_13 = arith.constant 0 : index
      %14 = vector.load %arg10[%c0_12, %c0_13] : memref<64x64xf32, #tpu.memory_space<vmem>>, vector<64x64xf32>
      tpu.vector_store %arg10[%c0_12, %c0_13], %13 {strides = array<i32>} : memref<64x64xf32, #tpu.memory_space<vmem>>, vector<64x64xf32>,
    } else {
    }
    %c0 = arith.constant 0 : index
    %c0_1 = arith.constant 0 : index
    %c0_2 = arith.constant 0 : index
    %3 = vector.load %arg4[%c0, %c0_1, %c0_2] : memref<1x64x256xf32, #tpu.memory_space<vmem>>, vector<1x64x256xf32>
    %4 = vector.shape_cast %3 : vector<1x64x256xf32> to vector<64x256xf32>
    %c0_3 = arith.constant 0 : index
    %c0_4 = arith.constant 0 : index
    %5 = vector.load %arg10[%c0_3, %c0_4] : memref<64x64xf32, #tpu.memory_space<vmem>>, vector<64x64xf32>
    %c0_5 = arith.constant 0 : index
    %c0_6 = arith.constant 0 : index
    %6 = vector.load %arg5[%c0_5, %c0_6] : memref<256x64xf32, #tpu.memory_space<vmem>>, vector<256x64xf32>
    %cst = arith.constant dense<0.000000e+00> : vector<64x64xf32>
    %7 = tpu.matmul %4, %6, %cst {dimension_numbers = #tpu.dot_dimension_numbers<[1], [0], [0], [1], [0, 0, 1, 1], [], []>} : vector<64x256xf32>, vector<256x64xf32>, vector<64x64xf32> -> vector<64x64xf32>
    %8 = arith.addf %5, %7 : vector<64x64xf32>
    %c0_7 = arith.constant 0 : index
    %c0_8 = arith.constant 0 : index
    %9 = vector.load %arg10[%c0_7, %c0_8] : memref<64x64xf32, #tpu.memory_space<vmem>>, vector<64x64xf32>
    tpu.vector_store %arg10[%c0_7, %c0_8], %8 {strides = array<i32>} : memref<64x64xf32, #tpu.memory_space<vmem>>, vector<64x64xf32>,
    %c0_i32_9 = arith.constant 0 : i32
    %10 = arith.cmpi eq, %arg3, %c0_i32_9 : i32
    %11 = arith.extui %10 : i1 to i32
    %c0_i32_10 = arith.constant 0 : i32
    %12 = arith.cmpi ne, %11, %c0_i32_10 : i32
    scf.if %12 {
      %c0_11 = arith.constant 0 : index
      %c0_12 = arith.constant 0 : index
      %13 = vector.load %arg10[%c0_11, %c0_12] : memref<64x64xf32, #tpu.memory_space<vmem>>, vector<64x64xf32>
      %c0_13 = arith.constant 0 : index
      %c0_14 = arith.constant 0 : index
      %14 = vector.load %arg6[%c0_13, %c0_14] : memref<1x64xf32, #tpu.memory_space<vmem>>, vector<1x64xf32>
      %15 = vector.broadcast %14 : vector<1x64xf32> to vector<64x64xf32>
      %16 = arith.addf %13, %15 : vector<64x64xf32>
      %c0_15 = arith.constant 0 : index
      %c0_16 = arith.constant 0 : index
      %c0_17 = arith.constant 0 : index
      %17 = vector.load %arg7[%c0_15, %c0_16, %c0_17] : memref<1x64x64xf32, #tpu.memory_space<vmem>>, vector<1x64x64xf32>
      %18 = vector.shape_cast %17 : vector<1x64x64xf32> to vector<64x64xf32>
      %c0_18 = arith.constant 0 : index
      %c0_19 = arith.constant 0 : index
      %c0_20 = arith.constant 0 : index
      %19 = vector.load %arg8[%c0_18, %c0_19, %c0_20] : memref<1x1x64xf32, #tpu.memory_space<vmem>>, vector<1x1x64xf32>
      %20 = vector.shape_cast %19 : vector<1x1x64xf32> to vector<1x64xf32>
      %21 = vector.broadcast %20 : vector<1x64xf32> to vector<64x64xf32>
      %22 = arith.mulf %21, %16 : vector<64x64xf32>
      %23 = arith.addf %18, %22 : vector<64x64xf32>
      %c0_21 = arith.constant 0 : index
      %c0_22 = arith.constant 0 : index
      %c0_23 = arith.constant 0 : index
      %24 = vector.load %arg9[%c0_21, %c0_22, %c0_23] : memref<1x64x64xf32, #tpu.memory_space<vmem>>, vector<1x64x64xf32>
      %25 = vector.shape_cast %24 : vector<1x64x64xf32> to vector<64x64xf32>
      %26 = vector.shape_cast %23 : vector<64x64xf32> to vector<1x64x64xf32>
      tpu.vector_store %arg9[%c0_21, %c0_22, %c0_23], %26 {strides = array<i32>} : memref<1x64x64xf32, #tpu.memory_space<vmem>>, vector<1x64x64xf32>,
    } else {
    }
    return
  }
  func.func @transform_0(%arg0: i32, %arg1: i32, %arg2: i32, %arg3: i32) -> (i32, i32, i32) {
    %c0_i32 = arith.constant 0 : i32
    return %arg0, %arg1, %arg3 : i32, i32, i32
  }
  func.func @transform_1(%arg0: i32, %arg1: i32, %arg2: i32, %arg3: i32) -> (i32, i32) {
    %c0_i32 = arith.constant 0 : i32
    return %arg3, %arg2 : i32, i32
  }
  func.func @transform_2(%arg0: i32, %arg1: i32, %arg2: i32, %arg3: i32) -> (i32, i32) {
    %c0_i32 = arith.constant 0 : i32
    %c0_i32_0 = arith.constant 0 : i32
    return %c0_i32, %arg2 : i32, i32
  }
  func.func @transform_3(%arg0: i32, %arg1: i32, %arg2: i32, %arg3: i32) -> (i32, i32, i32) {
    %c0_i32 = arith.constant 0 : i32
    return %arg0, %arg1, %arg2 : i32, i32, i32
  }
  func.func @transform_4(%arg0: i32, %arg1: i32, %arg2: i32, %arg3: i32) -> (i32, i32, i32) {
    %c0_i32 = arith.constant 0 : i32
    %c0_i32_0 = arith.constant 0 : i32
    return %arg0, %c0_i32, %arg2 : i32, i32, i32
  }
  func.func @transform_5(%arg0: i32, %arg1: i32, %arg2: i32, %arg3: i32) -> (i32, i32, i32) {
    %c0_i32 = arith.constant 0 : i32
    return %arg0, %arg1, %arg2 : i32, i32, i32
  }
}

module attributes {stable_mosaic.version = 11 : i64} {
  func.func @_linear_kernel(%arg0: i32, %arg1: i32, %arg2: i32, %arg3: i32, %arg4: memref<1x64x64xf32, #tpu.memory_space<vmem>>, %arg5: memref<1x1x64xf32, #tpu.memory_space<vmem>>, %arg6: memref<1x1x64xf32, #tpu.memory_space<vmem>>, %arg7: memref<64x32xf32, #tpu.memory_space<vmem>>, %arg8: memref<1x32xf32, #tpu.memory_space<vmem>>, %arg9: memref<1x64x32xf32, #tpu.memory_space<vmem>>, %arg10: memref<64x32xf32, #tpu.memory_space<vmem>>) attributes {dimension_semantics = [#tpu.dimension_semantics<parallel>, #tpu.dimension_semantics<parallel>, #tpu.dimension_semantics<parallel>, #tpu.dimension_semantics<arbitrary>], iteration_bounds = array<i64: 2, 1, 1, 1>, scalar_prefetch = 0 : i64, scratch_operands = 1 : i64, tpu.core_type = #tpu.core_type<tc>, window_params = [{transform_indices = @transform_0, window_bounds = array<i64: 1, 64, 64>}, {transform_indices = @transform_1, window_bounds = array<i64: 1, 1, 64>}, {transform_indices = @transform_2, window_bounds = array<i64: 1, 1, 64>}, {transform_indices = @transform_3, window_bounds = array<i64: 64, 32>}, {transform_indices = @transform_4, window_bounds = array<i64: 1, 32>}, {transform_indices = @transform_5, window_bounds = array<i64: 1, 64, 32>}]} {
    %c0_i32 = arith.constant 0 : i32
    %0 = arith.cmpi eq, %arg3, %c0_i32 : i32
    %1 = arith.extui %0 : i1 to i32
    %c0_i32_0 = arith.constant 0 : i32
    %2 = arith.cmpi ne, %1, %c0_i32_0 : i32
    scf.if %2 {
      %cst_23 = arith.constant 0.000000e+00 : f32
      %39 = vector.broadcast %cst_23 : f32 to vector<64x32xf32>
      %c0_24 = arith.constant 0 : index
      %c0_25 = arith.constant 0 : index
      %40 = vector.load %arg10[%c0_24, %c0_25] : memref<64x32xf32, #tpu.memory_space<vmem>>, vector<64x32xf32>
      tpu.vector_store %arg10[%c0_24, %c0_25], %39 {strides = array<i32>} : memref<64x32xf32, #tpu.memory_space<vmem>>, vector<64x32xf32>,
    } else {
    }
    %c0 = arith.constant 0 : index
    %c0_1 = arith.constant 0 : index
    %c0_2 = arith.constant 0 : index
    %3 = vector.load %arg4[%c0, %c0_1, %c0_2] : memref<1x64x64xf32, #tpu.memory_space<vmem>>, vector<1x64x64xf32>
    %4 = vector.shape_cast %3 : vector<1x64x64xf32> to vector<64x64xf32>
    %cst = arith.constant dense<0.000000e+00> : vector<64xf32>
    %5 = vector.multi_reduction <add>, %4, %cst [1] : vector<64x64xf32> to vector<64xf32>
    %6 = vector.shape_cast %5 : vector<64xf32> to vector<64x1xf32>
    %cst_3 = arith.constant 6.400000e+01 : f32
    %7 = vector.broadcast %cst_3 : f32 to vector<64x1xf32>
    %8 = arith.divf %6, %7 : vector<64x1xf32>
    %9 = vector.broadcast %8 : vector<64x1xf32> to vector<64x64xf32>
    %10 = arith.subf %4, %9 : vector<64x64xf32>
    %11 = arith.mulf %10, %10 : vector<64x64xf32>
    %cst_4 = arith.constant dense<0.000000e+00> : vector<64xf32>
    %12 = vector.multi_reduction <add>, %11, %cst_4 [1] : vector<64x64xf32> to vector<64xf32>
    %13 = vector.shape_cast %12 : vector<64xf32> to vector<64x1xf32>
    %cst_5 = arith.constant 6.400000e+01 : f32
    %14 = vector.broadcast %cst_5 : f32 to vector<64x1xf32>
    %15 = arith.divf %13, %14 : vector<64x1xf32>
    %cst_6 = arith.constant 9.99999974E-6 : f32
    %16 = vector.broadcast %cst_6 : f32 to vector<64x1xf32>
    %17 = arith.addf %15, %16 : vector<64x1xf32>
    %18 = math.rsqrt %17 : vector<64x1xf32>
    %19 = vector.broadcast %18 : vector<64x1xf32> to vector<64x64xf32>
    %20 = arith.mulf %10, %19 : vector<64x64xf32>
    %c0_7 = arith.constant 0 : index
    %c0_8 = arith.constant 0 : index
    %c0_9 = arith.constant 0 : index
    %21 = vector.load %arg5[%c0_7, %c0_8, %c0_9] : memref<1x1x64xf32, #tpu.memory_space<vmem>>, vector<1x1x64xf32>
    %22 = vector.shape_cast %21 : vector<1x1x64xf32> to vector<1x64xf32>
    %cst_10 = arith.constant 1.000000e+00 : f32
    %23 = vector.broadcast %cst_10 : f32 to vector<1x64xf32>
    %24 = arith.addf %23, %22 : vector<1x64xf32>
    %25 = vector.broadcast %24 : vector<1x64xf32> to vector<64x64xf32>
    %26 = arith.mulf %20, %25 : vector<64x64xf32>
    %c0_11 = arith.constant 0 : index
    %c0_12 = arith.constant 0 : index
    %c0_13 = arith.constant 0 : index
    %27 = vector.load %arg6[%c0_11, %c0_12, %c0_13] : memref<1x1x64xf32, #tpu.memory_space<vmem>>, vector<1x1x64xf32>
    %28 = vector.shape_cast %27 : vector<1x1x64xf32> to vector<1x64xf32>
    %29 = vector.broadcast %28 : vector<1x64xf32> to vector<64x64xf32>
    %30 = arith.addf %26, %29 : vector<64x64xf32>
    %c0_14 = arith.constant 0 : index
    %c0_15 = arith.constant 0 : index
    %31 = vector.load %arg10[%c0_14, %c0_15] : memref<64x32xf32, #tpu.memory_space<vmem>>, vector<64x32xf32>
    %c0_16 = arith.constant 0 : index
    %c0_17 = arith.constant 0 : index
    %32 = vector.load %arg7[%c0_16, %c0_17] : memref<64x32xf32, #tpu.memory_space<vmem>>, vector<64x32xf32>
    %cst_18 = arith.constant dense<0.000000e+00> : vector<64x32xf32>
    %33 = tpu.matmul %30, %32, %cst_18 {dimension_numbers = #tpu.dot_dimension_numbers<[1], [0], [0], [1], [0, 0, 1, 1], [], []>} : vector<64x64xf32>, vector<64x32xf32>, vector<64x32xf32> -> vector<64x32xf32>
    %34 = arith.addf %31, %33 : vector<64x32xf32>
    %c0_19 = arith.constant 0 : index
    %c0_20 = arith.constant 0 : index
    %35 = vector.load %arg10[%c0_19, %c0_20] : memref<64x32xf32, #tpu.memory_space<vmem>>, vector<64x32xf32>
    tpu.vector_store %arg10[%c0_19, %c0_20], %34 {strides = array<i32>} : memref<64x32xf32, #tpu.memory_space<vmem>>, vector<64x32xf32>,
    %c0_i32_21 = arith.constant 0 : i32
    %36 = arith.cmpi eq, %arg3, %c0_i32_21 : i32
    %37 = arith.extui %36 : i1 to i32
    %c0_i32_22 = arith.constant 0 : i32
    %38 = arith.cmpi ne, %37, %c0_i32_22 : i32
    scf.if %38 {
      %c0_23 = arith.constant 0 : index
      %c0_24 = arith.constant 0 : index
      %39 = vector.load %arg10[%c0_23, %c0_24] : memref<64x32xf32, #tpu.memory_space<vmem>>, vector<64x32xf32>
      %c0_25 = arith.constant 0 : index
      %c0_26 = arith.constant 0 : index
      %40 = vector.load %arg8[%c0_25, %c0_26] : memref<1x32xf32, #tpu.memory_space<vmem>>, vector<1x32xf32>
      %41 = vector.broadcast %40 : vector<1x32xf32> to vector<64x32xf32>
      %42 = arith.addf %39, %41 : vector<64x32xf32>
      %c0_27 = arith.constant 0 : index
      %c0_28 = arith.constant 0 : index
      %c0_29 = arith.constant 0 : index
      %43 = vector.load %arg9[%c0_27, %c0_28, %c0_29] : memref<1x64x32xf32, #tpu.memory_space<vmem>>, vector<1x64x32xf32>
      %44 = vector.shape_cast %43 : vector<1x64x32xf32> to vector<64x32xf32>
      %45 = vector.shape_cast %42 : vector<64x32xf32> to vector<1x64x32xf32>
      tpu.vector_store %arg9[%c0_27, %c0_28, %c0_29], %45 {strides = array<i32>} : memref<1x64x32xf32, #tpu.memory_space<vmem>>, vector<1x64x32xf32>,
    } else {
    }
    return
  }
  func.func @transform_0(%arg0: i32, %arg1: i32, %arg2: i32, %arg3: i32) -> (i32, i32, i32) {
    %c0_i32 = arith.constant 0 : i32
    return %arg0, %arg1, %arg3 : i32, i32, i32
  }
  func.func @transform_1(%arg0: i32, %arg1: i32, %arg2: i32, %arg3: i32) -> (i32, i32, i32) {
    %c0_i32 = arith.constant 0 : i32
    %c0_i32_0 = arith.constant 0 : i32
    %c0_i32_1 = arith.constant 0 : i32
    return %arg0, %c0_i32, %c0_i32_0 : i32, i32, i32
  }
  func.func @transform_2(%arg0: i32, %arg1: i32, %arg2: i32, %arg3: i32) -> (i32, i32, i32) {
    %c0_i32 = arith.constant 0 : i32
    %c0_i32_0 = arith.constant 0 : i32
    %c0_i32_1 = arith.constant 0 : i32
    return %arg0, %c0_i32, %c0_i32_0 : i32, i32, i32
  }
  func.func @transform_3(%arg0: i32, %arg1: i32, %arg2: i32, %arg3: i32) -> (i32, i32) {
    %c0_i32 = arith.constant 0 : i32
    return %arg3, %arg2 : i32, i32
  }
  func.func @transform_4(%arg0: i32, %arg1: i32, %arg2: i32, %arg3: i32) -> (i32, i32) {
    %c0_i32 = arith.constant 0 : i32
    %c0_i32_0 = arith.constant 0 : i32
    return %c0_i32, %arg2 : i32, i32
  }
  func.func @transform_5(%arg0: i32, %arg1: i32, %arg2: i32, %arg3: i32) -> (i32, i32, i32) {
    %c0_i32 = arith.constant 0 : i32
    return %arg0, %arg1, %arg2 : i32, i32, i32
  }
}

</mosaic_0001>

<bundles_post_ra>
// kernel: model_forward.26
= control target key start
LH: loop header
LB: loop body
LE: loop exit
PB: predicated region body
PF: predicated region fallthrough
CT: control target
= control target key end

     0   :  { %s779_s15 = smov 0   ;;  %s781_s16 = smov 0   ;;  %s900_s0 = inlined_call_operand.vmem [shape: f32[2,64,32], index: 0, kind: input, shape index: {}]   ;;  %s901_s1 = inlined_call_operand.vmem [shape: f32[32,64], index: 1, kind: input, shape index: {}]   ;;  %s902_s2 = inlined_call_operand.vmem [shape: f32[1,64], index: 2, kind: input, shape index: {}]   ;;  %s903_s3 = inlined_call_operand.vmem [shape: f32[1,64,64], index: 3, kind: input, shape index: {}]   ;;  %s904_s4 = inlined_call_operand.vmem [shape: f32[2,64,64], index: 4, kind: output, shape index: {}]  }
   0x1   :  { %s783_s17 = smov 0  }
   0x2 LB: > { %s40_s18 = sadd.s32 1, %s747_s16  ;;  %p674_p0 = scmp.ge.s32.totalorder %s751_s17, 1  ;;  %s751_s17 = sphi %s783_s17, %s14_s17   ;;  %s747_s16 = sphi %s781_s16, %s906_s16   ;;  %s743_s15 = sphi %s779_s15, %s905_s15  }
   0x3   : > { %p42_p1 = scmp.ge.s32.totalorder %s40_s18, 2  ;;  %p244_p2 = scmp.lt.s32.totalorder %s751_s17, 3 }
   0x5   : > { %s908_s18 = smov (%p42_p1, %s40_s18), 0  ;;  %p245_p3 = pnand %p674_p0, %p244_p2 }
   0x6   : > { %p304_p4 = scmp.lt.s32.totalorder (!%p245_p3), %s743_s15, 1 }
   0x7   : > { %248 = sbr.rel (%p245_p3) target bundleno = 178 (0xb2), region = 36 }
   0xc   : > { %v382_v0 = vld [vmem:[%s901_s1 + $0x18] sm:$0xff]  ;;  %v381_v1 = vld [vmem:[%s901_s1 + $0x10] sm:$0xff]  ;;  %vm354_vm0 = vcmask 523264   ;;  %v380_v2 = vld [vmem:[%s901_s1 + $0x8] sm:$0xff]  ;;  %s910_s15 = smov (!%p304_p4, %s743_s15), 1  ;;  %v753_v3 = vmov 0.0  }
   0xd   : > { %692 = vmatpush.msra.mxu2 %v382_v0  ;;  %693 = vmatpush.msra.mxu3 %v382_v0  ;;  %355 = vst.msk [vmem:[#allocation2] sm:$0xff] %vm354_vm0, %v753_v3  ;;  %v379_v4 = vld [vmem:[%s901_s1] sm:$0xff]  ;;  %s689_s27 = sshll.u32 %s910_s15, 6  ;;  %vm383_vm1 = vcmask 261120   ;;  %v491_v37 = vld [vmem:[%s903_s3 + $0x10] sm:$0xff]  ;;  %v490_v55 = vld [vmem:[%s903_s3 + $0x8] sm:$0xff] }
   0xe   : > { %420 = vmatpush.msra.mxu0 %v382_v0  ;;  %691 = vmatpush.msra.mxu1 %v382_v0  ;;  %356 = vst.msk [vmem:[#allocation2 + $0x8] sm:$0xff] %vm354_vm0, %v753_v3  ;;  %s314_s30 = scalar_lea.vmem %s900_s0, %s689_s27  ;;  %v728_v27 = vld [vmem:[%s902_s2] ss:$0 sm:$0xff]  ;;  %s852_s13 = scalar_lea.vmem %s904_s4, %s689_s27  ;;  %v495_v50 = vld [vmem:[%s903_s3 + $0x30] sm:$0xff]  ;;  %v492_v58 = vld [vmem:[%s903_s3 + $0x18] sm:$0xff] }
   0xf   : > { %695 = vmatpush.msra.mxu2 %v381_v1  ;;  %696 = vmatpush.msra.mxu3 %v381_v1  ;;  %357 = vst.msk [vmem:[#allocation2 + $0x10] sm:$0xff] %vm354_vm0, %v753_v3  ;;  %v367_v5 = vld [vmem:[%s314_s30 + $0x20] sm:$0xff]  ;;  %v369_v6 = vld [vmem:[%s314_s30 + $0x30] sm:$0xff]  ;;  %v368_v9 = vld [vmem:[%s314_s30 + $0x28] sm:$0xff] }
  0x10   : > { %421 = vmatpush.msra.mxu0 %v381_v1  ;;  %694 = vmatpush.msra.mxu1 %v381_v1  ;;  %358 = vst.msk [vmem:[#allocation2 + $0x18] sm:$0xff] %vm354_vm0, %v753_v3  ;;  %v363_v7 = vld [vmem:[%s314_s30] sm:$0xff]  ;;  %v365_v8 = vld [vmem:[%s314_s30 + $0x10] sm:$0xff]  ;;  %v370_v10 = vld [vmem:[%s314_s30 + $0x38] sm:$0xff] }
  0x11   : > { %698 = vmatpush.msra.mxu2 %v380_v2  ;;  %699 = vmatpush.msra.mxu3 %v380_v2  ;;  %359 = vst.msk [vmem:[#allocation2 + $0x20] sm:$0xff] %vm354_vm0, %v753_v3  ;;  %v364_v11 = vld [vmem:[%s314_s30 + $0x8] sm:$0xff]  ;;  %v366_v12 = vld [vmem:[%s314_s30 + $0x18] sm:$0xff]  ;;  %v489_v33 = vld [vmem:[%s903_s3] sm:$0xff] }
  0x12   : > { %422 = vmatpush.msra.mxu0 %v380_v2  ;;  %697 = vmatpush.msra.mxu1 %v380_v2  ;;  %360 = vst.msk [vmem:[#allocation2 + $0x28] sm:$0xff] %vm354_vm0, %v753_v3  ;;  %v493_v46 = vld [vmem:[%s903_s3 + $0x20] sm:$0xff]  ;;  %v494_v63 = vld [vmem:[%s903_s3 + $0x28] sm:$0xff]  ;;  %v496_v2 = vld [vmem:[%s903_s3 + $0x38] sm:$0xff] }
  0x13   : > { %701 = vmatpush.msra.mxu2 %v379_v4  ;;  %702 = vmatpush.msra.mxu3 %v379_v4  ;;  %361 = vst.msk [vmem:[#allocation2 + $0x30] sm:$0xff] %vm354_vm0, %v753_v3 }
  0x14   : > { %683 = vmatmul.msk.f32.vlgmr.msra.gmra.mxu2 %vm383_vm1, %v367_v5  ;;  %685 = vmatmul.msk.f32.vlgmr.msra.gmra.mxu3 %vm383_vm1, %v369_v6  ;;  %362 = vst.msk [vmem:[#allocation2 + $0x38] sm:$0xff] %vm354_vm0, %v753_v3  ;;  %v371_v13 = vld [vmem:[#allocation2] sm:$0xff] }
  0x15   : > { %423 = vmatpush.msra.mxu0 %v379_v4  ;;  %700 = vmatpush.msra.mxu1 %v379_v4  ;;  %v372_v25 = vld [vmem:[#allocation2 + $0x8] sm:$0xff] }
  0x16   : > { %679 = vmatmul.msk.f32.vlgmr.msra.gmra.mxu0 %vm383_vm1, %v363_v7  ;;  %681 = vmatmul.msk.f32.vlgmr.msra.gmra.mxu1 %vm383_vm1, %v365_v8  ;;  %v373_v14 = vld [vmem:[#allocation2 + $0x10] sm:$0xff] }
  0x17   : > { %v374_v26 = vld [vmem:[#allocation2 + $0x18] sm:$0xff] }
  0x18   : > { %v375_v19 = vld [vmem:[#allocation2 + $0x20] sm:$0xff] }
  0x19   : > { %v376_v34 = vld [vmem:[#allocation2 + $0x28] sm:$0xff] }
  0x1a   : > { %v377_v20 = vld [vmem:[#allocation2 + $0x30] sm:$0xff] }
  0x1b   : > { %v378_v38 = vld [vmem:[#allocation2 + $0x38] sm:$0xff] }
  0x1c   : > { %684 = vmatmul.msk.f32.gmra.mxu2 %vm383_vm1, %v368_v9  ;;  %686 = vmatmul.msk.f32.gmra.mxu3 %vm383_vm1, %v370_v10 }
  0x1e   : > { %680 = vmatmul.msk.f32.gmra.mxu0 %vm383_vm1, %v364_v11  ;;  %682 = vmatmul.msk.f32.gmra.mxu1 %vm383_vm1, %v366_v12 }
  0x93   : > { %v425_v15 = vpop.f32.mrf.mxu0  ;;  %v431_v16 = vpop.f32.mrf.mxu1 }
  0x94   : > { %v449_v17 = vadd.f32 %v425_v15, %v371_v13  ;;  %v451_v18 = vadd.f32 %v431_v16, %v373_v14 }
  0x96   : > { %458 = vst.msk [vmem:[#allocation2] sm:$0xff] %vm354_vm0, %v449_v17 }
  0x97   : > { %460 = vst.msk [vmem:[#allocation2 + $0x10] sm:$0xff] %vm354_vm0, %v451_v18  ;;  %v437_v21 = vpop.f32.mrf.mxu2  ;;  %v443_v22 = vpop.f32.mrf.mxu3 }
  0x98   : > { %v453_v23 = vadd.f32 %v437_v21, %v375_v19  ;;  %v455_v24 = vadd.f32 %v443_v22, %v377_v20 }
  0x9a   : > { %462 = vst.msk [vmem:[#allocation2 + $0x20] sm:$0xff] %vm354_vm0, %v453_v23 }
  0x9b   : > { %464 = vst.msk [vmem:[#allocation2 + $0x30] sm:$0xff] %vm354_vm0, %v455_v24  ;;  %v428_v28 = vpop.f32.mrf.mxu0  ;;  %v434_v29 = vpop.f32.mrf.mxu1 }
  0x9c   : > { %v450_v30 = vadd.f32 %v428_v28, %v372_v25  ;;  %v452_v31 = vadd.f32 %v434_v29, %v374_v26 }
  0x9d   : > { %v469_v32 = vld [vmem:[#allocation2] sm:$0xff] }
  0x9e   : > { %v481_v35 = vadd.f32 %v728_v27, %v469_v32  ;;  %v471_v36 = vld [vmem:[#allocation2 + $0x10] sm:$0xff]  ;;  %459 = vst.msk [vmem:[#allocation2 + $0x8] sm:$0xff] %vm354_vm0, %v450_v30 }
  0x9f   : > { %v483_v39 = vadd.f32 %v728_v27, %v471_v36  ;;  %461 = vst.msk [vmem:[#allocation2 + $0x18] sm:$0xff] %vm354_vm0, %v452_v31  ;;  %v440_v40 = vpop.f32.mrf.mxu2  ;;  %v446_v41 = vpop.f32.mrf.mxu3 }
  0xa0   : > { %v497_v42 = vadd.f32 %v489_v33, %v481_v35  ;;  %v454_v43 = vadd.f32 %v440_v40, %v376_v34  ;;  %v456_v47 = vadd.f32 %v446_v41, %v378_v38 }
  0xa1   : > { %v499_v44 = vadd.f32 %v491_v37, %v483_v39  ;;  %v473_v45 = vld [vmem:[#allocation2 + $0x20] sm:$0xff] }
  0xa2   : > { %505 = vst.msk [vmem:[%s852_s13] sm:$0xff] %vm354_vm0, %v497_v42  ;;  %v485_v48 = vadd.f32 %v728_v27, %v473_v45  ;;  %v475_v49 = vld [vmem:[#allocation2 + $0x30] sm:$0xff] }
  0xa3   : > { %507 = vst.msk [vmem:[%s852_s13 + $0x10] sm:$0xff] %vm354_vm0, %v499_v44  ;;  %v487_v51 = vadd.f32 %v728_v27, %v475_v49 }
  0xa4   : > { %v501_v52 = vadd.f32 %v493_v46, %v485_v48  ;;  %463 = vst.msk [vmem:[#allocation2 + $0x28] sm:$0xff] %vm354_vm0, %v454_v43 }
  0xa5   : > { %v503_v53 = vadd.f32 %v495_v50, %v487_v51  ;;  %v470_v54 = vld [vmem:[#allocation2 + $0x8] sm:$0xff]  ;;  %465 = vst.msk [vmem:[#allocation2 + $0x38] sm:$0xff] %vm354_vm0, %v456_v47 }
  0xa6   : > { %509 = vst.msk [vmem:[%s852_s13 + $0x20] sm:$0xff] %vm354_vm0, %v501_v52  ;;  %v482_v56 = vadd.f32 %v728_v27, %v470_v54  ;;  %v472_v57 = vld [vmem:[#allocation2 + $0x18] sm:$0xff] }
  0xa7   : > { %511 = vst.msk [vmem:[%s852_s13 + $0x30] sm:$0xff] %vm354_vm0, %v503_v53  ;;  %v484_v59 = vadd.f32 %v728_v27, %v472_v57 }
  0xa8   : > { %v498_v60 = vadd.f32 %v490_v55, %v482_v56 }
  0xa9   : > { %v500_v61 = vadd.f32 %v492_v58, %v484_v59 }
  0xaa   : > { %506 = vst.msk [vmem:[%s852_s13 + $0x8] sm:$0xff] %vm354_vm0, %v498_v60 }
  0xab   : > { %508 = vst.msk [vmem:[%s852_s13 + $0x18] sm:$0xff] %vm354_vm0, %v500_v61  ;;  %v474_v62 = vld [vmem:[#allocation2 + $0x28] sm:$0xff] }
  0xac   : > { %v486_v0 = vadd.f32 %v728_v27, %v474_v62  ;;  %v476_v1 = vld [vmem:[#allocation2 + $0x38] sm:$0xff] }
  0xad   : > { %v488_v3 = vadd.f32 %v728_v27, %v476_v1 }
  0xae   : > { %v502_v4 = vadd.f32 %v494_v63, %v486_v0 }
  0xaf   : > { %v504_v5 = vadd.f32 %v496_v2, %v488_v3 }
  0xb0   : > { %510 = vst.msk [vmem:[%s852_s13 + $0x28] sm:$0xff] %vm354_vm0, %v502_v4 }
  0xb1   : > { %512 = vst.msk [vmem:[%s852_s13 + $0x38] sm:$0xff] %vm354_vm0, %v504_v5 }
  0xb2 PF: > { %s14_s17 = sadd.s32 1, %s751_s17   ;;  %s905_s15 = smov %s747_s16 }
  0xb3   : > { %p11_p5 = scmp.ge.s32.totalorder %s14_s17, 4   ;;  %s906_s16 = smov %s908_s18 }
  0xb5   :  { %13 = sbr.rel (!%p11_p5) target bundleno = 2 (0x2), region = 83 }

// kernel: model_forward.28
= control target key start
LH: loop header
LB: loop body
LE: loop exit
PB: predicated region body
PF: predicated region fallthrough
CT: control target
= control target key end

     0   :  { %s517_s12 = smov 0   ;;  %s519_s13 = smov 0   ;;  %s580_s0 = inlined_call_operand.vmem [shape: f32[2,1,64], index: 0, kind: input, shape index: {}]   ;;  %s581_s1 = inlined_call_operand.vmem [shape: f32[64,64], index: 1, kind: input, shape index: {}]   ;;  %s582_s2 = inlined_call_operand.vmem [shape: f32[1,64], index: 2, kind: input, shape index: {}]   ;;  %s583_s3 = inlined_call_operand.vmem [shape: f32[2,1,64], index: 3, kind: output, shape index: {}]  }
   0x1   :  { %s521_s14 = smov 0  }
   0x2 LB: > { %s39_s15 = sadd.s32 1, %s490_s13  ;;  %p443_p0 = scmp.ge.s32.totalorder %s494_s14, 1  ;;  %s494_s14 = sphi %s521_s14, %s13_s14   ;;  %s490_s13 = sphi %s519_s13, %s585_s13   ;;  %s486_s12 = sphi %s517_s12, %s584_s12  }
   0x3   : > { %p41_p1 = scmp.ge.s32.totalorder %s39_s15, 2  ;;  %p199_p2 = scmp.lt.s32.totalorder %s494_s14, 3 }
   0x5   : > { %s587_s15 = smov (%p41_p1, %s39_s15), 0  ;;  %p200_p3 = pnand %p443_p0, %p199_p2 }
   0x6   : > { %p242_p4 = scmp.lt.s32.totalorder (!%p200_p3), %s486_s12, 1 }
   0x7   : > { %203 = sbr.rel (%p200_p3) target bundleno = 167 (0xa7), region = 32 }
   0xc   : > { %v287_v0 = vld [vmem:[%s581_s1 + $0x38] sm:$0xff]  ;;  %v286_v1 = vld [vmem:[%s581_s1 + $0x30] sm:$0xff]  ;;  %vm276_vm0 = vcmask 516096   ;;  %v285_v2 = vld [vmem:[%s581_s1 + $0x28] sm:$0xff]  ;;  %v496_v3 = vmov 0.0   ;;  %s589_s12 = smov (!%p242_p4, %s486_s12), 1 }
   0xd   : > { %300 = vmatpush.msra.mxu0 %v287_v0  ;;  %277 = vst.msk [vmem:[#allocation2] sm:$0x1] %vm276_vm0, %v496_v3  ;;  %v284_v4 = vld [vmem:[%s581_s1 + $0x20] sm:$0xff]  ;;  %v283_v5 = vld [vmem:[%s581_s1 + $0x18] sm:$0xff]  ;;  %v282_v6 = vld [vmem:[%s581_s1 + $0x10] sm:$0xff]  ;;  %s250_s5 = scalar_lea.vmem %s580_s0, %s589_s12  ;;  %vm288_vm1 = vcmask 523264   ;;  %s271_s16 = scalar_lea.vmem %s583_s3, %s589_s12 }
   0xe   : > { %v281_v7 = vld [vmem:[%s581_s1 + $0x8] sm:$0xff]  ;;  %v280_v8 = vld [vmem:[%s581_s1] sm:$0xff] }
   0xf   : > { %301 = vmatpush.msra.mxu0 %v286_v1  ;;  %v278_v9 = vld [vmem:[%s250_s5] sm:$0x1] }
  0x10   : > { %v319_v13 = vld [vmem:[%s582_s2] sm:$0x1] }
  0x11   : > { %302 = vmatpush.msra.mxu0 %v285_v2 }
  0x13   : > { %303 = vmatpush.msra.mxu0 %v284_v4 }
  0x14   : > { %v279_v10 = vld [vmem:[#allocation2] sm:$0x1] }
  0x15   : > { %304 = vmatpush.msra.mxu0 %v283_v5 }
  0x17   : > { %305 = vmatpush.msra.mxu0 %v282_v6 }
  0x19   : > { %306 = vmatpush.msra.mxu0 %v281_v7 }
  0x1b   : > { %307 = vmatpush.msra.mxu0 %v280_v8 }
  0x1c   : > { %444 = vmatmul.msk.f32.vlgmr.msra.gmra.mxu0 %vm288_vm1, %v278_v9 }
  0x99   : > { %v309_v11 = vpop.f32.mrf.mxu0 }
  0x9a   : > { %v312_v12 = vadd.f32 %v309_v11, %v279_v10 }
  0x9c   : > { %314 = vst.msk [vmem:[#allocation2] sm:$0x1] %vm276_vm0, %v312_v12 }
  0xa3   : > { %v318_v14 = vld [vmem:[#allocation2] sm:$0x1] }
  0xa4   : > { %v320_v15 = vadd.f32 %v319_v13, %v318_v14 }
  0xa6   : > { %321 = vst.msk [vmem:[%s271_s16] sm:$0x1] %vm276_vm0, %v320_v15 }
  0xa7 PF: > { %s13_s14 = sadd.s32 1, %s494_s14   ;;  %s584_s12 = smov %s490_s13 }
  0xa8   : > { %p10_p5 = scmp.ge.s32.totalorder %s13_s14, 4   ;;  %s585_s13 = smov %s587_s15 }
  0xaa   :  { %12 = sbr.rel (!%p10_p5) target bundleno = 2 (0x2), region = 76 }

// kernel: model_forward.27
= control target key start
LH: loop header
LB: loop body
LE: loop exit
PB: predicated region body
PF: predicated region fallthrough
CT: control target
= control target key end

     0   :  { %s604_s12 = smov 0   ;;  %s606_s13 = smov 0   ;;  %s747_s0 = inlined_call_operand.vmem [shape: f32[2,1,256], index: 0, kind: input, shape index: {}]   ;;  %s748_s1 = inlined_call_operand.vmem [shape: f32[256,64], index: 1, kind: input, shape index: {}]   ;;  %s749_s2 = inlined_call_operand.vmem [shape: f32[1,64], index: 2, kind: input, shape index: {}]   ;;  %s750_s3 = inlined_call_operand.vmem [shape: f32[2,1,64], index: 3, kind: output, shape index: {}]  }
   0x1   :  { %s608_s14 = smov 0  }
   0x2 LB: > { %s39_s15 = sadd.s32 1, %s577_s13  ;;  %p525_p0 = scmp.ge.s32.totalorder %s581_s14, 1  ;;  %s581_s14 = sphi %s608_s14, %s13_s14   ;;  %s577_s13 = sphi %s606_s13, %s752_s13   ;;  %s573_s12 = sphi %s604_s12, %s751_s12  }
   0x3   : > { %p41_p1 = scmp.ge.s32.totalorder %s39_s15, 2  ;;  %p203_p2 = scmp.lt.s32.totalorder %s581_s14, 3 }
   0x5   : > { %s754_s15 = smov (%p41_p1, %s39_s15), 0  ;;  %p204_p3 = pnand %p525_p0, %p203_p2 }
   0x6   : > { %p250_p4 = scmp.lt.s32.totalorder (!%p204_p3), %s573_s12, 1 }
   0x7   : > { %207 = sbr.rel (%p204_p3) target bundleno = 216 (0xd8), region = 32 }
   0xc   : > { %v306_v0 = vld [vmem:[%s748_s1 + $0x78] sm:$0xff]  ;;  %v305_v2 = vld [vmem:[%s748_s1 + $0x70] sm:$0xff]  ;;  %v304_v4 = vld [vmem:[%s748_s1 + $0x68] sm:$0xff]  ;;  %s756_s12 = smov (!%p250_p4, %s573_s12), 1  ;;  %vm287_vm0 = vcmask 516096   ;;  %v583_v35 = vmov 0.0  }
   0xd   : > { %v322_v1 = vld [vmem:[%s748_s1 + $0xf8] sm:$0xff]  ;;  %328 = vmatpush.msra.mxu0 %v306_v0  ;;  %v321_v3 = vld [vmem:[%s748_s1 + $0xf0] sm:$0xff]  ;;  %v320_v5 = vld [vmem:[%s748_s1 + $0xe8] sm:$0xff]  ;;  %s526_s10 = sshll.u32 %s756_s12, 1  ;;  %288 = vst.msk [vmem:[#allocation2] sm:$0x1] %vm287_vm0, %v583_v35  ;;  %s282_s19 = scalar_lea.vmem %s750_s3, %s756_s12 }
   0xe   : > { %348 = vmatpush.msra.mxu1 %v322_v1  ;;  %v303_v6 = vld [vmem:[%s748_s1 + $0x60] sm:$0xff]  ;;  %v302_v8 = vld [vmem:[%s748_s1 + $0x58] sm:$0xff]  ;;  %v301_v10 = vld [vmem:[%s748_s1 + $0x50] sm:$0xff]  ;;  %s260_s25 = scalar_lea.vmem %s747_s0, %s526_s10 }
   0xf   : > { %329 = vmatpush.msra.mxu0 %v305_v2  ;;  %v319_v7 = vld [vmem:[%s748_s1 + $0xe0] sm:$0xff]  ;;  %v318_v9 = vld [vmem:[%s748_s1 + $0xd8] sm:$0xff]  ;;  %v317_v11 = vld [vmem:[%s748_s1 + $0xd0] sm:$0xff] }
  0x10   : > { %349 = vmatpush.msra.mxu1 %v321_v3  ;;  %v300_v12 = vld [vmem:[%s748_s1 + $0x48] sm:$0xff]  ;;  %v299_v14 = vld [vmem:[%s748_s1 + $0x40] sm:$0xff]  ;;  %v298_v16 = vld [vmem:[%s748_s1 + $0x38] sm:$0xff] }
  0x11   : > { %330 = vmatpush.msra.mxu0 %v304_v4  ;;  %v316_v13 = vld [vmem:[%s748_s1 + $0xc8] sm:$0xff]  ;;  %v315_v15 = vld [vmem:[%s748_s1 + $0xc0] sm:$0xff]  ;;  %v314_v17 = vld [vmem:[%s748_s1 + $0xb8] sm:$0xff] }
  0x12   : > { %350 = vmatpush.msra.mxu1 %v320_v5  ;;  %v297_v18 = vld [vmem:[%s748_s1 + $0x30] sm:$0xff]  ;;  %v296_v20 = vld [vmem:[%s748_s1 + $0x28] sm:$0xff]  ;;  %v295_v22 = vld [vmem:[%s748_s1 + $0x20] sm:$0xff] }
  0x13   : > { %331 = vmatpush.msra.mxu0 %v303_v6  ;;  %v313_v19 = vld [vmem:[%s748_s1 + $0xb0] sm:$0xff]  ;;  %v312_v21 = vld [vmem:[%s748_s1 + $0xa8] sm:$0xff]  ;;  %v311_v23 = vld [vmem:[%s748_s1 + $0xa0] sm:$0xff] }
  0x14   : > { %351 = vmatpush.msra.mxu1 %v319_v7  ;;  %v294_v24 = vld [vmem:[%s748_s1 + $0x18] sm:$0xff]  ;;  %v293_v26 = vld [vmem:[%s748_s1 + $0x10] sm:$0xff]  ;;  %v289_v28 = vld [vmem:[%s260_s25] sm:$0x3] }
  0x15   : > { %332 = vmatpush.msra.mxu0 %v302_v8  ;;  %v310_v25 = vld [vmem:[%s748_s1 + $0x98] sm:$0xff]  ;;  %v309_v27 = vld [vmem:[%s748_s1 + $0x90] sm:$0xff]  ;;  %v292_v29 = vld [vmem:[%s748_s1 + $0x8] sm:$0xff]  ;;  %v324_v33 = vperm.slane %v289_v28, 0  ;;  %v325_v34 = vperm.slane %v289_v28, 1 }
  0x16   : > { %352 = vmatpush.msra.mxu1 %v318_v9  ;;  %v308_v30 = vld [vmem:[%s748_s1 + $0x88] sm:$0xff]  ;;  %v291_v31 = vld [vmem:[%s748_s1] sm:$0xff] }
  0x17   : > { %333 = vmatpush.msra.mxu0 %v301_v10  ;;  %v307_v32 = vld [vmem:[%s748_s1 + $0x80] sm:$0xff] }
  0x18   : > { %353 = vmatpush.msra.mxu1 %v317_v11  ;;  %v290_v37 = vld [vmem:[#allocation2] sm:$0x1] }
  0x19   : > { %334 = vmatpush.msra.mxu0 %v300_v12  ;;  %v375_v41 = vld [vmem:[%s749_s2] sm:$0x1] }
  0x1a   : > { %354 = vmatpush.msra.mxu1 %v316_v13 }
  0x1b   : > { %335 = vmatpush.msra.mxu0 %v299_v14 }
  0x1c   : > { %355 = vmatpush.msra.mxu1 %v315_v15 }
  0x1d   : > { %336 = vmatpush.msra.mxu0 %v298_v16 }
  0x1e   : > { %356 = vmatpush.msra.mxu1 %v314_v17 }
  0x1f   : > { %337 = vmatpush.msra.mxu0 %v297_v18 }
  0x20   : > { %357 = vmatpush.msra.mxu1 %v313_v19 }
  0x21   : > { %338 = vmatpush.msra.mxu0 %v296_v20 }
  0x22   : > { %358 = vmatpush.msra.mxu1 %v312_v21 }
  0x23   : > { %339 = vmatpush.msra.mxu0 %v295_v22 }
  0x24   : > { %359 = vmatpush.msra.mxu1 %v311_v23 }
  0x25   : > { %340 = vmatpush.msra.mxu0 %v294_v24 }
  0x26   : > { %360 = vmatpush.msra.mxu1 %v310_v25 }
  0x27   : > { %341 = vmatpush.msra.mxu0 %v293_v26 }
  0x28   : > { %361 = vmatpush.msra.mxu1 %v309_v27 }
  0x29   : > { %342 = vmatpush.msra.mxu0 %v292_v29 }
  0x2a   : > { %362 = vmatpush.msra.mxu1 %v308_v30 }
  0x2b   : > { %343 = vmatpush.msra.mxu0 %v291_v31 }
  0x2c   : > { %363 = vmatpush.msra.mxu1 %v307_v32  ;;  %344 = vmatmul.f32.vlgmr.msra.gmra.mxu0 %v324_v33 }
  0x2d   : > { %364 = vmatmul.f32.vlgmr.msra.gmra.mxu1 %v325_v34 }
  0xa9   : > { %v345_v36 = vpop.f32.mrf.mxu0 }
  0xaa   : > { %v365_v38 = vpop.f32.mrf.mxu1 }
  0xab   : > { %v366_v39 = vadd.f32 %v365_v38, %v345_v36 }
  0xad   : > { %v368_v40 = vadd.f32 %v366_v39, %v290_v37 }
  0xaf   : > { %370 = vst.msk [vmem:[#allocation2] sm:$0x1] %vm287_vm0, %v368_v40 }
  0xb6   : > { %v374_v42 = vld [vmem:[#allocation2] sm:$0x1] }
  0xb7   : > { %v376_v43 = vadd.f32 %v375_v41, %v374_v42 }
  0xb9   : > { %v527_v44 = vmul.f32 -1.442695, %v376_v43 }
  0xbb   : > { %555 = vpow2.f32 %v527_v44 }
  0xc1   : > { %v556_v45 = vpop.eup %555 }
  0xc2   : > { %v380_v46 = vadd.f32 1.0, %v556_v45 }
  0xc4   : > { %557 = vrcp.f32 %v380_v46  ;;  %v392_v50 = vand.u32 2147483648, %v380_v46  ;;  %v390_v52 = vand.u32 2147483647, %v380_v46  ;;  %vm386_vm2 = vweird.f32 %v380_v46 }
  0xc6   : > { %v393_v54 = vor.u32 1.1754944e-38, %v392_v50  ;;  %vm391_vm4 = vcmp.eq.f32.partialorder %v390_v52, 8.507059e+37 }
  0xca   : > { %v558_v47 = vpop.eup %557 }
  0xcb   : > { %v382_v48 = vmul.f32 %v558_v47, %v380_v46  ;;  %vm387_vm1 = vweird.f32 %v558_v47 }
  0xcc   : > { %vm388_vm3 = vmor %vm386_vm2, %vm387_vm1 }
  0xcd   : > { %v383_v49 = vsub.f32 1.0, %v382_v48 }
  0xcf   : > { %v384_v51 = vmul.f32 %v558_v47, %v383_v49 }
  0xd1   : > { %v385_v53 = vadd.f32 %v558_v47, %v384_v51 }
  0xd3   : > { %v389_v55 = vsel %vm388_vm3, %v558_v47, %v385_v53 }
  0xd4   : > { %v394_v56 = vsel %vm391_vm4, %v393_v54, %v389_v55 }
  0xd5   : > { %v396_v57 = vmul.f32 %v394_v56, %v376_v43 }
  0xd7   : > { %397 = vst.msk [vmem:[%s282_s19] sm:$0x1] %vm287_vm0, %v396_v57 }
  0xd8 PF: > { %s13_s14 = sadd.s32 1, %s581_s14   ;;  %s751_s12 = smov %s577_s13 }
  0xd9   : > { %p10_p5 = scmp.ge.s32.totalorder %s13_s14, 4   ;;  %s752_s13 = smov %s754_s15 }
  0xdb   :  { %12 = sbr.rel (!%p10_p5) target bundleno = 2 (0x2), region = 76 }

// kernel: model_forward.29
= control target key start
LH: loop header
LB: loop body
LE: loop exit
PB: predicated region body
PF: predicated region fallthrough
CT: control target
= control target key end

     0   :  { %s655_s12 = smov 0   ;;  %s657_s13 = smov 0   ;;  %s777_s0 = inlined_call_operand.vmem [shape: f32[2,1,64], index: 0, kind: input, shape index: {}]   ;;  %s778_s1 = inlined_call_operand.vmem [shape: f32[64,384], index: 1, kind: input, shape index: {}]   ;;  %s779_s2 = inlined_call_operand.vmem [shape: f32[1,384], index: 2, kind: input, shape index: {}]   ;;  %s780_s3 = inlined_call_operand.vmem [shape: f32[2,1,384], index: 3, kind: output, shape index: {}]  }
   0x1   :  { %s659_s14 = smov 0  }
   0x2 LB: > { %s39_s15 = sadd.s32 1, %s628_s13  ;;  %p573_p0 = scmp.ge.s32.totalorder %s632_s14, 1  ;;  %s632_s14 = sphi %s659_s14, %s13_s14   ;;  %s628_s13 = sphi %s657_s13, %s784_s13   ;;  %s624_s12 = sphi %s655_s12, %s783_s12  }
   0x3   : > { %p41_p1 = scmp.ge.s32.totalorder %s39_s15, 2  ;;  %p204_p2 = scmp.lt.s32.totalorder %s632_s14, 3 }
   0x5   : > { %s786_s15 = smov (%p41_p1, %s39_s15), 0  ;;  %p205_p3 = pnand %p573_p0, %p204_p2 }
   0x6   : > { %p253_p4 = scmp.lt.s32.totalorder (!%p205_p3), %s624_s12, 1 }
   0x7   : > { %208 = sbr.rel (%p205_p3) target bundleno = 195 (0xc3), region = 32 }
   0xc   : > { %v346_v0 = vld [vmem:[%s778_s1 + $0xb8] sm:$0xff]  ;;  %v343_v1 = vld [vmem:[%s778_s1 + $0xa0] sm:$0xff]  ;;  %v345_v2 = vld [vmem:[%s778_s1 + $0xb0] sm:$0xff]  ;;  %s788_s12 = smov (!%p253_p4, %s624_s12), 1  ;;  %vm347_vm4 = vcmask 523264   ;;  %v296_v39 = vlaneseq  ;;  %v634_v41 = vmov 0.0  }
   0xd   : > { %399 = vmatpush.msra.mxu2 %v346_v0  ;;  %v344_v3 = vld [vmem:[%s778_s1 + $0xa8] sm:$0xff]  ;;  %379 = vmatpush.msra.mxu1 %v345_v2  ;;  %v342_v5 = vld [vmem:[%s778_s1 + $0x98] sm:$0xff]  ;;  %v341_v6 = vld [vmem:[%s778_s1 + $0x90] sm:$0xff]  ;;  %s261_s11 = scalar_lea.vmem %s777_s0, %s788_s12  ;;  %vm416_vm6 = vcmask 1040384   ;;  %vm418_vm7 = vcmask 1041408   ;;  %s580_s21 = smul.u32 3, %s788_s12 }
   0xe   : > { %v340_v4 = vld [vmem:[%s778_s1 + $0x88] sm:$0xff]  ;;  %359 = vmatpush.msra.mxu0 %v344_v3  ;;  %v339_v7 = vld [vmem:[%s778_s1 + $0x80] sm:$0xff]  ;;  %v338_v8 = vld [vmem:[%s778_s1 + $0x78] sm:$0xff]  ;;  %vm751_vm5 = vcmp.lt.s32.totalorder %v296_v39, 384 }
   0xf   : > { %400 = vmatpush.msra.mxu2 %v343_v1  ;;  %v337_v9 = vld [vmem:[%s778_s1 + $0x70] sm:$0xff]  ;;  %380 = vmatpush.msra.mxu1 %v342_v5  ;;  %v336_v10 = vld [vmem:[%s778_s1 + $0x68] sm:$0xff]  ;;  %v335_v11 = vld [vmem:[%s778_s1 + $0x60] sm:$0xff]  ;;  %300 = vst.msk [vmem:[#allocation2] sm:$0x7] %vm751_vm5, %v634_v41  ;;  %s290_s26 = scalar_lea.vmem %s780_s3, %s580_s21 }
  0x10   : > { %360 = vmatpush.msra.mxu0 %v341_v6  ;;  %v334_v12 = vld [vmem:[%s778_s1 + $0x58] sm:$0xff]  ;;  %v301_v13 = vld [vmem:[%s261_s11] sm:$0x1]  ;;  %v333_v14 = vld [vmem:[%s778_s1 + $0x50] sm:$0xff] }
  0x11   : > { %401 = vmatpush.msra.mxu2 %v340_v4  ;;  %381 = vmatpush.msra.mxu1 %v339_v7  ;;  %v332_v15 = vld [vmem:[%s778_s1 + $0x48] sm:$0xff]  ;;  %v574_v16 = vmul.f32 -1.442695, %v301_v13  ;;  %v331_v17 = vld [vmem:[%s778_s1 + $0x40] sm:$0xff]  ;;  %v330_v18 = vld [vmem:[%s778_s1 + $0x38] sm:$0xff] }
  0x12   : > { %361 = vmatpush.msra.mxu0 %v338_v8  ;;  %v329_v19 = vld [vmem:[%s778_s1 + $0x30] sm:$0xff]  ;;  %v328_v20 = vld [vmem:[%s778_s1 + $0x28] sm:$0xff]  ;;  %v327_v21 = vld [vmem:[%s778_s1 + $0x20] sm:$0xff] }
  0x13   : > { %402 = vmatpush.msra.mxu2 %v337_v9  ;;  %382 = vmatpush.msra.mxu1 %v336_v10  ;;  %606 = vpow2.f32 %v574_v16  ;;  %v326_v22 = vld [vmem:[%s778_s1 + $0x18] sm:$0xff]  ;;  %v325_v23 = vld [vmem:[%s778_s1 + $0x10] sm:$0xff]  ;;  %v324_v24 = vld [vmem:[%s778_s1 + $0x8] sm:$0xff] }
  0x14   : > { %362 = vmatpush.msra.mxu0 %v335_v11  ;;  %v323_v25 = vld [vmem:[%s778_s1] sm:$0xff] }
  0x15   : > { %403 = vmatpush.msra.mxu2 %v334_v12  ;;  %383 = vmatpush.msra.mxu1 %v333_v14  ;;  %v431_v51 = vld [vmem:[%s779_s2] sm:$0x7] }
  0x16   : > { %363 = vmatpush.msra.mxu0 %v332_v15  ;;  %v322_v48 = vld [vmem:[#allocation2] sm:$0x7] }
  0x17   : > { %404 = vmatpush.msra.mxu2 %v331_v17  ;;  %384 = vmatpush.msra.mxu1 %v330_v18 }
  0x18   : > { %364 = vmatpush.msra.mxu0 %v329_v19 }
  0x19   : > { %405 = vmatpush.msra.mxu2 %v328_v20  ;;  %385 = vmatpush.msra.mxu1 %v327_v21  ;;  %v607_v26 = vpop.eup %606 }
  0x1a   : > { %365 = vmatpush.msra.mxu0 %v326_v22  ;;  %v305_v27 = vadd.f32 1.0, %v607_v26 }
  0x1b   : > { %406 = vmatpush.msra.mxu2 %v325_v23  ;;  %386 = vmatpush.msra.mxu1 %v324_v24 }
  0x1c   : > { %366 = vmatpush.msra.mxu0 %v323_v25  ;;  %608 = vrcp.f32 %v305_v27  ;;  %v317_v30 = vand.u32 2147483648, %v305_v27  ;;  %vm311_vm0 = vweird.f32 %v305_v27  ;;  %v315_v32 = vand.u32 2147483647, %v305_v27 }
  0x1e   : > { %v318_v34 = vor.u32 1.1754944e-38, %v317_v30  ;;  %vm316_vm3 = vcmp.eq.f32.partialorder %v315_v32, 8.507059e+37 }
  0x22   : > { %v609_v28 = vpop.eup %608 }
  0x23   : > { %v307_v29 = vmul.f32 %v609_v28, %v305_v27  ;;  %vm312_vm1 = vweird.f32 %v609_v28 }
  0x24   : > { %vm313_vm2 = vmor %vm311_vm0, %vm312_vm1 }
  0x25   : > { %v308_v31 = vsub.f32 1.0, %v307_v29 }
  0x27   : > { %v309_v33 = vmul.f32 %v609_v28, %v308_v31 }
  0x29   : > { %v310_v35 = vadd.f32 %v609_v28, %v309_v33 }
  0x2b   : > { %v314_v36 = vsel %vm313_vm2, %v609_v28, %v310_v35 }
  0x2c   : > { %v319_v37 = vsel %vm316_vm3, %v318_v34, %v314_v36 }
  0x2d   : > { %v321_v38 = vmul.f32 %v319_v37, %v301_v13 }
  0x2f   : > { %577 = vmatmul.msk.f32.vlgmr.msra.gmra.mxu2 %vm347_vm4, %v321_v38  ;;  %576 = vmatmul.msk.f32.vlgmr.msra.gmra.mxu1 %vm347_vm4, %v321_v38 }
  0x30   : > { %575 = vmatmul.msk.f32.vlgmr.msra.gmra.mxu0 %vm347_vm4, %v321_v38 }
  0xac   : > { %v388_v42 = vpop.f32.mrf.mxu1 }
  0xad   : > { %v414_v43 = vrot.slane %v388_v42, 7  ;;  %v368_v44 = vpop.f32.mrf.mxu0 }
  0xaf   : > { %v417_v46 = vsel %vm416_vm6, %v368_v44, %v414_v43 }
  0xb2   : > { %v408_v45 = vpop.f32.mrf.mxu2 }
  0xb3   : > { %v415_v47 = vrot.slane %v408_v45, 6 }
  0xb5   : > { %v419_v49 = vsel %vm418_vm7, %v417_v46, %v415_v47 }
  0xb6   : > { %v421_v50 = vadd.f32 %v419_v49, %v322_v48 }
  0xb8   : > { %426 = vst.msk [vmem:[#allocation2] sm:$0x7] %vm751_vm5, %v421_v50 }
  0xbf   : > { %v430_v52 = vld [vmem:[#allocation2] sm:$0x7] }
  0xc0   : > { %v432_v53 = vadd.f32 %v431_v51, %v430_v52 }
  0xc2   : > { %433 = vst.msk [vmem:[%s290_s26] sm:$0x7] %vm751_vm5, %v432_v53 }
  0xc3 PF: > { %s13_s14 = sadd.s32 1, %s632_s14   ;;  %s783_s12 = smov %s628_s13 }
  0xc4   : > { %p10_p5 = scmp.ge.s32.totalorder %s13_s14, 4   ;;  %s784_s13 = smov %s786_s15 }
  0xc6   :  { %12 = sbr.rel (!%p10_p5) target bundleno = 2 (0x2), region = 76 }

// kernel: model_forward.30
= control target key start
LH: loop header
LB: loop body
LE: loop exit
PB: predicated region body
PF: predicated region fallthrough
CT: control target
= control target key end

     0   :  { %s1033_s18 = smov 0   ;;  %s1035_s19 = smov 0   ;;  %s1319_s0 = inlined_call_operand.vmem [shape: f32[2,64,64], index: 0, kind: input, shape index: {}]   ;;  %s1320_s1 = inlined_call_operand.vmem [shape: f32[2,1,64], index: 1, kind: input, shape index: {}]   ;;  %s1321_s2 = inlined_call_operand.vmem [shape: f32[2,1,64], index: 2, kind: input, shape index: {}]   ;;  %s1322_s3 = inlined_call_operand.vmem [shape: f32[64,64], index: 3, kind: input, shape index: {}]   ;;  %s1323_s4 = inlined_call_operand.vmem [shape: f32[1,64], index: 4, kind: input, shape index: {}]   ;;  %s1324_s5 = inlined_call_operand.vmem [shape: f32[2,64,64], index: 5, kind: output, shape index: {}]  }
   0x1   :  { %s1037_s20 = smov 0  }
   0x2 LB: > { %s41_s21 = sadd.s32 1, %s995_s19  ;;  %p890_p0 = scmp.ge.s32.totalorder %s999_s20, 1  ;;  %s999_s20 = sphi %s1037_s20, %s15_s20   ;;  %s995_s19 = sphi %s1035_s19, %s1328_s19   ;;  %s991_s18 = sphi %s1033_s18, %s1327_s18  }
   0x3   : > { %p43_p1 = scmp.ge.s32.totalorder %s41_s21, 2  ;;  %p269_p2 = scmp.lt.s32.totalorder %s999_s20, 3 }
   0x5   : > { %s1330_s21 = smov (%p43_p1, %s41_s21), 0  ;;  %p270_p3 = pnand %p890_p0, %p269_p2 }
   0x6   : > { %p329_p4 = scmp.lt.s32.totalorder (!%p270_p3), %s991_s18, 1 }
   0x7   : > { %273 = sbr.rel (%p270_p3) target bundleno = 448 (0x1c0), region = 40 }
   0xc   : > { %s1332_s18 = smov (!%p329_p4, %s991_s18), 1  ;;  %vm376_vm0 = vcmask 523264   ;;  %v1001_v16 = vmov 64.0   ;;  %v617_v63 = vld [vmem:[%s1322_s3 + $0x38] sm:$0xff] }
   0xd   : > { %s905_s22 = sshll.u32 %s1332_s18, 6  ;;  %s346_s28 = scalar_lea.vmem %s1321_s2, %s1332_s18  ;;  %959 = vrcp.f32 %v1001_v16  ;;  %650 = vmatpush.msra.mxu0 %v617_v63  ;;  %908 = vmatpush.msra.mxu2 %v617_v63 }
   0xe   : > { %s339_s25 = scalar_lea.vmem %s1319_s0, %s905_s22  ;;  %907 = vmatpush.msra.mxu1 %v617_v63  ;;  %909 = vmatpush.msra.mxu3 %v617_v63  ;;  %s343_s27 = scalar_lea.vmem %s1320_s1, %s1332_s18 }
   0xf   : > { %v390_v0 = vld [vmem:[%s339_s25 + $0x28] sm:$0xff]  ;;  %v389_v2 = vld [vmem:[%s339_s25 + $0x20] sm:$0xff]  ;;  %v392_v6 = vld [vmem:[%s339_s25 + $0x38] sm:$0xff]  ;;  %s1285_s9 = scalar_lea.vmem %s1324_s5, %s905_s22 }
  0x10   : > { %v409_v1 = vsel %vm376_vm0, %v390_v0, 0.0  ;;  %v385_v3 = vld [vmem:[%s339_s25] sm:$0xff]  ;;  %v406_v4 = vsel %vm376_vm0, %v389_v2, 0.0  ;;  %v391_v7 = vld [vmem:[%s339_s25 + $0x30] sm:$0xff]  ;;  %v415_v9 = vsel %vm376_vm0, %v392_v6, 0.0  ;;  %v386_v12 = vld [vmem:[%s339_s25 + $0x8] sm:$0xff] }
  0x11   : > { %410 = vadd.xlane.f32.xlu2 %v409_v1  ;;  %v394_v5 = vsel %vm376_vm0, %v385_v3, 0.0  ;;  %407 = vadd.xlane.f32.xlu0 %v406_v4  ;;  %v387_v8 = vld [vmem:[%s339_s25 + $0x10] sm:$0xff]  ;;  %v412_v10 = vsel %vm376_vm0, %v391_v7, 0.0  ;;  %v388_v13 = vld [vmem:[%s339_s25 + $0x18] sm:$0xff]  ;;  %v397_v14 = vsel %vm376_vm0, %v386_v12, 0.0  ;;  %v615_v1 = vld [vmem:[%s1322_s3 + $0x28] sm:$0xff] }
  0x12   : > { %395 = vadd.xlane.f32.xlu1 %v394_v5  ;;  %v400_v11 = vsel %vm376_vm0, %v387_v8, 0.0  ;;  %v403_v15 = vsel %vm376_vm0, %v388_v13, 0.0  ;;  %v612_v4 = vld [vmem:[%s1322_s3 + $0x10] sm:$0xff]  ;;  %v611_v5 = vld [vmem:[%s1322_s3 + $0x8] sm:$0xff] }
  0x13   : > { %v960_v17 = vpop.eup %959 }
  0x14   : > { %v419_v18 = vmul.f32 64.0, %v960_v17  ;;  %vm423_vm1 = vweird.f32 %v960_v17 }
  0x16   : > { %v420_v19 = vsub.f32 1.0, %v419_v18 }
  0x18   : > { %v421_v20 = vmul.f32 %v960_v17, %v420_v19 }
  0x19   : > { %416 = vadd.xlane.f32.xlu2 %v415_v9  ;;  %413 = vadd.xlane.f32.xlu0 %v412_v10 }
  0x1a   : > { %401 = vadd.xlane.f32.xlu1 %v400_v11  ;;  %v422_v21 = vadd.f32 %v960_v17, %v421_v20 }
  0x1c   : > { %v1071_v22 = vsel %vm423_vm1, %v960_v17, %v422_v21 }
  0x21   : > { %398 = vadd.xlane.f32.xlu0 %v397_v14 }
  0x22   : > { %404 = vadd.xlane.f32.xlu1 %v403_v15 }
  0x84   : > { %v411_v23 = vpop.xlane.xlu2 %410  ;;  %v408_v24 = vpop.xlane.xlu0 %407 }
  0x85   : > { %v396_v25 = vpop.xlane.xlu1 %395  ;;  %v429_v26 = vmul.f32 %v1071_v22, %v408_v24  ;;  %v430_v41 = vmul.f32 %v1071_v22, %v411_v23 }
  0x86   : > { %v425_v27 = vmul.f32 %v1071_v22, %v396_v25 }
  0x87   : > { %v1075_v28 = vsub.f32 %v389_v2, %v429_v26  ;;  %v1102_v48 = vsub.f32 %v390_v0, %v430_v41  ;;  %v616_v0 = vld [vmem:[%s1322_s3 + $0x30] sm:$0xff]  ;;  %v614_v2 = vld [vmem:[%s1322_s3 + $0x20] sm:$0xff] }
  0x88   : > { %v1077_v29 = vsub.f32 %v385_v3, %v425_v27  ;;  %651 = vmatpush.msra.mxu0 %v616_v0  ;;  %911 = vmatpush.msra.mxu2 %v616_v0  ;;  %v613_v3 = vld [vmem:[%s1322_s3 + $0x18] sm:$0xff]  ;;  %v577_v27 = vld [vmem:[%s343_s27] sm:$0x1] }
  0x89   : > { %v445_v30 = vmul.f32 %v1075_v28, %v1075_v28  ;;  %v446_v56 = vmul.f32 %v1102_v48, %v1102_v48  ;;  %910 = vmatpush.msra.mxu1 %v616_v0  ;;  %912 = vmatpush.msra.mxu3 %v616_v0 }
  0x8a   : > { %v441_v31 = vmul.f32 %v1077_v29, %v1077_v29  ;;  %652 = vmatpush.msra.mxu0 %v615_v1  ;;  %914 = vmatpush.msra.mxu2 %v615_v1 }
  0x8b   : > { %v461_v33 = vsel %vm376_vm0, %v445_v30, 0.0  ;;  %v464_v59 = vsel %vm376_vm0, %v446_v56, 0.0  ;;  %913 = vmatpush.msra.mxu1 %v615_v1  ;;  %915 = vmatpush.msra.mxu3 %v615_v1 }
  0x8c   : > { %v417_v32 = vpop.xlane.xlu2 %416  ;;  %v449_v34 = vsel %vm376_vm0, %v441_v31, 0.0  ;;  %462 = vadd.xlane.f32.xlu2 %v461_v33  ;;  %v414_v36 = vpop.xlane.xlu0 %413  ;;  %653 = vmatpush.msra.mxu0 %v614_v2 }
  0x8d   : > { %v432_v35 = vmul.f32 %v1071_v22, %v417_v32  ;;  %450 = vadd.xlane.f32.xlu1 %v449_v34  ;;  %v402_v37 = vpop.xlane.xlu1 %401  ;;  %v431_v38 = vmul.f32 %v1071_v22, %v414_v36  ;;  %917 = vmatpush.msra.mxu2 %v614_v2  ;;  %v578_v34 = vadd.f32 1.0, %v577_v27 }
  0x8e   : > { %v427_v39 = vmul.f32 %v1071_v22, %v402_v37  ;;  %916 = vmatpush.msra.mxu1 %v614_v2  ;;  %918 = vmatpush.msra.mxu3 %v614_v2 }
  0x8f   : > { %v1088_v40 = vsub.f32 %v392_v6, %v432_v35  ;;  %v1091_v42 = vsub.f32 %v391_v7, %v431_v38  ;;  %654 = vmatpush.msra.mxu0 %v613_v3  ;;  %920 = vmatpush.msra.mxu2 %v613_v3  ;;  %v610_v6 = vld [vmem:[%s1322_s3] sm:$0xff] }
  0x90   : > { %v1093_v43 = vsub.f32 %v387_v8, %v427_v39  ;;  %919 = vmatpush.msra.mxu1 %v613_v3  ;;  %921 = vmatpush.msra.mxu3 %v613_v3  ;;  %v1204_v3 = vld [vmem:[%s346_s28] ss:$0 sm:$0xff] }
  0x91   : > { %v448_v44 = vmul.f32 %v1088_v40, %v1088_v40  ;;  %v447_v45 = vmul.f32 %v1091_v42, %v1091_v42  ;;  %655 = vmatpush.msra.mxu0 %v612_v4  ;;  %923 = vmatpush.msra.mxu2 %v612_v4 }
  0x92   : > { %v443_v46 = vmul.f32 %v1093_v43, %v1093_v43  ;;  %922 = vmatpush.msra.mxu1 %v612_v4  ;;  %924 = vmatpush.msra.mxu3 %v612_v4 }
  0x93   : > { %v470_v47 = vsel %vm376_vm0, %v448_v44, 0.0  ;;  %v467_v49 = vsel %vm376_vm0, %v447_v45, 0.0  ;;  %656 = vmatpush.msra.mxu0 %v611_v5  ;;  %926 = vmatpush.msra.mxu2 %v611_v5 }
  0x94   : > { %v455_v50 = vsel %vm376_vm0, %v443_v46, 0.0  ;;  %468 = vadd.xlane.f32.xlu0 %v467_v49  ;;  %v399_v51 = vpop.xlane.xlu0 %398  ;;  %925 = vmatpush.msra.mxu1 %v611_v5 }
  0x95   : > { %471 = vadd.xlane.f32.xlu1 %v470_v47  ;;  %v405_v52 = vpop.xlane.xlu1 %404  ;;  %v426_v53 = vmul.f32 %v1071_v22, %v399_v51  ;;  %456 = vadd.xlane.f32.xlu2 %v455_v50 }
  0x96   : > { %v428_v54 = vmul.f32 %v1071_v22, %v405_v52  ;;  %927 = vmatpush.msra.mxu3 %v611_v5  ;;  %657 = vmatpush.msra.mxu0 %v610_v6  ;;  %v1177_v52 = vperm.slane %v578_v34, 0 }
  0x97   : > { %v1108_v55 = vsub.f32 %v386_v12, %v426_v53  ;;  %929 = vmatpush.msra.mxu2 %v610_v6  ;;  %928 = vmatpush.msra.mxu1 %v610_v6 }
  0x98   : > { %v1114_v58 = vsub.f32 %v388_v13, %v428_v54  ;;  %930 = vmatpush.msra.mxu3 %v610_v6 }
  0x99   : > { %v442_v57 = vmul.f32 %v1108_v55, %v1108_v55 }
  0x9a   : > { %v444_v61 = vmul.f32 %v1114_v58, %v1114_v58 }
  0x9b   : > { %v452_v60 = vsel %vm376_vm0, %v442_v57, 0.0 }
  0x9c   : > { %465 = vadd.xlane.f32.xlu0 %v464_v59  ;;  %v458_v62 = vsel %vm376_vm0, %v444_v61, 0.0 }
  0x9d   : > { %453 = vadd.xlane.f32.xlu2 %v452_v60 }
  0xa4   : > { %459 = vadd.xlane.f32.xlu0 %v458_v62 }
  0xff   : > { %v463_v7 = vpop.xlane.xlu2 %462 }
 0x100   : > { %v451_v8 = vpop.xlane.xlu1 %450  ;;  %v477_v9 = vmul.f32 %v463_v7, %v1071_v22 }
 0x101   : > { %v473_v10 = vmul.f32 %v451_v8, %v1071_v22 }
 0x102   : > { %v485_v11 = vadd.f32 1e-06, %v477_v9 }
 0x103   : > { %v481_v12 = vadd.f32 1e-06, %v473_v10  ;;  %v1002_v10 = vmov 0.0  }
 0x104   : > { %961 = vrsqrt.f32 %v485_v11  ;;  %vm535_vm5 = vweird.f32 %v485_v11  ;;  %377 = vst.msk [vmem:[#allocation2] sm:$0xff] %vm376_vm0, %v1002_v10 }
 0x105   : > { %963 = vrsqrt.f32 %v481_v12  ;;  %vm495_vm3 = vweird.f32 %v481_v12  ;;  %378 = vst.msk [vmem:[#allocation2 + $0x8] sm:$0xff] %vm376_vm0, %v1002_v10 }
 0x106   : > { %379 = vst.msk [vmem:[#allocation2 + $0x10] sm:$0xff] %vm376_vm0, %v1002_v10 }
 0x107   : > { %v469_v13 = vpop.xlane.xlu0 %468  ;;  %380 = vst.msk [vmem:[#allocation2 + $0x18] sm:$0xff] %vm376_vm0, %v1002_v10 }
 0x108   : > { %v472_v14 = vpop.xlane.xlu1 %471  ;;  %v479_v15 = vmul.f32 %v469_v13, %v1071_v22  ;;  %v457_v16 = vpop.xlane.xlu2 %456  ;;  %381 = vst.msk [vmem:[#allocation2 + $0x20] sm:$0xff] %vm376_vm0, %v1002_v10 }
 0x109   : > { %v480_v17 = vmul.f32 %v472_v14, %v1071_v22  ;;  %v475_v18 = vmul.f32 %v457_v16, %v1071_v22  ;;  %382 = vst.msk [vmem:[#allocation2 + $0x28] sm:$0xff] %vm376_vm0, %v1002_v10 }
 0x10a   : > { %v962_v19 = vpop.eup %961  ;;  %v1154_v20 = vadd.f32 1e-06, %v479_v15  ;;  %383 = vst.msk [vmem:[#allocation2 + $0x30] sm:$0xff] %vm376_vm0, %v1002_v10 }
 0x10b   : > { %v1156_v21 = vadd.f32 1e-06, %v480_v17  ;;  %v964_v23 = vpop.eup %963  ;;  %v530_v24 = vmul.f32 %v962_v19, %v485_v11  ;;  %v1158_v25 = vadd.f32 1e-06, %v475_v18  ;;  %vm536_vm2 = vweird.f32 %v962_v19  ;;  %384 = vst.msk [vmem:[#allocation2 + $0x38] sm:$0xff] %vm376_vm0, %v1002_v10 }
 0x10c   : > { %v490_v26 = vmul.f32 %v964_v23, %v481_v12  ;;  %965 = vrsqrt.f32 %v1154_v20  ;;  %vm496_vm4 = vweird.f32 %v964_v23  ;;  %vm1179_vm6 = vmor %vm535_vm5, %vm536_vm2  ;;  %vm555_vm8 = vweird.f32 %v1154_v20 }
 0x10d   : > { %v531_v30 = vmul.f32 %v962_v19, %v530_v24  ;;  %967 = vrsqrt.f32 %v1158_v25  ;;  %vm497_vm7 = vmor %vm495_vm3, %vm496_vm4  ;;  %vm515_vm9 = vweird.f32 %v1158_v25  ;;  %vm565_vm10 = vweird.f32 %v1156_v21 }
 0x10e   : > { %v491_v31 = vmul.f32 %v964_v23, %v490_v26  ;;  %969 = vrsqrt.f32 %v1156_v21 }
 0x10f   : > { %v532_v32 = vmul.f32 0.5, %v531_v30  ;;  %v466_v33 = vpop.xlane.xlu0 %465 }
 0x110   : > { %v492_v35 = vmul.f32 0.5, %v491_v31  ;;  %v478_v36 = vmul.f32 %v466_v33, %v1071_v22  ;;  %v454_v37 = vpop.xlane.xlu2 %453 }
 0x111   : > { %v533_v38 = vsub.f32 1.5, %v532_v32  ;;  %v474_v39 = vmul.f32 %v454_v37, %v1071_v22 }
 0x112   : > { %v1165_v41 = vpop.eup %965  ;;  %v493_v44 = vsub.f32 1.5, %v492_v35  ;;  %v1167_v45 = vadd.f32 1e-06, %v478_v36 }
 0x113   : > { %v1169_v46 = vpop.eup %967  ;;  %v534_v47 = vmul.f32 %v962_v19, %v533_v38  ;;  %v550_v49 = vmul.f32 %v1165_v41, %v1154_v20  ;;  %v1173_v50 = vadd.f32 1e-06, %v474_v39  ;;  %vm556_vm11 = vweird.f32 %v1165_v41 }
 0x114   : > { %v1175_v51 = vpop.eup %969  ;;  %v494_v54 = vmul.f32 %v964_v23, %v493_v44  ;;  %v510_v56 = vmul.f32 %v1169_v46, %v1158_v25  ;;  %971 = vrsqrt.f32 %v1167_v45  ;;  %vm516_vm12 = vweird.f32 %v1169_v46  ;;  %vm557_vm14 = vmor %vm555_vm8, %vm556_vm11 }
 0x115   : > { %v538_v57 = vsel %vm1179_vm6, %v962_v19, %v534_v47  ;;  %v551_v59 = vmul.f32 %v1165_v41, %v550_v49  ;;  %v560_v60 = vmul.f32 %v1175_v51, %v1156_v21  ;;  %973 = vrsqrt.f32 %v1173_v50  ;;  %vm517_vm15 = vmor %vm515_vm9, %vm516_vm12 }
 0x116   : > { %v498_v61 = vsel %vm497_vm7, %v964_v23, %v494_v54  ;;  %v511_v62 = vmul.f32 %v1169_v46, %v510_v56  ;;  %v573_v6 = vmul.f32 %v538_v57, %v1075_v28  ;;  %vm566_vm13 = vweird.f32 %v1175_v51 }
 0x117   : > { %v552_v63 = vmul.f32 0.5, %v551_v59  ;;  %v561_v0 = vmul.f32 %v1175_v51, %v560_v60  ;;  %v460_v1 = vpop.xlane.xlu0 %459  ;;  %v569_v2 = vmul.f32 %v498_v61, %v1077_v29  ;;  %vm567_vm1 = vmor %vm565_vm10, %vm566_vm13  ;;  %vm545_vm3 = vweird.f32 %v1167_v45 }
 0x118   : > { %v512_v4 = vmul.f32 0.5, %v511_v62  ;;  %v476_v5 = vmul.f32 %v460_v1, %v1071_v22  ;;  %v586_v13 = vmul.f32 %v1177_v52, %v573_v6  ;;  %vm505_vm4 = vweird.f32 %v1173_v50  ;;  %v958_v6 = vld [vmem:[%s1323_s4] ss:$0 sm:$0xff] }
 0x119   : > { %v553_v7 = vsub.f32 1.5, %v552_v63  ;;  %v562_v8 = vmul.f32 0.5, %v561_v0  ;;  %v582_v9 = vmul.f32 %v1177_v52, %v569_v2  ;;  %v602_v0 = vld [vmem:[#allocation2] sm:$0xff] }
 0x11a   : > { %v972_v29 = vpop.eup %971  ;;  %v513_v11 = vsub.f32 1.5, %v512_v4  ;;  %v1212_v12 = vadd.f32 1e-06, %v476_v5  ;;  %v598_v26 = vadd.f32 %v1204_v3, %v586_v13  ;;  %v606_v4 = vld [vmem:[#allocation2 + $0x20] sm:$0xff]  ;;  %v604_v5 = vld [vmem:[#allocation2 + $0x10] sm:$0xff] }
 0x11b   : > { %v554_v22 = vmul.f32 %v1165_v41, %v553_v7  ;;  %v563_v28 = vsub.f32 1.5, %v562_v8  ;;  %v540_v14 = vmul.f32 %v972_v29, %v1167_v45  ;;  %v974_v15 = vpop.eup %973  ;;  %v594_v17 = vadd.f32 %v1204_v3, %v582_v9 }
 0x11c   : > { %v514_v16 = vmul.f32 %v1169_v46, %v513_v11  ;;  %975 = vrsqrt.f32 %v1212_v12  ;;  %v500_v20 = vmul.f32 %v974_v15, %v1173_v50  ;;  %899 = vmatmul.msk.f32.vlgmr.msra.gmra.mxu2 %vm376_vm0, %v598_v26  ;;  %vm546_vm2 = vweird.f32 %v972_v29 }
 0x11d   : > { %v558_v18 = vsel %vm557_vm14, %v1165_v41, %v554_v22  ;;  %v564_v19 = vmul.f32 %v1175_v51, %v563_v28  ;;  %v541_v23 = vmul.f32 %v972_v29, %v540_v14  ;;  %895 = vmatmul.msk.f32.vlgmr.msra.gmra.mxu0 %vm376_vm0, %v594_v17  ;;  %vm506_vm5 = vweird.f32 %v974_v15  ;;  %vm547_vm6 = vmor %vm545_vm3, %vm546_vm2  ;;  %v607_v14 = vld [vmem:[#allocation2 + $0x28] sm:$0xff] }
 0x11e   : > { %v518_v24 = vsel %vm517_vm15, %v1169_v46, %v514_v16  ;;  %v575_v25 = vmul.f32 %v558_v18, %v1091_v42  ;;  %v501_v31 = vmul.f32 %v974_v15, %v500_v20  ;;  %vm507_vm7 = vmor %vm505_vm4, %vm506_vm5  ;;  %vm525_vm9 = vweird.f32 %v1212_v12  ;;  %v605_v20 = vld [vmem:[#allocation2 + $0x18] sm:$0xff] }
 0x11f   : > { %v568_v27 = vsel %vm567_vm1, %v1175_v51, %v564_v19  ;;  %v542_v30 = vmul.f32 0.5, %v541_v23  ;;  %v571_v32 = vmul.f32 %v518_v24, %v1093_v43 }
 0x120   : > { %v588_v21 = vmul.f32 %v1177_v52, %v575_v25  ;;  %v576_v33 = vmul.f32 %v568_v27, %v1088_v40  ;;  %v502_v42 = vmul.f32 0.5, %v501_v31 }
 0x121   : > { %v543_v34 = vsub.f32 1.5, %v542_v30  ;;  %v584_v35 = vmul.f32 %v1177_v52, %v571_v32 }
 0x122   : > { %v976_v36 = vpop.eup %975  ;;  %v600_v43 = vadd.f32 %v1204_v3, %v588_v21  ;;  %v589_v37 = vmul.f32 %v1177_v52, %v576_v33  ;;  %v503_v39 = vsub.f32 1.5, %v502_v42 }
 0x123   : > { %v544_v38 = vmul.f32 %v972_v29, %v543_v34  ;;  %v520_v40 = vmul.f32 %v976_v36, %v1212_v12  ;;  %v596_v41 = vadd.f32 %v1204_v3, %v584_v35  ;;  %vm526_vm8 = vweird.f32 %v976_v36  ;;  %v603_v12 = vld [vmem:[#allocation2 + $0x8] sm:$0xff] }
 0x124   : > { %901 = vmatmul.msk.f32.vlgmr.msra.gmra.mxu3 %vm376_vm0, %v600_v43  ;;  %v601_v44 = vadd.f32 %v1204_v3, %v589_v37  ;;  %v504_v45 = vmul.f32 %v974_v15, %v503_v39  ;;  %vm527_vm10 = vmor %vm525_vm9, %vm526_vm8 }
 0x125   : > { %v548_v46 = vsel %vm547_vm6, %v972_v29, %v544_v38  ;;  %v521_v47 = vmul.f32 %v976_v36, %v520_v40  ;;  %897 = vmatmul.msk.f32.vlgmr.msra.gmra.mxu1 %vm376_vm0, %v596_v41 }
 0x126   : > { %v574_v49 = vmul.f32 %v548_v46, %v1102_v48  ;;  %v508_v50 = vsel %vm507_vm7, %v974_v15, %v504_v45  ;;  %v609_v15 = vld [vmem:[#allocation2 + $0x38] sm:$0xff] }
 0x127   : > { %v522_v51 = vmul.f32 0.5, %v521_v47  ;;  %v570_v53 = vmul.f32 %v508_v50, %v1108_v55 }
 0x128   : > { %v587_v54 = vmul.f32 %v1177_v52, %v574_v49 }
 0x129   : > { %v523_v56 = vsub.f32 1.5, %v522_v51  ;;  %v583_v57 = vmul.f32 %v1177_v52, %v570_v53 }
 0x12a   : > { %v599_v59 = vadd.f32 %v1204_v3, %v587_v54 }
 0x12b   : > { %v524_v60 = vmul.f32 %v976_v36, %v523_v56  ;;  %v595_v61 = vadd.f32 %v1204_v3, %v583_v57 }
 0x12c   : > { %900 = vmatmul.msk.f32.gmra.mxu2 %vm376_vm0, %v599_v59  ;;  %902 = vmatmul.msk.f32.gmra.mxu3 %vm376_vm0, %v601_v44 }
 0x12d   : > { %v528_v48 = vsel %vm527_vm10, %v976_v36, %v524_v60  ;;  %896 = vmatmul.msk.f32.gmra.mxu0 %vm376_vm0, %v595_v61 }
 0x12e   : > { %v572_v55 = vmul.f32 %v528_v48, %v1114_v58 }
 0x130   : > { %v585_v62 = vmul.f32 %v1177_v52, %v572_v55 }
 0x132   : > { %v597_v63 = vadd.f32 %v1204_v3, %v585_v62  ;;  %v608_v3 = vld [vmem:[#allocation2 + $0x30] sm:$0xff] }
 0x134   : > { %898 = vmatmul.msk.f32.gmra.mxu1 %vm376_vm0, %v597_v63 }
 0x19a   : > { %v659_v1 = vpop.f32.mrf.mxu0 }
 0x19b   : > { %v683_v2 = vadd.f32 %v659_v1, %v602_v0 }
 0x19d   : > { %691 = vst.msk [vmem:[#allocation2] sm:$0xff] %vm376_vm0, %v683_v2 }
 0x19f   : > { %v671_v7 = vpop.f32.mrf.mxu2 }
 0x1a0   : > { %v687_v58 = vadd.f32 %v671_v7, %v606_v4 }
 0x1a2   : > { %v665_v8 = vpop.f32.mrf.mxu1  ;;  %695 = vst.msk [vmem:[#allocation2 + $0x20] sm:$0xff] %vm376_vm0, %v687_v58 }
 0x1a3   : > { %v685_v9 = vadd.f32 %v665_v8, %v604_v5 }
 0x1a4   : > { %v702_v52 = vld [vmem:[#allocation2] sm:$0xff] }
 0x1a5   : > { %v714_v10 = vadd.f32 %v958_v6, %v702_v52  ;;  %693 = vst.msk [vmem:[#allocation2 + $0x10] sm:$0xff] %vm376_vm0, %v685_v9 }
 0x1a7   : > { %v677_v29 = vpop.f32.mrf.mxu3  ;;  %722 = vst.msk [vmem:[%s1285_s9] sm:$0xff] %vm376_vm0, %v714_v10 }
 0x1a8   : > { %v689_v11 = vadd.f32 %v677_v29, %v608_v3 }
 0x1a9   : > { %v706_v28 = vld [vmem:[#allocation2 + $0x20] sm:$0xff] }
 0x1aa   : > { %697 = vst.msk [vmem:[#allocation2 + $0x30] sm:$0xff] %vm376_vm0, %v689_v11  ;;  %v662_v13 = vpop.f32.mrf.mxu0  ;;  %v718_v16 = vadd.f32 %v958_v6, %v706_v28 }
 0x1ab   : > { %v684_v22 = vadd.f32 %v662_v13, %v603_v12 }
 0x1ac   : > { %v704_v17 = vld [vmem:[#allocation2 + $0x10] sm:$0xff]  ;;  %726 = vst.msk [vmem:[%s1285_s9 + $0x20] sm:$0xff] %vm376_vm0, %v718_v16 }
 0x1ad   : > { %692 = vst.msk [vmem:[#allocation2 + $0x8] sm:$0xff] %vm376_vm0, %v684_v22  ;;  %v716_v18 = vadd.f32 %v958_v6, %v704_v17 }
 0x1af   : > { %v674_v19 = vpop.f32.mrf.mxu2  ;;  %v680_v23 = vpop.f32.mrf.mxu3  ;;  %724 = vst.msk [vmem:[%s1285_s9 + $0x10] sm:$0xff] %vm376_vm0, %v716_v18 }
 0x1b0   : > { %v688_v24 = vadd.f32 %v674_v19, %v607_v14  ;;  %v690_v26 = vadd.f32 %v680_v23, %v609_v15 }
 0x1b1   : > { %v708_v25 = vld [vmem:[#allocation2 + $0x30] sm:$0xff]  ;;  %v668_v27 = vpop.f32.mrf.mxu1 }
 0x1b2   : > { %v720_v30 = vadd.f32 %v958_v6, %v708_v25  ;;  %696 = vst.msk [vmem:[#allocation2 + $0x28] sm:$0xff] %vm376_vm0, %v688_v24  ;;  %v686_v31 = vadd.f32 %v668_v27, %v605_v20 }
 0x1b3   : > { %698 = vst.msk [vmem:[#allocation2 + $0x38] sm:$0xff] %vm376_vm0, %v690_v26 }
 0x1b4   : > { %728 = vst.msk [vmem:[%s1285_s9 + $0x30] sm:$0xff] %vm376_vm0, %v720_v30  ;;  %v703_v32 = vld [vmem:[#allocation2 + $0x8] sm:$0xff] }
 0x1b5   : > { %694 = vst.msk [vmem:[#allocation2 + $0x18] sm:$0xff] %vm376_vm0, %v686_v31  ;;  %v715_v21 = vadd.f32 %v958_v6, %v703_v32 }
 0x1b7   : > { %723 = vst.msk [vmem:[%s1285_s9 + $0x8] sm:$0xff] %vm376_vm0, %v715_v21 }
 0x1b9   : > { %v707_v33 = vld [vmem:[#allocation2 + $0x28] sm:$0xff] }
 0x1ba   : > { %v719_v34 = vadd.f32 %v958_v6, %v707_v33  ;;  %v709_v42 = vld [vmem:[#allocation2 + $0x38] sm:$0xff] }
 0x1bb   : > { %v721_v35 = vadd.f32 %v958_v6, %v709_v42 }
 0x1bc   : > { %727 = vst.msk [vmem:[%s1285_s9 + $0x28] sm:$0xff] %vm376_vm0, %v719_v34  ;;  %v705_v36 = vld [vmem:[#allocation2 + $0x18] sm:$0xff] }
 0x1bd   : > { %729 = vst.msk [vmem:[%s1285_s9 + $0x38] sm:$0xff] %vm376_vm0, %v721_v35  ;;  %v717_v43 = vadd.f32 %v958_v6, %v705_v36 }
 0x1bf   : > { %725 = vst.msk [vmem:[%s1285_s9 + $0x18] sm:$0xff] %vm376_vm0, %v717_v43 }
 0x1c0 PF: > { %s15_s20 = sadd.s32 1, %s999_s20   ;;  %s1327_s18 = smov %s995_s19 }
 0x1c1   : > { %p12_p5 = scmp.ge.s32.totalorder %s15_s20, 4   ;;  %s1328_s19 = smov %s1330_s21 }
 0x1c3   :  { %14 = sbr.rel (!%p12_p5) target bundleno = 2 (0x2), region = 90 }

// kernel: model_forward.33
= control target key start
LH: loop header
LB: loop body
LE: loop exit
PB: predicated region body
PF: predicated region fallthrough
CT: control target
= control target key end

     0   :  { %s2197_s24 = smov 0   ;;  %s2199_s25 = smov 0   ;;  %s2846_s0 = inlined_call_operand.vmem [shape: f32[2,64,64], index: 0, kind: input, shape index: {}]   ;;  %s2847_s1 = inlined_call_operand.vmem [shape: f32[2,64,64], index: 1, kind: input, shape index: {}]   ;;  %s2848_s2 = inlined_call_operand.vmem [shape: f32[2,64,64], index: 2, kind: input, shape index: {}]   ;;  %s2849_s3 = inlined_call_operand.vmem [shape: f32[64,64], index: 3, kind: input, shape index: {}]   ;;  %s2850_s4 = inlined_call_operand.vmem [shape: f32[1,64], index: 4, kind: input, shape index: {}]   ;;  %s2851_s5 = inlined_call_operand.vmem [shape: f32[2,64,64], index: 5, kind: input, shape index: {}]   ;;  %s2852_s6 = inlined_call_operand.vmem [shape: f32[2,1,64], index: 6, kind: input, shape index: {}]   ;;  %s2853_s7 = inlined_call_operand.vmem [shape: f32[2,64,64], index: 7, kind: output, shape index: {}]  }
   0x1   :  { %s2201_s26 = smov 0  }
   0x2 LB: > { %s36_s27 = sadd.s32 1, %s2146_s25  ;;  %p1888_p0 = scmp.ge.s32.totalorder %s2150_s26, 1  ;;  %s2150_s26 = sphi %s2201_s26, %s17_s26   ;;  %s2146_s25 = sphi %s2199_s25, %s2855_s25   ;;  %s2142_s24 = sphi %s2197_s24, %s2854_s24  }
   0x3   : > { %p38_p1 = scmp.ge.s32.totalorder %s36_s27, 2  ;;  %p324_p2 = scmp.lt.s32.totalorder %s2150_s26, 3 }
   0x5   : > { %s2857_s27 = smov (%p38_p1, %s36_s27), 0  ;;  %p325_p3 = pnand %p1888_p0, %p324_p2 }
   0x6   : > { %p395_p4 = scmp.lt.s32.totalorder (!%p325_p3), %s2142_s24, 1  ;;  %s2152_s12 = smov (!%p325_p3), 96  }
   0x7   : > { %328 = sbr.rel (%p325_p3) target bundleno = 1240 (0x4d8), region = 48  ;;  %s2156_s19 = smov (!%p325_p3), 32  }
   0xc   : > { %s2859_s24 = smov (!%p395_p4, %s2142_s24), 1  ;;  %vm484_vm0 = vcmask 261120   ;;  %vm631_vm1 = vcmask 523264   ;;  %vm451_vm2 = vcmask 7168  }
   0xd   : > { %s2218_s28 = sshll.u32 %s2859_s24, 6  ;;  %s436_s8 = scalar_lea.vmem %s2852_s6, %s2859_s24 }
   0xe   : > { %s412_s11 = scalar_lea.vmem %s2847_s1, %s2218_s28  ;;  %s2242_s15 = scalar_lea.vmem %s2846_s0, %s2218_s28 }
   0xf   : > { %v516_v0 = vld [vmem:[%s412_s11 + $0x38] sm:$0xff]  ;;  %v514_v1 = vld [vmem:[%s412_s11 + $0x28] sm:$0xff]  ;;  %v515_v2 = vld [vmem:[%s412_s11 + $0x30] sm:$0xff]  ;;  %s2262_s18 = scalar_lea.vmem %s2848_s2, %s2218_s28  ;;  %s2805_s30 = scalar_lea.vmem %s2851_s5, %s2218_s28 }
  0x10   : > { %984 = vrot.lane.b32.xlu0 %v516_v0, %s2152_s12  ;;  %1899 = vmatpush.xpose.msk.msra.mxu0 %vm484_vm0, %v516_v0  ;;  %v512_v3 = vld [vmem:[%s412_s11 + $0x18] sm:$0xff]  ;;  %v513_v4 = vld [vmem:[%s412_s11 + $0x20] sm:$0xff]  ;;  %v511_v5 = vld [vmem:[%s412_s11 + $0x10] sm:$0xff]  ;;  %v2153_v0 = vmov -inf  }
  0x11   : > { %980 = vrot.lane.b32.xlu1 %v514_v1, %s2152_s12  ;;  %976 = vrot.lane.b32.xlu2 %v512_v3, %s2152_s12  ;;  %v510_v6 = vld [vmem:[%s412_s11 + $0x8] sm:$0xff]  ;;  %v509_v7 = vld [vmem:[%s412_s11] sm:$0xff]  ;;  %452 = vst.msk [vmem:[#allocation2] sm:$0xff] %vm451_vm2, %v2153_v0  ;;  %s2812_s11 = scalar_lea.vmem %s2853_s7, %s2218_s28 }
  0x12   : > { %v501_v8 = vld [vmem:[%s2242_s15] sm:$0xff]  ;;  %v502_v9 = vld [vmem:[%s2242_s15 + $0x8] sm:$0xff]  ;;  %v503_v10 = vld [vmem:[%s2242_s15 + $0x10] sm:$0xff]  ;;  %453 = vst.msk [vmem:[#allocation2 + $0x8] sm:$0xff] %vm451_vm2, %v2153_v0 }
  0x13   : > { %v504_v11 = vld [vmem:[%s2242_s15 + $0x18] sm:$0xff]  ;;  %v505_v12 = vld [vmem:[%s2242_s15 + $0x20] sm:$0xff]  ;;  %v506_v14 = vld [vmem:[%s2242_s15 + $0x28] sm:$0xff]  ;;  %454 = vst.msk [vmem:[#allocation2 + $0x10] sm:$0xff] %vm451_vm2, %v2153_v0 }
  0x14   : > { %1900 = vmatpush.xpose.msk.msra.mxu0 %vm484_vm0, %v515_v2  ;;  %v524_v13 = vld [vmem:[%s2262_s18 + $0x38] sm:$0xff]  ;;  %v523_v15 = vld [vmem:[%s2262_s18 + $0x30] sm:$0xff]  ;;  %v522_v17 = vld [vmem:[%s2262_s18 + $0x28] sm:$0xff]  ;;  %455 = vst.msk [vmem:[#allocation2 + $0x18] sm:$0xff] %vm451_vm2, %v2153_v0 }
  0x15   : > { %1963 = vmatpush.msra.mxu3 %v524_v13  ;;  %1962 = vmatpush.msra.mxu1 %v524_v13  ;;  %v508_v16 = vld [vmem:[%s2242_s15 + $0x38] sm:$0xff]  ;;  %v521_v18 = vld [vmem:[%s2262_s18 + $0x20] sm:$0xff]  ;;  %v2007_v19 = vpack.i.bf16 %v523_v15, %v524_v13  ;;  %v519_v21 = vld [vmem:[%s2262_s18 + $0x10] sm:$0xff]  ;;  %456 = vst.msk [vmem:[#allocation2 + $0x20] sm:$0xff] %vm451_vm2, %v2153_v0 }
  0x16   : > { %v2012_v20 = vpack.i.bf16 %v521_v18, %v522_v17  ;;  %v520_v22 = vld [vmem:[%s2262_s18 + $0x18] sm:$0xff]  ;;  %v507_v24 = vld [vmem:[%s2242_s15 + $0x30] sm:$0xff]  ;;  %v517_v25 = vld [vmem:[%s2262_s18] sm:$0xff]  ;;  %457 = vst.msk [vmem:[#allocation2 + $0x28] sm:$0xff] %vm451_vm2, %v2153_v0 }
  0x17   : > { %1965 = vmatpush.msra.mxu3 %v523_v15  ;;  %1964 = vmatpush.msra.mxu1 %v523_v15  ;;  %v2017_v23 = vpack.i.bf16 %v519_v21, %v520_v22  ;;  %v518_v26 = vld [vmem:[%s2262_s18 + $0x8] sm:$0xff]  ;;  %458 = vst.msk [vmem:[#allocation2 + $0x30] sm:$0xff] %vm451_vm2, %v2153_v0 }
  0x18   : > { %982 = vrot.lane.b32.xlu0 %v515_v2, %s2152_s12  ;;  %1901 = vmatpush.xpose.msk.msra.mxu0 %vm484_vm0, %v514_v1  ;;  %v2022_v27 = vpack.i.bf16 %v517_v25, %v518_v26  ;;  %459 = vst.msk [vmem:[#allocation2 + $0x38] sm:$0xff] %vm451_vm2, %v2153_v0 }
  0x19   : > { %978 = vrot.lane.b32.xlu1 %v513_v4, %s2152_s12  ;;  %974 = vrot.lane.b32.xlu2 %v511_v5, %s2152_s12  ;;  %460 = vst.msk [vmem:[#allocation2 + $0x40] sm:$0xff] %vm451_vm2, %v2153_v0 }
  0x1a   : > { %1967 = vmatpush.msra.mxu3 %v522_v17  ;;  %1966 = vmatpush.msra.mxu1 %v522_v17  ;;  %461 = vst.msk [vmem:[#allocation2 + $0x48] sm:$0xff] %vm451_vm2, %v2153_v0 }
  0x1b   : > { %462 = vst.msk [vmem:[#allocation2 + $0x50] sm:$0xff] %vm451_vm2, %v2153_v0 }
  0x1c   : > { %1902 = vmatpush.xpose.msk.msra.mxu0 %vm484_vm0, %v513_v4  ;;  %1969 = vmatpush.msra.mxu3 %v521_v18  ;;  %463 = vst.msk [vmem:[#allocation2 + $0x58] sm:$0xff] %vm451_vm2, %v2153_v0 }
  0x1d   : > { %1968 = vmatpush.msra.mxu1 %v521_v18  ;;  %464 = vst.msk [vmem:[#allocation2 + $0x60] sm:$0xff] %vm451_vm2, %v2153_v0 }
  0x1e   : > { %1971 = vmatpush.msra.mxu3 %v520_v22  ;;  %465 = vst.msk [vmem:[#allocation2 + $0x68] sm:$0xff] %vm451_vm2, %v2153_v0 }
  0x1f   : > { %1970 = vmatpush.msra.mxu1 %v520_v22  ;;  %466 = vst.msk [vmem:[#allocation2 + $0x70] sm:$0xff] %vm451_vm2, %v2153_v0 }
  0x20   : > { %1903 = vmatpush.xpose.msk.msra.mxu0 %vm484_vm0, %v512_v3  ;;  %972 = vrot.lane.b32.xlu0 %v510_v6, %s2152_s12  ;;  %467 = vst.msk [vmem:[#allocation2 + $0x78] sm:$0xff] %vm451_vm2, %v2153_v0 }
  0x21   : > { %970 = vrot.lane.b32.xlu1 %v509_v7, %s2152_s12  ;;  %954 = vrot.lane.b32.xlu2 %v501_v8, %s2152_s12 }
  0x22   : > { %1973 = vmatpush.msra.mxu3 %v519_v21  ;;  %1972 = vmatpush.msra.mxu1 %v519_v21 }
  0x24   : > { %1904 = vmatpush.xpose.msk.msra.mxu0 %vm484_vm0, %v511_v5  ;;  %1975 = vmatpush.msra.mxu3 %v518_v26 }
  0x25   : > { %1974 = vmatpush.msra.mxu1 %v518_v26 }
  0x26   : > { %1977 = vmatpush.msra.mxu3 %v517_v25 }
  0x27   : > { %1976 = vmatpush.msra.mxu1 %v517_v25 }
  0x28   : > { %1905 = vmatpush.xpose.msk.msra.mxu0 %vm484_vm0, %v510_v6  ;;  %956 = vrot.lane.b32.xlu0 %v502_v9, %s2152_s12 }
  0x29   : > { %958 = vrot.lane.b32.xlu1 %v503_v10, %s2152_s12  ;;  %960 = vrot.lane.b32.xlu2 %v504_v11, %s2152_s12 }
  0x2c   : > { %1906 = vmatpush.xpose.msk.msra.mxu0 %vm484_vm0, %v509_v7 }
  0x2f   : > { %1907 = vmatmul.msk.f32.vlgmr.msra.gmra.mxu0 %vm484_vm0, %v501_v8 }
  0x30   : > { %962 = vrot.lane.b32.xlu0 %v505_v12, %s2152_s12  ;;  %841 = vmatpush.msrb.mxu0 %v524_v13 }
  0x31   : > { %964 = vrot.lane.b32.xlu1 %v506_v14, %s2152_s12  ;;  %966 = vrot.lane.b32.xlu2 %v507_v24, %s2152_s12 }
  0x32   : > { %842 = vmatpush.msrb.mxu0 %v523_v15 }
  0x34   : > { %843 = vmatpush.msrb.mxu0 %v522_v17  ;;  %v2154_v17 = vmov 0  }
  0x35   : > { %2027 = vset.pattern.permute.xlu1 %v2154_v17  ;;  %2029 = vset.pattern.permute.xlu2 %v2154_v17 }
  0x36   : > { %844 = vmatpush.msrb.mxu0 %v521_v18  ;;  %2028 = vset.pattern.permute.xlu0 %v2154_v17  ;;  %v2155_v18 = vmov 0.0   ;;  %v1068_v17 = vld [vmem:[#allocation2 + $0x40] sm:$0xff] }
  0x37   : > { %1908 = vmatmul.msk.f32.gmra.mxu0 %vm484_vm0, %v502_v9  ;;  %493 = vst.msk [vmem:[#allocation4 + $0x40] sm:$0xff] %vm484_vm0, %v2155_v18 }
  0x38   : > { %968 = vrot.lane.b32.xlu0 %v508_v16, %s2152_s12  ;;  %845 = vmatpush.msrb.mxu0 %v520_v22  ;;  %468 = vst.msk [vmem:[#allocation3] sm:$0xff] %vm451_vm2, %v2155_v18 }
  0x39   : > { %2018 = vrot.lane.b32.xlu1 %v2017_v23, %s2152_s12  ;;  %2023 = vrot.lane.b32.xlu2 %v2022_v27, %s2152_s12  ;;  %469 = vst.msk [vmem:[#allocation3 + $0x8] sm:$0xff] %vm451_vm2, %v2155_v18 }
  0x3a   : > { %846 = vmatpush.msrb.mxu0 %v519_v21  ;;  %470 = vst.msk [vmem:[#allocation3 + $0x10] sm:$0xff] %vm451_vm2, %v2155_v18 }
  0x3b   : > { %471 = vst.msk [vmem:[#allocation3 + $0x18] sm:$0xff] %vm451_vm2, %v2155_v18 }
  0x3c   : > { %847 = vmatpush.msrb.mxu0 %v518_v26  ;;  %472 = vst.msk [vmem:[#allocation3 + $0x20] sm:$0xff] %vm451_vm2, %v2155_v18 }
  0x3d   : > { %473 = vst.msk [vmem:[#allocation3 + $0x28] sm:$0xff] %vm451_vm2, %v2155_v18 }
  0x3e   : > { %848 = vmatpush.msrb.mxu0 %v517_v25  ;;  %474 = vst.msk [vmem:[#allocation3 + $0x30] sm:$0xff] %vm451_vm2, %v2155_v18 }
  0x3f   : > { %1909 = vmatmul.msk.f32.gmra.mxu0 %vm484_vm0, %v503_v10  ;;  %475 = vst.msk [vmem:[#allocation3 + $0x38] sm:$0xff] %vm451_vm2, %v2155_v18 }
  0x40   : > { %2008 = vrot.lane.b32.xlu0 %v2007_v19, %s2152_s12  ;;  %v2366_v19 = vld [vmem:[#allocation2] sm:$0xff]  ;;  %476 = vst.msk [vmem:[#allocation3 + $0x40] sm:$0xff] %vm451_vm2, %v2155_v18 }
  0x41   : > { %477 = vst.msk [vmem:[#allocation3 + $0x48] sm:$0xff] %vm451_vm2, %v2155_v18 }
  0x42   : > { %478 = vst.msk [vmem:[#allocation3 + $0x50] sm:$0xff] %vm451_vm2, %v2155_v18 }
  0x43   : > { %479 = vst.msk [vmem:[#allocation3 + $0x58] sm:$0xff] %vm451_vm2, %v2155_v18 }
  0x44   : > { %480 = vst.msk [vmem:[#allocation3 + $0x60] sm:$0xff] %vm451_vm2, %v2155_v18 }
  0x45   : > { %481 = vst.msk [vmem:[#allocation3 + $0x68] sm:$0xff] %vm451_vm2, %v2155_v18 }
  0x46   : > { %482 = vst.msk [vmem:[#allocation3 + $0x70] sm:$0xff] %vm451_vm2, %v2155_v18 }
  0x47   : > { %1910 = vmatmul.msk.f32.gmra.mxu0 %vm484_vm0, %v504_v11  ;;  %483 = vst.msk [vmem:[#allocation3 + $0x78] sm:$0xff] %vm451_vm2, %v2155_v18 }
  0x48   : > { %2013 = vrot.lane.b32.xlu0 %v2012_v20, %s2152_s12  ;;  %485 = vst.msk [vmem:[#allocation4] sm:$0xff] %vm484_vm0, %v2155_v18 }
  0x49   : > { %486 = vst.msk [vmem:[#allocation4 + $0x8] sm:$0xff] %vm484_vm0, %v2155_v18 }
  0x4a   : > { %487 = vst.msk [vmem:[#allocation4 + $0x10] sm:$0xff] %vm484_vm0, %v2155_v18 }
  0x4b   : > { %488 = vst.msk [vmem:[#allocation4 + $0x18] sm:$0xff] %vm484_vm0, %v2155_v18 }
  0x4c   : > { %489 = vst.msk [vmem:[#allocation4 + $0x20] sm:$0xff] %vm484_vm0, %v2155_v18 }
  0x4d   : > { %490 = vst.msk [vmem:[#allocation4 + $0x28] sm:$0xff] %vm484_vm0, %v2155_v18 }
  0x4e   : > { %491 = vst.msk [vmem:[#allocation4 + $0x30] sm:$0xff] %vm484_vm0, %v2155_v18 }
  0x4f   : > { %1911 = vmatmul.msk.f32.gmra.mxu0 %vm484_vm0, %v505_v12  ;;  %492 = vst.msk [vmem:[#allocation4 + $0x38] sm:$0xff] %vm484_vm0, %v2155_v18 }
  0x50   : > { %494 = vst.msk [vmem:[#allocation4 + $0x48] sm:$0xff] %vm484_vm0, %v2155_v18 }
  0x51   : > { %495 = vst.msk [vmem:[#allocation4 + $0x50] sm:$0xff] %vm484_vm0, %v2155_v18 }
  0x52   : > { %496 = vst.msk [vmem:[#allocation4 + $0x58] sm:$0xff] %vm484_vm0, %v2155_v18 }
  0x53   : > { %497 = vst.msk [vmem:[#allocation4 + $0x60] sm:$0xff] %vm484_vm0, %v2155_v18 }
  0x54   : > { %498 = vst.msk [vmem:[#allocation4 + $0x68] sm:$0xff] %vm484_vm0, %v2155_v18 }
  0x55   : > { %499 = vst.msk [vmem:[#allocation4 + $0x70] sm:$0xff] %vm484_vm0, %v2155_v18 }
  0x56   : > { %500 = vst.msk [vmem:[#allocation4 + $0x78] sm:$0xff] %vm484_vm0, %v2155_v18 }
  0x57   : > { %1912 = vmatmul.msk.f32.gmra.mxu0 %vm484_vm0, %v506_v14 }
  0x5f   : > { %1913 = vmatmul.msk.f32.gmra.mxu0 %vm484_vm0, %v507_v24  ;;  %v2383_v24 = vld [vmem:[#allocation2 + $0x8] sm:$0xff] }
  0x67   : > { %1914 = vmatmul.msk.f32.gmra.mxu0 %vm484_vm0, %v508_v16 }
  0x6b   : > { %v977_v31 = vpop.permute.xlu2 %976 }
  0x73   : > { %v975_v33 = vpop.permute.xlu2 %974 }
  0x7b   : > { %v955_v37 = vpop.permute.xlu2 %954 }
  0x82   : > { %v985_v28 = vpop.permute.xlu0 %984 }
  0x83   : > { %1923 = vmatpush.xpose.msk.msra.mxu2 %vm484_vm0, %v985_v28  ;;  %v981_v29 = vpop.permute.xlu1 %980  ;;  %v961_v50 = vpop.permute.xlu2 %960 }
  0x8a   : > { %v983_v30 = vpop.permute.xlu0 %982 }
  0x8b   : > { %1924 = vmatpush.xpose.msk.msra.mxu2 %vm484_vm0, %v983_v30  ;;  %v979_v32 = vpop.permute.xlu1 %978  ;;  %v967_v60 = vpop.permute.xlu2 %966  ;;  %v2403_v30 = vld [vmem:[#allocation2 + $0x10] sm:$0xff] }
  0x8f   : > { %1925 = vmatpush.xpose.msk.msra.mxu2 %vm484_vm0, %v981_v29 }
  0x92   : > { %v973_v34 = vpop.permute.xlu0 %972 }
  0x93   : > { %1926 = vmatpush.xpose.msk.msra.mxu2 %vm484_vm0, %v979_v32  ;;  %v971_v35 = vpop.permute.xlu1 %970  ;;  %v2024_v2 = vpop.permute.xlu2 %2023 }
  0x94   : > { %v2025_v8 = vunpack.i.l.bf16 %v2024_v2  ;;  %v2026_v10 = vunpack.i.h.bf16 %v2024_v2 }
  0x97   : > { %1927 = vmatpush.xpose.msk.msra.mxu2 %vm484_vm0, %v977_v31 }
  0x9a   : > { %v957_v36 = vpop.permute.xlu0 %956 }
  0x9b   : > { %1928 = vmatpush.xpose.msk.msra.mxu2 %vm484_vm0, %v975_v33  ;;  %v959_v43 = vpop.permute.xlu1 %958 }
  0x9f   : > { %1929 = vmatpush.xpose.msk.msra.mxu2 %vm484_vm0, %v973_v34 }
  0xa2   : > { %v963_v38 = vpop.permute.xlu0 %962 }
  0xa3   : > { %1930 = vmatpush.xpose.msk.msra.mxu2 %vm484_vm0, %v971_v35  ;;  %v965_v61 = vpop.permute.xlu1 %964  ;;  %v2425_v35 = vld [vmem:[#allocation2 + $0x18] sm:$0xff] }
  0xa6   : > { %1931 = vmatmul.msk.f32.vlgmr.msra.gmra.mxu2 %vm484_vm0, %v955_v37  ;;  %v2427_v37 = vld [vmem:[#allocation2 + $0x20] sm:$0xff] }
  0xaa   : > { %v2306_v42 = vpop.permute.xlu0 %968 }
  0xab   : > { %v2019_v3 = vpop.permute.xlu1 %2018 }
  0xac   : > { %v591_v39 = vpop.f32.mrf.mxu0  ;;  %v2020_v5 = vunpack.i.l.bf16 %v2019_v3  ;;  %v2021_v7 = vunpack.i.h.bf16 %v2019_v3 }
  0xad   : > { %v2301_v40 = vmul.f32 0.17677669, %v591_v39 }
  0xae   : > { %1932 = vmatmul.msk.f32.gmra.mxu2 %vm484_vm0, %v957_v36 }
  0xaf   : > { %v632_v41 = vsel %vm631_vm1, %v2301_v40, -inf }
  0xb0   : > { %633 = vmax.xlane.f32.xlu1 %v632_v41 }
  0xb2   : > { %v2009_v47 = vpop.permute.xlu0 %2008 }
  0xb3   : > { %v2010_v48 = vunpack.i.l.bf16 %v2009_v47  ;;  %v2011_v49 = vunpack.i.h.bf16 %v2009_v47 }
  0xb4   : > { %v594_v44 = vpop.f32.mrf.mxu0 }
  0xb5   : > { %v2308_v45 = vmul.f32 0.17677669, %v594_v44  ;;  %1317 = vmatpush.msrb.mxu3 %v2010_v48 }
  0xb6   : > { %1933 = vmatmul.msk.f32.gmra.mxu2 %vm484_vm0, %v959_v43 }
  0xb7   : > { %v635_v46 = vsel %vm631_vm1, %v2308_v45, -inf  ;;  %1318 = vmatpush.msrb.mxu3 %v2011_v49  ;;  %v2447_v49 = vld [vmem:[#allocation2 + $0x28] sm:$0xff] }
  0xb8   : > { %636 = vmax.xlane.f32.xlu2 %v635_v46 }
  0xba   : > { %v2014_v54 = vpop.permute.xlu0 %2013 }
  0xbb   : > { %v2015_v55 = vunpack.i.l.bf16 %v2014_v54  ;;  %v2016_v56 = vunpack.i.h.bf16 %v2014_v54 }
  0xbc   : > { %v597_v51 = vpop.f32.mrf.mxu0 }
  0xbd   : > { %v2313_v52 = vmul.f32 0.17677669, %v597_v51  ;;  %1319 = vmatpush.msrb.mxu3 %v2015_v55 }
  0xbe   : > { %1934 = vmatmul.msk.f32.gmra.mxu2 %vm484_vm0, %v961_v50 }
  0xbf   : > { %v638_v53 = vsel %vm631_vm1, %v2313_v52, -inf  ;;  %1320 = vmatpush.msrb.mxu3 %v2016_v56 }
  0xc0   : > { %639 = vmax.xlane.f32.xlu2 %v638_v53 }
  0xc1   : > { %1321 = vmatpush.msrb.mxu3 %v2020_v5 }
  0xc3   : > { %1322 = vmatpush.msrb.mxu3 %v2021_v7 }
  0xc4   : > { %v600_v57 = vpop.f32.mrf.mxu0 }
  0xc5   : > { %v2318_v58 = vmul.f32 0.17677669, %v600_v57  ;;  %1323 = vmatpush.msrb.mxu3 %v2025_v8 }
  0xc6   : > { %1935 = vmatmul.msk.f32.gmra.mxu2 %vm484_vm0, %v963_v38 }
  0xc7   : > { %v641_v59 = vsel %vm631_vm1, %v2318_v58, -inf  ;;  %1324 = vmatpush.msrb.mxu3 %v2026_v10 }
  0xc8   : > { %642 = vmax.xlane.f32.xlu1 %v641_v59  ;;  %v2464_v59 = vld [vmem:[#allocation2 + $0x38] sm:$0xff] }
  0xcc   : > { %v603_v62 = vpop.f32.mrf.mxu0 }
  0xcd   : > { %v2323_v63 = vmul.f32 0.17677669, %v603_v62  ;;  %v2469_v62 = vld [vmem:[#allocation2 + $0x30] sm:$0xff] }
  0xce   : > { %1936 = vmatmul.msk.f32.gmra.mxu2 %vm484_vm0, %v965_v61 }
  0xcf   : > { %v644_v1 = vsel %vm631_vm1, %v2323_v63, -inf }
  0xd0   : > { %645 = vmax.xlane.f32.xlu2 %v644_v1 }
  0xd4   : > { %v606_v4 = vpop.f32.mrf.mxu0 }
  0xd5   : > { %v2335_v6 = vmul.f32 0.17677669, %v606_v4 }
  0xd6   : > { %1937 = vmatmul.msk.f32.gmra.mxu2 %vm484_vm0, %v967_v60 }
  0xd7   : > { %v647_v9 = vsel %vm631_vm1, %v2335_v6, -inf }
  0xd8   : > { %648 = vmax.xlane.f32.xlu2 %v647_v9 }
  0xdc   : > { %v609_v11 = vpop.f32.mrf.mxu0 }
  0xdd   : > { %v2355_v15 = vmul.f32 0.17677669, %v609_v11 }
  0xde   : > { %1938 = vmatmul.msk.f32.gmra.mxu2 %vm484_vm0, %v2306_v42 }
  0xdf   : > { %v650_v16 = vsel %vm631_vm1, %v2355_v15, -inf }
  0xe0   : > { %651 = vmax.xlane.f32.xlu0 %v650_v16 }
  0xe4   : > { %v612_v12 = vpop.f32.mrf.mxu0 }
  0xe5   : > { %v2351_v13 = vmul.f32 0.17677669, %v612_v12 }
  0xe7   : > { %v653_v14 = vsel %vm631_vm1, %v2351_v13, -inf }
  0xe8   : > { %654 = vmax.xlane.f32.xlu1 %v653_v14 }
 0x123   : > { %v634_v20 = vpop.xlane.xlu1 %633 }
 0x124   : > { %v2372_v21 = vmax.f32 %v2366_v19, %v634_v20 }
 0x126   : > { %v664_v22 = vsub.f32 %v2366_v19, %v2372_v21  ;;  %946 = vst.msk [vmem:[#allocation2] sm:$0xff] %vm451_vm2, %v2372_v21  ;;  %690 = vperm.xlu1 %2027, %v2372_v21  }
 0x129   : > { %v1035_v23 = vpop.f32.mrf.mxu2 }
 0x12a   : > { %v2386_v25 = vmul.f32 0.17677669, %v1035_v23 }
 0x12b   : > { %v637_v26 = vpop.xlane.xlu2 %636 }
 0x12c   : > { %v2391_v27 = vmax.f32 %v2383_v24, %v637_v26  ;;  %v1076_v28 = vsel %vm631_vm1, %v2386_v25, -inf }
 0x12d   : > { %1077 = vmax.xlane.f32.xlu0 %v1076_v28 }
 0x12e   : > { %v665_v29 = vsub.f32 %v2383_v24, %v2391_v27  ;;  %947 = vst.msk [vmem:[#allocation2 + $0x8] sm:$0xff] %vm451_vm2, %v2391_v27 }
 0x131   : > { %v1038_v34 = vpop.f32.mrf.mxu2 }
 0x132   : > { %v2460_v56 = vmul.f32 0.17677669, %v1038_v34 }
 0x133   : > { %v640_v31 = vpop.xlane.xlu2 %639 }
 0x134   : > { %v2409_v32 = vmax.f32 %v2403_v30, %v640_v31  ;;  %v1079_v57 = vsel %vm631_vm1, %v2460_v56, -inf }
 0x136   : > { %v666_v33 = vsub.f32 %v2403_v30, %v2409_v32  ;;  %948 = vst.msk [vmem:[#allocation2 + $0x10] sm:$0xff] %vm451_vm2, %v2409_v32  ;;  %700 = vperm.xlu2 %2029, %v2409_v32  }
 0x139   : > { %v1041_v44 = vpop.f32.mrf.mxu2 }
 0x13a   : > { %v2443_v46 = vmul.f32 0.17677669, %v1041_v44 }
 0x13b   : > { %v643_v36 = vpop.xlane.xlu1 %642 }
 0x13c   : > { %v2430_v39 = vmax.f32 %v2425_v35, %v643_v36  ;;  %v1082_v47 = vsel %vm631_vm1, %v2443_v46, -inf }
 0x13e   : > { %v667_v42 = vsub.f32 %v2425_v35, %v2430_v39  ;;  %949 = vst.msk [vmem:[#allocation2 + $0x18] sm:$0xff] %vm451_vm2, %v2430_v39 }
 0x141   : > { %695 = vperm.xlu0 %2028, %v2391_v27   ;;  %v1044_v48 = vpop.f32.mrf.mxu2 }
 0x142   : > { %v2449_v51 = vmul.f32 0.17677669, %v1044_v48 }
 0x143   : > { %v646_v38 = vpop.xlane.xlu2 %645 }
 0x144   : > { %v2433_v41 = vmax.f32 %v2427_v37, %v646_v38  ;;  %v1085_v55 = vsel %vm631_vm1, %v2449_v51, -inf }
 0x146   : > { %v668_v43 = vsub.f32 %v2427_v37, %v2433_v41  ;;  %950 = vst.msk [vmem:[#allocation2 + $0x20] sm:$0xff] %vm451_vm2, %v2433_v41 }
 0x149   : > { %v1047_v2 = vpop.f32.mrf.mxu2 }
 0x14a   : > { %v2478_v3 = vmul.f32 0.17677669, %v1047_v2 }
 0x14b   : > { %v649_v50 = vpop.xlane.xlu2 %648 }
 0x14c   : > { %v2452_v53 = vmax.f32 %v2447_v49, %v649_v50  ;;  %v1088_v4 = vsel %vm631_vm1, %v2478_v3, -inf }
 0x14e   : > { %v669_v54 = vsub.f32 %v2447_v49, %v2452_v53  ;;  %951 = vst.msk [vmem:[#allocation2 + $0x28] sm:$0xff] %vm451_vm2, %v2452_v53 }
 0x150   : > { %1089 = vmax.xlane.f32.xlu1 %v1088_v4  ;;  %v2513_v4 = vld [vmem:[#allocation2 + $0x58] sm:$0xff] }
 0x151   : > { %v1050_v5 = vpop.f32.mrf.mxu2 }
 0x152   : > { %v2491_v23 = vmul.f32 0.17677669, %v1050_v5 }
 0x153   : > { %v652_v0 = vpop.xlane.xlu0 %651 }
 0x154   : > { %v2474_v1 = vmax.f32 %v2469_v62, %v652_v0 }
 0x156   : > { %952 = vst.msk [vmem:[#allocation2 + $0x30] sm:$0xff] %vm451_vm2, %v2474_v1 }
 0x159   : > { %v1053_v10 = vpop.f32.mrf.mxu2 }
 0x15a   : > { %v2501_v34 = vmul.f32 0.17677669, %v1053_v10 }
 0x15b   : > { %v655_v60 = vpop.xlane.xlu1 %654 }
 0x15c   : > { %v2467_v61 = vmax.f32 %v2464_v59, %v655_v60  ;;  %v1094_v36 = vsel %vm631_vm1, %v2501_v34, -inf  ;;  %v1070_v60 = vld [vmem:[#allocation2 + $0x50] sm:$0xff] }
 0x15e   : > { %953 = vst.msk [vmem:[#allocation2 + $0x38] sm:$0xff] %vm451_vm2, %v2467_v61 }
 0x15f   : > { %1083 = vmax.xlane.f32.xlu2 %v1082_v47 }
 0x161   : > { %v1056_v20 = vpop.f32.mrf.mxu2 }
 0x167   : > { %1086 = vmax.xlane.f32.xlu2 %v1085_v55 }
 0x16b   : > { %1080 = vmax.xlane.f32.xlu0 %v1079_v57 }
 0x17f   : > { %710 = vperm.xlu2 %2029, %v2433_v41   ;;  %705 = vperm.xlu0 %2028, %v2430_v39   ;;  %v682_v41 = vmul.f32 1.442695, %v669_v54 }
 0x187   : > { %715 = vperm.xlu0 %2028, %v2452_v53  }
 0x190   : > { %v701_v7 = vpop.permute.xlu2 %700 }
 0x191   : > { %v730_v8 = vsub.f32 %v2313_v52, %v701_v7  ;;  %v2493_v52 = vmul.f32 0.17677669, %v1056_v20  ;;  %v1072_v20 = vld [vmem:[#allocation2 + $0x60] sm:$0xff] }
 0x193   : > { %v740_v9 = vmul.f32 1.442695, %v730_v8  ;;  %v1097_v31 = vsel %vm631_vm1, %v2493_v52, -inf  ;;  %v1069_v8 = vld [vmem:[#allocation2 + $0x48] sm:$0xff] }
 0x194   : > { %1098 = vmax.xlane.f32.xlu1 %v1097_v31 }
 0x195   : > { %2032 = vpow2.f32 %v740_v9 }
 0x198   : > { %v691_v11 = vpop.permute.xlu1 %690 }
 0x199   : > { %v728_v12 = vsub.f32 %v2301_v40, %v691_v11  ;;  %v1091_v40 = vsel %vm631_vm1, %v2491_v23, -inf }
 0x19b   : > { %v2487_v14 = vpop.eup %2032  ;;  %v736_v16 = vmul.f32 1.442695, %v728_v12 }
 0x19c   : > { %1917 = vmatmul.msk.f32.vlgmr.msra.gmra.mxu1 %vm631_vm1, %v2487_v14 }
 0x19d   : > { %2034 = vpow2.f32 %v736_v16 }
 0x1a0   : > { %v1078_v18 = vpop.xlane.xlu0 %1077 }
 0x1a1   : > { %v1100_v26 = vmax.f32 %v1068_v17, %v1078_v18 }
 0x1a3   : > { %v2035_v28 = vpop.eup %2034  ;;  %1423 = vst.msk [vmem:[#allocation2 + $0x40] sm:$0xff] %vm451_vm2, %v1100_v26  ;;  %v1108_v50 = vsub.f32 %v1068_v17, %v1100_v26 }
 0x1a4   : > { %1915 = vmatmul.msk.f32.vlgmr.msrb.gmra.mxu0 %vm631_vm1, %v2035_v28  ;;  %v768_v12 = vsel %vm631_vm1, %v2035_v28, 0.0 }
 0x1a5   : > { %v1116_v55 = vmul.f32 1.442695, %v1108_v50 }
 0x1a8   : > { %1092 = vmax.xlane.f32.xlu2 %v1091_v40 }
 0x1b1   : > { %1095 = vmax.xlane.f32.xlu0 %v1094_v36 }
 0x1b3   : > { %v696_v38 = vpop.permute.xlu0 %695 }
 0x1b4   : > { %v729_v44 = vsub.f32 %v2308_v45, %v696_v38 }
 0x1b6   : > { %v738_v47 = vmul.f32 1.442695, %v729_v44 }
 0x1b8   : > { %2036 = vpow2.f32 %v738_v47 }
 0x1b9   : > { %2038 = vpow2.f32 %v1116_v55 }
 0x1be   : > { %v2037_v48 = vpop.eup %2036 }
 0x1bf   : > { %1916 = vmatmul.msk.f32.gmra.mxu0 %vm631_vm1, %v2037_v48  ;;  %v2509_v57 = vpop.eup %2038  ;;  %v771_v38 = vsel %vm631_vm1, %v2037_v48, 0.0 }
 0x1c0   : > { %720 = vperm.xlu2 %2029, %v2474_v1  }
 0x1c3   : > { %v1090_v40 = vpop.xlane.xlu1 %1089 }
 0x1c4   : > { %v1104_v36 = vmax.f32 %v1072_v20, %v1090_v40 }
 0x1c5   : > { %1134 = vperm.xlu0 %2028, %v1100_v26  }
 0x1c6   : > { %1427 = vst.msk [vmem:[#allocation2 + $0x60] sm:$0xff] %vm451_vm2, %v1104_v36 }
 0x1c8   : > { %725 = vperm.xlu2 %2029, %v2467_v61  }
 0x1d0   : > { %1361 = vperm.xlu2 %2029, %v2509_v57  }
 0x1d2   : > { %v1084_v0 = vpop.xlane.xlu2 %1083 }
 0x1d3   : > { %v1102_v45 = vmax.f32 %v1070_v60, %v1084_v0 }
 0x1d5   : > { %v1110_v2 = vsub.f32 %v1070_v60, %v1102_v45  ;;  %1425 = vst.msk [vmem:[#allocation2 + $0x50] sm:$0xff] %vm451_vm2, %v1102_v45 }
 0x1da   : > { %v1087_v5 = vpop.xlane.xlu2 %1086 }
 0x1db   : > { %v2516_v7 = vmax.f32 %v2513_v4, %v1087_v5 }
 0x1dd   : > { %v1111_v9 = vsub.f32 %v2513_v4, %v2516_v7  ;;  %1426 = vst.msk [vmem:[#allocation2 + $0x58] sm:$0xff] %vm451_vm2, %v2516_v7  ;;  %1149 = vperm.xlu2 %2029, %v2516_v7   ;;  %v674_v4 = vmul.f32 1.442695, %v665_v29 }
 0x1de   : > { %v1081_v10 = vpop.xlane.xlu0 %1080 }
 0x1df   : > { %v1101_v11 = vmax.f32 %v1069_v8, %v1081_v10  ;;  %v2542_v10 = vld [vmem:[#allocation2 + $0x68] sm:$0xff] }
 0x1e1   : > { %1424 = vst.msk [vmem:[#allocation2 + $0x48] sm:$0xff] %vm451_vm2, %v1101_v11  ;;  %1139 = vperm.xlu1 %2027, %v1101_v11  }
 0x1e2   : > { %v711_v17 = vpop.permute.xlu2 %710 }
 0x1e3   : > { %v732_v31 = vsub.f32 %v2323_v63, %v711_v17  ;;  %v1109_v63 = vsub.f32 %v1069_v8, %v1101_v11  ;;  %v1120_v8 = vmul.f32 1.442695, %v1110_v2 }
 0x1e5   : > { %v744_v44 = vmul.f32 1.442695, %v732_v31  ;;  %v1118_v0 = vmul.f32 1.442695, %v1109_v63 }
 0x1ef   : > { %769 = vadd.xlane.f32.xlu0 %v768_v12 }
 0x1f1   : > { %v706_v16 = vpop.permute.xlu0 %705 }
 0x1f2   : > { %v731_v18 = vsub.f32 %v2318_v58, %v706_v16  ;;  %v1112_v16 = vsub.f32 %v1072_v20, %v1104_v36 }
 0x1f4   : > { %v742_v26 = vmul.f32 1.442695, %v731_v18 }
 0x1f6   : > { %2040 = vpow2.f32 %v742_v26  ;;  %v2555_v26 = vld [vmem:[#allocation2 + $0x78] sm:$0xff] }
 0x1f7   : > { %772 = vadd.xlane.f32.xlu0 %v771_v38  ;;  %2042 = vpow2.f32 %v744_v44 }
 0x1f9   : > { %v716_v47 = vpop.permute.xlu0 %715 }
 0x1fa   : > { %v733_v28 = vsub.f32 %v2335_v6, %v716_v47  ;;  %v774_v6 = vsel %vm631_vm1, %v2487_v14, 0.0  ;;  %v1124_v14 = vmul.f32 1.442695, %v1112_v16  ;;  %v1122_v16 = vmul.f32 1.442695, %v1111_v9 }
 0x1fc   : > { %v2041_v50 = vpop.eup %2040  ;;  %v746_v55 = vmul.f32 1.442695, %v733_v28 }
 0x1fd   : > { %1918 = vmatmul.msk.f32.gmra.mxu1 %vm631_vm1, %v2041_v50  ;;  %v2043_v58 = vpop.eup %2042  ;;  %v777_v48 = vsel %vm631_vm1, %v2041_v50, 0.0 }
 0x1fe   : > { %2044 = vpow2.f32 %v746_v55 }
 0x1ff   : > { %2046 = vpow2.f32 %v1118_v0 }
 0x200   : > { %2048 = vpow2.f32 %v1120_v8 }
 0x201   : > { %2050 = vpow2.f32 %v1124_v14 }
 0x204   : > { %v2531_v60 = vpop.eup %2044 }
 0x205   : > { %1919 = vmatmul.msk.f32.gmra.mxu1 %vm631_vm1, %v2043_v58  ;;  %1920 = vmatmul.msk.f32.vlgmr.msra.gmra.mxu3 %vm631_vm1, %v2531_v60  ;;  %v2539_v5 = vpop.eup %2046 }
 0x206   : > { %778 = vadd.xlane.f32.xlu2 %v777_v48  ;;  %v2553_v18 = vpop.eup %2048 }
 0x207   : > { %v1099_v40 = vpop.xlane.xlu1 %1098 }
 0x208   : > { %v2560_v20 = vmax.f32 %v2555_v26, %v1099_v40 }
 0x20a   : > { %1430 = vst.msk [vmem:[#allocation2 + $0x78] sm:$0xff] %vm451_vm2, %v2560_v20 }
 0x20b   : > { %775 = vadd.xlane.f32.xlu1 %v774_v6  ;;  %1144 = vperm.xlu0 %2028, %v1102_v45   ;;  %v2551_v45 = vld [vmem:[#allocation2 + $0x70] sm:$0xff] }
 0x213   : > { %1366 = vperm.xlu0 %2028, %v2539_v5  }
 0x21b   : > { %v1093_v11 = vpop.xlane.xlu2 %1092 }
 0x21c   : > { %v2545_v12 = vmax.f32 %v2542_v10, %v1093_v11 }
 0x21e   : > { %v1113_v17 = vsub.f32 %v2542_v10, %v2545_v12  ;;  %1428 = vst.msk [vmem:[#allocation2 + $0x68] sm:$0xff] %vm451_vm2, %v2545_v12  ;;  %1154 = vperm.xlu2 %2029, %v1104_v36  }
 0x223   : > { %v721_v2 = vpop.permute.xlu2 %720 }
 0x224   : > { %v734_v31 = vsub.f32 %v2355_v15, %v721_v2  ;;  %v1096_v38 = vpop.xlane.xlu0 %1095  ;;  %1371 = vperm.xlu1 %2027, %v2553_v18   ;;  %v2572_v15 = vpop.eup %2050  ;;  %v783_v2 = vsel %vm631_vm1, %v2531_v60, 0.0 }
 0x225   : > { %v2563_v36 = vmax.f32 %v2551_v45, %v1096_v38 }
 0x226   : > { %v748_v44 = vmul.f32 1.442695, %v734_v31 }
 0x227   : > { %v1114_v47 = vsub.f32 %v2551_v45, %v2563_v36  ;;  %1429 = vst.msk [vmem:[#allocation2 + $0x70] sm:$0xff] %vm451_vm2, %v2563_v36  ;;  %1164 = vperm.xlu2 %2029, %v2563_v36  }
 0x228   : > { %2052 = vpow2.f32 %v748_v44  ;;  %v753_v44 = vld [vmem:[#allocation3 + $0x8] sm:$0xff] }
 0x22b   : > { %v726_v28 = vpop.permute.xlu2 %725 }
 0x22c   : > { %v735_v50 = vsub.f32 %v2351_v13, %v726_v28  ;;  %1381 = vperm.xlu1 %2027, %v2572_v15   ;;  %v780_v13 = vsel %vm631_vm1, %v2043_v58, 0.0  ;;  %v678_v28 = vmul.f32 1.442695, %v667_v42  ;;  %v754_v42 = vld [vmem:[#allocation3 + $0x10] sm:$0xff] }
 0x22e   : > { %v2576_v55 = vpop.eup %2052  ;;  %v750_v63 = vmul.f32 1.442695, %v735_v50 }
 0x22f   : > { %1921 = vmatmul.msk.f32.gmra.mxu3 %vm631_vm1, %v2576_v55 }
 0x230   : > { %2054 = vpow2.f32 %v750_v63  ;;  %v676_v63 = vmul.f32 1.442695, %v666_v33 }
 0x233   : > { %v2611_v24 = vpop.permute.xlu2 %1361 }
 0x236   : > { %v2580_v48 = vpop.eup %2054 }
 0x237   : > { %v1135_v0 = vpop.permute.xlu0 %1134  ;;  %1922 = vmatmul.msk.f32.gmra.mxu3 %vm631_vm1, %v2580_v48 }
 0x238   : > { %v1172_v6 = vsub.f32 %v2386_v25, %v1135_v0  ;;  %v672_v25 = vmul.f32 1.442695, %v664_v22  ;;  %v752_v22 = vld [vmem:[#allocation3] sm:$0xff] }
 0x23a   : > { %v1180_v8 = vmul.f32 1.442695, %v1172_v6 }
 0x23b   : > { %v1150_v0 = vpop.permute.xlu2 %1149 }
 0x23c   : > { %2056 = vpow2.f32 %v1180_v8  ;;  %v755_v8 = vld [vmem:[#allocation3 + $0x18] sm:$0xff] }
 0x23d   : > { %781 = vadd.xlane.f32.xlu0 %v780_v13  ;;  %2058 = vpow2.f32 %v1122_v16 }
 0x23e   : > { %2060 = vpow2.f32 %v672_v25 }
 0x242   : > { %v2586_v11 = vpop.eup %2056 }
 0x243   : > { %1939 = vmatmul.msk.f32.vlgmr.msrb.gmra.mxu3 %vm631_vm1, %v2586_v11  ;;  %v2600_v31 = vpop.eup %2058 }
 0x244   : > { %v2061_v19 = vpop.eup %2060 }
 0x245   : > { %v760_v7 = vmul.f32 %v2061_v19, %v752_v22 }
 0x251   : > { %1159 = vperm.xlu0 %2028, %v2545_v12  }
 0x253   : > { %v1140_v14 = vpop.permute.xlu1 %1139 }
 0x254   : > { %v1173_v58 = vsub.f32 %v2460_v56, %v1140_v14 }
 0x256   : > { %v1182_v40 = vmul.f32 1.442695, %v1173_v58  ;;  %784 = vadd.xlane.f32.xlu1 %v783_v2  ;;  %v1175_v2 = vsub.f32 %v2449_v51, %v1150_v0 }
 0x258   : > { %2062 = vpow2.f32 %v1182_v40 }
 0x259   : > { %1376 = vperm.xlu0 %2028, %v2600_v31   ;;  %2064 = vpow2.f32 %v674_v4 }
 0x25a   : > { %2066 = vpow2.f32 %v678_v28 }
 0x25b   : > { %2068 = vpow2.f32 %v676_v63 }
 0x25e   : > { %v2063_v21 = vpop.eup %2062 }
 0x25f   : > { %1940 = vmatmul.msk.f32.gmra.mxu3 %vm631_vm1, %v2063_v21  ;;  %v1216_v56 = vsel %vm631_vm1, %v2063_v21, 0.0  ;;  %v2609_v38 = vpop.eup %2064  ;;  %v1186_v21 = vmul.f32 1.442695, %v1175_v2 }
 0x260   : > { %1217 = vadd.xlane.f32.xlu2 %v1216_v56  ;;  %v761_v27 = vmul.f32 %v2609_v38, %v753_v44  ;;  %v2622_v6 = vpop.eup %2066 }
 0x261   : > { %884 = vperm.xlu0 %2028, %v2061_v19   ;;  %v763_v13 = vmul.f32 %v2622_v6, %v755_v8  ;;  %v2625_v35 = vpop.eup %2068  ;;  %v1351_v8 = vld [vmem:[#allocation4 + $0x40] sm:$0xff] }
 0x262   : > { %v770_v9 = vpop.xlane.xlu0 %769  ;;  %v762_v14 = vmul.f32 %v2625_v35, %v754_v42 }
 0x263   : > { %v792_v60 = vadd.f32 %v770_v9, %v760_v7 }
 0x265   : > { %801 = vst.msk [vmem:[#allocation3] sm:$0xff] %vm451_vm2, %v792_v60  ;;  %v680_v60 = vmul.f32 1.442695, %v668_v43 }
 0x26a   : > { %v773_v29 = vpop.xlane.xlu0 %772 }
 0x26b   : > { %v793_v50 = vadd.f32 %v773_v29, %v761_v27 }
 0x26d   : > { %802 = vst.msk [vmem:[#allocation3 + $0x8] sm:$0xff] %vm451_vm2, %v793_v50  ;;  %v756_v50 = vld [vmem:[#allocation3 + $0x20] sm:$0xff] }
 0x26f   : > { %1169 = vperm.xlu1 %2027, %v2560_v20  }
 0x279   : > { %v779_v16 = vpop.xlane.xlu2 %778 }
 0x27a   : > { %v795_v39 = vadd.f32 %v779_v16, %v763_v13 }
 0x27c   : > { %804 = vst.msk [vmem:[#allocation3 + $0x18] sm:$0xff] %vm451_vm2, %v795_v39 }
 0x27d   : > { %v1145_v25 = vpop.permute.xlu0 %1144 }
 0x27e   : > { %v1174_v30 = vsub.f32 %v2443_v46, %v1145_v25  ;;  %v776_v32 = vpop.xlane.xlu1 %775  ;;  %v1213_v46 = vsel %vm631_vm1, %v2586_v11, 0.0  ;;  %v1128_v11 = vmul.f32 1.442695, %v1114_v47  ;;  %v1399_v25 = vmul.f32 %v2611_v24, %v1351_v8  ;;  %v1198_v24 = vld [vmem:[#allocation3 + $0x48] sm:$0xff] }
 0x27f   : > { %v794_v33 = vadd.f32 %v776_v32, %v762_v14  ;;  %v757_v14 = vld [vmem:[#allocation3 + $0x28] sm:$0xff] }
 0x280   : > { %v1184_v58 = vmul.f32 1.442695, %v1174_v30 }
 0x281   : > { %803 = vst.msk [vmem:[#allocation3 + $0x10] sm:$0xff] %vm451_vm2, %v794_v33  ;;  %v1155_v40 = vpop.permute.xlu2 %1154 }
 0x282   : > { %2070 = vpow2.f32 %v1184_v58  ;;  %v1176_v4 = vsub.f32 %v2478_v3, %v1155_v40 }
 0x284   : > { %v1188_v19 = vmul.f32 1.442695, %v1176_v4  ;;  %v874_v4 = vld [vmem:[#allocation4] sm:$0xff] }
 0x285   : > { %v1367_v27 = vpop.permute.xlu0 %1366 }
 0x286   : > { %2072 = vpow2.f32 %v1188_v19  ;;  %v1206_v19 = vmul.f32 %v2539_v5, %v1198_v24 }
 0x287   : > { %2074 = vpow2.f32 %v1186_v21 }
 0x288   : > { %v2071_v22 = vpop.eup %2070  ;;  %2076 = vpow2.f32 %v1128_v11  ;;  %v2652_v28 = vpop.f32.mrf.mxu3 }
 0x289   : > { %1941 = vmatmul.msk.f32.gmra.mxu3 %vm631_vm1, %v2071_v22  ;;  %v1219_v9 = vsel %vm631_vm1, %v2071_v22, 0.0  ;;  %2078 = vpow2.f32 %v680_v60  ;;  %v1165_v13 = vpop.permute.xlu2 %1164  ;;  %v1352_v60 = vld [vmem:[#allocation4 + $0x48] sm:$0xff] }
 0x28a   : > { %2080 = vpow2.f32 %v682_v41  ;;  %v1178_v30 = vsub.f32 %v2501_v34, %v1165_v13  ;;  %v1400_v5 = vmul.f32 %v1367_v27, %v1352_v60  ;;  %v1442_v60 = vld [vmem:[#allocation3] sm:$0xff] }
 0x28b   : > { %1214 = vadd.xlane.f32.xlu0 %v1213_v46 }
 0x28c   : > { %v2073_v56 = vpop.eup %2072  ;;  %v1192_v58 = vmul.f32 1.442695, %v1178_v30 }
 0x28d   : > { %v1225_v51 = vsel %vm631_vm1, %v2073_v56, 0.0  ;;  %v2075_v7 = vpop.eup %2074 }
 0x28e   : > { %1226 = vadd.xlane.f32.xlu2 %v1225_v51  ;;  %v1222_v3 = vsel %vm631_vm1, %v2075_v7, 0.0  ;;  %v2647_v44 = vpop.eup %2076 }
 0x28f   : > { %v2650_v29 = vpop.eup %2078 }
 0x290   : > { %v764_v63 = vmul.f32 %v2650_v29, %v756_v50  ;;  %v2668_v42 = vpop.eup %2080 }
 0x291   : > { %1942 = vmatmul.msk.f32.gmra.mxu3 %vm631_vm1, %v2075_v7  ;;  %v765_v54 = vmul.f32 %v2668_v42, %v757_v14  ;;  %v850_v7 = vpop.f32.mrf.mxu0 }
 0x293   : > { %1223 = vadd.xlane.f32.xlu0 %v1222_v3 }
 0x296   : > { %v2658_v37 = vpop.permute.xlu1 %1371 }
 0x299   : > { %1220 = vadd.xlane.f32.xlu1 %v1219_v9  ;;  %1943 = vmatmul.msk.f32.gmra.mxu3 %vm631_vm1, %v2073_v56 }
 0x29e   : > { %v2665_v0 = vpop.permute.xlu1 %1381 }
 0x2a7   : > { %1391 = vperm.xlu0 %2028, %v2647_v44  }
 0x2b0   : > { %v782_v45 = vpop.xlane.xlu0 %781 }
 0x2b1   : > { %v796_v36 = vadd.f32 %v782_v45, %v764_v63 }
 0x2b2   : > { %v2656_v47 = vpop.f32.mrf.mxu3 }
 0x2b3   : > { %805 = vst.msk [vmem:[#allocation3 + $0x20] sm:$0xff] %vm451_vm2, %v796_v36 }
 0x2ba   : > { %v2663_v43 = vpop.f32.mrf.mxu3 }
 0x2c3   : > { %v1160_v16 = vpop.permute.xlu0 %1159 }
 0x2c4   : > { %v1177_v39 = vsub.f32 %v2491_v23, %v1160_v16 }
 0x2c6   : > { %v1190_v32 = vmul.f32 1.442695, %v1177_v39  ;;  %v1326_v49 = vpop.f32.mrf.mxu3  ;;  %v1197_v39 = vld [vmem:[#allocation3 + $0x40] sm:$0xff] }
 0x2c7   : > { %v1407_v53 = vadd.f32 %v1399_v25, %v1326_v49  ;;  %v1205_v27 = vmul.f32 %v2509_v57, %v1197_v39  ;;  %v1201_v25 = vld [vmem:[#allocation3 + $0x60] sm:$0xff]  ;;  %v1199_v57 = vld [vmem:[#allocation3 + $0x50] sm:$0xff] }
 0x2c8   : > { %2082 = vpow2.f32 %v1190_v32  ;;  %v1209_v30 = vmul.f32 %v2572_v15, %v1201_v25 }
 0x2c9   : > { %1415 = vst.msk [vmem:[#allocation4 + $0x40] sm:$0xff] %vm484_vm0, %v1407_v53  ;;  %v785_v33 = vpop.xlane.xlu1 %784  ;;  %2084 = vpow2.f32 %v1192_v58  ;;  %v1200_v53 = vld [vmem:[#allocation3 + $0x58] sm:$0xff] }
 0x2ca   : > { %v797_v2 = vadd.f32 %v785_v33, %v765_v54  ;;  %v1208_v54 = vmul.f32 %v2600_v31, %v1200_v53 }
 0x2cb   : > { %v2674_v40 = vpop.permute.xlu0 %1376 }
 0x2cc   : > { %806 = vst.msk [vmem:[#allocation3 + $0x28] sm:$0xff] %vm451_vm2, %v797_v2  ;;  %v1353_v2 = vld [vmem:[#allocation4 + $0x50] sm:$0xff] }
 0x2cd   : > { %v1401_v15 = vmul.f32 %v2658_v37, %v1353_v2 }
 0x2ce   : > { %v2083_v23 = vpop.eup %2082 }
 0x2cf   : > { %1944 = vmatmul.msk.f32.gmra.mxu3 %vm631_vm1, %v2083_v23  ;;  %v1228_v34 = vsel %vm631_vm1, %v2083_v23, 0.0  ;;  %v2085_v46 = vpop.eup %2084 }
 0x2d0   : > { %1229 = vadd.xlane.f32.xlu1 %v1228_v34  ;;  %v1231_v9 = vsel %vm631_vm1, %v2085_v46, 0.0  ;;  %v1207_v34 = vmul.f32 %v2553_v18, %v1199_v57 }
 0x2d3   : > { %v885_v21 = vpop.permute.xlu0 %884  ;;  %v1218_v22 = vpop.xlane.xlu2 %1217 }
 0x2d4   : > { %v922_v56 = vmul.f32 %v885_v21, %v874_v4  ;;  %v1238_v51 = vadd.f32 %v1218_v22, %v1206_v19 }
 0x2d6   : > { %v930_v3 = vadd.f32 %v922_v56, %v850_v7  ;;  %1246 = vst.msk [vmem:[#allocation3 + $0x48] sm:$0xff] %vm451_vm2, %v1238_v51  ;;  %v1355_v7 = vld [vmem:[#allocation4 + $0x60] sm:$0xff] }
 0x2d7   : > { %1945 = vmatmul.msk.f32.gmra.mxu3 %vm631_vm1, %v2085_v46 }
 0x2d8   : > { %938 = vst.msk [vmem:[#allocation4] sm:$0xff] %vm484_vm0, %v930_v3  ;;  %1232 = vadd.xlane.f32.xlu1 %v1231_v9  ;;  %v1403_v3 = vmul.f32 %v2665_v0, %v1355_v7  ;;  %v1126_v0 = vmul.f32 1.442695, %v1113_v17  ;;  %v1203_v17 = vld [vmem:[#allocation3 + $0x70] sm:$0xff] }
 0x2dd   : > { %v1515_v11 = vld [vmem:[#allocation3 + $0x48] sm:$0xff] }
 0x2de   : > { %2086 = vrcp.f32 %v1515_v11 }
 0x2e1   : > { %v1170_v50 = vpop.permute.xlu1 %1169 }
 0x2e2   : > { %v1179_v63 = vsub.f32 %v2493_v52, %v1170_v50  ;;  %v1329_v45 = vpop.f32.mrf.mxu3 }
 0x2e3   : > { %v1408_v36 = vadd.f32 %v1400_v5, %v1329_v45  ;;  %v1444_v45 = vld [vmem:[#allocation3 + $0x10] sm:$0xff] }
 0x2e4   : > { %v2087_v41 = vpop.eup %2086  ;;  %v1194_v8 = vmul.f32 1.442695, %v1179_v63 }
 0x2e5   : > { %1416 = vst.msk [vmem:[#allocation4 + $0x48] sm:$0xff] %vm484_vm0, %v1408_v36  ;;  %1537 = vperm.xlu0 %2028, %v2087_v41   ;;  %v786_v41 = vsel %vm631_vm1, %v2576_v55, 0.0 }
 0x2e6   : > { %2088 = vpow2.f32 %v1194_v8  ;;  %v1202_v8 = vld [vmem:[#allocation3 + $0x68] sm:$0xff] }
 0x2ec   : > { %v2089_v13 = vpop.eup %2088 }
 0x2ed   : > { %1946 = vmatmul.msk.f32.gmra.mxu3 %vm631_vm1, %v2089_v13  ;;  %v1234_v16 = vsel %vm631_vm1, %v2089_v13, 0.0 }
 0x2ee   : > { %1235 = vadd.xlane.f32.xlu1 %v1234_v16  ;;  %v1211_v16 = vmul.f32 %v2647_v44, %v1203_v17 }
 0x2fe   : > { %v1215_v14 = vpop.xlane.xlu0 %1214 }
 0x2ff   : > { %v1237_v52 = vadd.f32 %v1215_v14, %v1205_v27  ;;  %v1357_v14 = vld [vmem:[#allocation4 + $0x70] sm:$0xff] }
 0x301   : > { %1245 = vst.msk [vmem:[#allocation3 + $0x40] sm:$0xff] %vm451_vm2, %v1237_v52  ;;  %v1227_v32 = vpop.xlane.xlu2 %1226 }
 0x302   : > { %v1241_v49 = vadd.f32 %v1227_v32, %v1209_v30  ;;  %v1443_v30 = vld [vmem:[#allocation3 + $0x8] sm:$0xff] }
 0x304   : > { %1249 = vst.msk [vmem:[#allocation3 + $0x60] sm:$0xff] %vm451_vm2, %v1241_v49 }
 0x306   : > { %v1224_v33 = vpop.xlane.xlu0 %1223 }
 0x307   : > { %v1240_v58 = vadd.f32 %v1224_v33, %v1208_v54  ;;  %889 = vperm.xlu1 %2027, %v2609_v38   ;;  %v1354_v38 = vld [vmem:[#allocation4 + $0x58] sm:$0xff] }
 0x308   : > { %v1514_v23 = vld [vmem:[#allocation3 + $0x40] sm:$0xff]  ;;  %v1402_v56 = vmul.f32 %v2674_v40, %v1354_v38  ;;  %v1115_v40 = vsub.f32 %v2555_v26, %v2560_v20  ;;  %v789_v26 = vsel %vm631_vm1, %v2580_v48, 0.0  ;;  %v1204_v33 = vld [vmem:[#allocation3 + $0x78] sm:$0xff] }
 0x309   : > { %1248 = vst.msk [vmem:[#allocation3 + $0x58] sm:$0xff] %vm451_vm2, %v1240_v58  ;;  %2090 = vrcp.f32 %v1514_v23 }
 0x30a   : > { %v1130_v63 = vmul.f32 1.442695, %v1115_v40 }
 0x30b   : > { %v1518_v24 = vld [vmem:[#allocation3 + $0x60] sm:$0xff] }
 0x30c   : > { %v1332_v4 = vpop.f32.mrf.mxu3  ;;  %v1221_v19 = vpop.xlane.xlu1 %1220  ;;  %2092 = vrcp.f32 %v1518_v24 }
 0x30d   : > { %v1409_v21 = vadd.f32 %v1401_v15, %v1332_v4  ;;  %v1239_v31 = vadd.f32 %v1221_v19, %v1207_v34  ;;  %v670_v34 = vsub.f32 %v2469_v62, %v2474_v1  ;;  %v1506_v19 = vld [vmem:[#allocation4 + $0x40] sm:$0xff]  ;;  %v1507_v1 = vld [vmem:[#allocation4 + $0x48] sm:$0xff] }
 0x30f   : > { %v2091_v22 = vpop.eup %2090  ;;  %1417 = vst.msk [vmem:[#allocation4 + $0x50] sm:$0xff] %vm484_vm0, %v1409_v21  ;;  %v684_v4 = vmul.f32 1.442695, %v670_v34 }
 0x310   : > { %1247 = vst.msk [vmem:[#allocation3 + $0x50] sm:$0xff] %vm451_vm2, %v1239_v31  ;;  %1532 = vperm.xlu2 %2029, %v2091_v22   ;;  %v1517_v27 = vld [vmem:[#allocation3 + $0x58] sm:$0xff]  ;;  %v671_v22 = vsub.f32 %v2464_v59, %v2467_v61  ;;  %v853_v61 = vpop.f32.mrf.mxu0 }
 0x312   : > { %v2093_v46 = vpop.eup %2092  ;;  %v686_v62 = vmul.f32 1.442695, %v671_v22 }
 0x313   : > { %1552 = vperm.xlu0 %2028, %v2093_v46  }
 0x314   : > { %v1335_v37 = vpop.f32.mrf.mxu3 }
 0x315   : > { %v1410_v51 = vadd.f32 %v1402_v56, %v1335_v37  ;;  %v875_v37 = vld [vmem:[#allocation4 + $0x8] sm:$0xff] }
 0x317   : > { %1418 = vst.msk [vmem:[#allocation4 + $0x58] sm:$0xff] %vm484_vm0, %v1410_v51  ;;  %v1516_v18 = vld [vmem:[#allocation3 + $0x50] sm:$0xff]  ;;  %v1445_v51 = vld [vmem:[#allocation3 + $0x18] sm:$0xff] }
 0x318   : > { %2094 = vrcp.f32 %v1516_v18 }
 0x319   : > { %2096 = vrcp.f32 %v1442_v60  ;;  %v1392_v52 = vpop.permute.xlu0 %1391 }
 0x31a   : > { %2098 = vpow2.f32 %v1130_v63  ;;  %v1405_v49 = vmul.f32 %v1392_v52, %v1357_v14 }
 0x31b   : > { %2100 = vrcp.f32 %v1444_v45  ;;  %v876_v45 = vld [vmem:[#allocation4 + $0x10] sm:$0xff] }
 0x31c   : > { %v1338_v9 = vpop.f32.mrf.mxu3  ;;  %2102 = vpow2.f32 %v1126_v0 }
 0x31d   : > { %v1411_v11 = vadd.f32 %v1403_v3, %v1338_v9  ;;  %2104 = vrcp.f32 %v1517_v27  ;;  %v759_v27 = vld [vmem:[#allocation3 + $0x38] sm:$0xff] }
 0x31e   : > { %v2095_v5 = vpop.eup %2094  ;;  %v1509_v34 = vld [vmem:[#allocation4 + $0x58] sm:$0xff] }
 0x31f   : > { %1419 = vst.msk [vmem:[#allocation4 + $0x60] sm:$0xff] %vm484_vm0, %v1411_v11  ;;  %1542 = vperm.xlu1 %2027, %v2095_v5   ;;  %v2097_v50 = vpop.eup %2096  ;;  %v1447_v11 = vld [vmem:[#allocation3 + $0x28] sm:$0xff] }
 0x320   : > { %v2099_v36 = vpop.eup %2098 }
 0x321   : > { %v2101_v20 = vpop.eup %2100  ;;  %v1212_v57 = vmul.f32 %v2099_v36, %v1204_v33 }
 0x327   : > { %1460 = vperm.xlu1 %2027, %v2097_v50   ;;  %v1508_v50 = vld [vmem:[#allocation4 + $0x50] sm:$0xff] }
 0x32f   : > { %894 = vperm.xlu1 %2027, %v2625_v35   ;;  %v2103_v35 = vpop.eup %2102 }
 0x330   : > { %v1210_v13 = vmul.f32 %v2103_v35, %v1202_v8  ;;  %v2105_v32 = vpop.eup %2104 }
 0x337   : > { %1396 = vperm.xlu1 %2027, %v2099_v36  }
 0x339   : > { %787 = vadd.xlane.f32.xlu2 %v786_v41 }
 0x33d   : > { %790 = vadd.xlane.f32.xlu0 %v789_v26  ;;  %v856_v26 = vpop.f32.mrf.mxu1 }
 0x33f   : > { %1470 = vperm.xlu1 %2027, %v2101_v20  }
 0x343   : > { %v1230_v10 = vpop.xlane.xlu1 %1229 }
 0x344   : > { %v1242_v12 = vadd.f32 %v1230_v10, %v1210_v13  ;;  %v758_v13 = vld [vmem:[#allocation3 + $0x30] sm:$0xff] }
 0x346   : > { %1250 = vst.msk [vmem:[#allocation3 + $0x68] sm:$0xff] %vm451_vm2, %v1242_v12 }
 0x34b   : > { %v1233_v55 = vpop.xlane.xlu1 %1232 }
 0x34c   : > { %v1243_v39 = vadd.f32 %v1233_v55, %v1211_v16 }
 0x34d   : > { %v1519_v58 = vld [vmem:[#allocation3 + $0x68] sm:$0xff] }
 0x34e   : > { %1251 = vst.msk [vmem:[#allocation3 + $0x70] sm:$0xff] %vm451_vm2, %v1243_v39 }
 0x351   : > { %1386 = vperm.xlu2 %2029, %v2103_v35   ;;  %v1358_v35 = vld [vmem:[#allocation4 + $0x78] sm:$0xff] }
 0x352   : > { %v2716_v48 = vpop.f32.mrf.mxu3 }
 0x355   : > { %v1520_v25 = vld [vmem:[#allocation3 + $0x70] sm:$0xff] }
 0x356   : > { %2106 = vrcp.f32 %v1520_v25 }
 0x357   : > { %2108 = vrcp.f32 %v1443_v30  ;;  %v1625_v30 = vld [vmem:[%s2849_s3 + $0x38] sm:$0xff] }
 0x358   : > { %2110 = vrcp.f32 %v1519_v58  ;;  %1662 = vmatpush.msrb.mxu1 %v1625_v30  ;;  %v1623_v58 = vld [vmem:[%s2849_s3 + $0x28] sm:$0xff] }
 0x359   : > { %1547 = vperm.xlu2 %2029, %v2105_v32   ;;  %2112 = vpow2.f32 %v684_v4  ;;  %v1624_v32 = vld [vmem:[%s2849_s3 + $0x30] sm:$0xff] }
 0x35a   : > { %v1344_v53 = vpop.f32.mrf.mxu3  ;;  %1663 = vmatpush.msrb.mxu1 %v1624_v32 }
 0x35b   : > { %v1413_v44 = vadd.f32 %v1405_v49, %v1344_v53  ;;  %v1356_v53 = vld [vmem:[#allocation4 + $0x68] sm:$0xff] }
 0x35c   : > { %v2107_v54 = vpop.eup %2106  ;;  %1664 = vmatpush.msrb.mxu1 %v1623_v58 }
 0x35d   : > { %1421 = vst.msk [vmem:[#allocation4 + $0x70] sm:$0xff] %vm484_vm0, %v1413_v44  ;;  %1562 = vperm.xlu0 %2028, %v2107_v54   ;;  %v2109_v2 = vpop.eup %2108 }
 0x35e   : > { %v2111_v24 = vpop.eup %2110 }
 0x35f   : > { %v2113_v56 = vpop.eup %2112 }
 0x360   : > { %v766_v16 = vmul.f32 %v2113_v56, %v758_v13 }
 0x361   : > { %1465 = vperm.xlu2 %2029, %v2109_v2   ;;  %v1236_v23 = vpop.xlane.xlu1 %1235 }
 0x362   : > { %v1244_v15 = vadd.f32 %v1236_v23, %v1212_v57  ;;  %v1622_v57 = vld [vmem:[%s2849_s3 + $0x20] sm:$0xff] }
 0x363   : > { %1665 = vmatpush.msrb.mxu1 %v1622_v57 }
 0x364   : > { %1252 = vst.msk [vmem:[#allocation3 + $0x78] sm:$0xff] %vm451_vm2, %v1244_v15  ;;  %v1621_v15 = vld [vmem:[%s2849_s3 + $0x18] sm:$0xff] }
 0x365   : > { %904 = vperm.xlu0 %2028, %v2650_v29   ;;  %v1538_v29 = vpop.permute.xlu0 %1537  ;;  %1666 = vmatpush.msrb.mxu1 %v1621_v15 }
 0x366   : > { %v1571_v46 = vmul.f32 %v1538_v29, %v1507_v1 }
 0x369   : > { %1557 = vperm.xlu2 %2029, %v2111_v24  }
 0x36a   : > { %v1533_v21 = vpop.permute.xlu2 %1532 }
 0x36b   : > { %v1570_v31 = vmul.f32 %v1533_v21, %v1506_v19  ;;  %v1521_v38 = vld [vmem:[#allocation3 + $0x78] sm:$0xff]  ;;  %v1619_v21 = vld [vmem:[%s2849_s3 + $0x8] sm:$0xff] }
 0x36c   : > { %2114 = vrcp.f32 %v1521_v38  ;;  %v1510_v38 = vld [vmem:[#allocation4 + $0x60] sm:$0xff] }
 0x36d   : > { %1586 = vrot.lane.b32.xlu1 %v1570_v31, %s2156_s19  ;;  %909 = vperm.xlu0 %2028, %v2668_v42   ;;  %2116 = vpow2.f32 %v686_v62  ;;  %v1618_v31 = vld [vmem:[%s2849_s3] sm:$0xff] }
 0x36e   : > { %2118 = vrcp.f32 %v1445_v51 }
 0x370   : > { %v1347_v17 = vpop.f32.mrf.mxu3 }
 0x371   : > { %899 = vperm.xlu2 %2029, %v2622_v6   ;;  %v1446_v6 = vld [vmem:[#allocation3 + $0x20] sm:$0xff] }
 0x372   : > { %v2115_v42 = vpop.eup %2114  ;;  %2120 = vrcp.f32 %v1446_v6 }
 0x373   : > { %v2117_v7 = vpop.eup %2116  ;;  %2122 = vrcp.f32 %v1447_v11 }
 0x374   : > { %v2119_v9 = vpop.eup %2118  ;;  %v767_v14 = vmul.f32 %v2117_v7, %v759_v27 }
 0x375   : > { %1588 = vrot.lane.b32.xlu1 %v1571_v46, %s2156_s19  ;;  %914 = vperm.xlu0 %2028, %v2113_v56  }
 0x378   : > { %v2121_v60 = vpop.eup %2120 }
 0x379   : > { %1567 = vperm.xlu2 %2029, %v2115_v42   ;;  %v890_v18 = vpop.permute.xlu1 %889  ;;  %v2123_v5 = vpop.eup %2122  ;;  %v877_v42 = vld [vmem:[#allocation4 + $0x18] sm:$0xff] }
 0x37a   : > { %v923_v59 = vmul.f32 %v890_v18, %v875_v37  ;;  %v859_v37 = vpop.f32.mrf.mxu1  ;;  %v1512_v18 = vld [vmem:[#allocation4 + $0x70] sm:$0xff] }
 0x37c   : > { %v931_v3 = vadd.f32 %v923_v59, %v853_v61 }
 0x37d   : > { %919 = vperm.xlu0 %2028, %v2117_v7  }
 0x37e   : > { %939 = vst.msk [vmem:[#allocation4 + $0x8] sm:$0xff] %vm484_vm0, %v931_v3  ;;  %v878_v3 = vld [vmem:[#allocation4 + $0x20] sm:$0xff] }
 0x381   : > { %1475 = vperm.xlu2 %2029, %v2119_v9  }
 0x385   : > { %v1553_v8 = vpop.permute.xlu0 %1552 }
 0x386   : > { %v1574_v62 = vmul.f32 %v1553_v8, %v1510_v38 }
 0x389   : > { %1480 = vperm.xlu2 %2029, %v2121_v60  }
 0x391   : > { %v1543_v40 = vpop.permute.xlu1 %1542  ;;  %1485 = vperm.xlu2 %2029, %v2123_v5   ;;  %v862_v5 = vpop.f32.mrf.mxu1 }
 0x392   : > { %v1572_v63 = vmul.f32 %v1543_v40, %v1508_v50 }
 0x394   : > { %1590 = vrot.lane.b32.xlu1 %v1572_v63, %s2156_s19 }
 0x399   : > { %v2731_v0 = vpop.permute.xlu1 %1460 }
 0x3a1   : > { %v895_v36 = vpop.permute.xlu1 %894 }
 0x3a2   : > { %v924_v41 = vmul.f32 %v895_v36, %v876_v45  ;;  %v1434_v45 = vld [vmem:[#allocation4] sm:$0xff] }
 0x3a4   : > { %v932_v20 = vadd.f32 %v924_v41, %v856_v26  ;;  %v879_v41 = vld [vmem:[#allocation4 + $0x28] sm:$0xff]  ;;  %v1498_v26 = vmul.f32 %v2731_v0, %v1434_v45  ;;  %v1697_v45 = vld [vmem:[%s2805_s30 + $0x10] sm:$0xff] }
 0x3a6   : > { %940 = vst.msk [vmem:[#allocation4 + $0x10] sm:$0xff] %vm484_vm0, %v932_v20 }
 0x3a9   : > { %v1397_v10 = vpop.permute.xlu1 %1396 }
 0x3aa   : > { %v1406_v12 = vmul.f32 %v1397_v10, %v1358_v35 }
 0x3ac   : > { %v1414_v55 = vadd.f32 %v1406_v12, %v1347_v17  ;;  %v788_v39 = vpop.xlane.xlu2 %787  ;;  %v1435_v12 = vld [vmem:[#allocation4 + $0x8] sm:$0xff]  ;;  %v880_v17 = vld [vmem:[#allocation4 + $0x30] sm:$0xff] }
 0x3ad   : > { %v798_v25 = vadd.f32 %v788_v39, %v766_v16  ;;  %v1436_v32 = vld [vmem:[#allocation4 + $0x10] sm:$0xff] }
 0x3ae   : > { %1422 = vst.msk [vmem:[#allocation4 + $0x78] sm:$0xff] %vm484_vm0, %v1414_v55 }
 0x3af   : > { %807 = vst.msk [vmem:[#allocation3 + $0x30] sm:$0xff] %vm451_vm2, %v798_v25 }
 0x3b0   : > { %v791_v52 = vpop.xlane.xlu0 %790 }
 0x3b1   : > { %v799_v49 = vadd.f32 %v791_v52, %v767_v14  ;;  %v1471_v6 = vpop.permute.xlu1 %1470  ;;  %v881_v14 = vld [vmem:[#allocation4 + $0x38] sm:$0xff] }
 0x3b3   : > { %808 = vst.msk [vmem:[#allocation3 + $0x38] sm:$0xff] %vm451_vm2, %v799_v49  ;;  %v1500_v49 = vmul.f32 %v1471_v6, %v1436_v32 }
 0x3b4   : > { %v1387_v44 = vpop.permute.xlu2 %1386 }
 0x3b5   : > { %v1404_v54 = vmul.f32 %v1387_v44, %v1356_v53  ;;  %v1513_v63 = vld [vmem:[#allocation4 + $0x78] sm:$0xff] }
 0x3b6   : > { %v1448_v33 = vld [vmem:[#allocation3 + $0x30] sm:$0xff] }
 0x3b7   : > { %v1412_v2 = vadd.f32 %v1404_v54, %v2716_v48  ;;  %2124 = vrcp.f32 %v1448_v33  ;;  %v1620_v48 = vld [vmem:[%s2849_s3 + $0x10] sm:$0xff] }
 0x3b8   : > { %1667 = vmatpush.msrb.mxu1 %v1620_v48 }
 0x3b9   : > { %1420 = vst.msk [vmem:[#allocation4 + $0x68] sm:$0xff] %vm484_vm0, %v1412_v2 }
 0x3ba   : > { %v1449_v23 = vld [vmem:[#allocation3 + $0x38] sm:$0xff]  ;;  %1668 = vmatpush.msrb.mxu1 %v1619_v21 }
 0x3bb   : > { %2126 = vrcp.f32 %v1449_v23 }
 0x3bc   : > { %v1548_v24 = vpop.permute.xlu2 %1547  ;;  %1669 = vmatpush.msrb.mxu1 %v1618_v31 }
 0x3bd   : > { %v2125_v4 = vpop.eup %2124  ;;  %v1573_v19 = vmul.f32 %v1548_v24, %v1509_v34 }
 0x3be   : > { %1490 = vperm.xlu2 %2029, %v2125_v4  }
 0x3bf   : > { %1592 = vrot.lane.b32.xlu1 %v1573_v19, %s2156_s19 }
 0x3c0   : > { %v1511_v1 = vld [vmem:[#allocation4 + $0x68] sm:$0xff] }
 0x3c1   : > { %v2127_v22 = vpop.eup %2126 }
 0x3c2   : > { %1495 = vperm.xlu0 %2028, %v2127_v22  }
 0x3c4   : > { %v1466_v29 = vpop.permute.xlu2 %1465 }
 0x3c5   : > { %v1499_v16 = vmul.f32 %v1466_v29, %v1435_v12 }
 0x3c7   : > { %1594 = vrot.lane.b32.xlu1 %v1574_v62, %s2156_s19 }
 0x3cc   : > { %v1558_v46 = vpop.permute.xlu2 %1557 }
 0x3cd   : > { %v1575_v56 = vmul.f32 %v1558_v46, %v1511_v1 }
 0x3cf   : > { %v1563_v51 = vpop.permute.xlu0 %1562  ;;  %1596 = vrot.lane.b32.xlu1 %v1575_v56, %s2156_s19 }
 0x3d0   : > { %v1576_v61 = vmul.f32 %v1563_v51, %v1512_v18  ;;  %v2030_v18 = vld [vmem:[%s436_s8] ss:$0 sm:$0xff] }
 0x3d4   : > { %v900_v59 = vpop.permute.xlu2 %899 }
 0x3d5   : > { %v925_v7 = vmul.f32 %v900_v59, %v877_v42  ;;  %v2031_v42 = vld [vmem:[%s2850_s4] ss:$0 sm:$0xff] }
 0x3d7   : > { %v933_v9 = vadd.f32 %v925_v7, %v859_v37  ;;  %v905_v11 = vpop.permute.xlu0 %904  ;;  %1598 = vrot.lane.b32.xlu1 %v1576_v61, %s2156_s19  ;;  %v1695_v7 = vld [vmem:[%s2805_s30] sm:$0xff] }
 0x3d8   : > { %v926_v60 = vmul.f32 %v905_v11, %v878_v3 }
 0x3d9   : > { %941 = vst.msk [vmem:[#allocation4 + $0x18] sm:$0xff] %vm484_vm0, %v933_v9 }
 0x3da   : > { %v934_v50 = vadd.f32 %v926_v60, %v862_v5  ;;  %v1696_v60 = vld [vmem:[%s2805_s30 + $0x8] sm:$0xff] }
 0x3dc   : > { %942 = vst.msk [vmem:[#allocation4 + $0x20] sm:$0xff] %vm484_vm0, %v934_v50  ;;  %v1568_v40 = vpop.permute.xlu2 %1567 }
 0x3dd   : > { %v1577_v36 = vmul.f32 %v1568_v40, %v1513_v63 }
 0x3df   : > { %v910_v20 = vpop.permute.xlu0 %909  ;;  %1600 = vrot.lane.b32.xlu2 %v1577_v36, %s2156_s19  ;;  %v1587_v35 = vpop.permute.xlu1 %1586 }
 0x3e0   : > { %v927_v8 = vmul.f32 %v910_v20, %v879_v41  ;;  %v1610_v13 = vsel %vm484_vm0, %v1498_v26, %v1587_v35  ;;  %v1437_v33 = vld [vmem:[#allocation4 + $0x18] sm:$0xff] }
 0x3e1   : > { %1947 = vmatmul.msk.f32.vlgmr.msrb.gmra.mxu1 %vm631_vm1, %v1610_v13  ;;  %v1698_v35 = vld [vmem:[%s2805_s30 + $0x18] sm:$0xff] }
 0x3e2   : > { %v935_v10 = vadd.f32 %v927_v8, %v2652_v28 }
 0x3e3   : > { %v1438_v23 = vld [vmem:[#allocation4 + $0x20] sm:$0xff] }
 0x3e4   : > { %943 = vst.msk [vmem:[#allocation4 + $0x28] sm:$0xff] %vm484_vm0, %v935_v10  ;;  %v1476_v54 = vpop.permute.xlu2 %1475 }
 0x3e5   : > { %v1501_v58 = vmul.f32 %v1476_v54, %v1437_v33  ;;  %v1702_v54 = vld [vmem:[%s2805_s30 + $0x38] sm:$0xff] }
 0x3e7   : > { %v915_v55 = vpop.permute.xlu0 %914  ;;  %v1589_v39 = vpop.permute.xlu1 %1588 }
 0x3e8   : > { %v928_v27 = vmul.f32 %v915_v55, %v880_v17  ;;  %v1611_v0 = vsel %vm484_vm0, %v1499_v16, %v1589_v39  ;;  %v1699_v17 = vld [vmem:[%s2805_s30 + $0x20] sm:$0xff] }
 0x3e9   : > { %1948 = vmatmul.msk.f32.gmra.mxu1 %vm631_vm1, %v1611_v0  ;;  %v1700_v0 = vld [vmem:[%s2805_s30 + $0x28] sm:$0xff] }
 0x3ea   : > { %v936_v25 = vadd.f32 %v928_v27, %v2656_v47 }
 0x3eb   : > { %v1439_v48 = vld [vmem:[#allocation4 + $0x28] sm:$0xff] }
 0x3ec   : > { %944 = vst.msk [vmem:[#allocation4 + $0x30] sm:$0xff] %vm484_vm0, %v936_v25  ;;  %v1481_v57 = vpop.permute.xlu2 %1480 }
 0x3ef   : > { %v920_v52 = vpop.permute.xlu0 %919 }
 0x3f0   : > { %v929_v30 = vmul.f32 %v920_v52, %v881_v14 }
 0x3f2   : > { %v937_v28 = vadd.f32 %v929_v30, %v2663_v43  ;;  %v1502_v43 = vmul.f32 %v1481_v57, %v1438_v23 }
 0x3f3   : > { %v1440_v22 = vld [vmem:[#allocation4 + $0x30] sm:$0xff] }
 0x3f4   : > { %945 = vst.msk [vmem:[#allocation4 + $0x38] sm:$0xff] %vm484_vm0, %v937_v28  ;;  %v1486_v24 = vpop.permute.xlu2 %1485  ;;  %v1701_v28 = vld [vmem:[%s2805_s30 + $0x30] sm:$0xff] }
 0x3f5   : > { %v1503_v4 = vmul.f32 %v1486_v24, %v1439_v48 }
 0x3fb   : > { %v1441_v46 = vld [vmem:[#allocation4 + $0x38] sm:$0xff] }
 0x406   : > { %v1591_v53 = vpop.permute.xlu1 %1590 }
 0x407   : > { %v1612_v44 = vsel %vm484_vm0, %v1500_v49, %v1591_v53 }
 0x408   : > { %1949 = vmatmul.msk.f32.gmra.mxu1 %vm631_vm1, %v1612_v44 }
 0x418   : > { %v1491_v31 = vpop.permute.xlu2 %1490 }
 0x419   : > { %v1504_v38 = vmul.f32 %v1491_v31, %v1440_v22 }
 0x431   : > { %v1593_v47 = vpop.permute.xlu1 %1592 }
 0x432   : > { %v1613_v2 = vsel %vm484_vm0, %v1501_v58, %v1593_v47 }
 0x433   : > { %1950 = vmatmul.msk.f32.gmra.mxu1 %vm631_vm1, %v1613_v2 }
 0x434   : > { %v1496_v1 = vpop.permute.xlu0 %1495 }
 0x435   : > { %v1505_v37 = vmul.f32 %v1496_v1, %v1441_v46 }
 0x439   : > { %v1595_v15 = vpop.permute.xlu1 %1594  ;;  %v1601_v56 = vpop.permute.xlu2 %1600 }
 0x43a   : > { %v1614_v34 = vsel %vm484_vm0, %v1502_v43, %v1595_v15  ;;  %v1617_v51 = vsel %vm484_vm0, %v1505_v37, %v1601_v56 }
 0x43b   : > { %1951 = vmatmul.msk.f32.gmra.mxu1 %vm631_vm1, %v1614_v34 }
 0x441   : > { %v1597_v19 = vpop.permute.xlu1 %1596 }
 0x442   : > { %v1615_v21 = vsel %vm484_vm0, %v1503_v4, %v1597_v19 }
 0x443   : > { %1952 = vmatmul.msk.f32.gmra.mxu1 %vm631_vm1, %v1615_v21 }
 0x449   : > { %v1599_v29 = vpop.permute.xlu1 %1598 }
 0x44a   : > { %v1616_v62 = vsel %vm484_vm0, %v1504_v38, %v1599_v29 }
 0x44b   : > { %1953 = vmatmul.msk.f32.gmra.mxu1 %vm631_vm1, %v1616_v62 }
 0x453   : > { %1954 = vmatmul.msk.f32.gmra.mxu1 %vm631_vm1, %v1617_v51 }
 0x45e   : > { %v1671_v59 = vpop.f32.mrf.mxu1 }
 0x45f   : > { %v1672_v61 = vadd.f32 %v2031_v42, %v1671_v59 }
 0x461   : > { %v1707_v3 = vmul.f32 %v2030_v18, %v1672_v61 }
 0x463   : > { %v1715_v6 = vadd.f32 %v1707_v3, %v1695_v7 }
 0x465   : > { %1723 = vst.msk [vmem:[%s2812_s11] sm:$0xff] %vm631_vm1, %v1715_v6 }
 0x466   : > { %v1674_v9 = vpop.f32.mrf.mxu1 }
 0x467   : > { %v1675_v11 = vadd.f32 %v2031_v42, %v1674_v9 }
 0x469   : > { %v1708_v5 = vmul.f32 %v2030_v18, %v1675_v11 }
 0x46b   : > { %v1716_v50 = vadd.f32 %v1708_v5, %v1696_v60 }
 0x46d   : > { %1724 = vst.msk [vmem:[%s2812_s11 + $0x8] sm:$0xff] %vm631_vm1, %v1716_v50 }
 0x485   : > { %v1677_v40 = vpop.f32.mrf.mxu1 }
 0x486   : > { %v1678_v63 = vadd.f32 %v2031_v42, %v1677_v40 }
 0x488   : > { %v1709_v36 = vmul.f32 %v2030_v18, %v1678_v63 }
 0x48a   : > { %v1717_v41 = vadd.f32 %v1709_v36, %v1697_v45 }
 0x48c   : > { %1725 = vst.msk [vmem:[%s2812_s11 + $0x10] sm:$0xff] %vm631_vm1, %v1717_v41 }
 0x4b0   : > { %v1680_v26 = vpop.f32.mrf.mxu1 }
 0x4b1   : > { %v1681_v20 = vadd.f32 %v2031_v42, %v1680_v26 }
 0x4b3   : > { %v1710_v8 = vmul.f32 %v2030_v18, %v1681_v20 }
 0x4b5   : > { %v1718_v13 = vadd.f32 %v1710_v8, %v1698_v35 }
 0x4b7   : > { %1726 = vst.msk [vmem:[%s2812_s11 + $0x18] sm:$0xff] %vm631_vm1, %v1718_v13 }
 0x4b8   : > { %v1683_v10 = vpop.f32.mrf.mxu1 }
 0x4b9   : > { %v1684_v12 = vadd.f32 %v2031_v42, %v1683_v10 }
 0x4bb   : > { %v1711_v16 = vmul.f32 %v2030_v18, %v1684_v12 }
 0x4bd   : > { %v1719_v55 = vadd.f32 %v1711_v16, %v1699_v17 }
 0x4bf   : > { %1727 = vst.msk [vmem:[%s2812_s11 + $0x20] sm:$0xff] %vm631_vm1, %v1719_v55 }
 0x4c0   : > { %v1686_v39 = vpop.f32.mrf.mxu1 }
 0x4c1   : > { %v1687_v27 = vadd.f32 %v2031_v42, %v1686_v39 }
 0x4c3   : > { %v1712_v25 = vmul.f32 %v2030_v18, %v1687_v27 }
 0x4c5   : > { %v1720_v14 = vadd.f32 %v1712_v25, %v1700_v0 }
 0x4c7   : > { %1728 = vst.msk [vmem:[%s2812_s11 + $0x28] sm:$0xff] %vm631_vm1, %v1720_v14 }
 0x4c8   : > { %v1689_v52 = vpop.f32.mrf.mxu1 }
 0x4c9   : > { %v1690_v30 = vadd.f32 %v2031_v42, %v1689_v52 }
 0x4cb   : > { %v1713_v32 = vmul.f32 %v2030_v18, %v1690_v30 }
 0x4cd   : > { %v1721_v49 = vadd.f32 %v1713_v32, %v1701_v28 }
 0x4cf   : > { %1729 = vst.msk [vmem:[%s2812_s11 + $0x30] sm:$0xff] %vm631_vm1, %v1721_v49 }
 0x4d0   : > { %v1692_v53 = vpop.f32.mrf.mxu1 }
 0x4d1   : > { %v1693_v44 = vadd.f32 %v2031_v42, %v1692_v53 }
 0x4d3   : > { %v1714_v33 = vmul.f32 %v2030_v18, %v1693_v44 }
 0x4d5   : > { %v1722_v58 = vadd.f32 %v1714_v33, %v1702_v54 }
 0x4d7   : > { %1730 = vst.msk [vmem:[%s2812_s11 + $0x38] sm:$0xff] %vm631_vm1, %v1722_v58 }
 0x4d8 PF: > { %s17_s26 = sadd.s32 1, %s2150_s26   ;;  %s2854_s24 = smov %s2146_s25 }
 0x4d9   : > { %p14_p5 = scmp.ge.s32.totalorder %s17_s26, 4   ;;  %s2855_s25 = smov %s2857_s27 }
 0x4db   :  { %16 = sbr.rel (!%p14_p5) target bundleno = 2 (0x2), region = 101 }

// kernel: model_forward.35
= control target key start
LH: loop header
LB: loop body
LE: loop exit
PB: predicated region body
PF: predicated region fallthrough
CT: control target
= control target key end

     0   :  { %s533_s12 = smov 0   ;;  %s535_s13 = smov 0   ;;  %s584_s0 = inlined_call_operand.vmem [shape: f32[2,8,32], index: 0, kind: input, shape index: {}]   ;;  %s585_s1 = inlined_call_operand.vmem [shape: f32[32,64], index: 1, kind: input, shape index: {}]   ;;  %s586_s2 = inlined_call_operand.vmem [shape: f32[1,64], index: 2, kind: input, shape index: {}]   ;;  %s587_s3 = inlined_call_operand.vmem [shape: f32[2,8,64], index: 3, kind: output, shape index: {}]  }
   0x1   :  { %s537_s14 = smov 0  }
   0x2 LB: > { %s39_s15 = sadd.s32 1, %s506_s13  ;;  %p456_p0 = scmp.ge.s32.totalorder %s510_s14, 1  ;;  %s510_s14 = sphi %s537_s14, %s13_s14   ;;  %s506_s13 = sphi %s535_s13, %s589_s13   ;;  %s502_s12 = sphi %s533_s12, %s588_s12  }
   0x3   : > { %p41_p1 = scmp.ge.s32.totalorder %s39_s15, 2  ;;  %p200_p2 = scmp.lt.s32.totalorder %s510_s14, 3 }
   0x5   : > { %s591_s15 = smov (%p41_p1, %s39_s15), 0  ;;  %p201_p3 = pnand %p456_p0, %p200_p2 }
   0x6   : > { %p245_p4 = scmp.lt.s32.totalorder (!%p201_p3), %s502_s12, 1 }
   0x7   : > { %204 = sbr.rel (%p201_p3) target bundleno = 159 (0x9f), region = 32 }
   0xc   : > { %v288_v0 = vld [vmem:[%s585_s1 + $0x18] sm:$0xff]  ;;  %v287_v1 = vld [vmem:[%s585_s1 + $0x10] sm:$0xff]  ;;  %vm281_vm0 = vcmask 523264   ;;  %v286_v2 = vld [vmem:[%s585_s1 + $0x8] sm:$0xff]  ;;  %s593_s12 = smov (!%p245_p4, %s502_s12), 1  ;;  %v512_v3 = vmov 0.0  }
   0xd   : > { %305 = vmatpush.msra.mxu0 %v288_v0  ;;  %282 = vst.msk [vmem:[#allocation2] sm:$0xff] %vm281_vm0, %v512_v3  ;;  %v285_v4 = vld [vmem:[%s585_s1] sm:$0xff]  ;;  %s457_s24 = sshll.u32 %s593_s12, 3  ;;  %vm289_vm1 = vcmask 261120  }
   0xe   : > { %s254_s27 = scalar_lea.vmem %s584_s0, %s457_s24  ;;  %v487_v9 = vld [vmem:[%s586_s2] ss:$0 sm:$0xff]  ;;  %s276_s5 = scalar_lea.vmem %s587_s3, %s457_s24 }
   0xf   : > { %306 = vmatpush.msra.mxu0 %v287_v1  ;;  %v283_v5 = vld [vmem:[%s254_s27] sm:$0xff] }
  0x11   : > { %307 = vmatpush.msra.mxu0 %v286_v2 }
  0x13   : > { %308 = vmatpush.msra.mxu0 %v285_v4 }
  0x14   : > { %459 = vmatmul.msk.f32.vlgmr.msra.gmra.mxu0 %vm289_vm1, %v283_v5  ;;  %v284_v6 = vld [vmem:[#allocation2] sm:$0xff] }
  0x91   : > { %v310_v7 = vpop.f32.mrf.mxu0 }
  0x92   : > { %v313_v8 = vadd.f32 %v310_v7, %v284_v6 }
  0x94   : > { %315 = vst.msk [vmem:[#allocation2] sm:$0xff] %vm281_vm0, %v313_v8 }
  0x9b   : > { %v319_v10 = vld [vmem:[#allocation2] sm:$0xff] }
  0x9c   : > { %v324_v11 = vadd.f32 %v487_v9, %v319_v10 }
  0x9e   : > { %325 = vst.msk [vmem:[%s276_s5] sm:$0xff] %vm281_vm0, %v324_v11 }
  0x9f PF: > { %s13_s14 = sadd.s32 1, %s510_s14   ;;  %s588_s12 = smov %s506_s13 }
  0xa0   : > { %p10_p5 = scmp.ge.s32.totalorder %s13_s14, 4   ;;  %s589_s13 = smov %s591_s15 }
  0xa2   :  { %12 = sbr.rel (!%p10_p5) target bundleno = 2 (0x2), region = 76 }

// kernel: model_forward.37
= control target key start
LH: loop header
LB: loop body
LE: loop exit
PB: predicated region body
PF: predicated region fallthrough
CT: control target
= control target key end

     0   :  { %s1966_s21 = smov 0   ;;  %s1968_s22 = smov 0   ;;  %s2582_s0 = inlined_call_operand.vmem [shape: f32[2,64,64], index: 0, kind: input, shape index: {}]   ;;  %s2583_s1 = inlined_call_operand.vmem [shape: f32[2,8,64], index: 1, kind: input, shape index: {}]   ;;  %s2584_s2 = inlined_call_operand.vmem [shape: f32[2,8,64], index: 2, kind: input, shape index: {}]   ;;  %s2585_s3 = inlined_call_operand.vmem [shape: f32[64,64], index: 3, kind: input, shape index: {}]   ;;  %s2586_s4 = inlined_call_operand.vmem [shape: f32[1,64], index: 4, kind: input, shape index: {}]   ;;  %s2587_s5 = inlined_call_operand.vmem [shape: f32[2,64,64], index: 5, kind: input, shape index: {}]   ;;  %s2588_s6 = inlined_call_operand.vmem [shape: f32[2,64,64], index: 6, kind: output, shape index: {}]  }
   0x1   :  { %s1970_s23 = smov 0  }
   0x2 LB: > { %s35_s24 = sadd.s32 1, %s1920_s22  ;;  %p1714_p0 = scmp.ge.s32.totalorder %s1924_s23, 1  ;;  %s1924_s23 = sphi %s1970_s23, %s16_s23   ;;  %s1920_s22 = sphi %s1968_s22, %s2590_s22   ;;  %s1916_s21 = sphi %s1966_s21, %s2589_s21  }
   0x3   : > { %p37_p1 = scmp.ge.s32.totalorder %s35_s24, 2  ;;  %p285_p2 = scmp.lt.s32.totalorder %s1924_s23, 3 }
   0x5   : > { %s2592_s24 = smov (%p37_p1, %s35_s24), 0  ;;  %p286_p3 = pnand %p1714_p0, %p285_p2 }
   0x6   : > { %p347_p4 = scmp.lt.s32.totalorder (!%p286_p3), %s1916_s21, 1  ;;  %s1926_s12 = smov (!%p286_p3), 96  }
   0x7   : > { %289 = sbr.rel (%p286_p3) target bundleno = 1416 (0x588), region = 44  ;;  %s1930_s13 = smov (!%p286_p3), 32  }
   0xc   : > { %s2594_s21 = smov (!%p347_p4, %s1916_s21), 1  ;;  %vm427_vm0 = vcmask 261120   ;;  %vm539_vm1 = vcmask 64512   ;;  %vm394_vm2 = vcmask 7168   ;;  %v1927_v30 = vmov -inf  }
   0xd   : > { %s1984_s25 = sshll.u32 %s2594_s21, 6  ;;  %s1717_s26 = sshll.u32 %s2594_s21, 3  ;;  %396 = vst.msk [vmem:[#allocation2 + $0x8] sm:$0xff] %vm394_vm2, %v1927_v30  ;;  %v1928_v33 = vmov 0.0   ;;  %v1929_v37 = vmov 0   ;;  %vm1482_vm3 = vcmask 523264  }
   0xe   : > { %s354_s29 = scalar_lea.vmem %s2582_s0, %s1984_s25  ;;  %s362_s8 = scalar_lea.vmem %s2583_s1, %s1717_s26  ;;  %395 = vst.msk [vmem:[#allocation2] sm:$0xff] %vm394_vm2, %v1927_v30  ;;  %1802 = vset.pattern.permute.xlu1 %v1929_v37  ;;  %1803 = vset.pattern.permute.xlu0 %v1929_v37 }
   0xf   : > { %s369_s11 = scalar_lea.vmem %s2584_s2, %s1717_s26  ;;  %v452_v0 = vld [vmem:[%s362_s8] sm:$0xff]  ;;  %v445_v3 = vld [vmem:[%s354_s29 + $0x8] sm:$0xff]  ;;  %v447_v4 = vld [vmem:[%s354_s29 + $0x18] sm:$0xff]  ;;  %397 = vst.msk [vmem:[#allocation2 + $0x10] sm:$0xff] %vm394_vm2, %v1927_v30  ;;  %1804 = vset.pattern.permute.xlu2 %v1929_v37  ;;  %s2542_s17 = scalar_lea.vmem %s2588_s6, %s1984_s25 }
  0x10   : > { %v453_v1 = vld [vmem:[%s369_s11] sm:$0xff]  ;;  %1723 = vmatpush.xpose.msk.msra.mxu0 %vm427_vm0, %v452_v0  ;;  %878 = vrot.lane.b32.xlu2 %v452_v0, %s1926_s12  ;;  %v2001_v5 = vld [vmem:[%s354_s29 + $0x10] sm:$0xff]  ;;  %v449_v6 = vld [vmem:[%s354_s29 + $0x28] sm:$0xff]  ;;  %398 = vst.msk [vmem:[#allocation2 + $0x18] sm:$0xff] %vm394_vm2, %v1927_v30 }
  0x11   : > { %v444_v2 = vld [vmem:[%s354_s29] sm:$0xff]  ;;  %1771 = vmatpush.msra.mxu2 %v453_v1  ;;  %1772 = vmatpush.msra.mxu3 %v453_v1  ;;  %v451_v7 = vld [vmem:[%s354_s29 + $0x38] sm:$0xff]  ;;  %v2015_v9 = vld [vmem:[%s354_s29 + $0x30] sm:$0xff]  ;;  %399 = vst.msk [vmem:[#allocation2 + $0x20] sm:$0xff] %vm394_vm2, %v1927_v30 }
  0x12   : > { %1770 = vmatpush.msra.mxu1 %v453_v1  ;;  %v2008_v8 = vld [vmem:[%s354_s29 + $0x20] sm:$0xff]  ;;  %400 = vst.msk [vmem:[#allocation2 + $0x28] sm:$0xff] %vm394_vm2, %v1927_v30 }
  0x13   : > { %1724 = vmatmul.msk.f32.vlgmr.msra.gmra.mxu0 %vm427_vm0, %v444_v2  ;;  %401 = vst.msk [vmem:[#allocation2 + $0x30] sm:$0xff] %vm394_vm2, %v1927_v30 }
  0x14   : > { %756 = vmatpush.msrb.mxu0 %v453_v1  ;;  %402 = vst.msk [vmem:[#allocation2 + $0x38] sm:$0xff] %vm394_vm2, %v1927_v30  ;;  %v2096_v38 = vld [vmem:[#allocation2 + $0x8] sm:$0xff] }
  0x15   : > { %403 = vst.msk [vmem:[#allocation2 + $0x40] sm:$0xff] %vm394_vm2, %v1927_v30 }
  0x16   : > { %404 = vst.msk [vmem:[#allocation2 + $0x48] sm:$0xff] %vm394_vm2, %v1927_v30  ;;  %v2155_v59 = vld [vmem:[#allocation2 + $0x10] sm:$0xff] }
  0x17   : > { %405 = vst.msk [vmem:[#allocation2 + $0x50] sm:$0xff] %vm394_vm2, %v1927_v30  ;;  %v2111_v41 = vld [vmem:[#allocation2 + $0x18] sm:$0xff] }
  0x18   : > { %862 = vrot.lane.b32.xlu2 %v444_v2, %s1926_s12  ;;  %406 = vst.msk [vmem:[#allocation2 + $0x58] sm:$0xff] %vm394_vm2, %v1927_v30  ;;  %v2118_v44 = vld [vmem:[#allocation2 + $0x20] sm:$0xff] }
  0x19   : > { %407 = vst.msk [vmem:[#allocation2 + $0x60] sm:$0xff] %vm394_vm2, %v1927_v30  ;;  %v2128_v48 = vld [vmem:[#allocation2 + $0x28] sm:$0xff] }
  0x1a   : > { %408 = vst.msk [vmem:[#allocation2 + $0x68] sm:$0xff] %vm394_vm2, %v1927_v30  ;;  %v2144_v54 = vld [vmem:[#allocation2 + $0x30] sm:$0xff] }
  0x1b   : > { %1725 = vmatmul.msk.f32.gmra.mxu0 %vm427_vm0, %v445_v3  ;;  %409 = vst.msk [vmem:[#allocation2 + $0x70] sm:$0xff] %vm394_vm2, %v1927_v30 }
  0x1c   : > { %410 = vst.msk [vmem:[#allocation2 + $0x78] sm:$0xff] %vm394_vm2, %v1927_v30 }
  0x1d   : > { %411 = vst.msk [vmem:[#allocation3] sm:$0xff] %vm394_vm2, %v1928_v33 }
  0x1e   : > { %412 = vst.msk [vmem:[#allocation3 + $0x8] sm:$0xff] %vm394_vm2, %v1928_v33 }
  0x1f   : > { %413 = vst.msk [vmem:[#allocation3 + $0x10] sm:$0xff] %vm394_vm2, %v1928_v33 }
  0x20   : > { %868 = vrot.lane.b32.xlu2 %v447_v4, %s1926_s12  ;;  %414 = vst.msk [vmem:[#allocation3 + $0x18] sm:$0xff] %vm394_vm2, %v1928_v33 }
  0x21   : > { %415 = vst.msk [vmem:[#allocation3 + $0x20] sm:$0xff] %vm394_vm2, %v1928_v33 }
  0x22   : > { %416 = vst.msk [vmem:[#allocation3 + $0x28] sm:$0xff] %vm394_vm2, %v1928_v33 }
  0x23   : > { %1726 = vmatmul.msk.f32.gmra.mxu0 %vm427_vm0, %v2001_v5  ;;  %417 = vst.msk [vmem:[#allocation3 + $0x30] sm:$0xff] %vm394_vm2, %v1928_v33 }
  0x24   : > { %418 = vst.msk [vmem:[#allocation3 + $0x38] sm:$0xff] %vm394_vm2, %v1928_v33 }
  0x25   : > { %419 = vst.msk [vmem:[#allocation3 + $0x40] sm:$0xff] %vm394_vm2, %v1928_v33 }
  0x26   : > { %420 = vst.msk [vmem:[#allocation3 + $0x48] sm:$0xff] %vm394_vm2, %v1928_v33 }
  0x27   : > { %421 = vst.msk [vmem:[#allocation3 + $0x50] sm:$0xff] %vm394_vm2, %v1928_v33 }
  0x28   : > { %872 = vrot.lane.b32.xlu2 %v449_v6, %s1926_s12  ;;  %422 = vst.msk [vmem:[#allocation3 + $0x58] sm:$0xff] %vm394_vm2, %v1928_v33 }
  0x29   : > { %423 = vst.msk [vmem:[#allocation3 + $0x60] sm:$0xff] %vm394_vm2, %v1928_v33 }
  0x2a   : > { %424 = vst.msk [vmem:[#allocation3 + $0x68] sm:$0xff] %vm394_vm2, %v1928_v33 }
  0x2b   : > { %1727 = vmatmul.msk.f32.gmra.mxu0 %vm427_vm0, %v447_v4  ;;  %425 = vst.msk [vmem:[#allocation3 + $0x70] sm:$0xff] %vm394_vm2, %v1928_v33 }
  0x2c   : > { %426 = vst.msk [vmem:[#allocation3 + $0x78] sm:$0xff] %vm394_vm2, %v1928_v33 }
  0x2d   : > { %428 = vst.msk [vmem:[#allocation4] sm:$0xff] %vm427_vm0, %v1928_v33 }
  0x2e   : > { %429 = vst.msk [vmem:[#allocation4 + $0x8] sm:$0xff] %vm427_vm0, %v1928_v33 }
  0x2f   : > { %430 = vst.msk [vmem:[#allocation4 + $0x10] sm:$0xff] %vm427_vm0, %v1928_v33 }
  0x30   : > { %876 = vrot.lane.b32.xlu2 %v451_v7, %s1926_s12  ;;  %431 = vst.msk [vmem:[#allocation4 + $0x18] sm:$0xff] %vm427_vm0, %v1928_v33 }
  0x31   : > { %432 = vst.msk [vmem:[#allocation4 + $0x20] sm:$0xff] %vm427_vm0, %v1928_v33 }
  0x32   : > { %433 = vst.msk [vmem:[#allocation4 + $0x28] sm:$0xff] %vm427_vm0, %v1928_v33 }
  0x33   : > { %1728 = vmatmul.msk.f32.gmra.mxu0 %vm427_vm0, %v2008_v8  ;;  %434 = vst.msk [vmem:[#allocation4 + $0x30] sm:$0xff] %vm427_vm0, %v1928_v33 }
  0x34   : > { %435 = vst.msk [vmem:[#allocation4 + $0x38] sm:$0xff] %vm427_vm0, %v1928_v33 }
  0x35   : > { %436 = vst.msk [vmem:[#allocation4 + $0x40] sm:$0xff] %vm427_vm0, %v1928_v33 }
  0x36   : > { %437 = vst.msk [vmem:[#allocation4 + $0x48] sm:$0xff] %vm427_vm0, %v1928_v33 }
  0x37   : > { %438 = vst.msk [vmem:[#allocation4 + $0x50] sm:$0xff] %vm427_vm0, %v1928_v33 }
  0x38   : > { %1134 = vrot.lane.b32.xlu2 %v453_v1, %s1926_s12  ;;  %439 = vst.msk [vmem:[#allocation4 + $0x58] sm:$0xff] %vm427_vm0, %v1928_v33 }
  0x39   : > { %440 = vst.msk [vmem:[#allocation4 + $0x60] sm:$0xff] %vm427_vm0, %v1928_v33 }
  0x3a   : > { %441 = vst.msk [vmem:[#allocation4 + $0x68] sm:$0xff] %vm427_vm0, %v1928_v33 }
  0x3b   : > { %1729 = vmatmul.msk.f32.gmra.mxu0 %vm427_vm0, %v449_v6  ;;  %442 = vst.msk [vmem:[#allocation4 + $0x70] sm:$0xff] %vm427_vm0, %v1928_v33 }
  0x3c   : > { %443 = vst.msk [vmem:[#allocation4 + $0x78] sm:$0xff] %vm427_vm0, %v1928_v33 }
  0x43   : > { %1730 = vmatmul.msk.f32.gmra.mxu0 %vm427_vm0, %v2015_v9 }
  0x4b   : > { %1731 = vmatmul.msk.f32.gmra.mxu0 %vm427_vm0, %v451_v7 }
  0x6a   : > { %v879_v19 = vpop.permute.xlu2 %878 }
  0x6b   : > { %1740 = vmatpush.xpose.msk.msrb.mxu2 %vm427_vm0, %v879_v19 }
  0x72   : > { %v2039_v25 = vpop.permute.xlu2 %862 }
  0x7a   : > { %v2041_v26 = vpop.permute.xlu2 %868 }
  0x82   : > { %v2044_v27 = vpop.permute.xlu2 %872 }
  0x8a   : > { %v2046_v28 = vpop.permute.xlu2 %876 }
  0x90   : > { %v2020_v10 = vpop.f32.mrf.mxu0 }
  0x91   : > { %v2161_v62 = vmul.f32 0.17677669, %v2020_v10 }
  0x92   : > { %v1135_v29 = vpop.permute.xlu2 %1134 }
  0x93   : > { %1176 = vmatpush.msrb.mxu3 %v1135_v29  ;;  %v540_v63 = vsel %vm539_vm1, %v2161_v62, -inf }
  0x98   : > { %v502_v11 = vpop.f32.mrf.mxu0 }
  0x99   : > { %v2022_v12 = vmul.f32 0.17677669, %v502_v11  ;;  %v2186_v11 = vld [vmem:[#allocation2 + $0x38] sm:$0xff] }
  0x9b   : > { %v543_v13 = vsel %vm539_vm1, %v2022_v12, -inf }
  0x9c   : > { %544 = vmax.xlane.f32.xlu2 %v543_v13 }
  0xa0   : > { %v505_v14 = vpop.f32.mrf.mxu0 }
  0xa1   : > { %v2076_v35 = vmul.f32 0.17677669, %v505_v14 }
  0xa3   : > { %v546_v36 = vsel %vm539_vm1, %v2076_v35, -inf }
  0xa8   : > { %v508_v15 = vpop.f32.mrf.mxu0 }
  0xa9   : > { %v2026_v16 = vmul.f32 0.17677669, %v508_v15 }
  0xab   : > { %v549_v17 = vsel %vm539_vm1, %v2026_v16, -inf }
  0xac   : > { %550 = vmax.xlane.f32.xlu2 %v549_v17  ;;  %v2197_v17 = vld [vmem:[#allocation2] sm:$0xff] }
  0xb0   : > { %v511_v18 = vpop.f32.mrf.mxu0 }
  0xb1   : > { %v2030_v20 = vmul.f32 0.17677669, %v511_v18 }
  0xb3   : > { %v552_v21 = vsel %vm539_vm1, %v2030_v20, -inf }
  0xb4   : > { %553 = vmax.xlane.f32.xlu0 %v552_v21 }
  0xb8   : > { %v514_v22 = vpop.f32.mrf.mxu0 }
  0xb9   : > { %v2035_v23 = vmul.f32 0.17677669, %v514_v22 }
  0xbb   : > { %v555_v24 = vsel %vm539_vm1, %v2035_v23, -inf }
  0xbc   : > { %556 = vmax.xlane.f32.xlu0 %v555_v24 }
  0xc0   : > { %v517_v31 = vpop.f32.mrf.mxu0 }
  0xc1   : > { %v2064_v32 = vmul.f32 0.17677669, %v517_v31 }
  0xc3   : > { %v558_v34 = vsel %vm539_vm1, %v2064_v32, -inf }
  0xc8   : > { %v520_v53 = vpop.f32.mrf.mxu0 }
  0xc9   : > { %v2146_v56 = vmul.f32 0.17677669, %v520_v53 }
  0xcb   : > { %v561_v58 = vsel %vm539_vm1, %v2146_v56, -inf }
  0xd0   : > { %864 = vrot.lane.b32.xlu0 %v445_v3, %s1926_s12 }
  0xfa   : > { %559 = vmax.xlane.f32.xlu0 %v558_v34 }
 0x102   : > { %547 = vmax.xlane.f32.xlu0 %v546_v36 }
 0x10f   : > { %v545_v39 = vpop.xlane.xlu2 %544 }
 0x110   : > { %v2102_v40 = vmax.f32 %v2096_v38, %v545_v39 }
 0x112   : > { %855 = vst.msk [vmem:[#allocation2 + $0x8] sm:$0xff] %vm394_vm2, %v2102_v40 }
 0x11f   : > { %v551_v42 = vpop.xlane.xlu2 %550 }
 0x120   : > { %v2114_v43 = vmax.f32 %v2111_v41, %v551_v42 }
 0x122   : > { %857 = vst.msk [vmem:[#allocation2 + $0x18] sm:$0xff] %vm394_vm2, %v2114_v43 }
 0x127   : > { %v554_v45 = vpop.xlane.xlu0 %553 }
 0x128   : > { %v2121_v46 = vmax.f32 %v2118_v44, %v554_v45 }
 0x12a   : > { %v576_v47 = vsub.f32 %v2118_v44, %v2121_v46  ;;  %858 = vst.msk [vmem:[#allocation2 + $0x20] sm:$0xff] %vm394_vm2, %v2121_v46  ;;  %618 = vperm.xlu1 %1802, %v2121_v46  }
 0x12f   : > { %v557_v49 = vpop.xlane.xlu0 %556 }
 0x130   : > { %v2131_v50 = vmax.f32 %v2128_v48, %v557_v49 }
 0x132   : > { %v577_v51 = vsub.f32 %v2128_v48, %v2131_v50  ;;  %859 = vst.msk [vmem:[#allocation2 + $0x28] sm:$0xff] %vm394_vm2, %v2131_v50  ;;  %623 = vperm.xlu1 %1802, %v2131_v50   ;;  %v1205_v48 = vld [vmem:[#allocation4 + $0x50] sm:$0xff] }
 0x13a   : > { %866 = vrot.lane.b32.xlu1 %v2001_v5, %s1926_s12 }
 0x142   : > { %870 = vrot.lane.b32.xlu1 %v2008_v8, %s1926_s12  ;;  %v865_v52 = vpop.permute.xlu0 %864 }
 0x14a   : > { %874 = vrot.lane.b32.xlu1 %v2015_v9, %s1926_s12  ;;  %s2532_s12 = scalar_lea.vmem %s2587_s5, %s1984_s25 }
 0x16d   : > { %v560_v55 = vpop.xlane.xlu0 %559 }
 0x16e   : > { %v2149_v57 = vmax.f32 %v2144_v54, %v560_v55 }
 0x170   : > { %860 = vst.msk [vmem:[#allocation2 + $0x30] sm:$0xff] %vm394_vm2, %v2149_v57 }
 0x174   : > { %562 = vmax.xlane.f32.xlu1 %v561_v58 }
 0x175   : > { %v548_v60 = vpop.xlane.xlu0 %547 }
 0x176   : > { %v2158_v61 = vmax.f32 %v2155_v59, %v548_v60 }
 0x178   : > { %856 = vst.msk [vmem:[#allocation2 + $0x10] sm:$0xff] %vm394_vm2, %v2158_v61 }
 0x17c   : > { %541 = vmax.xlane.f32.xlu1 %v540_v63 }
 0x19c   : > { %v619_v0 = vpop.permute.xlu1 %618 }
 0x19d   : > { %v640_v1 = vsub.f32 %v2030_v20, %v619_v0 }
 0x19f   : > { %v652_v2 = vmul.f32 1.442695, %v640_v1 }
 0x1a1   : > { %1806 = vpow2.f32 %v652_v2 }
 0x1a4   : > { %v624_v3 = vpop.permute.xlu1 %623 }
 0x1a5   : > { %v641_v4 = vsub.f32 %v2035_v23, %v624_v3 }
 0x1a7   : > { %v2169_v5 = vpop.eup %1806  ;;  %v654_v6 = vmul.f32 1.442695, %v641_v4 }
 0x1a8   : > { %1736 = vmatmul.msk.f32.vlgmr.msra.gmra.mxu2 %vm539_vm1, %v2169_v5 }
 0x1a9   : > { %1808 = vpow2.f32 %v654_v6 }
 0x1ac   : > { %v867_v8 = vpop.permute.xlu1 %866 }
 0x1af   : > { %v2173_v7 = vpop.eup %1808 }
 0x1b0   : > { %1737 = vmatmul.msk.f32.gmra.mxu2 %vm539_vm1, %v2173_v7 }
 0x1b4   : > { %v871_v9 = vpop.permute.xlu1 %870 }
 0x1b8   : > { %1741 = vmatmul.msk.f32.vlgmr.msrb.gmra.mxu2 %vm427_vm0, %v2039_v25 }
 0x1bc   : > { %v875_v10 = vpop.permute.xlu1 %874 }
 0x1c0   : > { %1742 = vmatmul.msk.f32.gmra.mxu2 %vm427_vm0, %v865_v52 }
 0x1c8   : > { %1743 = vmatmul.msk.f32.gmra.mxu2 %vm427_vm0, %v867_v8 }
 0x1d0   : > { %1744 = vmatmul.msk.f32.gmra.mxu2 %vm427_vm0, %v2041_v26 }
 0x1d8   : > { %1745 = vmatmul.msk.f32.gmra.mxu2 %vm427_vm0, %v871_v9 }
 0x1e0   : > { %1746 = vmatmul.msk.f32.gmra.mxu2 %vm427_vm0, %v2044_v27 }
 0x1e7   : > { %v563_v13 = vpop.xlane.xlu1 %562 }
 0x1e8   : > { %v2189_v14 = vmax.f32 %v2186_v11, %v563_v13  ;;  %1747 = vmatmul.msk.f32.gmra.mxu2 %vm427_vm0, %v875_v10 }
 0x1ea   : > { %v579_v15 = vsub.f32 %v2186_v11, %v2189_v14  ;;  %861 = vst.msk [vmem:[#allocation2 + $0x38] sm:$0xff] %vm394_vm2, %v2189_v14  ;;  %633 = vperm.xlu1 %1802, %v2189_v14  }
 0x1ef   : > { %v542_v18 = vpop.xlane.xlu1 %541 }
 0x1f0   : > { %v2200_v19 = vmax.f32 %v2197_v17, %v542_v18  ;;  %1748 = vmatmul.msk.f32.gmra.mxu2 %vm427_vm0, %v2046_v28 }
 0x1f2   : > { %v572_v20 = vsub.f32 %v2197_v17, %v2200_v19  ;;  %854 = vst.msk [vmem:[#allocation2] sm:$0xff] %vm394_vm2, %v2200_v19  ;;  %598 = vperm.xlu0 %1803, %v2200_v19  }
 0x1fa   : > { %603 = vperm.xlu0 %1803, %v2102_v40  }
 0x202   : > { %608 = vperm.xlu0 %1803, %v2158_v61  }
 0x20a   : > { %628 = vperm.xlu0 %1803, %v2149_v57  }
 0x22b   : > { %v2212_v21 = vpop.f32.mrf.mxu2 }
 0x233   : > { %v2214_v22 = vpop.f32.mrf.mxu2 }
 0x23b   : > { %v915_v23 = vpop.f32.mrf.mxu2 }
 0x23c   : > { %v2216_v24 = vmul.f32 0.17677669, %v915_v23 }
 0x23e   : > { %v956_v25 = vsel %vm539_vm1, %v2216_v24, -inf }
 0x23f   : > { %957 = vmax.xlane.f32.xlu2 %v956_v25 }
 0x243   : > { %v918_v26 = vpop.f32.mrf.mxu2 }
 0x244   : > { %v2220_v27 = vmul.f32 0.17677669, %v918_v26 }
 0x246   : > { %v959_v28 = vsel %vm539_vm1, %v2220_v27, -inf }
 0x247   : > { %960 = vmax.xlane.f32.xlu0 %v959_v28 }
 0x24b   : > { %v921_v29 = vpop.f32.mrf.mxu2 }
 0x24c   : > { %v2224_v30 = vmul.f32 0.17677669, %v921_v29 }
 0x24e   : > { %v962_v31 = vsel %vm539_vm1, %v2224_v30, -inf }
 0x24f   : > { %963 = vmax.xlane.f32.xlu2 %v962_v31 }
 0x253   : > { %v924_v33 = vpop.f32.mrf.mxu2 }
 0x254   : > { %v2247_v9 = vmul.f32 0.17677669, %v924_v33 }
 0x25b   : > { %v927_v34 = vpop.f32.mrf.mxu2 }
 0x25c   : > { %v2228_v36 = vmul.f32 0.17677669, %v927_v34  ;;  %v634_v18 = vpop.permute.xlu1 %633 }
 0x25d   : > { %v643_v26 = vsub.f32 %v2146_v56, %v634_v18  ;;  %v948_v56 = vld [vmem:[#allocation2 + $0x40] sm:$0xff] }
 0x25e   : > { %v968_v37 = vsel %vm539_vm1, %v2228_v36, -inf }
 0x25f   : > { %969 = vmax.xlane.f32.xlu2 %v968_v37  ;;  %v658_v31 = vmul.f32 1.442695, %v643_v26 }
 0x263   : > { %v930_v39 = vpop.f32.mrf.mxu2 }
 0x264   : > { %v2232_v42 = vmul.f32 0.17677669, %v930_v39  ;;  %v599_v45 = vpop.permute.xlu0 %598 }
 0x265   : > { %v636_v49 = vsub.f32 %v2161_v62, %v599_v45 }
 0x266   : > { %v971_v52 = vsel %vm539_vm1, %v2232_v42, -inf }
 0x267   : > { %v644_v53 = vmul.f32 1.442695, %v636_v49  ;;  %972 = vmax.xlane.f32.xlu2 %v971_v52  ;;  %v949_v52 = vld [vmem:[#allocation2 + $0x48] sm:$0xff] }
 0x269   : > { %1810 = vpow2.f32 %v644_v53 }
 0x26b   : > { %v933_v55 = vpop.f32.mrf.mxu2 }
 0x26c   : > { %v2237_v58 = vmul.f32 0.17677669, %v933_v55  ;;  %v604_v60 = vpop.permute.xlu0 %603 }
 0x26d   : > { %v637_v63 = vsub.f32 %v2022_v12, %v604_v60 }
 0x26e   : > { %v974_v0 = vsel %vm539_vm1, %v2237_v58, -inf }
 0x26f   : > { %v1811_v1 = vpop.eup %1810  ;;  %v646_v2 = vmul.f32 1.442695, %v637_v63  ;;  %975 = vmax.xlane.f32.xlu0 %v974_v0  ;;  %v950_v63 = vld [vmem:[#allocation2 + $0x50] sm:$0xff] }
 0x270   : > { %1732 = vmatmul.msk.f32.vlgmr.msrb.gmra.mxu0 %vm539_vm1, %v1811_v1  ;;  %v676_v62 = vsel %vm539_vm1, %v1811_v1, 0.0 }
 0x271   : > { %1812 = vpow2.f32 %v646_v2  ;;  %677 = vadd.xlane.f32.xlu1 %v676_v62  ;;  %v952_v62 = vld [vmem:[#allocation2 + $0x60] sm:$0xff] }
 0x273   : > { %v936_v28 = vpop.f32.mrf.mxu2 }
 0x274   : > { %v609_v3 = vpop.permute.xlu0 %608  ;;  %v2257_v29 = vmul.f32 0.17677669, %v936_v28 }
 0x275   : > { %v638_v4 = vsub.f32 %v2076_v35, %v609_v3  ;;  %v965_v35 = vsel %vm539_vm1, %v2247_v9, -inf }
 0x277   : > { %v1813_v6 = vpop.eup %1812  ;;  %v648_v8 = vmul.f32 1.442695, %v638_v4 }
 0x278   : > { %1733 = vmatmul.msk.f32.gmra.mxu0 %vm539_vm1, %v1813_v6  ;;  %v679_v12 = vsel %vm539_vm1, %v1813_v6, 0.0 }
 0x279   : > { %1814 = vpow2.f32 %v648_v8  ;;  %680 = vadd.xlane.f32.xlu1 %v679_v12  ;;  %v580_v8 = vmul.f32 1.442695, %v572_v20  ;;  %v2280_v12 = vld [vmem:[#allocation2 + $0x68] sm:$0xff]  ;;  %v2296_v20 = vld [vmem:[#allocation2 + $0x70] sm:$0xff] }
 0x27c   : > { %v629_v10 = vpop.permute.xlu0 %628 }
 0x27d   : > { %v642_v13 = vsub.f32 %v2064_v32, %v629_v10  ;;  %v977_v32 = vsel %vm539_vm1, %v2257_v29, -inf  ;;  %v573_v10 = vsub.f32 %v2096_v38, %v2102_v40  ;;  %v660_v38 = vld [vmem:[#allocation3] sm:$0xff] }
 0x27f   : > { %v2250_v23 = vpop.eup %1814  ;;  %v656_v25 = vmul.f32 1.442695, %v642_v13  ;;  %v582_v17 = vmul.f32 1.442695, %v573_v10  ;;  %v2315_v10 = vld [vmem:[#allocation2 + $0x78] sm:$0xff] }
 0x280   : > { %1734 = vmatmul.msk.f32.vlgmr.msra.gmra.mxu1 %vm539_vm1, %v2250_v23 }
 0x281   : > { %1816 = vpow2.f32 %v656_v25  ;;  %966 = vmax.xlane.f32.xlu1 %v965_v35 }
 0x282   : > { %1818 = vpow2.f32 %v658_v31 }
 0x287   : > { %v2259_v33 = vpop.eup %1816 }
 0x288   : > { %1738 = vmatmul.msk.f32.vlgmr.msra.gmra.mxu3 %vm539_vm1, %v2259_v33  ;;  %v2265_v34 = vpop.eup %1818 }
 0x289   : > { %978 = vmax.xlane.f32.xlu1 %v977_v32 }
 0x290   : > { %1739 = vmatmul.msk.f32.gmra.mxu3 %vm539_vm1, %v2265_v34 }
 0x2b2   : > { %v958_v37 = vpop.xlane.xlu2 %957 }
 0x2b3   : > { %v980_v39 = vmax.f32 %v948_v56, %v958_v37  ;;  %v682_v37 = vsel %vm539_vm1, %v2250_v23, 0.0 }
 0x2b5   : > { %v988_v45 = vsub.f32 %v948_v56, %v980_v39  ;;  %1275 = vst.msk [vmem:[#allocation2 + $0x40] sm:$0xff] %vm394_vm2, %v980_v39  ;;  %1014 = vperm.xlu2 %1804, %v980_v39  }
 0x2b7   : > { %v996_v49 = vmul.f32 1.442695, %v988_v45  ;;  %v661_v45 = vld [vmem:[#allocation3 + $0x8] sm:$0xff] }
 0x2b9   : > { %1820 = vpow2.f32 %v996_v49 }
 0x2ba   : > { %v961_v53 = vpop.xlane.xlu0 %960 }
 0x2bb   : > { %v981_v55 = vmax.f32 %v949_v52, %v961_v53 }
 0x2bd   : > { %1276 = vst.msk [vmem:[#allocation2 + $0x48] sm:$0xff] %vm394_vm2, %v981_v55  ;;  %1019 = vperm.xlu2 %1804, %v981_v55   ;;  %v989_v2 = vsub.f32 %v949_v52, %v981_v55 }
 0x2bf   : > { %v2271_v60 = vpop.eup %1820  ;;  %v998_v3 = vmul.f32 1.442695, %v989_v2 }
 0x2c0   : > { %1213 = vperm.xlu0 %1803, %v2271_v60  }
 0x2c1   : > { %1822 = vpow2.f32 %v998_v3 }
 0x2c2   : > { %v964_v0 = vpop.xlane.xlu2 %963  ;;  %1824 = vpow2.f32 %v580_v8 }
 0x2c3   : > { %v982_v1 = vmax.f32 %v950_v63, %v964_v0  ;;  %1826 = vpow2.f32 %v582_v17  ;;  %v951_v0 = vld [vmem:[#allocation2 + $0x58] sm:$0xff] }
 0x2c5   : > { %1277 = vst.msk [vmem:[#allocation2 + $0x50] sm:$0xff] %vm394_vm2, %v982_v1  ;;  %1024 = vperm.xlu1 %1802, %v982_v1   ;;  %v990_v23 = vsub.f32 %v950_v63, %v982_v1 }
 0x2c7   : > { %v2287_v25 = vpop.eup %1822  ;;  %v1000_v17 = vmul.f32 1.442695, %v990_v23 }
 0x2c8   : > { %v2294_v19 = vpop.eup %1824 }
 0x2c9   : > { %v668_v28 = vmul.f32 %v2294_v19, %v660_v38  ;;  %v2310_v39 = vpop.eup %1826 }
 0x2ca   : > { %v669_v49 = vmul.f32 %v2310_v39, %v661_v45 }
 0x2cd   : > { %613 = vperm.xlu1 %1802, %v2114_v43  }
 0x2d2   : > { %v970_v4 = vpop.xlane.xlu2 %969 }
 0x2d3   : > { %v984_v6 = vmax.f32 %v952_v62, %v970_v4 }
 0x2d5   : > { %1279 = vst.msk [vmem:[#allocation2 + $0x60] sm:$0xff] %vm394_vm2, %v984_v6  ;;  %1034 = vperm.xlu1 %1802, %v984_v6   ;;  %v992_v55 = vsub.f32 %v952_v62, %v984_v6 }
 0x2d7   : > { %v1004_v2 = vmul.f32 1.442695, %v992_v55 }
 0x2d9   : > { %1828 = vpow2.f32 %v1004_v2 }
 0x2da   : > { %v973_v13 = vpop.xlane.xlu2 %972 }
 0x2db   : > { %v2285_v18 = vmax.f32 %v2280_v12, %v973_v13 }
 0x2dd   : > { %v993_v35 = vsub.f32 %v2280_v12, %v2285_v18  ;;  %1280 = vst.msk [vmem:[#allocation2 + $0x68] sm:$0xff] %vm394_vm2, %v2285_v18  ;;  %1218 = vperm.xlu1 %1802, %v2287_v25  }
 0x2e2   : > { %v976_v40 = vpop.xlane.xlu0 %975 }
 0x2e3   : > { %v2299_v26 = vmax.f32 %v2296_v20, %v976_v40 }
 0x2e4   : > { %v678_v31 = vpop.xlane.xlu1 %677 }
 0x2e5   : > { %v994_v32 = vsub.f32 %v2296_v20, %v2299_v26  ;;  %1281 = vst.msk [vmem:[#allocation2 + $0x70] sm:$0xff] %vm394_vm2, %v2299_v26  ;;  %v700_v56 = vadd.f32 %v678_v31, %v668_v28  ;;  %1044 = vperm.xlu1 %1802, %v2299_v26   ;;  %v2320_v28 = vpop.eup %1828  ;;  %v1078_v26 = vld [vmem:[#allocation3 + $0x48] sm:$0xff] }
 0x2e6   : > { %683 = vadd.xlane.f32.xlu2 %v682_v37 }
 0x2e7   : > { %709 = vst.msk [vmem:[#allocation3] sm:$0xff] %vm394_vm2, %v700_v56 }
 0x2ec   : > { %v681_v52 = vpop.xlane.xlu1 %680 }
 0x2ed   : > { %v701_v53 = vadd.f32 %v681_v52, %v669_v49 }
 0x2ef   : > { %710 = vst.msk [vmem:[#allocation3 + $0x8] sm:$0xff] %vm394_vm2, %v701_v53 }
 0x2f4   : > { %v967_v3 = vpop.xlane.xlu1 %966 }
 0x2f5   : > { %v983_v4 = vmax.f32 %v951_v0, %v967_v3 }
 0x2f7   : > { %v991_v8 = vsub.f32 %v951_v0, %v983_v4  ;;  %1278 = vst.msk [vmem:[#allocation2 + $0x58] sm:$0xff] %vm394_vm2, %v983_v4  ;;  %1029 = vperm.xlu0 %1803, %v983_v4   ;;  %v688_v0 = vsel %vm539_vm1, %v2169_v5, 0.0  ;;  %v694_v5 = vsel %vm539_vm1, %v2259_v33, 0.0 }
 0x2f9   : > { %v1002_v13 = vmul.f32 1.442695, %v991_v8 }
 0x2fb   : > { %1830 = vpow2.f32 %v1002_v13 }
 0x2fc   : > { %v979_v38 = vpop.xlane.xlu1 %978  ;;  %1832 = vpow2.f32 %v1000_v17 }
 0x2fd   : > { %v2318_v40 = vmax.f32 %v2315_v10, %v979_v38 }
 0x2fe   : > { %1039 = vperm.xlu2 %1804, %v2285_v18  }
 0x2ff   : > { %v995_v62 = vsub.f32 %v2315_v10, %v2318_v40  ;;  %1282 = vst.msk [vmem:[#allocation2 + $0x78] sm:$0xff] %vm394_vm2, %v2318_v40  ;;  %1233 = vperm.xlu0 %1803, %v2320_v28   ;;  %1049 = vperm.xlu1 %1802, %v2318_v40   ;;  %v1081_v40 = vld [vmem:[#allocation3 + $0x60] sm:$0xff] }
 0x301   : > { %v2329_v63 = vpop.eup %1830 }
 0x302   : > { %v2331_v1 = vpop.eup %1832 }
 0x306   : > { %1228 = vperm.xlu2 %1804, %v2329_v63  }
 0x307   : > { %1223 = vperm.xlu1 %1802, %v2331_v1  }
 0x30f   : > { %v1015_v6 = vpop.permute.xlu2 %1014 }
 0x310   : > { %v1052_v31 = vsub.f32 %v2216_v24, %v1015_v6  ;;  %v1006_v24 = vmul.f32 1.442695, %v993_v35 }
 0x312   : > { %v1060_v56 = vmul.f32 1.442695, %v1052_v31 }
 0x314   : > { %1834 = vpow2.f32 %v1060_v56  ;;  %v662_v56 = vld [vmem:[#allocation3 + $0x10] sm:$0xff] }
 0x317   : > { %v1020_v37 = vpop.permute.xlu2 %1019 }
 0x318   : > { %v1053_v45 = vsub.f32 %v2220_v27, %v1020_v37 }
 0x31a   : > { %v1835_v49 = vpop.eup %1834  ;;  %v1062_v52 = vmul.f32 1.442695, %v1053_v45 }
 0x31b   : > { %1749 = vmatmul.msk.f32.vlgmr.msrb.gmra.mxu3 %vm539_vm1, %v1835_v49  ;;  %v1093_v27 = vsel %vm539_vm1, %v1835_v49, 0.0 }
 0x31c   : > { %1836 = vpow2.f32 %v1062_v52 }
 0x31d   : > { %1838 = vpow2.f32 %v1006_v24 }
 0x322   : > { %v1837_v53 = vpop.eup %1836 }
 0x323   : > { %1750 = vmatmul.msk.f32.gmra.mxu3 %vm539_vm1, %v1837_v53  ;;  %v1096_v55 = vsel %vm539_vm1, %v1837_v53, 0.0  ;;  %v2347_v8 = vpop.eup %1838 }
 0x329   : > { %1097 = vadd.xlane.f32.xlu0 %v1096_v55 }
 0x32f   : > { %689 = vadd.xlane.f32.xlu2 %v688_v0 }
 0x337   : > { %1094 = vadd.xlane.f32.xlu2 %v1093_v27  ;;  %v1025_v2 = vpop.permute.xlu1 %1024 }
 0x338   : > { %v1054_v3 = vsub.f32 %v2224_v30, %v1025_v2  ;;  %v574_v30 = vsub.f32 %v2155_v59, %v2158_v61 }
 0x33a   : > { %v1064_v4 = vmul.f32 1.442695, %v1054_v3  ;;  %v584_v17 = vmul.f32 1.442695, %v574_v30 }
 0x33c   : > { %1840 = vpow2.f32 %v1064_v4 }
 0x33d   : > { %1238 = vperm.xlu0 %1803, %v2347_v8  }
 0x33f   : > { %695 = vadd.xlane.f32.xlu2 %v694_v5  ;;  %v614_v23 = vpop.permute.xlu1 %613 }
 0x340   : > { %v639_v12 = vsub.f32 %v2026_v16, %v614_v23  ;;  %v691_v16 = vsel %vm539_vm1, %v2173_v7, 0.0  ;;  %v1214_v7 = vpop.permute.xlu0 %1213 }
 0x342   : > { %v1841_v18 = vpop.eup %1840  ;;  %v650_v35 = vmul.f32 1.442695, %v639_v12 }
 0x343   : > { %1751 = vmatmul.msk.f32.gmra.mxu3 %vm539_vm1, %v1841_v18  ;;  %v1099_v49 = vsel %vm539_vm1, %v1841_v18, 0.0 }
 0x344   : > { %1842 = vpow2.f32 %v650_v35 }
 0x345   : > { %1844 = vpow2.f32 %v584_v17 }
 0x347   : > { %v1035_v33 = vpop.permute.xlu1 %1034 }
 0x348   : > { %v1056_v31 = vsub.f32 %v2228_v36, %v1035_v33  ;;  %v2384_v33 = vpop.f32.mrf.mxu3 }
 0x34a   : > { %v1843_v13 = vpop.eup %1842  ;;  %v1068_v61 = vmul.f32 1.442695, %v1056_v31 }
 0x34b   : > { %1735 = vmatmul.msk.f32.gmra.mxu1 %vm539_vm1, %v1843_v13  ;;  %v685_v38 = vsel %vm539_vm1, %v1843_v13, 0.0  ;;  %v2360_v6 = vpop.eup %1844 }
 0x34c   : > { %686 = vadd.xlane.f32.xlu1 %v685_v38  ;;  %v670_v59 = vmul.f32 %v2360_v6, %v662_v56  ;;  %1846 = vpow2.f32 %v1068_v61  ;;  %v1008_v38 = vmul.f32 1.442695, %v994_v32  ;;  %v588_v56 = vmul.f32 1.442695, %v576_v47  ;;  %v1203_v61 = vld [vmem:[#allocation4 + $0x40] sm:$0xff] }
 0x34d   : > { %v697_v47 = vsel %vm539_vm1, %v2265_v34, 0.0 }
 0x34f   : > { %v2366_v52 = vpop.permute.xlu1 %1218 }
 0x350   : > { %v2396_v20 = vpop.f32.mrf.mxu3 }
 0x352   : > { %v1847_v53 = vpop.eup %1846 }
 0x353   : > { %v1105_v55 = vsel %vm539_vm1, %v1847_v53, 0.0 }
 0x354   : > { %692 = vadd.xlane.f32.xlu1 %v691_v16  ;;  %v1294_v16 = vld [vmem:[#allocation3] sm:$0xff] }
 0x357   : > { %v1045_v36 = vpop.permute.xlu1 %1044 }
 0x358   : > { %v1058_v18 = vsub.f32 %v2237_v58, %v1045_v36  ;;  %v664_v36 = vld [vmem:[#allocation3 + $0x20] sm:$0xff] }
 0x359   : > { %v684_v37 = vpop.xlane.xlu2 %683 }
 0x35a   : > { %v702_v45 = vadd.f32 %v684_v37, %v670_v59 }
 0x35c   : > { %711 = vst.msk [vmem:[#allocation3 + $0x10] sm:$0xff] %vm394_vm2, %v702_v45  ;;  %1100 = vadd.xlane.f32.xlu1 %v1099_v49  ;;  %v1086_v45 = vmul.f32 %v2287_v25, %v1078_v26  ;;  %v663_v26 = vld [vmem:[#allocation3 + $0x18] sm:$0xff] }
 0x361   : > { %v1040_v0 = vpop.permute.xlu2 %1039 }
 0x362   : > { %v1057_v2 = vsub.f32 %v2232_v42, %v1040_v0  ;;  %v1072_v42 = vmul.f32 1.442695, %v1058_v18 }
 0x364   : > { %v1070_v4 = vmul.f32 1.442695, %v1057_v2 }
 0x367   : > { %1106 = vadd.xlane.f32.xlu0 %v1105_v55 }
 0x369   : > { %v1030_v24 = vpop.permute.xlu0 %1029  ;;  %v2398_v37 = vpop.permute.xlu2 %1228 }
 0x36a   : > { %v1055_v27 = vsub.f32 %v2247_v9, %v1030_v24  ;;  %v578_v24 = vsub.f32 %v2144_v54, %v2149_v57 }
 0x36c   : > { %v1066_v3 = vmul.f32 1.442695, %v1055_v27  ;;  %v1295_v27 = vld [vmem:[#allocation3 + $0x8] sm:$0xff]  ;;  %v592_v34 = vmul.f32 1.442695, %v578_v24 }
 0x36e   : > { %1848 = vpow2.f32 %v1066_v3 }
 0x36f   : > { %1850 = vpow2.f32 %v1070_v4 }
 0x371   : > { %v1050_v5 = vpop.permute.xlu1 %1049  ;;  %v2393_v59 = vpop.permute.xlu0 %1233 }
 0x372   : > { %v1059_v23 = vsub.f32 %v2257_v29, %v1050_v5 }
 0x374   : > { %v1849_v12 = vpop.eup %1848  ;;  %v1074_v35 = vmul.f32 1.442695, %v1059_v23  ;;  %v1077_v23 = vld [vmem:[#allocation3 + $0x40] sm:$0xff] }
 0x375   : > { %1752 = vmatmul.msk.f32.gmra.mxu3 %vm539_vm1, %v1849_v12  ;;  %792 = vperm.xlu1 %1802, %v2294_v19   ;;  %v1102_v30 = vsel %vm539_vm1, %v1849_v12, 0.0  ;;  %v1851_v9 = vpop.eup %1850  ;;  %v1085_v57 = vmul.f32 %v2271_v60, %v1077_v23  ;;  %v1089_v23 = vmul.f32 %v2320_v28, %v1081_v40 }
 0x376   : > { %1852 = vpow2.f32 %v1074_v35  ;;  %1103 = vadd.xlane.f32.xlu2 %v1102_v30  ;;  %v1108_v29 = vsel %vm539_vm1, %v1851_v9, 0.0  ;;  %v666_v30 = vld [vmem:[#allocation3 + $0x30] sm:$0xff] }
 0x377   : > { %1854 = vpow2.f32 %v1072_v42  ;;  %v1296_v42 = vld [vmem:[#allocation3 + $0x10] sm:$0xff] }
 0x378   : > { %1856 = vpow2.f32 %v1008_v38 }
 0x379   : > { %1858 = vrcp.f32 %v1294_v16 }
 0x37a   : > { %1860 = vpow2.f32 %v588_v56 }
 0x37b   : > { %1862 = vrcp.f32 %v1295_v27  ;;  %v1010_v27 = vmul.f32 1.442695, %v995_v62 }
 0x37c   : > { %v1853_v13 = vpop.eup %1852  ;;  %1864 = vpow2.f32 %v592_v34 }
 0x37d   : > { %1753 = vmatmul.msk.f32.gmra.mxu3 %vm539_vm1, %v1847_v53  ;;  %v1114_v58 = vsel %vm539_vm1, %v1853_v13, 0.0  ;;  %v1855_v17 = vpop.eup %1854  ;;  %v1251_v53 = vmul.f32 %v1214_v7, %v1203_v61  ;;  %v1204_v7 = vld [vmem:[#allocation4 + $0x48] sm:$0xff]  ;;  %1866 = vrcp.f32 %v1296_v42 }
 0x37e   : > { %1109 = vadd.xlane.f32.xlu2 %v1108_v29  ;;  %1115 = vadd.xlane.f32.xlu0 %v1114_v58  ;;  %v1111_v19 = vsel %vm539_vm1, %v1855_v17, 0.0  ;;  %v2387_v31 = vpop.eup %1856  ;;  %v1252_v4 = vmul.f32 %v2366_v52, %v1204_v7 }
 0x37f   : > { %v1859_v32 = vpop.eup %1858 }
 0x380   : > { %v2401_v44 = vpop.eup %1860 }
 0x381   : > { %v672_v25 = vmul.f32 %v2401_v44, %v664_v36  ;;  %v1863_v54 = vpop.eup %1862 }
 0x382   : > { %v2418_v52 = vpop.eup %1864 }
 0x385   : > { %1754 = vmatmul.msk.f32.gmra.mxu3 %vm539_vm1, %v1851_v9 }
 0x386   : > { %1112 = vadd.xlane.f32.xlu2 %v1111_v19  ;;  %v1867_v19 = vpop.eup %1866 }
 0x38d   : > { %1755 = vmatmul.msk.f32.gmra.mxu3 %vm539_vm1, %v1855_v17 }
 0x392   : > { %1243 = vperm.xlu0 %1803, %v2387_v31  }
 0x395   : > { %1756 = vmatmul.msk.f32.gmra.mxu3 %vm539_vm1, %v1853_v13  ;;  %v674_v13 = vmul.f32 %v2418_v52, %v666_v30 }
 0x39a   : > { %1312 = vperm.xlu0 %1803, %v1859_v32  }
 0x39c   : > { %v1098_v49 = vpop.xlane.xlu0 %1097 }
 0x39d   : > { %v1118_v55 = vadd.f32 %v1098_v49, %v1086_v45 }
 0x39e   : > { %v1178_v46 = vpop.f32.mrf.mxu3 }
 0x39f   : > { %1126 = vst.msk [vmem:[#allocation3 + $0x48] sm:$0xff] %vm394_vm2, %v1118_v55  ;;  %v1259_v0 = vadd.f32 %v1251_v53, %v1178_v46  ;;  %698 = vadd.xlane.f32.xlu1 %v697_v47 }
 0x3a1   : > { %1267 = vst.msk [vmem:[#allocation4 + $0x40] sm:$0xff] %vm427_vm0, %v1259_v0 }
 0x3a2   : > { %v690_v2 = vpop.xlane.xlu2 %689  ;;  %802 = vperm.xlu0 %1803, %v2360_v6   ;;  %v575_v6 = vsub.f32 %v2111_v41, %v2114_v43  ;;  %v1224_v41 = vpop.permute.xlu1 %1223  ;;  %v590_v43 = vmul.f32 1.442695, %v577_v51  ;;  %v665_v51 = vld [vmem:[#allocation3 + $0x28] sm:$0xff] }
 0x3a3   : > { %v704_v3 = vadd.f32 %v690_v2, %v672_v25  ;;  %v1253_v55 = vmul.f32 %v1224_v41, %v1205_v48  ;;  %v1079_v25 = vld [vmem:[#allocation3 + $0x50] sm:$0xff] }
 0x3a4   : > { %v586_v9 = vmul.f32 1.442695, %v575_v6  ;;  %v1087_v7 = vmul.f32 %v2331_v1, %v1079_v25  ;;  %v1208_v25 = vld [vmem:[#allocation4 + $0x68] sm:$0xff] }
 0x3a5   : > { %713 = vst.msk [vmem:[#allocation3 + $0x20] sm:$0xff] %vm394_vm2, %v704_v3 }
 0x3a6   : > { %v1181_v5 = vpop.f32.mrf.mxu3  ;;  %1868 = vpow2.f32 %v586_v9  ;;  %v1367_v16 = vld [vmem:[#allocation3 + $0x48] sm:$0xff]  ;;  %v758_v9 = vpop.f32.mrf.mxu0 }
 0x3a7   : > { %v1260_v12 = vadd.f32 %v1252_v4, %v1181_v5 }
 0x3a9   : > { %1268 = vst.msk [vmem:[#allocation4 + $0x48] sm:$0xff] %vm427_vm0, %v1260_v12 }
 0x3aa   : > { %v1095_v18 = vpop.xlane.xlu2 %1094  ;;  %1317 = vperm.xlu0 %1803, %v1863_v54  }
 0x3ab   : > { %v1117_v35 = vadd.f32 %v1095_v18, %v1085_v57  ;;  %v782_v18 = vld [vmem:[#allocation4] sm:$0xff] }
 0x3ac   : > { %v1298_v17 = vld [vmem:[#allocation3 + $0x20] sm:$0xff]  ;;  %v2425_v38 = vpop.eup %1868 }
 0x3ad   : > { %1125 = vst.msk [vmem:[#allocation3 + $0x40] sm:$0xff] %vm394_vm2, %v1117_v35  ;;  %v671_v32 = vmul.f32 %v2425_v38, %v663_v26  ;;  %v1080_v35 = vld [vmem:[#allocation3 + $0x58] sm:$0xff] }
 0x3ae   : > { %v1088_v42 = vmul.f32 %v2329_v63, %v1080_v35  ;;  %v1206_v26 = vld [vmem:[#allocation4 + $0x58] sm:$0xff] }
 0x3af   : > { %v2439_v4 = vpop.permute.xlu0 %1238 }
 0x3b2   : > { %v696_v29 = vpop.xlane.xlu2 %695 }
 0x3b3   : > { %v706_v58 = vadd.f32 %v696_v29, %v674_v13 }
 0x3b4   : > { %v1366_v60 = vld [vmem:[#allocation3 + $0x40] sm:$0xff] }
 0x3b5   : > { %715 = vst.msk [vmem:[#allocation3 + $0x30] sm:$0xff] %vm394_vm2, %v706_v58  ;;  %1870 = vrcp.f32 %v1366_v60  ;;  %v1082_v58 = vld [vmem:[#allocation3 + $0x68] sm:$0xff]  ;;  %v1084_v60 = vld [vmem:[#allocation3 + $0x78] sm:$0xff] }
 0x3b6   : > { %1872 = vrcp.f32 %v1298_v17  ;;  %v1090_v17 = vmul.f32 %v2347_v8, %v1082_v58 }
 0x3b7   : > { %1874 = vpow2.f32 %v590_v43 }
 0x3b8   : > { %1322 = vperm.xlu1 %1802, %v1867_v19   ;;  %1876 = vrcp.f32 %v1367_v16 }
 0x3b9   : > { %1878 = vpow2.f32 %v1010_v27  ;;  %v594_v27 = vmul.f32 1.442695, %v579_v15  ;;  %v667_v15 = vld [vmem:[#allocation3 + $0x38] sm:$0xff] }
 0x3bb   : > { %v1871_v56 = vpop.eup %1870 }
 0x3bc   : > { %1384 = vperm.xlu2 %1804, %v1871_v56   ;;  %v1873_v61 = vpop.eup %1872  ;;  %v1300_v62 = vld [vmem:[#allocation3 + $0x30] sm:$0xff] }
 0x3bd   : > { %v2428_v53 = vpop.eup %1874 }
 0x3be   : > { %v1877_v50 = vpop.eup %1876  ;;  %v673_v47 = vmul.f32 %v2428_v53, %v665_v51 }
 0x3bf   : > { %v687_v45 = vpop.xlane.xlu1 %686  ;;  %v1879_v10 = vpop.eup %1878 }
 0x3c0   : > { %v703_v49 = vadd.f32 %v687_v45, %v671_v32  ;;  %1332 = vperm.xlu1 %1802, %v1873_v61   ;;  %v1092_v19 = vmul.f32 %v1879_v10, %v1084_v60  ;;  %v1083_v32 = vld [vmem:[#allocation3 + $0x70] sm:$0xff]  ;;  %v1254_v61 = vmul.f32 %v2398_v37, %v1206_v26  ;;  %v783_v60 = vld [vmem:[#allocation4 + $0x8] sm:$0xff] }
 0x3c2   : > { %712 = vst.msk [vmem:[#allocation3 + $0x18] sm:$0xff] %vm394_vm2, %v703_v49  ;;  %v1091_v49 = vmul.f32 %v2387_v31, %v1083_v32 }
 0x3c4   : > { %1389 = vperm.xlu2 %1804, %v1877_v50  }
 0x3c6   : > { %v1184_v46 = vpop.f32.mrf.mxu3 }
 0x3c7   : > { %v1261_v36 = vadd.f32 %v1253_v55, %v1184_v46  ;;  %v693_v0 = vpop.xlane.xlu1 %692  ;;  %v1207_v46 = vld [vmem:[#allocation4 + $0x60] sm:$0xff] }
 0x3c8   : > { %v705_v24 = vadd.f32 %v693_v0, %v673_v47  ;;  %v1255_v47 = vmul.f32 %v2393_v59, %v1207_v46 }
 0x3c9   : > { %1269 = vst.msk [vmem:[#allocation4 + $0x50] sm:$0xff] %vm427_vm0, %v1261_v36 }
 0x3ca   : > { %714 = vst.msk [vmem:[#allocation3 + $0x28] sm:$0xff] %vm394_vm2, %v705_v24 }
 0x3cc   : > { %797 = vperm.xlu2 %1804, %v2310_v39  }
 0x3cf   : > { %v1101_v2 = vpop.xlane.xlu1 %1100 }
 0x3d0   : > { %v1119_v3 = vadd.f32 %v1101_v2, %v1087_v7  ;;  %v1256_v2 = vmul.f32 %v2439_v4, %v1208_v25 }
 0x3d1   : > { %v1299_v34 = vld [vmem:[#allocation3 + $0x28] sm:$0xff] }
 0x3d2   : > { %1127 = vst.msk [vmem:[#allocation3 + $0x50] sm:$0xff] %vm394_vm2, %v1119_v3  ;;  %1880 = vrcp.f32 %v1299_v34 }
 0x3d3   : > { %1882 = vrcp.f32 %v1300_v62  ;;  %v1209_v62 = vld [vmem:[#allocation4 + $0x70] sm:$0xff] }
 0x3d4   : > { %1248 = vperm.xlu2 %1804, %v1879_v10  }
 0x3d8   : > { %v1881_v5 = vpop.eup %1880 }
 0x3d9   : > { %1337 = vperm.xlu1 %1802, %v1881_v5   ;;  %v1368_v39 = vld [vmem:[#allocation3 + $0x50] sm:$0xff]  ;;  %v1883_v54 = vpop.eup %1882 }
 0x3da   : > { %v1107_v12 = vpop.xlane.xlu0 %1106  ;;  %1884 = vrcp.f32 %v1368_v39 }
 0x3db   : > { %v1121_v1 = vadd.f32 %v1107_v12, %v1089_v23 }
 0x3dd   : > { %1129 = vst.msk [vmem:[#allocation3 + $0x60] sm:$0xff] %vm394_vm2, %v1121_v1  ;;  %v784_v1 = vld [vmem:[#allocation4 + $0x10] sm:$0xff] }
 0x3e0   : > { %v1885_v57 = vpop.eup %1884 }
 0x3e1   : > { %1342 = vperm.xlu1 %1802, %v1883_v54   ;;  %1394 = vperm.xlu0 %1803, %v1885_v57  }
 0x3e4   : > { %v1370_v51 = vld [vmem:[#allocation3 + $0x60] sm:$0xff] }
 0x3e7   : > { %v793_v6 = vpop.permute.xlu1 %792 }
 0x3e8   : > { %v830_v30 = vmul.f32 %v793_v6, %v782_v18  ;;  %v764_v6 = vpop.f32.mrf.mxu1 }
 0x3e9   : > { %v1104_v13 = vpop.xlane.xlu2 %1103 }
 0x3ea   : > { %v838_v28 = vadd.f32 %v830_v30, %v758_v9  ;;  %v1120_v29 = vadd.f32 %v1104_v13, %v1088_v42  ;;  %v1358_v30 = vld [vmem:[#allocation4 + $0x40] sm:$0xff] }
 0x3ec   : > { %846 = vst.msk [vmem:[#allocation4] sm:$0xff] %vm427_vm0, %v838_v28  ;;  %v1359_v28 = vld [vmem:[#allocation4 + $0x48] sm:$0xff] }
 0x3ed   : > { %1128 = vst.msk [vmem:[#allocation3 + $0x58] sm:$0xff] %vm394_vm2, %v1120_v29 }
 0x3f1   : > { %v1110_v41 = vpop.xlane.xlu2 %1109  ;;  %v1116_v43 = vpop.xlane.xlu0 %1115 }
 0x3f2   : > { %v1122_v16 = vadd.f32 %v1110_v41, %v1090_v17  ;;  %v1124_v56 = vadd.f32 %v1116_v43, %v1092_v19  ;;  %v761_v41 = vpop.f32.mrf.mxu0 }
 0x3f3   : > { %v1286_v25 = vld [vmem:[#allocation4] sm:$0xff] }
 0x3f4   : > { %1130 = vst.msk [vmem:[#allocation3 + $0x68] sm:$0xff] %vm394_vm2, %v1122_v16  ;;  %v1369_v63 = vld [vmem:[#allocation3 + $0x58] sm:$0xff] }
 0x3f5   : > { %1132 = vst.msk [vmem:[#allocation3 + $0x78] sm:$0xff] %vm394_vm2, %v1124_v56  ;;  %1886 = vrcp.f32 %v1369_v63  ;;  %v1210_v16 = vld [vmem:[#allocation4 + $0x78] sm:$0xff] }
 0x3f6   : > { %1888 = vrcp.f32 %v1370_v51  ;;  %v1360_v51 = vld [vmem:[#allocation4 + $0x50] sm:$0xff] }
 0x3f8   : > { %v1187_v45 = vpop.f32.mrf.mxu3 }
 0x3f9   : > { %v1262_v48 = vadd.f32 %v1254_v61, %v1187_v45  ;;  %v1113_v8 = vpop.xlane.xlu2 %1112  ;;  %v1476_v61 = vld [vmem:[%s2585_s3 + $0x30] sm:$0xff]  ;;  %v1474_v45 = vld [vmem:[%s2585_s3 + $0x20] sm:$0xff] }
 0x3fa   : > { %v1123_v50 = vadd.f32 %v1113_v8, %v1091_v49  ;;  %v1472_v8 = vld [vmem:[%s2585_s3 + $0x10] sm:$0xff] }
 0x3fb   : > { %v1887_v55 = vpop.eup %1886  ;;  %1270 = vst.msk [vmem:[#allocation4 + $0x58] sm:$0xff] %vm427_vm0, %v1262_v48  ;;  %v1371_v37 = vld [vmem:[#allocation3 + $0x68] sm:$0xff]  ;;  %v1473_v48 = vld [vmem:[%s2585_s3 + $0x18] sm:$0xff] }
 0x3fc   : > { %1131 = vst.msk [vmem:[#allocation3 + $0x70] sm:$0xff] %vm394_vm2, %v1123_v50  ;;  %1399 = vperm.xlu0 %1803, %v1887_v55   ;;  %v1889_v24 = vpop.eup %1888  ;;  %v1373_v10 = vld [vmem:[#allocation3 + $0x78] sm:$0xff]  ;;  %v1471_v50 = vld [vmem:[%s2585_s3 + $0x8] sm:$0xff] }
 0x400   : > { %v1190_v36 = vpop.f32.mrf.mxu3 }
 0x401   : > { %v1263_v0 = vadd.f32 %v1255_v47, %v1190_v36  ;;  %v1297_v47 = vld [vmem:[#allocation3 + $0x18] sm:$0xff]  ;;  %v1470_v36 = vld [vmem:[%s2585_s3] sm:$0xff] }
 0x403   : > { %1271 = vst.msk [vmem:[#allocation4 + $0x60] sm:$0xff] %vm427_vm0, %v1263_v0  ;;  %v1372_v31 = vld [vmem:[#allocation3 + $0x70] sm:$0xff] }
 0x404   : > { %1404 = vperm.xlu0 %1803, %v1889_v24   ;;  %v1244_v7 = vpop.permute.xlu0 %1243  ;;  %1890 = vrcp.f32 %v1372_v31  ;;  %v1361_v24 = vld [vmem:[#allocation4 + $0x58] sm:$0xff] }
 0x405   : > { %1892 = vrcp.f32 %v1371_v37  ;;  %v1257_v5 = vmul.f32 %v1244_v7, %v1209_v62 }
 0x406   : > { %1894 = vpow2.f32 %v594_v27 }
 0x407   : > { %1896 = vrcp.f32 %v1373_v10 }
 0x408   : > { %v1193_v59 = vpop.f32.mrf.mxu3  ;;  %1898 = vrcp.f32 %v1297_v47 }
 0x409   : > { %v1264_v3 = vadd.f32 %v1256_v2, %v1193_v59 }
 0x40a   : > { %v1891_v34 = vpop.eup %1890 }
 0x40b   : > { %v1893_v40 = vpop.eup %1892  ;;  %1272 = vst.msk [vmem:[#allocation4 + $0x68] sm:$0xff] %vm427_vm0, %v1264_v3  ;;  %1414 = vperm.xlu2 %1804, %v1891_v34   ;;  %v1362_v34 = vld [vmem:[#allocation4 + $0x60] sm:$0xff] }
 0x40c   : > { %1409 = vperm.xlu0 %1803, %v1893_v40   ;;  %v2461_v11 = vpop.permute.xlu0 %1312  ;;  %v2463_v14 = vpop.eup %1894 }
 0x40d   : > { %v675_v39 = vmul.f32 %v2463_v14, %v667_v15  ;;  %v1897_v54 = vpop.eup %1896  ;;  %v1350_v7 = vmul.f32 %v2461_v11, %v1286_v25  ;;  %v767_v11 = vpop.f32.mrf.mxu1 }
 0x40e   : > { %v1899_v0 = vpop.eup %1898 }
 0x410   : > { %v1196_v23 = vpop.f32.mrf.mxu3 }
 0x411   : > { %v1265_v4 = vadd.f32 %v1257_v5, %v1196_v23 }
 0x412   : > { %v699_v12 = vpop.xlane.xlu1 %698  ;;  %v1363_v23 = vld [vmem:[#allocation4 + $0x68] sm:$0xff] }
 0x413   : > { %1273 = vst.msk [vmem:[#allocation4 + $0x70] sm:$0xff] %vm427_vm0, %v1265_v4  ;;  %v707_v57 = vadd.f32 %v699_v12, %v675_v39 }
 0x414   : > { %1419 = vperm.xlu0 %1803, %v1897_v54   ;;  %v803_v18 = vpop.permute.xlu0 %802 }
 0x415   : > { %716 = vst.msk [vmem:[#allocation3 + $0x38] sm:$0xff] %vm394_vm2, %v707_v57  ;;  %v832_v35 = vmul.f32 %v803_v18, %v784_v1 }
 0x416   : > { %v1385_v42 = vpop.permute.xlu2 %1384 }
 0x417   : > { %v840_v9 = vadd.f32 %v832_v35, %v764_v6  ;;  %v1422_v13 = vmul.f32 %v1385_v42, %v1358_v30  ;;  %v786_v42 = vld [vmem:[#allocation4 + $0x20] sm:$0xff] }
 0x418   : > { %v1199_v63 = vpop.f32.mrf.mxu3 }
 0x419   : > { %848 = vst.msk [vmem:[#allocation4 + $0x10] sm:$0xff] %vm427_vm0, %v840_v9  ;;  %1438 = vrot.lane.b32.xlu2 %v1422_v13, %s1930_s13 }
 0x41a   : > { %v1364_v12 = vld [vmem:[#allocation4 + $0x70] sm:$0xff] }
 0x41c   : > { %v1318_v49 = vpop.permute.xlu0 %1317  ;;  %v1301_v3 = vld [vmem:[#allocation3 + $0x38] sm:$0xff] }
 0x41d   : > { %1900 = vrcp.f32 %v1301_v3 }
 0x41e   : > { %v1390_v29 = vpop.permute.xlu2 %1389 }
 0x41f   : > { %v1423_v58 = vmul.f32 %v1390_v29, %v1359_v28 }
 0x421   : > { %807 = vperm.xlu2 %1804, %v2425_v38   ;;  %1440 = vrot.lane.b32.xlu0 %v1423_v58, %s1930_s13  ;;  %v1477_v38 = vld [vmem:[%s2585_s3 + $0x38] sm:$0xff]  ;;  %v1288_v58 = vld [vmem:[#allocation4 + $0x10] sm:$0xff] }
 0x422   : > { %1515 = vmatpush.msrb.mxu1 %v1477_v38 }
 0x423   : > { %v1901_v15 = vpop.eup %1900 }
 0x424   : > { %1516 = vmatpush.msrb.mxu1 %v1476_v61  ;;  %v789_v61 = vld [vmem:[#allocation4 + $0x38] sm:$0xff] }
 0x426   : > { %v798_v17 = vpop.permute.xlu2 %797 }
 0x427   : > { %v831_v19 = vmul.f32 %v798_v17, %v783_v60 }
 0x429   : > { %v839_v43 = vadd.f32 %v831_v19, %v761_v41  ;;  %812 = vperm.xlu0 %1803, %v2401_v44   ;;  %v1475_v44 = vld [vmem:[%s2585_s3 + $0x28] sm:$0xff] }
 0x42a   : > { %1517 = vmatpush.msrb.mxu1 %v1475_v44  ;;  %v1323_v29 = vpop.permute.xlu1 %1322 }
 0x42b   : > { %847 = vst.msk [vmem:[#allocation4 + $0x8] sm:$0xff] %vm427_vm0, %v839_v43  ;;  %v1352_v60 = vmul.f32 %v1323_v29, %v1288_v58  ;;  %v787_v43 = vld [vmem:[#allocation4 + $0x28] sm:$0xff] }
 0x42c   : > { %1518 = vmatpush.msrb.mxu1 %v1474_v45  ;;  %v1553_v29 = vld [vmem:[%s2532_s12 + $0x28] sm:$0xff] }
 0x42e   : > { %v1249_v56 = vpop.permute.xlu2 %1248  ;;  %1519 = vmatpush.msrb.mxu1 %v1473_v48 }
 0x42f   : > { %v1258_v26 = vmul.f32 %v1249_v56, %v1210_v16 }
 0x430   : > { %1520 = vmatpush.msrb.mxu1 %v1472_v8 }
 0x431   : > { %v1266_v32 = vadd.f32 %v1258_v26, %v1199_v63  ;;  %v788_v63 = vld [vmem:[#allocation4 + $0x30] sm:$0xff] }
 0x432   : > { %1521 = vmatpush.msrb.mxu1 %v1471_v50  ;;  %v1287_v18 = vld [vmem:[#allocation4 + $0x8] sm:$0xff] }
 0x433   : > { %1274 = vst.msk [vmem:[#allocation4 + $0x78] sm:$0xff] %vm427_vm0, %v1266_v32  ;;  %v1351_v35 = vmul.f32 %v1318_v49, %v1287_v18  ;;  %v1551_v18 = vld [vmem:[%s2532_s12 + $0x18] sm:$0xff] }
 0x434   : > { %1522 = vmatpush.msrb.mxu1 %v1470_v36  ;;  %v1805_v36 = vld [vmem:[%s2586_s4] ss:$0 sm:$0xff] }
 0x453   : > { %v1395_v55 = vpop.permute.xlu0 %1394 }
 0x454   : > { %v1424_v46 = vmul.f32 %v1395_v55, %v1360_v51  ;;  %v1333_v51 = vpop.permute.xlu1 %1332 }
 0x456   : > { %1442 = vrot.lane.b32.xlu2 %v1424_v46, %s1930_s13 }
 0x45e   : > { %1327 = vperm.xlu2 %1804, %v1899_v0  }
 0x465   : > { %v1415_v37 = vpop.permute.xlu2 %1414 }
 0x466   : > { %817 = vperm.xlu2 %1804, %v2428_v53   ;;  %v1428_v54 = vmul.f32 %v1415_v37, %v1364_v12 }
 0x46e   : > { %v1400_v31 = vpop.permute.xlu0 %1399  ;;  %822 = vperm.xlu2 %1804, %v2418_v52   ;;  %v785_v52 = vld [vmem:[#allocation4 + $0x18] sm:$0xff] }
 0x46f   : > { %v1425_v27 = vmul.f32 %v1400_v31, %v1361_v24  ;;  %v1548_v24 = vld [vmem:[%s2532_s12] sm:$0xff] }
 0x471   : > { %1444 = vrot.lane.b32.xlu0 %v1425_v27, %s1930_s13 }
 0x473   : > { %v1439_v2 = vpop.permute.xlu2 %1438 }
 0x474   : > { %v1462_v59 = vsel %vm427_vm0, %v1350_v7, %v1439_v2 }
 0x475   : > { %1757 = vmatmul.msk.f32.vlgmr.msrb.gmra.mxu1 %vm1482_vm3, %v1462_v59 }
 0x476   : > { %v1405_v53 = vpop.permute.xlu0 %1404  ;;  %827 = vperm.xlu2 %1804, %v2463_v14   ;;  %v1365_v14 = vld [vmem:[#allocation4 + $0x78] sm:$0xff] }
 0x477   : > { %v1426_v10 = vmul.f32 %v1405_v53, %v1362_v34 }
 0x479   : > { %1446 = vrot.lane.b32.xlu0 %v1426_v10, %s1930_s13 }
 0x47b   : > { %v808_v40 = vpop.permute.xlu2 %807 }
 0x47c   : > { %v833_v62 = vmul.f32 %v808_v40, %v785_v52 }
 0x47e   : > { %v841_v5 = vadd.f32 %v833_v62, %v767_v11  ;;  %v1410_v4 = vpop.permute.xlu0 %1409  ;;  %1347 = vperm.xlu2 %1804, %v1901_v15  }
 0x47f   : > { %v1427_v39 = vmul.f32 %v1410_v4, %v1363_v23  ;;  %v1549_v23 = vld [vmem:[%s2532_s12 + $0x8] sm:$0xff] }
 0x480   : > { %849 = vst.msk [vmem:[#allocation4 + $0x18] sm:$0xff] %vm427_vm0, %v841_v5 }
 0x481   : > { %1448 = vrot.lane.b32.xlu0 %v1427_v39, %s1930_s13 }
 0x486   : > { %v1420_v1 = vpop.permute.xlu0 %1419 }
 0x487   : > { %v1429_v57 = vmul.f32 %v1420_v1, %v1365_v14  ;;  %v1289_v48 = vld [vmem:[#allocation4 + $0x18] sm:$0xff]  ;;  %v1550_v14 = vld [vmem:[%s2532_s12 + $0x10] sm:$0xff] }
 0x489   : > { %1450 = vrot.lane.b32.xlu0 %v1428_v54, %s1930_s13  ;;  %1452 = vrot.lane.b32.xlu1 %v1429_v57, %s1930_s13 }
 0x493   : > { %v1441_v6 = vpop.permute.xlu0 %1440 }
 0x494   : > { %v1463_v30 = vsel %vm427_vm0, %v1351_v35, %v1441_v6 }
 0x495   : > { %1758 = vmatmul.msk.f32.gmra.mxu1 %vm1482_vm3, %v1463_v30 }
 0x49b   : > { %v813_v9 = vpop.permute.xlu0 %812 }
 0x49c   : > { %v834_v13 = vmul.f32 %v813_v9, %v786_v42  ;;  %v1552_v42 = vld [vmem:[%s2532_s12 + $0x20] sm:$0xff] }
 0x49e   : > { %v842_v28 = vadd.f32 %v834_v13, %v2212_v21 }
 0x4a0   : > { %850 = vst.msk [vmem:[#allocation4 + $0x20] sm:$0xff] %vm427_vm0, %v842_v28 }
 0x4b0   : > { %v1443_v17 = vpop.permute.xlu2 %1442 }
 0x4b1   : > { %v1464_v19 = vsel %vm427_vm0, %v1352_v60, %v1443_v17 }
 0x4b2   : > { %1759 = vmatmul.msk.f32.gmra.mxu1 %vm1482_vm3, %v1464_v19  ;;  %v1554_v19 = vld [vmem:[%s2532_s12 + $0x30] sm:$0xff] }
 0x4b8   : > { %v1328_v41 = vpop.permute.xlu2 %1327 }
 0x4b9   : > { %v1353_v8 = vmul.f32 %v1328_v41, %v1289_v48 }
 0x4c0   : > { %v818_v16 = vpop.permute.xlu2 %817 }
 0x4c1   : > { %v835_v56 = vmul.f32 %v818_v16, %v787_v43 }
 0x4c3   : > { %v843_v26 = vadd.f32 %v835_v56, %v2214_v22  ;;  %v1555_v56 = vld [vmem:[%s2532_s12 + $0x38] sm:$0xff] }
 0x4c5   : > { %851 = vst.msk [vmem:[#allocation4 + $0x28] sm:$0xff] %vm427_vm0, %v843_v26 }
 0x4c8   : > { %v823_v21 = vpop.permute.xlu2 %822 }
 0x4c9   : > { %v836_v32 = vmul.f32 %v823_v21, %v788_v63 }
 0x4cb   : > { %v844_v38 = vadd.f32 %v836_v32, %v2384_v33  ;;  %v1290_v33 = vld [vmem:[#allocation4 + $0x20] sm:$0xff] }
 0x4cc   : > { %v1354_v55 = vmul.f32 %v1333_v51, %v1290_v33  ;;  %v1291_v0 = vld [vmem:[#allocation4 + $0x28] sm:$0xff] }
 0x4cd   : > { %852 = vst.msk [vmem:[#allocation4 + $0x30] sm:$0xff] %vm427_vm0, %v844_v38 }
 0x4d0   : > { %v828_v44 = vpop.permute.xlu2 %827 }
 0x4d1   : > { %v837_v45 = vmul.f32 %v828_v44, %v789_v61 }
 0x4d3   : > { %v845_v49 = vadd.f32 %v837_v45, %v2396_v20  ;;  %v1338_v20 = vpop.permute.xlu1 %1337 }
 0x4d4   : > { %v1355_v31 = vmul.f32 %v1338_v20, %v1291_v0  ;;  %v1292_v59 = vld [vmem:[#allocation4 + $0x30] sm:$0xff] }
 0x4d5   : > { %853 = vst.msk [vmem:[#allocation4 + $0x38] sm:$0xff] %vm427_vm0, %v845_v49 }
 0x4d8   : > { %v1348_v40 = vpop.permute.xlu2 %1347 }
 0x4db   : > { %v1343_v3 = vpop.permute.xlu1 %1342 }
 0x4dc   : > { %v1356_v34 = vmul.f32 %v1343_v3, %v1292_v59  ;;  %v1293_v52 = vld [vmem:[#allocation4 + $0x38] sm:$0xff] }
 0x4dd   : > { %v1357_v15 = vmul.f32 %v1348_v40, %v1293_v52 }
 0x4e3   : > { %v1445_v22 = vpop.permute.xlu0 %1444 }
 0x4e4   : > { %v1465_v50 = vsel %vm427_vm0, %v1353_v8, %v1445_v22 }
 0x4e5   : > { %1760 = vmatmul.msk.f32.gmra.mxu1 %vm1482_vm3, %v1465_v50 }
 0x4eb   : > { %v1447_v46 = vpop.permute.xlu0 %1446 }
 0x4ec   : > { %v1466_v47 = vsel %vm427_vm0, %v1354_v55, %v1447_v46 }
 0x4ed   : > { %1761 = vmatmul.msk.f32.gmra.mxu1 %vm1482_vm3, %v1466_v47 }
 0x4f2   : > { %v1524_v37 = vpop.f32.mrf.mxu1 }
 0x4f3   : > { %v1449_v27 = vpop.permute.xlu0 %1448  ;;  %v1525_v25 = vadd.f32 %v1805_v36, %v1524_v37 }
 0x4f4   : > { %v1467_v7 = vsel %vm427_vm0, %v1355_v31, %v1449_v27 }
 0x4f5   : > { %v1556_v2 = vadd.f32 %v1548_v24, %v1525_v25  ;;  %1762 = vmatmul.msk.f32.gmra.mxu1 %vm1482_vm3, %v1467_v7 }
 0x4f7   : > { %1564 = vst.msk [vmem:[%s2542_s17] sm:$0xff] %vm1482_vm3, %v1556_v2 }
 0x4fb   : > { %v1451_v53 = vpop.permute.xlu0 %1450  ;;  %v1453_v62 = vpop.permute.xlu1 %1452 }
 0x4fc   : > { %v1468_v10 = vsel %vm427_vm0, %v1356_v34, %v1451_v53  ;;  %v1469_v11 = vsel %vm427_vm0, %v1357_v15, %v1453_v62 }
 0x4fd   : > { %1763 = vmatmul.msk.f32.gmra.mxu1 %vm1482_vm3, %v1468_v10 }
 0x505   : > { %1764 = vmatmul.msk.f32.gmra.mxu1 %vm1482_vm3, %v1469_v11 }
 0x512   : > { %v1527_v5 = vpop.f32.mrf.mxu1 }
 0x513   : > { %v1528_v4 = vadd.f32 %v1805_v36, %v1527_v5 }
 0x515   : > { %v1557_v39 = vadd.f32 %v1549_v23, %v1528_v4 }
 0x517   : > { %1565 = vst.msk [vmem:[%s2542_s17 + $0x8] sm:$0xff] %vm1482_vm3, %v1557_v39 }
 0x52f   : > { %v1530_v12 = vpop.f32.mrf.mxu1 }
 0x530   : > { %v1531_v1 = vadd.f32 %v1805_v36, %v1530_v12 }
 0x532   : > { %v1558_v54 = vadd.f32 %v1550_v14, %v1531_v1 }
 0x534   : > { %1566 = vst.msk [vmem:[%s2542_s17 + $0x10] sm:$0xff] %vm1482_vm3, %v1558_v54 }
 0x562   : > { %v1533_v57 = vpop.f32.mrf.mxu1 }
 0x563   : > { %v1534_v35 = vadd.f32 %v1805_v36, %v1533_v57 }
 0x565   : > { %v1559_v6 = vadd.f32 %v1551_v18, %v1534_v35 }
 0x567   : > { %1567 = vst.msk [vmem:[%s2542_s17 + $0x18] sm:$0xff] %vm1482_vm3, %v1559_v6 }
 0x56a   : > { %v1536_v30 = vpop.f32.mrf.mxu1 }
 0x56b   : > { %v1537_v9 = vadd.f32 %v1805_v36, %v1536_v30 }
 0x56d   : > { %v1560_v13 = vadd.f32 %v1552_v42, %v1537_v9 }
 0x56f   : > { %1568 = vst.msk [vmem:[%s2542_s17 + $0x20] sm:$0xff] %vm1482_vm3, %v1560_v13 }
 0x572   : > { %v1539_v28 = vpop.f32.mrf.mxu1 }
 0x573   : > { %v1540_v58 = vadd.f32 %v1805_v36, %v1539_v28 }
 0x575   : > { %v1561_v60 = vadd.f32 %v1553_v29, %v1540_v58 }
 0x577   : > { %1569 = vst.msk [vmem:[%s2542_s17 + $0x28] sm:$0xff] %vm1482_vm3, %v1561_v60 }
 0x57a   : > { %v1542_v17 = vpop.f32.mrf.mxu1 }
 0x57b   : > { %v1543_v41 = vadd.f32 %v1805_v36, %v1542_v17 }
 0x57d   : > { %v1562_v43 = vadd.f32 %v1554_v19, %v1543_v41 }
 0x57f   : > { %1570 = vst.msk [vmem:[%s2542_s17 + $0x30] sm:$0xff] %vm1482_vm3, %v1562_v43 }
 0x582   : > { %v1545_v16 = vpop.f32.mrf.mxu1 }
 0x583   : > { %v1546_v26 = vadd.f32 %v1805_v36, %v1545_v16 }
 0x585   : > { %v1563_v63 = vadd.f32 %v1555_v56, %v1546_v26 }
 0x587   : > { %1571 = vst.msk [vmem:[%s2542_s17 + $0x38] sm:$0xff] %vm1482_vm3, %v1563_v63 }
 0x588 PF: > { %s16_s23 = sadd.s32 1, %s1924_s23   ;;  %s2589_s21 = smov %s1920_s22 }
 0x589   : > { %p13_p5 = scmp.ge.s32.totalorder %s16_s23, 4   ;;  %s2590_s22 = smov %s2592_s24 }
 0x58b   :  { %15 = sbr.rel (!%p13_p5) target bundleno = 2 (0x2), region = 94 }

// kernel: model_forward.50
= control target key start
LH: loop header
LB: loop body
LE: loop exit
PB: predicated region body
PF: predicated region fallthrough
CT: control target
= control target key end

     0   :  { %s955_s18 = smov 0   ;;  %s957_s19 = smov 0   ;;  %s1189_s0 = inlined_call_operand.vmem [shape: f32[2,64,256], index: 0, kind: input, shape index: {}]   ;;  %s1190_s1 = inlined_call_operand.vmem [shape: f32[256,64], index: 1, kind: input, shape index: {}]   ;;  %s1191_s2 = inlined_call_operand.vmem [shape: f32[1,64], index: 2, kind: input, shape index: {}]   ;;  %s1192_s3 = inlined_call_operand.vmem [shape: f32[2,64,64], index: 3, kind: input, shape index: {}]   ;;  %s1193_s4 = inlined_call_operand.vmem [shape: f32[2,1,64], index: 4, kind: input, shape index: {}]   ;;  %s1194_s5 = inlined_call_operand.vmem [shape: f32[2,64,64], index: 5, kind: output, shape index: {}]  }
   0x1   :  { %s959_s20 = smov 0  }
   0x2 LB: > { %s41_s21 = sadd.s32 1, %s918_s19  ;;  %p829_p0 = scmp.ge.s32.totalorder %s922_s20, 1  ;;  %s922_s20 = sphi %s959_s20, %s15_s20   ;;  %s918_s19 = sphi %s957_s19, %s1196_s19   ;;  %s914_s18 = sphi %s955_s18, %s1195_s18  }
   0x3   : > { %p43_p1 = scmp.ge.s32.totalorder %s41_s21, 2  ;;  %p291_p2 = scmp.lt.s32.totalorder %s922_s20, 3 }
   0x5   : > { %s1198_s21 = smov (%p43_p1, %s41_s21), 0  ;;  %p292_p3 = pnand %p829_p0, %p291_p2 }
   0x6   : > { %p366_p4 = scmp.lt.s32.totalorder (!%p292_p3), %s914_s18, 1 }
   0x7   : > { %295 = sbr.rel (%p292_p3) target bundleno = 220 (0xdc), region = 40 }
   0xc   : > { %v476_v0 = vld [vmem:[%s1190_s1 + $0x78] sm:$0xff]  ;;  %v475_v2 = vld [vmem:[%s1190_s1 + $0x70] sm:$0xff]  ;;  %v474_v4 = vld [vmem:[%s1190_s1 + $0x68] sm:$0xff]  ;;  %s1200_s18 = smov (!%p366_p4, %s914_s18), 1  ;;  %vm428_vm0 = vcmask 523264   ;;  %v924_v48 = vmov 0.0  }
   0xd   : > { %v492_v1 = vld [vmem:[%s1190_s1 + $0xf8] sm:$0xff]  ;;  %841 = vmatpush.msra.mxu2 %v476_v0  ;;  %v491_v3 = vld [vmem:[%s1190_s1 + $0xf0] sm:$0xff]  ;;  %v490_v5 = vld [vmem:[%s1190_s1 + $0xe8] sm:$0xff]  ;;  %493 = vmatpush.msra.mxu0 %v476_v0  ;;  %s410_s6 = scalar_lea.vmem %s1193_s4, %s1200_s18  ;;  %s838_s11 = sshll.u32 %s1200_s18, 7  ;;  %429 = vst.msk [vmem:[#allocation2] sm:$0xff] %vm428_vm0, %v924_v48 }
   0xe   : > { %857 = vmatpush.msra.mxu3 %v492_v1  ;;  %534 = vmatpush.msra.mxu1 %v492_v1  ;;  %v473_v6 = vld [vmem:[%s1190_s1 + $0x60] sm:$0xff]  ;;  %v472_v8 = vld [vmem:[%s1190_s1 + $0x58] sm:$0xff]  ;;  %v471_v10 = vld [vmem:[%s1190_s1 + $0x50] sm:$0xff]  ;;  %s1077_s26 = scalar_lea.vmem %s1189_s0, %s838_s11  ;;  %430 = vst.msk [vmem:[#allocation2 + $0x8] sm:$0xff] %vm428_vm0, %v924_v48  ;;  %s839_s7 = sshll.u32 %s1200_s18, 6 }
   0xf   : > { %842 = vmatpush.msra.mxu2 %v475_v2  ;;  %v489_v7 = vld [vmem:[%s1190_s1 + $0xe0] sm:$0xff]  ;;  %494 = vmatpush.msra.mxu0 %v475_v2  ;;  %v488_v9 = vld [vmem:[%s1190_s1 + $0xd8] sm:$0xff]  ;;  %v487_v11 = vld [vmem:[%s1190_s1 + $0xd0] sm:$0xff]  ;;  %431 = vst.msk [vmem:[#allocation2 + $0x10] sm:$0xff] %vm428_vm0, %v924_v48  ;;  %s1127_s14 = scalar_lea.vmem %s1192_s3, %s839_s7  ;;  %s1136_s15 = scalar_lea.vmem %s1194_s5, %s839_s7 }
  0x10   : > { %858 = vmatpush.msra.mxu3 %v491_v3  ;;  %535 = vmatpush.msra.mxu1 %v491_v3  ;;  %v470_v12 = vld [vmem:[%s1190_s1 + $0x48] sm:$0xff]  ;;  %v469_v14 = vld [vmem:[%s1190_s1 + $0x40] sm:$0xff]  ;;  %v468_v16 = vld [vmem:[%s1190_s1 + $0x38] sm:$0xff]  ;;  %432 = vst.msk [vmem:[#allocation2 + $0x18] sm:$0xff] %vm428_vm0, %v924_v48 }
  0x11   : > { %843 = vmatpush.msra.mxu2 %v474_v4  ;;  %495 = vmatpush.msra.mxu0 %v474_v4  ;;  %v486_v13 = vld [vmem:[%s1190_s1 + $0xc8] sm:$0xff]  ;;  %v485_v15 = vld [vmem:[%s1190_s1 + $0xc0] sm:$0xff]  ;;  %v484_v17 = vld [vmem:[%s1190_s1 + $0xb8] sm:$0xff]  ;;  %433 = vst.msk [vmem:[#allocation2 + $0x20] sm:$0xff] %vm428_vm0, %v924_v48 }
  0x12   : > { %859 = vmatpush.msra.mxu3 %v490_v5  ;;  %536 = vmatpush.msra.mxu1 %v490_v5  ;;  %v467_v18 = vld [vmem:[%s1190_s1 + $0x30] sm:$0xff]  ;;  %v466_v20 = vld [vmem:[%s1190_s1 + $0x28] sm:$0xff]  ;;  %v465_v22 = vld [vmem:[%s1190_s1 + $0x20] sm:$0xff]  ;;  %434 = vst.msk [vmem:[#allocation2 + $0x28] sm:$0xff] %vm428_vm0, %v924_v48 }
  0x13   : > { %844 = vmatpush.msra.mxu2 %v473_v6  ;;  %496 = vmatpush.msra.mxu0 %v473_v6  ;;  %v483_v19 = vld [vmem:[%s1190_s1 + $0xb0] sm:$0xff]  ;;  %v482_v21 = vld [vmem:[%s1190_s1 + $0xa8] sm:$0xff]  ;;  %v481_v23 = vld [vmem:[%s1190_s1 + $0xa0] sm:$0xff]  ;;  %435 = vst.msk [vmem:[#allocation2 + $0x30] sm:$0xff] %vm428_vm0, %v924_v48 }
  0x14   : > { %860 = vmatpush.msra.mxu3 %v489_v7  ;;  %537 = vmatpush.msra.mxu1 %v489_v7  ;;  %v464_v24 = vld [vmem:[%s1190_s1 + $0x18] sm:$0xff]  ;;  %v463_v26 = vld [vmem:[%s1190_s1 + $0x10] sm:$0xff]  ;;  %v462_v28 = vld [vmem:[%s1190_s1 + $0x8] sm:$0xff]  ;;  %436 = vst.msk [vmem:[#allocation2 + $0x38] sm:$0xff] %vm428_vm0, %v924_v48 }
  0x15   : > { %845 = vmatpush.msra.mxu2 %v472_v8  ;;  %497 = vmatpush.msra.mxu0 %v472_v8  ;;  %v480_v25 = vld [vmem:[%s1190_s1 + $0x98] sm:$0xff]  ;;  %v479_v27 = vld [vmem:[%s1190_s1 + $0x90] sm:$0xff]  ;;  %v478_v29 = vld [vmem:[%s1190_s1 + $0x88] sm:$0xff] }
  0x16   : > { %861 = vmatpush.msra.mxu3 %v488_v9  ;;  %538 = vmatpush.msra.mxu1 %v488_v9  ;;  %v461_v30 = vld [vmem:[%s1190_s1] sm:$0xff]  ;;  %v446_v33 = vld [vmem:[%s1077_s26 + $0x48] sm:$0xff]  ;;  %v447_v36 = vld [vmem:[%s1077_s26 + $0x50] sm:$0xff] }
  0x17   : > { %846 = vmatpush.msra.mxu2 %v471_v10  ;;  %498 = vmatpush.msra.mxu0 %v471_v10  ;;  %v477_v31 = vld [vmem:[%s1190_s1 + $0x80] sm:$0xff]  ;;  %v438_v35 = vld [vmem:[%s1077_s26 + $0x8] sm:$0xff]  ;;  %v448_v37 = vld [vmem:[%s1077_s26 + $0x58] sm:$0xff] }
  0x18   : > { %862 = vmatpush.msra.mxu3 %v487_v11  ;;  %539 = vmatpush.msra.mxu1 %v487_v11  ;;  %v445_v32 = vld [vmem:[%s1077_s26 + $0x40] sm:$0xff]  ;;  %v439_v38 = vld [vmem:[%s1077_s26 + $0x10] sm:$0xff]  ;;  %v440_v39 = vld [vmem:[%s1077_s26 + $0x18] sm:$0xff] }
  0x19   : > { %847 = vmatpush.msra.mxu2 %v470_v12  ;;  %499 = vmatpush.msra.mxu0 %v470_v12  ;;  %v437_v34 = vld [vmem:[%s1077_s26] sm:$0xff]  ;;  %v450_v41 = vld [vmem:[%s1077_s26 + $0x68] sm:$0xff]  ;;  %v451_v44 = vld [vmem:[%s1077_s26 + $0x70] sm:$0xff] }
  0x1a   : > { %863 = vmatpush.msra.mxu3 %v486_v13  ;;  %540 = vmatpush.msra.mxu1 %v486_v13  ;;  %v449_v40 = vld [vmem:[%s1077_s26 + $0x60] sm:$0xff]  ;;  %v442_v43 = vld [vmem:[%s1077_s26 + $0x28] sm:$0xff]  ;;  %v452_v45 = vld [vmem:[%s1077_s26 + $0x78] sm:$0xff] }
  0x1b   : > { %848 = vmatpush.msra.mxu2 %v469_v14  ;;  %500 = vmatpush.msra.mxu0 %v469_v14  ;;  %v441_v42 = vld [vmem:[%s1077_s26 + $0x20] sm:$0xff]  ;;  %v443_v46 = vld [vmem:[%s1077_s26 + $0x30] sm:$0xff]  ;;  %v444_v47 = vld [vmem:[%s1077_s26 + $0x38] sm:$0xff] }
  0x1c   : > { %864 = vmatpush.msra.mxu3 %v485_v15  ;;  %541 = vmatpush.msra.mxu1 %v485_v15  ;;  %v453_v50 = vld [vmem:[#allocation2] sm:$0xff]  ;;  %v454_v60 = vld [vmem:[#allocation2 + $0x8] sm:$0xff]  ;;  %v455_v13 = vld [vmem:[#allocation2 + $0x10] sm:$0xff] }
  0x1d   : > { %849 = vmatpush.msra.mxu2 %v468_v16  ;;  %501 = vmatpush.msra.mxu0 %v468_v16  ;;  %v457_v55 = vld [vmem:[#allocation2 + $0x20] sm:$0xff]  ;;  %v458_v4 = vld [vmem:[#allocation2 + $0x28] sm:$0xff]  ;;  %v617_v48 = vld [vmem:[%s1127_s14 + $0x10] sm:$0xff] }
  0x1e   : > { %865 = vmatpush.msra.mxu3 %v484_v17  ;;  %542 = vmatpush.msra.mxu1 %v484_v17  ;;  %v1114_v62 = vld [vmem:[%s1191_s2] ss:$0 sm:$0xff] }
  0x1f   : > { %850 = vmatpush.msra.mxu2 %v467_v18  ;;  %502 = vmatpush.msra.mxu0 %v467_v18  ;;  %v1122_v0 = vld [vmem:[%s410_s6] ss:$0 sm:$0xff] }
  0x20   : > { %866 = vmatpush.msra.mxu3 %v483_v19  ;;  %543 = vmatpush.msra.mxu1 %v483_v19  ;;  %v615_v8 = vld [vmem:[%s1127_s14] sm:$0xff] }
  0x21   : > { %851 = vmatpush.msra.mxu2 %v466_v20  ;;  %503 = vmatpush.msra.mxu0 %v466_v20  ;;  %v619_v18 = vld [vmem:[%s1127_s14 + $0x20] sm:$0xff] }
  0x22   : > { %867 = vmatpush.msra.mxu3 %v482_v21  ;;  %544 = vmatpush.msra.mxu1 %v482_v21 }
  0x23   : > { %852 = vmatpush.msra.mxu2 %v465_v22  ;;  %504 = vmatpush.msra.mxu0 %v465_v22 }
  0x24   : > { %868 = vmatpush.msra.mxu3 %v481_v23  ;;  %545 = vmatpush.msra.mxu1 %v481_v23  ;;  %v459_v23 = vld [vmem:[#allocation2 + $0x30] sm:$0xff] }
  0x25   : > { %853 = vmatpush.msra.mxu2 %v464_v24  ;;  %505 = vmatpush.msra.mxu0 %v464_v24 }
  0x26   : > { %869 = vmatpush.msra.mxu3 %v480_v25  ;;  %546 = vmatpush.msra.mxu1 %v480_v25 }
  0x27   : > { %854 = vmatpush.msra.mxu2 %v463_v26  ;;  %506 = vmatpush.msra.mxu0 %v463_v26 }
  0x28   : > { %870 = vmatpush.msra.mxu3 %v479_v27  ;;  %547 = vmatpush.msra.mxu1 %v479_v27 }
  0x29   : > { %855 = vmatpush.msra.mxu2 %v462_v28  ;;  %507 = vmatpush.msra.mxu0 %v462_v28  ;;  %v616_v28 = vld [vmem:[%s1127_s14 + $0x8] sm:$0xff] }
  0x2a   : > { %871 = vmatpush.msra.mxu3 %v478_v29  ;;  %548 = vmatpush.msra.mxu1 %v478_v29 }
  0x2b   : > { %856 = vmatpush.msra.mxu2 %v461_v30  ;;  %508 = vmatpush.msra.mxu0 %v461_v30 }
  0x2c   : > { %872 = vmatpush.msra.mxu3 %v477_v31  ;;  %521 = vmatmul.f32.vlgmr.msra.gmra.mxu2 %v445_v32 }
  0x2d   : > { %562 = vmatmul.f32.vlgmr.msra.gmra.mxu3 %v446_v33  ;;  %549 = vmatpush.msra.mxu1 %v477_v31  ;;  %v456_v33 = vld [vmem:[#allocation2 + $0x18] sm:$0xff] }
  0x2e   : > { %509 = vmatmul.f32.vlgmr.msra.gmra.mxu0 %v437_v34  ;;  %550 = vmatmul.f32.vlgmr.msra.gmra.mxu1 %v438_v35 }
  0x34   : > { %524 = vmatmul.f32.gmra.mxu2 %v447_v36 }
  0x35   : > { %565 = vmatmul.f32.gmra.mxu3 %v448_v37 }
  0x36   : > { %512 = vmatmul.f32.gmra.mxu0 %v439_v38  ;;  %553 = vmatmul.f32.gmra.mxu1 %v440_v39  ;;  %v620_v38 = vld [vmem:[%s1127_s14 + $0x28] sm:$0xff] }
  0x3c   : > { %527 = vmatmul.f32.gmra.mxu2 %v449_v40 }
  0x3d   : > { %568 = vmatmul.f32.gmra.mxu3 %v450_v41 }
  0x3e   : > { %515 = vmatmul.f32.gmra.mxu0 %v441_v42  ;;  %556 = vmatmul.f32.gmra.mxu1 %v442_v43  ;;  %v460_v43 = vld [vmem:[#allocation2 + $0x38] sm:$0xff] }
  0x44   : > { %530 = vmatmul.f32.gmra.mxu2 %v451_v44 }
  0x45   : > { %571 = vmatmul.f32.gmra.mxu3 %v452_v45 }
  0x46   : > { %518 = vmatmul.f32.gmra.mxu0 %v443_v46  ;;  %559 = vmatmul.f32.gmra.mxu1 %v444_v47 }
  0xab   : > { %v510_v49 = vpop.f32.mrf.mxu0  ;;  %v551_v51 = vpop.f32.mrf.mxu1 }
  0xac   : > { %v552_v52 = vadd.f32 %v551_v51, %v510_v49 }
  0xae   : > { %v575_v53 = vadd.f32 %v552_v52, %v453_v50 }
  0xaf   : > { %v522_v54 = vpop.f32.mrf.mxu2 }
  0xb0   : > { %v563_v56 = vpop.f32.mrf.mxu3  ;;  %584 = vst.msk [vmem:[#allocation2] sm:$0xff] %vm428_vm0, %v575_v53 }
  0xb1   : > { %v564_v57 = vadd.f32 %v563_v56, %v522_v54  ;;  %v621_v54 = vld [vmem:[%s1127_s14 + $0x30] sm:$0xff] }
  0xb3   : > { %v579_v58 = vadd.f32 %v564_v57, %v457_v55  ;;  %v513_v59 = vpop.f32.mrf.mxu0  ;;  %v554_v61 = vpop.f32.mrf.mxu1 }
  0xb4   : > { %v555_v63 = vadd.f32 %v554_v61, %v513_v59  ;;  %v618_v59 = vld [vmem:[%s1127_s14 + $0x18] sm:$0xff] }
  0xb5   : > { %588 = vst.msk [vmem:[#allocation2 + $0x20] sm:$0xff] %vm428_vm0, %v579_v58 }
  0xb6   : > { %v576_v1 = vadd.f32 %v555_v63, %v454_v60 }
  0xb7   : > { %v595_v2 = vld [vmem:[#allocation2] sm:$0xff]  ;;  %v525_v3 = vpop.f32.mrf.mxu2 }
  0xb8   : > { %v566_v5 = vpop.f32.mrf.mxu3  ;;  %v607_v6 = vadd.f32 %v1114_v62, %v595_v2  ;;  %585 = vst.msk [vmem:[#allocation2 + $0x8] sm:$0xff] %vm428_vm0, %v576_v1  ;;  %v622_v2 = vld [vmem:[%s1127_s14 + $0x38] sm:$0xff] }
  0xb9   : > { %v567_v7 = vadd.f32 %v566_v5, %v525_v3 }
  0xba   : > { %v627_v9 = vmul.f32 %v1122_v0, %v607_v6 }
  0xbb   : > { %v580_v10 = vadd.f32 %v567_v7, %v458_v4  ;;  %v516_v12 = vpop.f32.mrf.mxu0  ;;  %v557_v14 = vpop.f32.mrf.mxu1 }
  0xbc   : > { %v599_v11 = vld [vmem:[#allocation2 + $0x20] sm:$0xff]  ;;  %v635_v15 = vadd.f32 %v627_v9, %v615_v8  ;;  %v558_v17 = vadd.f32 %v557_v14, %v516_v12 }
  0xbd   : > { %v611_v16 = vadd.f32 %v1114_v62, %v599_v11  ;;  %589 = vst.msk [vmem:[#allocation2 + $0x28] sm:$0xff] %vm428_vm0, %v580_v10 }
  0xbe   : > { %643 = vst.msk [vmem:[%s1136_s15] sm:$0xff] %vm428_vm0, %v635_v15  ;;  %v577_v20 = vadd.f32 %v558_v17, %v455_v13 }
  0xbf   : > { %v631_v19 = vmul.f32 %v1122_v0, %v611_v16  ;;  %v596_v21 = vld [vmem:[#allocation2 + $0x8] sm:$0xff]  ;;  %v528_v22 = vpop.f32.mrf.mxu2 }
  0xc0   : > { %v569_v24 = vpop.f32.mrf.mxu3  ;;  %v608_v26 = vadd.f32 %v1114_v62, %v596_v21  ;;  %586 = vst.msk [vmem:[#allocation2 + $0x10] sm:$0xff] %vm428_vm0, %v577_v20 }
  0xc1   : > { %v639_v25 = vadd.f32 %v631_v19, %v619_v18  ;;  %v570_v27 = vadd.f32 %v569_v24, %v528_v22 }
  0xc2   : > { %v628_v29 = vmul.f32 %v1122_v0, %v608_v26 }
  0xc3   : > { %647 = vst.msk [vmem:[%s1136_s15 + $0x20] sm:$0xff] %vm428_vm0, %v639_v25  ;;  %v581_v30 = vadd.f32 %v570_v27, %v459_v23  ;;  %v519_v32 = vpop.f32.mrf.mxu0  ;;  %v560_v34 = vpop.f32.mrf.mxu1 }
  0xc4   : > { %v600_v31 = vld [vmem:[#allocation2 + $0x28] sm:$0xff]  ;;  %v636_v35 = vadd.f32 %v628_v29, %v616_v28  ;;  %v561_v37 = vadd.f32 %v560_v34, %v519_v32 }
  0xc5   : > { %v612_v36 = vadd.f32 %v1114_v62, %v600_v31  ;;  %590 = vst.msk [vmem:[#allocation2 + $0x30] sm:$0xff] %vm428_vm0, %v581_v30 }
  0xc6   : > { %644 = vst.msk [vmem:[%s1136_s15 + $0x8] sm:$0xff] %vm428_vm0, %v636_v35  ;;  %v578_v40 = vadd.f32 %v561_v37, %v456_v33 }
  0xc7   : > { %v632_v39 = vmul.f32 %v1122_v0, %v612_v36  ;;  %v597_v41 = vld [vmem:[#allocation2 + $0x10] sm:$0xff]  ;;  %v531_v42 = vpop.f32.mrf.mxu2 }
  0xc8   : > { %v572_v44 = vpop.f32.mrf.mxu3  ;;  %v609_v46 = vadd.f32 %v1114_v62, %v597_v41  ;;  %587 = vst.msk [vmem:[#allocation2 + $0x18] sm:$0xff] %vm428_vm0, %v578_v40 }
  0xc9   : > { %v640_v45 = vadd.f32 %v632_v39, %v620_v38  ;;  %v573_v47 = vadd.f32 %v572_v44, %v531_v42 }
  0xca   : > { %v629_v49 = vmul.f32 %v1122_v0, %v609_v46 }
  0xcb   : > { %648 = vst.msk [vmem:[%s1136_s15 + $0x28] sm:$0xff] %vm428_vm0, %v640_v45  ;;  %v582_v50 = vadd.f32 %v573_v47, %v460_v43 }
  0xcc   : > { %v601_v51 = vld [vmem:[#allocation2 + $0x30] sm:$0xff]  ;;  %v637_v52 = vadd.f32 %v629_v49, %v617_v48 }
  0xcd   : > { %v613_v53 = vadd.f32 %v1114_v62, %v601_v51  ;;  %591 = vst.msk [vmem:[#allocation2 + $0x38] sm:$0xff] %vm428_vm0, %v582_v50 }
  0xce   : > { %645 = vst.msk [vmem:[%s1136_s15 + $0x10] sm:$0xff] %vm428_vm0, %v637_v52 }
  0xcf   : > { %v633_v55 = vmul.f32 %v1122_v0, %v613_v53  ;;  %v598_v56 = vld [vmem:[#allocation2 + $0x18] sm:$0xff] }
  0xd0   : > { %v610_v58 = vadd.f32 %v1114_v62, %v598_v56 }
  0xd1   : > { %v641_v57 = vadd.f32 %v633_v55, %v621_v54 }
  0xd2   : > { %v630_v60 = vmul.f32 %v1122_v0, %v610_v58 }
  0xd3   : > { %649 = vst.msk [vmem:[%s1136_s15 + $0x30] sm:$0xff] %vm428_vm0, %v641_v57 }
  0xd4   : > { %v602_v61 = vld [vmem:[#allocation2 + $0x38] sm:$0xff]  ;;  %v638_v63 = vadd.f32 %v630_v60, %v618_v59 }
  0xd5   : > { %v614_v1 = vadd.f32 %v1114_v62, %v602_v61 }
  0xd6   : > { %646 = vst.msk [vmem:[%s1136_s15 + $0x18] sm:$0xff] %vm428_vm0, %v638_v63 }
  0xd7   : > { %v634_v3 = vmul.f32 %v1122_v0, %v614_v1 }
  0xd9   : > { %v642_v4 = vadd.f32 %v634_v3, %v622_v2 }
  0xdb   : > { %650 = vst.msk [vmem:[%s1136_s15 + $0x38] sm:$0xff] %vm428_vm0, %v642_v4 }
  0xdc PF: > { %s15_s20 = sadd.s32 1, %s922_s20   ;;  %s1195_s18 = smov %s918_s19 }
  0xdd   : > { %p12_p5 = scmp.ge.s32.totalorder %s15_s20, 4   ;;  %s1196_s19 = smov %s1198_s21 }
  0xdf   :  { %14 = sbr.rel (!%p12_p5) target bundleno = 2 (0x2), region = 90 }

// kernel: model_forward.38
= control target key start
LH: loop header
LB: loop body
LE: loop exit
PB: predicated region body
PF: predicated region fallthrough
CT: control target
= control target key end

     0   :  { %s1342_s18 = smov 0   ;;  %s1344_s19 = smov 0   ;;  %s1739_s0 = inlined_call_operand.vmem [shape: f32[2,64,64], index: 0, kind: input, shape index: {}]   ;;  %s1740_s1 = inlined_call_operand.vmem [shape: f32[2,1,64], index: 1, kind: input, shape index: {}]   ;;  %s1741_s2 = inlined_call_operand.vmem [shape: f32[2,1,64], index: 2, kind: input, shape index: {}]   ;;  %s1742_s3 = inlined_call_operand.vmem [shape: f32[64,256], index: 3, kind: input, shape index: {}]   ;;  %s1743_s4 = inlined_call_operand.vmem [shape: f32[1,256], index: 4, kind: input, shape index: {}]   ;;  %s1744_s5 = inlined_call_operand.vmem [shape: f32[2,64,256], index: 5, kind: output, shape index: {}]  }
   0x1   :  { %s1346_s20 = smov 0  }
   0x2 LB: > { %s41_s21 = sadd.s32 1, %s1305_s19  ;;  %p1170_p0 = scmp.ge.s32.totalorder %s1309_s20, 1  ;;  %s1309_s20 = sphi %s1346_s20, %s15_s20   ;;  %s1305_s19 = sphi %s1344_s19, %s1750_s19   ;;  %s1301_s18 = sphi %s1342_s18, %s1749_s18  }
   0x3   : > { %p43_p1 = scmp.ge.s32.totalorder %s41_s21, 2  ;;  %p274_p2 = scmp.lt.s32.totalorder %s1309_s20, 3 }
   0x5   : > { %s1752_s21 = smov (%p43_p1, %s41_s21), 0  ;;  %p275_p3 = pnand %p1170_p0, %p274_p2 }
   0x6   : > { %p339_p4 = scmp.lt.s32.totalorder (!%p275_p3), %s1301_s18, 1 }
   0x7   : > { %278 = sbr.rel (%p275_p3) target bundleno = 477 (0x1dd), region = 40 }
   0xc   : > { %s1754_s18 = smov (!%p339_p4, %s1301_s18), 1  ;;  %vm418_vm0 = vcmask 523264   ;;  %v1311_v16 = vmov 64.0   ;;  %v657_v63 = vld [vmem:[%s1742_s3 + $0x70] sm:$0xff] }
   0xd   : > { %s1193_s22 = sshll.u32 %s1754_s18, 6  ;;  %s356_s28 = scalar_lea.vmem %s1741_s2, %s1754_s18  ;;  %1237 = vrcp.f32 %v1311_v16  ;;  %1195 = vmatpush.msra.mxu2 %v657_v63  ;;  %691 = vmatpush.msra.mxu0 %v657_v63 }
   0xe   : > { %s349_s25 = scalar_lea.vmem %s1739_s0, %s1193_s22  ;;  %s353_s22 = scalar_lea.vmem %s1740_s1, %s1754_s18 }
   0xf   : > { %v416_v0 = vld [vmem:[%s349_s25 + $0x30] sm:$0xff]  ;;  %v415_v1 = vld [vmem:[%s349_s25 + $0x28] sm:$0xff]  ;;  %v414_v4 = vld [vmem:[%s349_s25 + $0x20] sm:$0xff]  ;;  %s1194_s26 = sshll.u32 %s1754_s18, 7 }
  0x10   : > { %v437_v2 = vsel %vm418_vm0, %v416_v0, 0.0  ;;  %v434_v3 = vsel %vm418_vm0, %v415_v1, 0.0  ;;  %v431_v5 = vsel %vm418_vm0, %v414_v4, 0.0  ;;  %v412_v6 = vld [vmem:[%s349_s25 + $0x10] sm:$0xff]  ;;  %v411_v7 = vld [vmem:[%s349_s25 + $0x8] sm:$0xff]  ;;  %v410_v8 = vld [vmem:[%s349_s25] sm:$0xff]  ;;  %s1660_s29 = scalar_lea.vmem %s1744_s5, %s1194_s26 }
  0x11   : > { %438 = vadd.xlane.f32.xlu2 %v437_v2  ;;  %435 = vadd.xlane.f32.xlu1 %v434_v3  ;;  %v425_v9 = vsel %vm418_vm0, %v412_v6, 0.0  ;;  %v422_v10 = vsel %vm418_vm0, %v411_v7, 0.0  ;;  %v419_v11 = vsel %vm418_vm0, %v410_v8, 0.0  ;;  %v413_v12 = vld [vmem:[%s349_s25 + $0x18] sm:$0xff]  ;;  %v656_v2 = vld [vmem:[%s1742_s3 + $0x68] sm:$0xff]  ;;  %v653_v3 = vld [vmem:[%s1742_s3 + $0x50] sm:$0xff] }
  0x12   : > { %432 = vadd.xlane.f32.xlu0 %v431_v5  ;;  %v417_v13 = vld [vmem:[%s349_s25 + $0x38] sm:$0xff]  ;;  %v428_v14 = vsel %vm418_vm0, %v413_v12, 0.0  ;;  %v651_v5 = vld [vmem:[%s1742_s3 + $0x40] sm:$0xff] }
  0x13   : > { %v440_v15 = vsel %vm418_vm0, %v417_v13, 0.0  ;;  %v1238_v17 = vpop.eup %1237 }
  0x14   : > { %v444_v18 = vmul.f32 64.0, %v1238_v17  ;;  %vm448_vm1 = vweird.f32 %v1238_v17 }
  0x16   : > { %v445_v19 = vsub.f32 1.0, %v444_v18 }
  0x18   : > { %v446_v20 = vmul.f32 %v1238_v17, %v445_v19 }
  0x19   : > { %426 = vadd.xlane.f32.xlu2 %v425_v9  ;;  %423 = vadd.xlane.f32.xlu1 %v422_v10  ;;  %v647_v9 = vld [vmem:[%s1742_s3 + $0x20] sm:$0xff]  ;;  %v648_v10 = vld [vmem:[%s1742_s3 + $0x28] sm:$0xff] }
  0x1a   : > { %420 = vadd.xlane.f32.xlu0 %v419_v11  ;;  %v447_v21 = vadd.f32 %v1238_v17, %v446_v20  ;;  %v645_v11 = vld [vmem:[%s1742_s3 + $0x10] sm:$0xff] }
  0x1c   : > { %v1378_v22 = vsel %vm448_vm1, %v1238_v17, %v447_v21 }
  0x21   : > { %429 = vadd.xlane.f32.xlu1 %v428_v14  ;;  %v644_v14 = vld [vmem:[%s1742_s3 + $0x8] sm:$0xff] }
  0x22   : > { %441 = vadd.xlane.f32.xlu0 %v440_v15 }
  0x84   : > { %v439_v23 = vpop.xlane.xlu2 %438  ;;  %v436_v24 = vpop.xlane.xlu1 %435 }
  0x85   : > { %v455_v25 = vmul.f32 %v1378_v22, %v436_v24  ;;  %v433_v26 = vpop.xlane.xlu0 %432  ;;  %v456_v39 = vmul.f32 %v1378_v22, %v439_v23 }
  0x86   : > { %v454_v27 = vmul.f32 %v1378_v22, %v433_v26 }
  0x87   : > { %v1382_v28 = vsub.f32 %v415_v1, %v455_v25  ;;  %v1406_v46 = vsub.f32 %v416_v0, %v456_v39  ;;  %v658_v0 = vld [vmem:[%s1742_s3 + $0x78] sm:$0xff]  ;;  %v655_v1 = vld [vmem:[%s1742_s3 + $0x60] sm:$0xff] }
  0x88   : > { %v1384_v29 = vsub.f32 %v414_v4, %v454_v27  ;;  %1203 = vmatpush.msra.mxu3 %v658_v0  ;;  %732 = vmatpush.msra.mxu1 %v658_v0  ;;  %v654_v4 = vld [vmem:[%s1742_s3 + $0x58] sm:$0xff] }
  0x89   : > { %v471_v30 = vmul.f32 %v1382_v28, %v1382_v28  ;;  %v472_v55 = vmul.f32 %v1406_v46, %v1406_v46  ;;  %1196 = vmatpush.msra.mxu2 %v655_v1  ;;  %692 = vmatpush.msra.mxu0 %v655_v1 }
  0x8a   : > { %v470_v31 = vmul.f32 %v1384_v29, %v1384_v29  ;;  %1204 = vmatpush.msra.mxu3 %v656_v2  ;;  %733 = vmatpush.msra.mxu1 %v656_v2 }
  0x8b   : > { %v489_v32 = vsel %vm418_vm0, %v471_v30, 0.0  ;;  %v492_v58 = vsel %vm418_vm0, %v472_v55, 0.0  ;;  %1197 = vmatpush.msra.mxu2 %v653_v3  ;;  %693 = vmatpush.msra.mxu0 %v653_v3 }
  0x8c   : > { %v486_v33 = vsel %vm418_vm0, %v470_v31, 0.0  ;;  %v427_v34 = vpop.xlane.xlu2 %426  ;;  %490 = vadd.xlane.f32.xlu1 %v489_v32  ;;  %v424_v35 = vpop.xlane.xlu1 %423  ;;  %1205 = vmatpush.msra.mxu3 %v654_v4 }
  0x8d   : > { %487 = vadd.xlane.f32.xlu2 %v486_v33  ;;  %v452_v36 = vmul.f32 %v1378_v22, %v427_v34  ;;  %v451_v37 = vmul.f32 %v1378_v22, %v424_v35  ;;  %v421_v38 = vpop.xlane.xlu0 %420  ;;  %734 = vmatpush.msra.mxu1 %v654_v4 }
  0x8e   : > { %v450_v40 = vmul.f32 %v1378_v22, %v421_v38  ;;  %1198 = vmatpush.msra.mxu2 %v651_v5  ;;  %694 = vmatpush.msra.mxu0 %v651_v5 }
  0x8f   : > { %v1396_v41 = vsub.f32 %v412_v6, %v452_v36  ;;  %v1398_v42 = vsub.f32 %v411_v7, %v451_v37  ;;  %v652_v6 = vld [vmem:[%s1742_s3 + $0x48] sm:$0xff]  ;;  %v649_v7 = vld [vmem:[%s1742_s3 + $0x30] sm:$0xff]  ;;  %v602_v37 = vld [vmem:[%s353_s22] sm:$0x1] }
  0x90   : > { %v1400_v43 = vsub.f32 %v410_v8, %v450_v40  ;;  %1206 = vmatpush.msra.mxu3 %v652_v6  ;;  %v650_v8 = vld [vmem:[%s1742_s3 + $0x38] sm:$0xff]  ;;  %735 = vmatpush.msra.mxu1 %v652_v6 }
  0x91   : > { %v468_v44 = vmul.f32 %v1396_v41, %v1396_v41  ;;  %v467_v45 = vmul.f32 %v1398_v42, %v1398_v42  ;;  %1199 = vmatpush.msra.mxu2 %v649_v7  ;;  %695 = vmatpush.msra.mxu0 %v649_v7 }
  0x92   : > { %v466_v47 = vmul.f32 %v1400_v43, %v1400_v43  ;;  %1207 = vmatpush.msra.mxu3 %v650_v8  ;;  %736 = vmatpush.msra.mxu1 %v650_v8 }
  0x93   : > { %v480_v48 = vsel %vm418_vm0, %v468_v44, 0.0  ;;  %v477_v49 = vsel %vm418_vm0, %v467_v45, 0.0  ;;  %1200 = vmatpush.msra.mxu2 %v647_v9  ;;  %696 = vmatpush.msra.mxu0 %v647_v9  ;;  %v603_v44 = vadd.f32 1.0, %v602_v37  ;;  %v1520_v9 = vld [vmem:[%s356_s28] ss:$0 sm:$0xff] }
  0x94   : > { %481 = vadd.xlane.f32.xlu1 %v480_v48  ;;  %v474_v50 = vsel %vm418_vm0, %v466_v47, 0.0  ;;  %v430_v51 = vpop.xlane.xlu1 %429  ;;  %1208 = vmatpush.msra.mxu3 %v648_v10 }
  0x95   : > { %478 = vadd.xlane.f32.xlu2 %v477_v49  ;;  %475 = vadd.xlane.f32.xlu0 %v474_v50  ;;  %v442_v52 = vpop.xlane.xlu0 %441  ;;  %v453_v54 = vmul.f32 %v1378_v22, %v430_v51  ;;  %v1506_v1 = vperm.slane %v603_v44, 0 }
  0x96   : > { %v457_v53 = vmul.f32 %v1378_v22, %v442_v52  ;;  %737 = vmatpush.msra.mxu1 %v648_v10  ;;  %1201 = vmatpush.msra.mxu2 %v645_v11 }
  0x97   : > { %v1419_v57 = vsub.f32 %v413_v12, %v453_v54  ;;  %v646_v12 = vld [vmem:[%s1742_s3 + $0x18] sm:$0xff]  ;;  %697 = vmatpush.msra.mxu0 %v645_v11 }
  0x98   : > { %v1417_v56 = vsub.f32 %v417_v13, %v457_v53  ;;  %1209 = vmatpush.msra.mxu3 %v646_v12  ;;  %v643_v13 = vld [vmem:[%s1742_s3] sm:$0xff]  ;;  %738 = vmatpush.msra.mxu1 %v646_v12 }
  0x99   : > { %v469_v61 = vmul.f32 %v1419_v57, %v1419_v57  ;;  %1202 = vmatpush.msra.mxu2 %v643_v13  ;;  %698 = vmatpush.msra.mxu0 %v643_v13 }
  0x9a   : > { %v473_v59 = vmul.f32 %v1417_v56, %v1417_v56  ;;  %1210 = vmatpush.msra.mxu3 %v644_v14  ;;  %739 = vmatpush.msra.mxu1 %v644_v14 }
  0x9b   : > { %v483_v62 = vsel %vm418_vm0, %v469_v61, 0.0 }
  0x9c   : > { %v495_v60 = vsel %vm418_vm0, %v473_v59, 0.0 }
  0x9d   : > { %493 = vadd.xlane.f32.xlu0 %v492_v58  ;;  %496 = vadd.xlane.f32.xlu2 %v495_v60 }
  0xa5   : > { %484 = vadd.xlane.f32.xlu0 %v483_v62 }
  0xff   : > { %v491_v15 = vpop.xlane.xlu1 %490 }
 0x100   : > { %v488_v16 = vpop.xlane.xlu2 %487  ;;  %v503_v17 = vmul.f32 %v491_v15, %v1378_v22 }
 0x101   : > { %v502_v18 = vmul.f32 %v488_v16, %v1378_v22 }
 0x102   : > { %v511_v19 = vadd.f32 1e-06, %v503_v17 }
 0x103   : > { %v510_v20 = vadd.f32 1e-06, %v502_v18 }
 0x104   : > { %1239 = vrsqrt.f32 %v511_v19  ;;  %vm570_vm2 = vweird.f32 %v511_v19 }
 0x105   : > { %1241 = vrsqrt.f32 %v510_v20  ;;  %vm560_vm5 = vweird.f32 %v510_v20 }
 0x107   : > { %v482_v21 = vpop.xlane.xlu1 %481 }
 0x108   : > { %v479_v23 = vpop.xlane.xlu2 %478  ;;  %v500_v24 = vmul.f32 %v482_v21, %v1378_v22  ;;  %v476_v25 = vpop.xlane.xlu0 %475 }
 0x109   : > { %v499_v26 = vmul.f32 %v479_v23, %v1378_v22  ;;  %v498_v27 = vmul.f32 %v476_v25, %v1378_v22 }
 0x10a   : > { %v1240_v30 = vpop.eup %1239  ;;  %v508_v31 = vadd.f32 1e-06, %v500_v24 }
 0x10b   : > { %v1242_v32 = vpop.eup %1241  ;;  %v565_v33 = vmul.f32 %v1240_v30, %v511_v19  ;;  %v1485_v34 = vadd.f32 1e-06, %v499_v26  ;;  %v1487_v35 = vadd.f32 1e-06, %v498_v27  ;;  %vm571_vm3 = vweird.f32 %v1240_v30 }
 0x10c   : > { %v555_v36 = vmul.f32 %v1242_v32, %v510_v20  ;;  %1243 = vrsqrt.f32 %v508_v31  ;;  %vm561_vm4 = vweird.f32 %v1242_v32  ;;  %vm1499_vm6 = vmor %vm570_vm2, %vm571_vm3  ;;  %vm540_vm8 = vweird.f32 %v508_v31 }
 0x10d   : > { %v566_v38 = vmul.f32 %v1240_v30, %v565_v33  ;;  %1245 = vrsqrt.f32 %v1485_v34  ;;  %vm562_vm7 = vmor %vm560_vm5, %vm561_vm4  ;;  %vm530_vm10 = vweird.f32 %v1485_v34  ;;  %vm520_vm15 = vweird.f32 %v1487_v35 }
 0x10e   : > { %v556_v39 = vmul.f32 %v1242_v32, %v555_v36  ;;  %1247 = vrsqrt.f32 %v1487_v35 }
 0x10f   : > { %v567_v40 = vmul.f32 0.5, %v566_v38 }
 0x110   : > { %v557_v45 = vmul.f32 0.5, %v556_v39  ;;  %v497_v47 = vpop.xlane.xlu2 %496  ;;  %v494_v48 = vpop.xlane.xlu0 %493 }
 0x111   : > { %v568_v49 = vsub.f32 1.5, %v567_v40  ;;  %v505_v50 = vmul.f32 %v497_v47, %v1378_v22  ;;  %v504_v51 = vmul.f32 %v494_v48, %v1378_v22 }
 0x112   : > { %v1493_v52 = vpop.eup %1243  ;;  %v558_v53 = vsub.f32 1.5, %v557_v45 }
 0x113   : > { %v1246_v54 = vpop.eup %1245  ;;  %v569_v55 = vmul.f32 %v1240_v30, %v568_v49  ;;  %v535_v58 = vmul.f32 %v1493_v52, %v508_v31  ;;  %v1496_v59 = vadd.f32 1e-06, %v505_v50  ;;  %v1504_v0 = vadd.f32 1e-06, %v504_v51 }
 0x114   : > { %v1248_v60 = vpop.eup %1247  ;;  %v559_v61 = vmul.f32 %v1242_v32, %v558_v53  ;;  %v525_v63 = vmul.f32 %v1246_v54, %v1485_v34  ;;  %vm541_vm9 = vweird.f32 %v1493_v52  ;;  %vm531_vm11 = vweird.f32 %v1246_v54 }
 0x115   : > { %v573_v2 = vsel %vm1499_vm6, %v1240_v30, %v569_v55  ;;  %v536_v3 = vmul.f32 %v1493_v52, %v535_v58  ;;  %v515_v4 = vmul.f32 %v1248_v60, %v1487_v35  ;;  %1249 = vrsqrt.f32 %v1496_v59  ;;  %vm1527_vm12 = vmor %vm540_vm8, %vm541_vm9 }
 0x116   : > { %v563_v5 = vsel %vm562_vm7, %v1242_v32, %v559_v61  ;;  %v526_v6 = vmul.f32 %v1246_v54, %v525_v63  ;;  %1251 = vrsqrt.f32 %v1504_v0  ;;  %v599_v13 = vmul.f32 %v573_v2, %v1382_v28  ;;  %vm532_vm14 = vmor %vm530_vm10, %vm531_vm11 }
 0x117   : > { %v537_v7 = vmul.f32 0.5, %v536_v3  ;;  %v516_v8 = vmul.f32 %v1248_v60, %v515_v4  ;;  %v598_v12 = vmul.f32 %v563_v5, %v1384_v29  ;;  %vm521_vm13 = vweird.f32 %v1248_v60 }
 0x118   : > { %v527_v10 = vmul.f32 0.5, %v526_v6  ;;  %v485_v11 = vpop.xlane.xlu0 %484  ;;  %v612_v20 = vmul.f32 %v1506_v1, %v599_v13  ;;  %vm522_vm1 = vmor %vm520_vm15, %vm521_vm13  ;;  %vm590_vm2 = vweird.f32 %v1496_v59  ;;  %vm580_vm6 = vweird.f32 %v1504_v0 }
 0x119   : > { %v538_v14 = vsub.f32 1.5, %v537_v7  ;;  %v517_v15 = vmul.f32 0.5, %v516_v8  ;;  %v501_v16 = vmul.f32 %v485_v11, %v1378_v22  ;;  %v611_v19 = vmul.f32 %v1506_v1, %v598_v12 }
 0x11a   : > { %v528_v17 = vsub.f32 1.5, %v527_v10  ;;  %v624_v25 = vadd.f32 %v1520_v9, %v612_v20 }
 0x11b   : > { %v539_v29 = vmul.f32 %v1493_v52, %v538_v14  ;;  %v518_v28 = vsub.f32 1.5, %v517_v15  ;;  %v509_v21 = vadd.f32 1e-06, %v501_v16  ;;  %v1250_v23 = vpop.eup %1249  ;;  %v623_v22 = vadd.f32 %v1520_v9, %v611_v19 }
 0x11c   : > { %v529_v24 = vmul.f32 %v1246_v54, %v528_v17  ;;  %v1252_v26 = vpop.eup %1251  ;;  %v585_v31 = vmul.f32 %v1250_v23, %v1496_v59  ;;  %vm591_vm3 = vweird.f32 %v1250_v23 }
 0x11d   : > { %v543_v27 = vsel %vm1527_vm12, %v1493_v52, %v539_v29  ;;  %v519_v30 = vmul.f32 %v1248_v60, %v518_v28  ;;  %v575_v33 = vmul.f32 %v1252_v26, %v1504_v0  ;;  %1253 = vrsqrt.f32 %v509_v21  ;;  %1179 = vmatmul.msk.f32.vlgmr.msra.gmra.mxu2 %vm418_vm0, %v623_v22  ;;  %1187 = vmatmul.msk.f32.vlgmr.msra.gmra.mxu3 %vm418_vm0, %v623_v22  ;;  %vm592_vm5 = vmor %vm590_vm2, %vm591_vm3 }
 0x11e   : > { %v533_v32 = vsel %vm532_vm14, %v1246_v54, %v529_v24  ;;  %v586_v36 = vmul.f32 %v1250_v23, %v585_v31  ;;  %v596_v35 = vmul.f32 %v543_v27, %v1396_v41  ;;  %vm581_vm4 = vweird.f32 %v1252_v26 }
 0x11f   : > { %v523_v34 = vsel %vm522_vm1, %v1248_v60, %v519_v30  ;;  %v595_v37 = vmul.f32 %v533_v32, %v1398_v42  ;;  %v576_v38 = vmul.f32 %v1252_v26, %v575_v33  ;;  %vm582_vm7 = vmor %vm580_vm6, %vm581_vm4  ;;  %vm550_vm8 = vweird.f32 %v509_v21 }
 0x120   : > { %v594_v39 = vmul.f32 %v523_v34, %v1400_v43  ;;  %v587_v40 = vmul.f32 0.5, %v586_v36  ;;  %v609_v48 = vmul.f32 %v1506_v1, %v596_v35 }
 0x121   : > { %v608_v44 = vmul.f32 %v1506_v1, %v595_v37  ;;  %v577_v45 = vmul.f32 0.5, %v576_v38 }
 0x122   : > { %v607_v47 = vmul.f32 %v1506_v1, %v594_v39  ;;  %v588_v49 = vsub.f32 1.5, %v587_v40  ;;  %v621_v41 = vadd.f32 %v1520_v9, %v609_v48 }
 0x123   : > { %v620_v50 = vadd.f32 %v1520_v9, %v608_v44  ;;  %v1254_v42 = vpop.eup %1253  ;;  %v578_v51 = vsub.f32 1.5, %v577_v45 }
 0x124   : > { %v619_v43 = vadd.f32 %v1520_v9, %v607_v47  ;;  %v589_v52 = vmul.f32 %v1250_v23, %v588_v49  ;;  %v545_v53 = vmul.f32 %v1254_v42, %v509_v21  ;;  %vm551_vm9 = vweird.f32 %v1254_v42 }
 0x125   : > { %v579_v54 = vmul.f32 %v1252_v26, %v578_v51  ;;  %1180 = vmatmul.msk.f32.gmra.mxu2 %vm418_vm0, %v624_v25  ;;  %1188 = vmatmul.msk.f32.gmra.mxu3 %vm418_vm0, %v624_v25  ;;  %vm552_vm10 = vmor %vm550_vm8, %vm551_vm9 }
 0x126   : > { %1175 = vmatmul.msk.f32.vlgmr.msra.gmra.mxu0 %vm418_vm0, %v619_v43  ;;  %v593_v55 = vsel %vm592_vm5, %v1250_v23, %v589_v52  ;;  %v546_v58 = vmul.f32 %v1254_v42, %v545_v53  ;;  %1183 = vmatmul.msk.f32.vlgmr.msra.gmra.mxu1 %vm418_vm0, %v619_v43 }
 0x127   : > { %v583_v59 = vsel %vm582_vm7, %v1252_v26, %v579_v54  ;;  %v601_v60 = vmul.f32 %v593_v55, %v1417_v56 }
 0x128   : > { %v547_v61 = vmul.f32 0.5, %v546_v58  ;;  %v600_v62 = vmul.f32 %v583_v59, %v1406_v46 }
 0x129   : > { %v614_v63 = vmul.f32 %v1506_v1, %v601_v60 }
 0x12a   : > { %v548_v0 = vsub.f32 1.5, %v547_v61  ;;  %v613_v2 = vmul.f32 %v1506_v1, %v600_v62 }
 0x12b   : > { %v626_v3 = vadd.f32 %v1520_v9, %v614_v63 }
 0x12c   : > { %v549_v4 = vmul.f32 %v1254_v42, %v548_v0  ;;  %v625_v5 = vadd.f32 %v1520_v9, %v613_v2 }
 0x12e   : > { %1176 = vmatmul.msk.f32.gmra.mxu0 %vm418_vm0, %v620_v50  ;;  %v553_v6 = vsel %vm552_vm10, %v1254_v42, %v549_v4  ;;  %1181 = vmatmul.msk.f32.gmra.mxu2 %vm418_vm0, %v625_v5 }
 0x12f   : > { %1184 = vmatmul.msk.f32.gmra.mxu1 %vm418_vm0, %v620_v50  ;;  %1189 = vmatmul.msk.f32.gmra.mxu3 %vm418_vm0, %v625_v5  ;;  %v597_v46 = vmul.f32 %v553_v6, %v1419_v57  ;;  %v816_v57 = vld [vmem:[%s1743_s4] sm:$0x3] }
 0x130   : > { %v1583_v8 = vperm.slane %v816_v57, 0 }
 0x131   : > { %v610_v56 = vmul.f32 %v1506_v1, %v597_v46  ;;  %v1585_v1 = vperm.slane %v816_v57, 1 }
 0x133   : > { %v622_v7 = vadd.f32 %v1520_v9, %v610_v56 }
 0x136   : > { %1177 = vmatmul.msk.f32.gmra.mxu0 %vm418_vm0, %v621_v41  ;;  %1182 = vmatmul.msk.f32.gmra.mxu2 %vm418_vm0, %v626_v3 }
 0x137   : > { %1185 = vmatmul.msk.f32.gmra.mxu1 %vm418_vm0, %v621_v41  ;;  %1190 = vmatmul.msk.f32.gmra.mxu3 %vm418_vm0, %v626_v3 }
 0x13e   : > { %1178 = vmatmul.msk.f32.gmra.mxu0 %vm418_vm0, %v622_v7 }
 0x13f   : > { %1186 = vmatmul.msk.f32.gmra.mxu1 %vm418_vm0, %v622_v7 }
 0x1a0   : > { %v712_v9 = vpop.f32.mrf.mxu2  ;;  %v753_v10 = vpop.f32.mrf.mxu3 }
 0x1a1   : > { %v1588_v11 = vadd.f32 %v1583_v8, %v712_v9  ;;  %v1591_v12 = vadd.f32 %v1585_v1, %v753_v10 }
 0x1a3   : > { %v700_v13 = vpop.f32.mrf.mxu0  ;;  %v846_v14 = vmul.f32 %v1588_v11, %v1588_v11  ;;  %v847_v15 = vmul.f32 %v1591_v12, %v1591_v12  ;;  %v741_v17 = vpop.f32.mrf.mxu1 }
 0x1a4   : > { %v1598_v16 = vadd.f32 %v1583_v8, %v700_v13  ;;  %v1601_v18 = vadd.f32 %v1585_v1, %v741_v17 }
 0x1a5   : > { %v862_v19 = vmul.f32 %v846_v14, %v1588_v11  ;;  %v863_v20 = vmul.f32 %v847_v15, %v1591_v12 }
 0x1a6   : > { %v838_v29 = vmul.f32 %v1598_v16, %v1598_v16  ;;  %v839_v28 = vmul.f32 %v1601_v18, %v1601_v18 }
 0x1a7   : > { %v878_v21 = vmul.f32 0.044715, %v862_v19  ;;  %v879_v23 = vmul.f32 0.044715, %v863_v20 }
 0x1a8   : > { %v854_v24 = vmul.f32 %v838_v29, %v1598_v16  ;;  %v855_v22 = vmul.f32 %v839_v28, %v1601_v18  ;;  %v715_v25 = vpop.f32.mrf.mxu2  ;;  %v756_v32 = vpop.f32.mrf.mxu3 }
 0x1a9   : > { %v894_v26 = vadd.f32 %v878_v21, %v1588_v11  ;;  %v895_v27 = vadd.f32 %v879_v23, %v1591_v12  ;;  %v1614_v31 = vadd.f32 %v1583_v8, %v715_v25  ;;  %v1617_v34 = vadd.f32 %v1585_v1, %v756_v32 }
 0x1aa   : > { %v870_v30 = vmul.f32 0.044715, %v854_v24  ;;  %v871_v33 = vmul.f32 0.044715, %v855_v22 }
 0x1ab   : > { %v703_v36 = vpop.f32.mrf.mxu0  ;;  %v910_v37 = vmul.f32 0.7978846, %v894_v26  ;;  %v911_v38 = vmul.f32 0.7978846, %v895_v27  ;;  %v848_v35 = vmul.f32 %v1614_v31, %v1614_v31  ;;  %v849_v45 = vmul.f32 %v1617_v34, %v1617_v34 }
 0x1ac   : > { %v886_v39 = vadd.f32 %v870_v30, %v1598_v16  ;;  %v744_v40 = vpop.f32.mrf.mxu1  ;;  %v887_v44 = vadd.f32 %v871_v33, %v1601_v18  ;;  %v1626_v47 = vadd.f32 %v1583_v8, %v703_v36 }
 0x1ad   : > { %v1629_v48 = vadd.f32 %v1585_v1, %v744_v40  ;;  %1255 = vtanh.f32 %v910_v37  ;;  %v864_v50 = vmul.f32 %v848_v35, %v1614_v31  ;;  %v865_v51 = vmul.f32 %v849_v45, %v1617_v34 }
 0x1ae   : > { %v902_v49 = vmul.f32 0.7978846, %v886_v39  ;;  %1257 = vtanh.f32 %v911_v38  ;;  %v903_v42 = vmul.f32 0.7978846, %v887_v44  ;;  %v840_v43 = vmul.f32 %v1626_v47, %v1626_v47 }
 0x1af   : > { %v880_v41 = vmul.f32 0.044715, %v864_v50  ;;  %v841_v52 = vmul.f32 %v1629_v48, %v1629_v48  ;;  %v881_v53 = vmul.f32 0.044715, %v865_v51 }
 0x1b0   : > { %1259 = vtanh.f32 %v902_v49  ;;  %v856_v54 = vmul.f32 %v840_v43, %v1626_v47 }
 0x1b1   : > { %1261 = vtanh.f32 %v903_v42  ;;  %v896_v55 = vadd.f32 %v880_v41, %v1614_v31  ;;  %v857_v58 = vmul.f32 %v841_v52, %v1629_v48  ;;  %v718_v59 = vpop.f32.mrf.mxu2  ;;  %v897_v60 = vadd.f32 %v881_v53, %v1617_v34 }
 0x1b2   : > { %v872_v61 = vmul.f32 0.044715, %v856_v54  ;;  %v1642_v62 = vadd.f32 %v1583_v8, %v718_v59  ;;  %v759_v63 = vpop.f32.mrf.mxu3 }
 0x1b3   : > { %v706_v0 = vpop.f32.mrf.mxu0  ;;  %v1256_v2 = vpop.eup %1255  ;;  %v912_v3 = vmul.f32 0.7978846, %v896_v55  ;;  %v873_v4 = vmul.f32 0.044715, %v857_v58  ;;  %v1645_v5 = vadd.f32 %v1585_v1, %v759_v63  ;;  %v913_v7 = vmul.f32 0.7978846, %v897_v60 }
 0x1b4   : > { %v1648_v6 = vadd.f32 %v1583_v8, %v706_v0  ;;  %v1258_v46 = vpop.eup %1257  ;;  %v942_v56 = vadd.f32 1.0, %v1256_v2  ;;  %v888_v57 = vadd.f32 %v872_v61, %v1626_v47  ;;  %v850_v9 = vmul.f32 %v1642_v62, %v1642_v62  ;;  %v747_v28 = vpop.f32.mrf.mxu1 }
 0x1b5   : > { %v943_v13 = vadd.f32 1.0, %v1258_v46  ;;  %1263 = vtanh.f32 %v912_v3  ;;  %v889_v14 = vadd.f32 %v873_v4, %v1629_v48  ;;  %v851_v15 = vmul.f32 %v1645_v5, %v1645_v5 }
 0x1b6   : > { %v1260_v10 = vpop.eup %1259  ;;  %v958_v19 = vmul.f32 0.5, %v942_v56  ;;  %1265 = vtanh.f32 %v913_v7  ;;  %v904_v29 = vmul.f32 0.7978846, %v888_v57  ;;  %v866_v22 = vmul.f32 %v850_v9, %v1642_v62 }
 0x1b7   : > { %v1262_v17 = vpop.eup %1261  ;;  %v934_v20 = vadd.f32 1.0, %v1260_v10  ;;  %v959_v21 = vmul.f32 0.5, %v943_v13  ;;  %v905_v24 = vmul.f32 0.7978846, %v889_v14  ;;  %v867_v27 = vmul.f32 %v851_v15, %v1645_v5 }
 0x1b8   : > { %v935_v23 = vadd.f32 1.0, %v1262_v17  ;;  %v974_v25 = vmul.f32 %v958_v19, %v1588_v11  ;;  %1267 = vtanh.f32 %v904_v29  ;;  %v882_v33 = vmul.f32 0.044715, %v866_v22 }
 0x1b9   : > { %v950_v26 = vmul.f32 0.5, %v934_v20  ;;  %v975_v30 = vmul.f32 %v959_v21, %v1591_v12  ;;  %1269 = vtanh.f32 %v905_v24  ;;  %v721_v36 = vpop.f32.mrf.mxu2  ;;  %v883_v38 = vmul.f32 0.044715, %v867_v27 }
 0x1ba   : > { %v951_v32 = vmul.f32 0.5, %v935_v23  ;;  %990 = vst [vmem:[%s1660_s29 + $0x40] sm:$0xff] %v974_v25  ;;  %v842_v11 = vmul.f32 %v1648_v6, %v1648_v6  ;;  %v1671_v39 = vadd.f32 %v1585_v1, %v747_v28  ;;  %v762_v35 = vpop.f32.mrf.mxu3  ;;  %v898_v44 = vadd.f32 %v882_v33, %v1642_v62 }
 0x1bb   : > { %v966_v37 = vmul.f32 %v950_v26, %v1598_v16  ;;  %v1264_v40 = vpop.eup %1263  ;;  %991 = vst [vmem:[%s1660_s29 + $0x48] sm:$0xff] %v975_v30  ;;  %v1677_v45 = vadd.f32 %v1583_v8, %v721_v36  ;;  %v1680_v16 = vadd.f32 %v1585_v1, %v762_v35  ;;  %v899_v42 = vadd.f32 %v883_v38, %v1645_v5  ;;  %v709_v3 = vpop.f32.mrf.mxu0 }
 0x1bc   : > { %v967_v12 = vmul.f32 %v951_v32, %v1601_v18  ;;  %v1266_v49 = vpop.eup %1265  ;;  %v944_v50 = vadd.f32 1.0, %v1264_v40  ;;  %v858_v51 = vmul.f32 %v842_v11, %v1648_v6  ;;  %v843_v43 = vmul.f32 %v1671_v39, %v1671_v39  ;;  %v750_v7 = vpop.f32.mrf.mxu1 }
 0x1bd   : > { %982 = vst [vmem:[%s1660_s29] sm:$0xff] %v966_v37  ;;  %v945_v18 = vadd.f32 1.0, %v1266_v49  ;;  %v914_v41 = vmul.f32 0.7978846, %v898_v44  ;;  %v852_v52 = vmul.f32 %v1677_v45, %v1677_v45  ;;  %v853_v53 = vmul.f32 %v1680_v16, %v1680_v16 }
 0x1be   : > { %983 = vst [vmem:[%s1660_s29 + $0x8] sm:$0xff] %v967_v12  ;;  %v1268_v54 = vpop.eup %1267  ;;  %v960_v55 = vmul.f32 0.5, %v944_v50  ;;  %v915_v58 = vmul.f32 0.7978846, %v899_v42  ;;  %v874_v59 = vmul.f32 0.044715, %v858_v51  ;;  %v859_v60 = vmul.f32 %v843_v43, %v1671_v39 }
 0x1bf   : > { %v1270_v61 = vpop.eup %1269  ;;  %v961_v63 = vmul.f32 0.5, %v945_v18  ;;  %v936_v0 = vadd.f32 1.0, %v1268_v54  ;;  %1271 = vtanh.f32 %v914_v41  ;;  %v868_v2 = vmul.f32 %v852_v52, %v1677_v45 }
 0x1c0   : > { %v976_v4 = vmul.f32 %v960_v55, %v1614_v31  ;;  %v937_v46 = vadd.f32 1.0, %v1270_v61  ;;  %1273 = vtanh.f32 %v915_v58  ;;  %v890_v56 = vadd.f32 %v874_v59, %v1648_v6 }
 0x1c1   : > { %v977_v57 = vmul.f32 %v961_v63, %v1617_v34  ;;  %v952_v9 = vmul.f32 0.5, %v936_v0  ;;  %v875_v10 = vmul.f32 0.044715, %v859_v60  ;;  %v884_v13 = vmul.f32 0.044715, %v868_v2 }
 0x1c2   : > { %992 = vst [vmem:[%s1660_s29 + $0x50] sm:$0xff] %v976_v4  ;;  %v953_v14 = vmul.f32 0.5, %v937_v46  ;;  %v906_v15 = vmul.f32 0.7978846, %v890_v56  ;;  %v869_v17 = vmul.f32 %v853_v53, %v1680_v16  ;;  %v1700_v19 = vadd.f32 %v1583_v8, %v709_v3 }
 0x1c3   : > { %993 = vst [vmem:[%s1660_s29 + $0x58] sm:$0xff] %v977_v57  ;;  %v968_v31 = vmul.f32 %v952_v9, %v1626_v47  ;;  %v891_v20 = vadd.f32 %v875_v10, %v1671_v39  ;;  %v900_v34 = vadd.f32 %v884_v13, %v1677_v45  ;;  %v829_v29 = vadd.f32 %v1585_v1, %v750_v7 }
 0x1c4   : > { %v969_v28 = vmul.f32 %v953_v14, %v1629_v48  ;;  %1275 = vtanh.f32 %v906_v15  ;;  %v885_v21 = vmul.f32 0.044715, %v869_v17  ;;  %v844_v23 = vmul.f32 %v1700_v19, %v1700_v19 }
 0x1c5   : > { %v1272_v24 = vpop.eup %1271  ;;  %984 = vst [vmem:[%s1660_s29 + $0x10] sm:$0xff] %v968_v31  ;;  %v907_v8 = vmul.f32 0.7978846, %v891_v20  ;;  %v916_v22 = vmul.f32 0.7978846, %v900_v34  ;;  %v845_v25 = vmul.f32 %v829_v29, %v829_v29 }
 0x1c6   : > { %v1274_v26 = vpop.eup %1273  ;;  %985 = vst [vmem:[%s1660_s29 + $0x18] sm:$0xff] %v969_v28  ;;  %v946_v47 = vadd.f32 1.0, %v1272_v24  ;;  %v901_v27 = vadd.f32 %v885_v21, %v1680_v16  ;;  %v860_v30 = vmul.f32 %v844_v23, %v1700_v19 }
 0x1c7   : > { %v947_v1 = vadd.f32 1.0, %v1274_v26  ;;  %1277 = vtanh.f32 %v907_v8  ;;  %v861_v48 = vmul.f32 %v845_v25, %v829_v29 }
 0x1c8   : > { %v962_v32 = vmul.f32 0.5, %v946_v47  ;;  %1279 = vtanh.f32 %v916_v22  ;;  %v917_v33 = vmul.f32 0.7978846, %v901_v27  ;;  %v876_v36 = vmul.f32 0.044715, %v860_v30 }
 0x1c9   : > { %v963_v37 = vmul.f32 0.5, %v947_v1  ;;  %v877_v38 = vmul.f32 0.044715, %v861_v48 }
 0x1ca   : > { %v1276_v11 = vpop.eup %1275  ;;  %v978_v35 = vmul.f32 %v962_v32, %v1642_v62  ;;  %1281 = vtanh.f32 %v917_v33  ;;  %v892_v40 = vadd.f32 %v876_v36, %v1700_v19 }
 0x1cb   : > { %v979_v12 = vmul.f32 %v963_v37, %v1645_v5  ;;  %v938_v44 = vadd.f32 1.0, %v1276_v11  ;;  %v893_v49 = vadd.f32 %v877_v38, %v829_v29 }
 0x1cc   : > { %994 = vst [vmem:[%s1660_s29 + $0x60] sm:$0xff] %v978_v35  ;;  %v908_v50 = vmul.f32 0.7978846, %v892_v40 }
 0x1cd   : > { %v1278_v42 = vpop.eup %1277  ;;  %995 = vst [vmem:[%s1660_s29 + $0x68] sm:$0xff] %v979_v12  ;;  %v954_v51 = vmul.f32 0.5, %v938_v44  ;;  %v909_v43 = vmul.f32 0.7978846, %v893_v49 }
 0x1ce   : > { %v1280_v18 = vpop.eup %1279  ;;  %v939_v41 = vadd.f32 1.0, %v1278_v42  ;;  %1283 = vtanh.f32 %v908_v50 }
 0x1cf   : > { %v970_v62 = vmul.f32 %v954_v51, %v1648_v6  ;;  %v948_v52 = vadd.f32 1.0, %v1280_v18  ;;  %1285 = vtanh.f32 %v909_v43 }
 0x1d0   : > { %v1282_v5 = vpop.eup %1281  ;;  %v955_v53 = vmul.f32 0.5, %v939_v41 }
 0x1d1   : > { %986 = vst [vmem:[%s1660_s29 + $0x20] sm:$0xff] %v970_v62  ;;  %v964_v54 = vmul.f32 0.5, %v948_v52  ;;  %v949_v55 = vadd.f32 1.0, %v1282_v5 }
 0x1d2   : > { %v971_v58 = vmul.f32 %v955_v53, %v1671_v39 }
 0x1d3   : > { %v980_v59 = vmul.f32 %v964_v54, %v1677_v45  ;;  %v965_v60 = vmul.f32 0.5, %v949_v55 }
 0x1d4   : > { %v1284_v61 = vpop.eup %1283  ;;  %987 = vst [vmem:[%s1660_s29 + $0x28] sm:$0xff] %v971_v58 }
 0x1d5   : > { %v1286_v63 = vpop.eup %1285  ;;  %996 = vst [vmem:[%s1660_s29 + $0x70] sm:$0xff] %v980_v59  ;;  %v981_v6 = vmul.f32 %v965_v60, %v1680_v16  ;;  %v940_v0 = vadd.f32 1.0, %v1284_v61 }
 0x1d6   : > { %v941_v2 = vadd.f32 1.0, %v1286_v63 }
 0x1d7   : > { %997 = vst [vmem:[%s1660_s29 + $0x78] sm:$0xff] %v981_v6  ;;  %v956_v3 = vmul.f32 0.5, %v940_v0 }
 0x1d8   : > { %v957_v4 = vmul.f32 0.5, %v941_v2 }
 0x1d9   : > { %v972_v46 = vmul.f32 %v956_v3, %v1700_v19 }
 0x1da   : > { %v973_v56 = vmul.f32 %v957_v4, %v829_v29 }
 0x1db   : > { %988 = vst [vmem:[%s1660_s29 + $0x30] sm:$0xff] %v972_v46 }
 0x1dc   : > { %989 = vst [vmem:[%s1660_s29 + $0x38] sm:$0xff] %v973_v56 }
 0x1dd PF: > { %s15_s20 = sadd.s32 1, %s1309_s20   ;;  %s1749_s18 = smov %s1305_s19 }
 0x1de   : > { %p12_p5 = scmp.ge.s32.totalorder %s15_s20, 4   ;;  %s1750_s19 = smov %s1752_s21 }
 0x1e0   :  { %14 = sbr.rel (!%p12_p5) target bundleno = 2 (0x2), region = 90 }

// kernel: model_forward.39
= control target key start
LH: loop header
LB: loop body
LE: loop exit
PB: predicated region body
PF: predicated region fallthrough
CT: control target
= control target key end

     0   :  { %10 = vsyncpa [#allocation4], 0  ;;  %s1010_s18 = smov 0   ;;  %s1012_s19 = smov 0   ;;  %s1245_s0 = inlined_call_operand.vmem [shape: f32[2,64,256], index: 0, kind: input, shape index: {}]   ;;  %s1246_s1 = inlined_call_operand.vmem [shape: f32[256,64], index: 1, kind: input, shape index: {}]   ;;  %s1247_s2 = inlined_call_operand.hbm [shape: f32[1,64], index: 2, kind: input, shape index: {}]   ;;  %s1248_s3 = inlined_call_operand.vmem [shape: f32[2,64,64], index: 3, kind: input, shape index: {}]   ;;  %s1249_s4 = inlined_call_operand.vmem [shape: f32[2,1,64], index: 4, kind: input, shape index: {}]   ;;  %s1250_s5 = inlined_call_operand.vmem [shape: f32[2,64,64], index: 5, kind: output, shape index: {}]  }
   0x1   :  { %s1014_s20 = smov 0  }
   0x2 LB: > { %s831_s21 = sadd.s32 4294967295, %s976_s20   ;;  %s42_s22 = sadd.s32 1, %s972_s19  ;;  %s976_s20 = sphi %s1014_s20, %s16_s20   ;;  %s972_s19 = sphi %s1012_s19, %s1252_s19   ;;  %s968_s18 = sphi %s1010_s18, %s1251_s18  }
   0x3   : > { %p44_p0 = scmp.ge.s32.totalorder %s42_s22, 2  ;;  %p833_p1 = scmp.ge.s32.totalorder %s976_s20, 1 }
   0x4   : > { %p219_p2 = scmp.lt.s32.totalorder %s976_s20, 3  ;;  %p890_p4 = scmp.eq.s32.totalorder %s831_s21, 0 }
   0x5   : > { %s1254_s22 = smov (%p44_p0, %s42_s22), 0  ;;  %s244_s25 = sshll.u32 %s1247_s2, 4  ;;  %s245_s25 = int_to_ptr.hbm [resolvable:$true] %s244_s25 }
   0x6   : > { %p220_p3 = pnand %p833_p1, %p219_p2  ;;  %s978_s26 = smov [#allocation3]  }
   0x7   : > { %s246_s27 = sshll.u32 %s978_s26, 4  ;;  %s247_s27 = int_to_ptr.vmem [resolvable:$true] %s246_s27 }
   0x8   : > { %p886_p5 = pneg %p220_p3  ;;  %303 = sbr.rel (%p220_p3) target bundleno = 222 (0xde), region = 40 }
   0xa   : > { %p887_p6 = pnand %p890_p4, %p886_p5 }
   0xc   : > { %889 = dma.hbm_to_vmem [thread:$0]  (!%p887_p6), %s245_s25, 16, %s247_s27, [#allocation4]  }
   0xd   : > { %963 = dma.done.wait (%p890_p4), [#allocation4], 16  }
   0xe   : > { %965 = vsyncadd (%p890_p4), [#allocation4], 4294967280  ;;  %v483_v0 = vld [vmem:[%s1246_s1 + $0x78] sm:$0xff]  ;;  %v482_v2 = vld [vmem:[%s1246_s1 + $0x70] sm:$0xff]  ;;  %p376_p7 = scmp.lt.s32.totalorder %s968_s18, 1  ;;  %vm435_vm0 = vcmask 523264  }
   0xf   : > { %v499_v1 = vld [vmem:[%s1246_s1 + $0xf8] sm:$0xff]  ;;  %850 = vmatpush.msra.mxu2 %v483_v0  ;;  %v498_v3 = vld [vmem:[%s1246_s1 + $0xf0] sm:$0xff]  ;;  %v481_v4 = vld [vmem:[%s1246_s1 + $0x68] sm:$0xff]  ;;  %500 = vmatpush.msra.mxu0 %v483_v0  ;;  %v979_v48 = vmov 0.0  }
  0x10   : > { %866 = vmatpush.msra.mxu3 %v499_v1  ;;  %v497_v5 = vld [vmem:[%s1246_s1 + $0xe8] sm:$0xff]  ;;  %541 = vmatpush.msra.mxu1 %v499_v1  ;;  %v480_v6 = vld [vmem:[%s1246_s1 + $0x60] sm:$0xff]  ;;  %v479_v8 = vld [vmem:[%s1246_s1 + $0x58] sm:$0xff]  ;;  %s1256_s18 = smov (!%p376_p7, %s968_s18), 1  ;;  %436 = vst.msk [vmem:[#allocation2] sm:$0xff] %vm435_vm0, %v979_v48 }
  0x11   : > { %851 = vmatpush.msra.mxu2 %v482_v2  ;;  %v496_v7 = vld [vmem:[%s1246_s1 + $0xe0] sm:$0xff]  ;;  %501 = vmatpush.msra.mxu0 %v482_v2  ;;  %v495_v9 = vld [vmem:[%s1246_s1 + $0xd8] sm:$0xff]  ;;  %v478_v10 = vld [vmem:[%s1246_s1 + $0x50] sm:$0xff]  ;;  %s417_s12 = scalar_lea.vmem %s1249_s4, %s1256_s18  ;;  %s847_s17 = sshll.u32 %s1256_s18, 7  ;;  %437 = vst.msk [vmem:[#allocation2 + $0x8] sm:$0xff] %vm435_vm0, %v979_v48 }
  0x12   : > { %867 = vmatpush.msra.mxu3 %v498_v3  ;;  %542 = vmatpush.msra.mxu1 %v498_v3  ;;  %v494_v11 = vld [vmem:[%s1246_s1 + $0xd0] sm:$0xff]  ;;  %v477_v12 = vld [vmem:[%s1246_s1 + $0x48] sm:$0xff]  ;;  %v476_v14 = vld [vmem:[%s1246_s1 + $0x40] sm:$0xff]  ;;  %s1136_s7 = scalar_lea.vmem %s1245_s0, %s847_s17  ;;  %438 = vst.msk [vmem:[#allocation2 + $0x10] sm:$0xff] %vm435_vm0, %v979_v48  ;;  %s848_s13 = sshll.u32 %s1256_s18, 6 }
  0x13   : > { %852 = vmatpush.msra.mxu2 %v481_v4  ;;  %502 = vmatpush.msra.mxu0 %v481_v4  ;;  %v493_v13 = vld [vmem:[%s1246_s1 + $0xc8] sm:$0xff]  ;;  %v492_v15 = vld [vmem:[%s1246_s1 + $0xc0] sm:$0xff]  ;;  %v475_v16 = vld [vmem:[%s1246_s1 + $0x38] sm:$0xff]  ;;  %439 = vst.msk [vmem:[#allocation2 + $0x18] sm:$0xff] %vm435_vm0, %v979_v48  ;;  %s1183_s21 = scalar_lea.vmem %s1248_s3, %s848_s13  ;;  %s1192_s23 = scalar_lea.vmem %s1250_s5, %s848_s13 }
  0x14   : > { %868 = vmatpush.msra.mxu3 %v497_v5  ;;  %543 = vmatpush.msra.mxu1 %v497_v5  ;;  %v491_v17 = vld [vmem:[%s1246_s1 + $0xb8] sm:$0xff]  ;;  %v474_v18 = vld [vmem:[%s1246_s1 + $0x30] sm:$0xff]  ;;  %v473_v20 = vld [vmem:[%s1246_s1 + $0x28] sm:$0xff]  ;;  %440 = vst.msk [vmem:[#allocation2 + $0x20] sm:$0xff] %vm435_vm0, %v979_v48 }
  0x15   : > { %853 = vmatpush.msra.mxu2 %v480_v6  ;;  %503 = vmatpush.msra.mxu0 %v480_v6  ;;  %v490_v19 = vld [vmem:[%s1246_s1 + $0xb0] sm:$0xff]  ;;  %v489_v21 = vld [vmem:[%s1246_s1 + $0xa8] sm:$0xff]  ;;  %v472_v22 = vld [vmem:[%s1246_s1 + $0x20] sm:$0xff]  ;;  %441 = vst.msk [vmem:[#allocation2 + $0x28] sm:$0xff] %vm435_vm0, %v979_v48 }
  0x16   : > { %869 = vmatpush.msra.mxu3 %v496_v7  ;;  %544 = vmatpush.msra.mxu1 %v496_v7  ;;  %v488_v23 = vld [vmem:[%s1246_s1 + $0xa0] sm:$0xff]  ;;  %v471_v24 = vld [vmem:[%s1246_s1 + $0x18] sm:$0xff]  ;;  %v470_v26 = vld [vmem:[%s1246_s1 + $0x10] sm:$0xff]  ;;  %442 = vst.msk [vmem:[#allocation2 + $0x30] sm:$0xff] %vm435_vm0, %v979_v48 }
  0x17   : > { %854 = vmatpush.msra.mxu2 %v479_v8  ;;  %504 = vmatpush.msra.mxu0 %v479_v8  ;;  %v487_v25 = vld [vmem:[%s1246_s1 + $0x98] sm:$0xff]  ;;  %v486_v27 = vld [vmem:[%s1246_s1 + $0x90] sm:$0xff]  ;;  %v469_v28 = vld [vmem:[%s1246_s1 + $0x8] sm:$0xff]  ;;  %443 = vst.msk [vmem:[#allocation2 + $0x38] sm:$0xff] %vm435_vm0, %v979_v48 }
  0x18   : > { %870 = vmatpush.msra.mxu3 %v495_v9  ;;  %545 = vmatpush.msra.mxu1 %v495_v9  ;;  %v485_v29 = vld [vmem:[%s1246_s1 + $0x88] sm:$0xff]  ;;  %v468_v30 = vld [vmem:[%s1246_s1] sm:$0xff]  ;;  %v454_v36 = vld [vmem:[%s1136_s7 + $0x50] sm:$0xff] }
  0x19   : > { %855 = vmatpush.msra.mxu2 %v478_v10  ;;  %505 = vmatpush.msra.mxu0 %v478_v10  ;;  %v484_v31 = vld [vmem:[%s1246_s1 + $0x80] sm:$0xff]  ;;  %v453_v33 = vld [vmem:[%s1136_s7 + $0x48] sm:$0xff]  ;;  %v455_v37 = vld [vmem:[%s1136_s7 + $0x58] sm:$0xff] }
  0x1a   : > { %871 = vmatpush.msra.mxu3 %v494_v11  ;;  %546 = vmatpush.msra.mxu1 %v494_v11  ;;  %v452_v32 = vld [vmem:[%s1136_s7 + $0x40] sm:$0xff]  ;;  %v445_v35 = vld [vmem:[%s1136_s7 + $0x8] sm:$0xff]  ;;  %v446_v38 = vld [vmem:[%s1136_s7 + $0x10] sm:$0xff] }
  0x1b   : > { %856 = vmatpush.msra.mxu2 %v477_v12  ;;  %506 = vmatpush.msra.mxu0 %v477_v12  ;;  %v444_v34 = vld [vmem:[%s1136_s7] sm:$0xff]  ;;  %v447_v39 = vld [vmem:[%s1136_s7 + $0x18] sm:$0xff]  ;;  %v457_v41 = vld [vmem:[%s1136_s7 + $0x68] sm:$0xff] }
  0x1c   : > { %872 = vmatpush.msra.mxu3 %v493_v13  ;;  %547 = vmatpush.msra.mxu1 %v493_v13  ;;  %v456_v40 = vld [vmem:[%s1136_s7 + $0x60] sm:$0xff]  ;;  %v449_v43 = vld [vmem:[%s1136_s7 + $0x28] sm:$0xff]  ;;  %v458_v44 = vld [vmem:[%s1136_s7 + $0x70] sm:$0xff] }
  0x1d   : > { %857 = vmatpush.msra.mxu2 %v476_v14  ;;  %507 = vmatpush.msra.mxu0 %v476_v14  ;;  %v448_v42 = vld [vmem:[%s1136_s7 + $0x20] sm:$0xff]  ;;  %v459_v45 = vld [vmem:[%s1136_s7 + $0x78] sm:$0xff]  ;;  %v450_v46 = vld [vmem:[%s1136_s7 + $0x30] sm:$0xff] }
  0x1e   : > { %873 = vmatpush.msra.mxu3 %v492_v15  ;;  %548 = vmatpush.msra.mxu1 %v492_v15  ;;  %v451_v47 = vld [vmem:[%s1136_s7 + $0x38] sm:$0xff]  ;;  %v460_v50 = vld [vmem:[#allocation2] sm:$0xff]  ;;  %v461_v60 = vld [vmem:[#allocation2 + $0x8] sm:$0xff] }
  0x1f   : > { %858 = vmatpush.msra.mxu2 %v475_v16  ;;  %508 = vmatpush.msra.mxu0 %v475_v16  ;;  %v464_v55 = vld [vmem:[#allocation2 + $0x20] sm:$0xff]  ;;  %v465_v4 = vld [vmem:[#allocation2 + $0x28] sm:$0xff]  ;;  %v462_v13 = vld [vmem:[#allocation2 + $0x10] sm:$0xff] }
  0x20   : > { %874 = vmatpush.msra.mxu3 %v491_v17  ;;  %549 = vmatpush.msra.mxu1 %v491_v17  ;;  %v1170_v62 = vld [vmem:[#allocation3] ss:$0 sm:$0xff]  ;;  %v624_v48 = vld [vmem:[%s1183_s21 + $0x10] sm:$0xff] }
  0x21   : > { %859 = vmatpush.msra.mxu2 %v474_v18  ;;  %509 = vmatpush.msra.mxu0 %v474_v18  ;;  %v1178_v0 = vld [vmem:[%s417_s12] ss:$0 sm:$0xff] }
  0x22   : > { %875 = vmatpush.msra.mxu3 %v490_v19  ;;  %550 = vmatpush.msra.mxu1 %v490_v19  ;;  %v622_v8 = vld [vmem:[%s1183_s21] sm:$0xff] }
  0x23   : > { %860 = vmatpush.msra.mxu2 %v473_v20  ;;  %510 = vmatpush.msra.mxu0 %v473_v20  ;;  %v626_v18 = vld [vmem:[%s1183_s21 + $0x20] sm:$0xff] }
  0x24   : > { %876 = vmatpush.msra.mxu3 %v489_v21  ;;  %551 = vmatpush.msra.mxu1 %v489_v21 }
  0x25   : > { %861 = vmatpush.msra.mxu2 %v472_v22  ;;  %511 = vmatpush.msra.mxu0 %v472_v22 }
  0x26   : > { %877 = vmatpush.msra.mxu3 %v488_v23  ;;  %552 = vmatpush.msra.mxu1 %v488_v23  ;;  %v466_v23 = vld [vmem:[#allocation2 + $0x30] sm:$0xff] }
  0x27   : > { %862 = vmatpush.msra.mxu2 %v471_v24  ;;  %512 = vmatpush.msra.mxu0 %v471_v24 }
  0x28   : > { %878 = vmatpush.msra.mxu3 %v487_v25  ;;  %553 = vmatpush.msra.mxu1 %v487_v25 }
  0x29   : > { %863 = vmatpush.msra.mxu2 %v470_v26  ;;  %513 = vmatpush.msra.mxu0 %v470_v26 }
  0x2a   : > { %879 = vmatpush.msra.mxu3 %v486_v27  ;;  %554 = vmatpush.msra.mxu1 %v486_v27 }
  0x2b   : > { %864 = vmatpush.msra.mxu2 %v469_v28  ;;  %514 = vmatpush.msra.mxu0 %v469_v28  ;;  %v623_v28 = vld [vmem:[%s1183_s21 + $0x8] sm:$0xff] }
  0x2c   : > { %880 = vmatpush.msra.mxu3 %v485_v29  ;;  %555 = vmatpush.msra.mxu1 %v485_v29 }
  0x2d   : > { %865 = vmatpush.msra.mxu2 %v468_v30  ;;  %515 = vmatpush.msra.mxu0 %v468_v30 }
  0x2e   : > { %881 = vmatpush.msra.mxu3 %v484_v31  ;;  %528 = vmatmul.f32.vlgmr.msra.gmra.mxu2 %v452_v32 }
  0x2f   : > { %569 = vmatmul.f32.vlgmr.msra.gmra.mxu3 %v453_v33  ;;  %556 = vmatpush.msra.mxu1 %v484_v31  ;;  %v463_v33 = vld [vmem:[#allocation2 + $0x18] sm:$0xff] }
  0x30   : > { %516 = vmatmul.f32.vlgmr.msra.gmra.mxu0 %v444_v34  ;;  %557 = vmatmul.f32.vlgmr.msra.gmra.mxu1 %v445_v35 }
  0x36   : > { %531 = vmatmul.f32.gmra.mxu2 %v454_v36 }
  0x37   : > { %572 = vmatmul.f32.gmra.mxu3 %v455_v37 }
  0x38   : > { %519 = vmatmul.f32.gmra.mxu0 %v446_v38  ;;  %560 = vmatmul.f32.gmra.mxu1 %v447_v39  ;;  %v627_v38 = vld [vmem:[%s1183_s21 + $0x28] sm:$0xff] }
  0x3e   : > { %534 = vmatmul.f32.gmra.mxu2 %v456_v40 }
  0x3f   : > { %575 = vmatmul.f32.gmra.mxu3 %v457_v41 }
  0x40   : > { %522 = vmatmul.f32.gmra.mxu0 %v448_v42  ;;  %563 = vmatmul.f32.gmra.mxu1 %v449_v43  ;;  %v467_v43 = vld [vmem:[#allocation2 + $0x38] sm:$0xff] }
  0x46   : > { %537 = vmatmul.f32.gmra.mxu2 %v458_v44 }
  0x47   : > { %578 = vmatmul.f32.gmra.mxu3 %v459_v45 }
  0x48   : > { %525 = vmatmul.f32.gmra.mxu0 %v450_v46  ;;  %566 = vmatmul.f32.gmra.mxu1 %v451_v47 }
  0xad   : > { %v517_v49 = vpop.f32.mrf.mxu0  ;;  %v558_v51 = vpop.f32.mrf.mxu1 }
  0xae   : > { %v559_v52 = vadd.f32 %v558_v51, %v517_v49 }
  0xb0   : > { %v582_v53 = vadd.f32 %v559_v52, %v460_v50 }
  0xb1   : > { %v529_v54 = vpop.f32.mrf.mxu2 }
  0xb2   : > { %v570_v56 = vpop.f32.mrf.mxu3  ;;  %591 = vst.msk [vmem:[#allocation2] sm:$0xff] %vm435_vm0, %v582_v53 }
  0xb3   : > { %v571_v57 = vadd.f32 %v570_v56, %v529_v54  ;;  %v628_v54 = vld [vmem:[%s1183_s21 + $0x30] sm:$0xff] }
  0xb5   : > { %v586_v58 = vadd.f32 %v571_v57, %v464_v55  ;;  %v520_v59 = vpop.f32.mrf.mxu0  ;;  %v561_v61 = vpop.f32.mrf.mxu1 }
  0xb6   : > { %v562_v63 = vadd.f32 %v561_v61, %v520_v59  ;;  %v625_v59 = vld [vmem:[%s1183_s21 + $0x18] sm:$0xff] }
  0xb7   : > { %595 = vst.msk [vmem:[#allocation2 + $0x20] sm:$0xff] %vm435_vm0, %v586_v58 }
  0xb8   : > { %v583_v1 = vadd.f32 %v562_v63, %v461_v60 }
  0xb9   : > { %v602_v2 = vld [vmem:[#allocation2] sm:$0xff]  ;;  %v532_v3 = vpop.f32.mrf.mxu2 }
  0xba   : > { %v573_v5 = vpop.f32.mrf.mxu3  ;;  %v614_v6 = vadd.f32 %v1170_v62, %v602_v2  ;;  %592 = vst.msk [vmem:[#allocation2 + $0x8] sm:$0xff] %vm435_vm0, %v583_v1  ;;  %v629_v2 = vld [vmem:[%s1183_s21 + $0x38] sm:$0xff] }
  0xbb   : > { %v574_v7 = vadd.f32 %v573_v5, %v532_v3 }
  0xbc   : > { %v634_v9 = vmul.f32 %v1178_v0, %v614_v6 }
  0xbd   : > { %v587_v10 = vadd.f32 %v574_v7, %v465_v4  ;;  %v523_v12 = vpop.f32.mrf.mxu0  ;;  %v564_v14 = vpop.f32.mrf.mxu1 }
  0xbe   : > { %v606_v11 = vld [vmem:[#allocation2 + $0x20] sm:$0xff]  ;;  %v642_v15 = vadd.f32 %v634_v9, %v622_v8  ;;  %v565_v17 = vadd.f32 %v564_v14, %v523_v12 }
  0xbf   : > { %v618_v16 = vadd.f32 %v1170_v62, %v606_v11  ;;  %596 = vst.msk [vmem:[#allocation2 + $0x28] sm:$0xff] %vm435_vm0, %v587_v10 }
  0xc0   : > { %650 = vst.msk [vmem:[%s1192_s23] sm:$0xff] %vm435_vm0, %v642_v15  ;;  %v584_v20 = vadd.f32 %v565_v17, %v462_v13 }
  0xc1   : > { %v638_v19 = vmul.f32 %v1178_v0, %v618_v16  ;;  %v603_v21 = vld [vmem:[#allocation2 + $0x8] sm:$0xff]  ;;  %v535_v22 = vpop.f32.mrf.mxu2 }
  0xc2   : > { %v576_v24 = vpop.f32.mrf.mxu3  ;;  %v615_v26 = vadd.f32 %v1170_v62, %v603_v21  ;;  %593 = vst.msk [vmem:[#allocation2 + $0x10] sm:$0xff] %vm435_vm0, %v584_v20 }
  0xc3   : > { %v646_v25 = vadd.f32 %v638_v19, %v626_v18  ;;  %v577_v27 = vadd.f32 %v576_v24, %v535_v22 }
  0xc4   : > { %v635_v29 = vmul.f32 %v1178_v0, %v615_v26 }
  0xc5   : > { %654 = vst.msk [vmem:[%s1192_s23 + $0x20] sm:$0xff] %vm435_vm0, %v646_v25  ;;  %v588_v30 = vadd.f32 %v577_v27, %v466_v23  ;;  %v526_v32 = vpop.f32.mrf.mxu0  ;;  %v567_v34 = vpop.f32.mrf.mxu1 }
  0xc6   : > { %v607_v31 = vld [vmem:[#allocation2 + $0x28] sm:$0xff]  ;;  %v643_v35 = vadd.f32 %v635_v29, %v623_v28  ;;  %v568_v37 = vadd.f32 %v567_v34, %v526_v32 }
  0xc7   : > { %v619_v36 = vadd.f32 %v1170_v62, %v607_v31  ;;  %597 = vst.msk [vmem:[#allocation2 + $0x30] sm:$0xff] %vm435_vm0, %v588_v30 }
  0xc8   : > { %651 = vst.msk [vmem:[%s1192_s23 + $0x8] sm:$0xff] %vm435_vm0, %v643_v35  ;;  %v585_v40 = vadd.f32 %v568_v37, %v463_v33 }
  0xc9   : > { %v639_v39 = vmul.f32 %v1178_v0, %v619_v36  ;;  %v604_v41 = vld [vmem:[#allocation2 + $0x10] sm:$0xff]  ;;  %v538_v42 = vpop.f32.mrf.mxu2 }
  0xca   : > { %v579_v44 = vpop.f32.mrf.mxu3  ;;  %v616_v46 = vadd.f32 %v1170_v62, %v604_v41  ;;  %594 = vst.msk [vmem:[#allocation2 + $0x18] sm:$0xff] %vm435_vm0, %v585_v40 }
  0xcb   : > { %v647_v45 = vadd.f32 %v639_v39, %v627_v38  ;;  %v580_v47 = vadd.f32 %v579_v44, %v538_v42 }
  0xcc   : > { %v636_v49 = vmul.f32 %v1178_v0, %v616_v46 }
  0xcd   : > { %655 = vst.msk [vmem:[%s1192_s23 + $0x28] sm:$0xff] %vm435_vm0, %v647_v45  ;;  %v589_v50 = vadd.f32 %v580_v47, %v467_v43 }
  0xce   : > { %v608_v51 = vld [vmem:[#allocation2 + $0x30] sm:$0xff]  ;;  %v644_v52 = vadd.f32 %v636_v49, %v624_v48 }
  0xcf   : > { %v620_v53 = vadd.f32 %v1170_v62, %v608_v51  ;;  %598 = vst.msk [vmem:[#allocation2 + $0x38] sm:$0xff] %vm435_vm0, %v589_v50 }
  0xd0   : > { %652 = vst.msk [vmem:[%s1192_s23 + $0x10] sm:$0xff] %vm435_vm0, %v644_v52 }
  0xd1   : > { %v640_v55 = vmul.f32 %v1178_v0, %v620_v53  ;;  %v605_v56 = vld [vmem:[#allocation2 + $0x18] sm:$0xff] }
  0xd2   : > { %v617_v58 = vadd.f32 %v1170_v62, %v605_v56 }
  0xd3   : > { %v648_v57 = vadd.f32 %v640_v55, %v628_v54 }
  0xd4   : > { %v637_v60 = vmul.f32 %v1178_v0, %v617_v58 }
  0xd5   : > { %656 = vst.msk [vmem:[%s1192_s23 + $0x30] sm:$0xff] %vm435_vm0, %v648_v57 }
  0xd6   : > { %v609_v61 = vld [vmem:[#allocation2 + $0x38] sm:$0xff]  ;;  %v645_v63 = vadd.f32 %v637_v60, %v625_v59 }
  0xd7   : > { %v621_v1 = vadd.f32 %v1170_v62, %v609_v61 }
  0xd8   : > { %653 = vst.msk [vmem:[%s1192_s23 + $0x18] sm:$0xff] %vm435_vm0, %v645_v63 }
  0xd9   : > { %v641_v3 = vmul.f32 %v1178_v0, %v621_v1 }
  0xdb   : > { %v649_v4 = vadd.f32 %v641_v3, %v629_v2 }
  0xdd   : > { %657 = vst.msk [vmem:[%s1192_s23 + $0x38] sm:$0xff] %vm435_vm0, %v649_v4 }
  0xde PF: > { %s16_s20 = sadd.s32 1, %s976_s20   ;;  %s1251_s18 = smov %s972_s19 }
  0xdf   : > { %p13_p8 = scmp.ge.s32.totalorder %s16_s20, 4   ;;  %s1252_s19 = smov %s1254_s22 }
  0xe1   :  { %15 = sbr.rel (!%p13_p8) target bundleno = 2 (0x2), region = 93 }
  0xe6   :  { %694 = vsyncpa [#allocation4], 1 }
  0xe7   :  { %696 = vsyncpa [#allocation4 + $0x1], 1 }

// kernel: model_forward.51
= control target key start
LH: loop header
LB: loop body
LE: loop exit
PB: predicated region body
PF: predicated region fallthrough
CT: control target
= control target key end

     0   :  { %s1034_s18 = smov 0   ;;  %s1036_s19 = smov 0   ;;  %s1327_s0 = inlined_call_operand.vmem [shape: f32[2,64,64], index: 0, kind: input, shape index: {}]   ;;  %s1328_s1 = inlined_call_operand.vmem [shape: f32[2,1,64], index: 1, kind: input, shape index: {}, may-alias: {1,2}]   ;;  %s1329_s2 = inlined_call_operand.vmem [shape: f32[2,1,64], index: 2, kind: input, shape index: {}, may-alias: {1,2}]   ;;  %s1330_s3 = inlined_call_operand.vmem [shape: f32[64,32], index: 3, kind: input, shape index: {}]   ;;  %s1331_s4 = inlined_call_operand.vmem [shape: f32[1,32], index: 4, kind: input, shape index: {}]   ;;  %s1332_s5 = inlined_call_operand.vmem [shape: f32[2,64,32], index: 5, kind: output, shape index: {}]  }
   0x1   :  { %s1038_s20 = smov 0  }
   0x2 LB: > { %s41_s21 = sadd.s32 1, %s996_s19  ;;  %p891_p0 = scmp.ge.s32.totalorder %s1000_s20, 1  ;;  %s1000_s20 = sphi %s1038_s20, %s15_s20   ;;  %s996_s19 = sphi %s1036_s19, %s1336_s19   ;;  %s992_s18 = sphi %s1034_s18, %s1335_s18  }
   0x3   : > { %p43_p1 = scmp.ge.s32.totalorder %s41_s21, 2  ;;  %p269_p2 = scmp.lt.s32.totalorder %s1000_s20, 3 }
   0x5   : > { %s1338_s21 = smov (%p43_p1, %s41_s21), 0  ;;  %p270_p3 = pnand %p891_p0, %p269_p2 }
   0x6   : > { %p329_p4 = scmp.lt.s32.totalorder (!%p270_p3), %s992_s18, 1 }
   0x7   : > { %273 = sbr.rel (%p270_p3) target bundleno = 448 (0x1c0), region = 40 }
   0xc   : > { %s1340_s18 = smov (!%p329_p4, %s992_s18), 1  ;;  %vm393_vm0 = vcmask 523264   ;;  %v1002_v16 = vmov 64.0   ;;  %v617_v63 = vld [vmem:[%s1330_s3 + $0x38] sm:$0xff]  ;;  %vm376_vm12 = vcmask 261120  }
   0xd   : > { %s906_s22 = sshll.u32 %s1340_s18, 6  ;;  %s346_s28 = scalar_lea.vmem %s1329_s2, %s1340_s18  ;;  %960 = vrcp.f32 %v1002_v16  ;;  %650 = vmatpush.msra.mxu0 %v617_v63  ;;  %909 = vmatpush.msra.mxu2 %v617_v63 }
   0xe   : > { %s339_s25 = scalar_lea.vmem %s1327_s0, %s906_s22  ;;  %908 = vmatpush.msra.mxu1 %v617_v63  ;;  %910 = vmatpush.msra.mxu3 %v617_v63  ;;  %s343_s27 = scalar_lea.vmem %s1328_s1, %s1340_s18 }
   0xf   : > { %v390_v0 = vld [vmem:[%s339_s25 + $0x28] sm:$0xff]  ;;  %v389_v2 = vld [vmem:[%s339_s25 + $0x20] sm:$0xff]  ;;  %v392_v6 = vld [vmem:[%s339_s25 + $0x38] sm:$0xff]  ;;  %s1293_s9 = scalar_lea.vmem %s1332_s5, %s906_s22 }
  0x10   : > { %v409_v1 = vsel %vm393_vm0, %v390_v0, 0.0  ;;  %v385_v3 = vld [vmem:[%s339_s25] sm:$0xff]  ;;  %v406_v4 = vsel %vm393_vm0, %v389_v2, 0.0  ;;  %v391_v7 = vld [vmem:[%s339_s25 + $0x30] sm:$0xff]  ;;  %v415_v9 = vsel %vm393_vm0, %v392_v6, 0.0  ;;  %v386_v12 = vld [vmem:[%s339_s25 + $0x8] sm:$0xff] }
  0x11   : > { %410 = vadd.xlane.f32.xlu2 %v409_v1  ;;  %v394_v5 = vsel %vm393_vm0, %v385_v3, 0.0  ;;  %407 = vadd.xlane.f32.xlu0 %v406_v4  ;;  %v387_v8 = vld [vmem:[%s339_s25 + $0x10] sm:$0xff]  ;;  %v412_v10 = vsel %vm393_vm0, %v391_v7, 0.0  ;;  %v388_v13 = vld [vmem:[%s339_s25 + $0x18] sm:$0xff]  ;;  %v397_v14 = vsel %vm393_vm0, %v386_v12, 0.0  ;;  %v615_v1 = vld [vmem:[%s1330_s3 + $0x28] sm:$0xff] }
  0x12   : > { %395 = vadd.xlane.f32.xlu1 %v394_v5  ;;  %v400_v11 = vsel %vm393_vm0, %v387_v8, 0.0  ;;  %v403_v15 = vsel %vm393_vm0, %v388_v13, 0.0  ;;  %v612_v4 = vld [vmem:[%s1330_s3 + $0x10] sm:$0xff]  ;;  %v611_v5 = vld [vmem:[%s1330_s3 + $0x8] sm:$0xff] }
  0x13   : > { %v961_v17 = vpop.eup %960 }
  0x14   : > { %v419_v18 = vmul.f32 64.0, %v961_v17  ;;  %vm423_vm1 = vweird.f32 %v961_v17 }
  0x16   : > { %v420_v19 = vsub.f32 1.0, %v419_v18 }
  0x18   : > { %v421_v20 = vmul.f32 %v961_v17, %v420_v19 }
  0x19   : > { %416 = vadd.xlane.f32.xlu2 %v415_v9  ;;  %413 = vadd.xlane.f32.xlu0 %v412_v10 }
  0x1a   : > { %401 = vadd.xlane.f32.xlu1 %v400_v11  ;;  %v422_v21 = vadd.f32 %v961_v17, %v421_v20  ;;  %v577_v20 = vld [vmem:[%s343_s27] sm:$0x1] }
  0x1c   : > { %v1072_v22 = vsel %vm423_vm1, %v961_v17, %v422_v21 }
  0x21   : > { %398 = vadd.xlane.f32.xlu0 %v397_v14 }
  0x22   : > { %404 = vadd.xlane.f32.xlu1 %v403_v15 }
  0x84   : > { %v411_v23 = vpop.xlane.xlu2 %410  ;;  %v408_v24 = vpop.xlane.xlu0 %407 }
  0x85   : > { %v396_v25 = vpop.xlane.xlu1 %395  ;;  %v429_v26 = vmul.f32 %v1072_v22, %v408_v24  ;;  %v430_v41 = vmul.f32 %v1072_v22, %v411_v23 }
  0x86   : > { %v425_v27 = vmul.f32 %v1072_v22, %v396_v25 }
  0x87   : > { %v1076_v28 = vsub.f32 %v389_v2, %v429_v26  ;;  %v1103_v48 = vsub.f32 %v390_v0, %v430_v41  ;;  %v616_v0 = vld [vmem:[%s1330_s3 + $0x30] sm:$0xff]  ;;  %v614_v2 = vld [vmem:[%s1330_s3 + $0x20] sm:$0xff] }
  0x88   : > { %v1078_v29 = vsub.f32 %v385_v3, %v425_v27  ;;  %651 = vmatpush.msra.mxu0 %v616_v0  ;;  %912 = vmatpush.msra.mxu2 %v616_v0  ;;  %v613_v3 = vld [vmem:[%s1330_s3 + $0x18] sm:$0xff] }
  0x89   : > { %v445_v30 = vmul.f32 %v1076_v28, %v1076_v28  ;;  %v446_v56 = vmul.f32 %v1103_v48, %v1103_v48  ;;  %911 = vmatpush.msra.mxu1 %v616_v0  ;;  %913 = vmatpush.msra.mxu3 %v616_v0 }
  0x8a   : > { %v441_v31 = vmul.f32 %v1078_v29, %v1078_v29  ;;  %652 = vmatpush.msra.mxu0 %v615_v1  ;;  %915 = vmatpush.msra.mxu2 %v615_v1 }
  0x8b   : > { %v461_v33 = vsel %vm393_vm0, %v445_v30, 0.0  ;;  %v464_v59 = vsel %vm393_vm0, %v446_v56, 0.0  ;;  %914 = vmatpush.msra.mxu1 %v615_v1  ;;  %916 = vmatpush.msra.mxu3 %v615_v1  ;;  %v578_v30 = vadd.f32 1.0, %v577_v20 }
  0x8c   : > { %v417_v32 = vpop.xlane.xlu2 %416  ;;  %v449_v34 = vsel %vm393_vm0, %v441_v31, 0.0  ;;  %462 = vadd.xlane.f32.xlu2 %v461_v33  ;;  %v414_v36 = vpop.xlane.xlu0 %413  ;;  %653 = vmatpush.msra.mxu0 %v614_v2 }
  0x8d   : > { %v432_v35 = vmul.f32 %v1072_v22, %v417_v32  ;;  %450 = vadd.xlane.f32.xlu1 %v449_v34  ;;  %v402_v37 = vpop.xlane.xlu1 %401  ;;  %v431_v38 = vmul.f32 %v1072_v22, %v414_v36  ;;  %918 = vmatpush.msra.mxu2 %v614_v2 }
  0x8e   : > { %v427_v39 = vmul.f32 %v1072_v22, %v402_v37  ;;  %917 = vmatpush.msra.mxu1 %v614_v2  ;;  %919 = vmatpush.msra.mxu3 %v614_v2 }
  0x8f   : > { %v1089_v40 = vsub.f32 %v392_v6, %v432_v35  ;;  %v1092_v42 = vsub.f32 %v391_v7, %v431_v38  ;;  %654 = vmatpush.msra.mxu0 %v613_v3  ;;  %921 = vmatpush.msra.mxu2 %v613_v3  ;;  %v610_v6 = vld [vmem:[%s1330_s3] sm:$0xff]  ;;  %v1165_v38 = vperm.slane %v578_v30, 0 }
  0x90   : > { %v1094_v43 = vsub.f32 %v387_v8, %v427_v39  ;;  %920 = vmatpush.msra.mxu1 %v613_v3  ;;  %922 = vmatpush.msra.mxu3 %v613_v3  ;;  %v1206_v3 = vld [vmem:[%s346_s28] ss:$0 sm:$0xff] }
  0x91   : > { %v448_v44 = vmul.f32 %v1089_v40, %v1089_v40  ;;  %v447_v45 = vmul.f32 %v1092_v42, %v1092_v42  ;;  %655 = vmatpush.msra.mxu0 %v612_v4  ;;  %924 = vmatpush.msra.mxu2 %v612_v4 }
  0x92   : > { %v443_v46 = vmul.f32 %v1094_v43, %v1094_v43  ;;  %923 = vmatpush.msra.mxu1 %v612_v4  ;;  %925 = vmatpush.msra.mxu3 %v612_v4 }
  0x93   : > { %v470_v47 = vsel %vm393_vm0, %v448_v44, 0.0  ;;  %v467_v49 = vsel %vm393_vm0, %v447_v45, 0.0  ;;  %656 = vmatpush.msra.mxu0 %v611_v5  ;;  %927 = vmatpush.msra.mxu2 %v611_v5 }
  0x94   : > { %v455_v50 = vsel %vm393_vm0, %v443_v46, 0.0  ;;  %468 = vadd.xlane.f32.xlu0 %v467_v49  ;;  %v399_v51 = vpop.xlane.xlu0 %398  ;;  %926 = vmatpush.msra.mxu1 %v611_v5 }
  0x95   : > { %471 = vadd.xlane.f32.xlu1 %v470_v47  ;;  %v405_v52 = vpop.xlane.xlu1 %404  ;;  %v426_v53 = vmul.f32 %v1072_v22, %v399_v51  ;;  %456 = vadd.xlane.f32.xlu2 %v455_v50 }
  0x96   : > { %v428_v54 = vmul.f32 %v1072_v22, %v405_v52  ;;  %928 = vmatpush.msra.mxu3 %v611_v5  ;;  %657 = vmatpush.msra.mxu0 %v610_v6 }
  0x97   : > { %v1109_v55 = vsub.f32 %v386_v12, %v426_v53  ;;  %930 = vmatpush.msra.mxu2 %v610_v6  ;;  %929 = vmatpush.msra.mxu1 %v610_v6 }
  0x98   : > { %v1115_v58 = vsub.f32 %v388_v13, %v428_v54  ;;  %931 = vmatpush.msra.mxu3 %v610_v6 }
  0x99   : > { %v442_v57 = vmul.f32 %v1109_v55, %v1109_v55 }
  0x9a   : > { %v444_v61 = vmul.f32 %v1115_v58, %v1115_v58 }
  0x9b   : > { %v452_v60 = vsel %vm393_vm0, %v442_v57, 0.0 }
  0x9c   : > { %465 = vadd.xlane.f32.xlu0 %v464_v59  ;;  %v458_v62 = vsel %vm393_vm0, %v444_v61, 0.0 }
  0x9d   : > { %453 = vadd.xlane.f32.xlu2 %v452_v60 }
  0xa4   : > { %459 = vadd.xlane.f32.xlu0 %v458_v62 }
  0xff   : > { %v463_v7 = vpop.xlane.xlu2 %462 }
 0x100   : > { %v451_v8 = vpop.xlane.xlu1 %450  ;;  %v477_v9 = vmul.f32 %v463_v7, %v1072_v22 }
 0x101   : > { %v473_v10 = vmul.f32 %v451_v8, %v1072_v22 }
 0x102   : > { %v485_v11 = vadd.f32 1e-05, %v477_v9 }
 0x103   : > { %v481_v12 = vadd.f32 1e-05, %v473_v10 }
 0x104   : > { %962 = vrsqrt.f32 %v485_v11  ;;  %vm535_vm5 = vweird.f32 %v485_v11 }
 0x105   : > { %964 = vrsqrt.f32 %v481_v12  ;;  %vm495_vm3 = vweird.f32 %v481_v12 }
 0x107   : > { %v469_v13 = vpop.xlane.xlu0 %468 }
 0x108   : > { %v472_v14 = vpop.xlane.xlu1 %471  ;;  %v479_v15 = vmul.f32 %v469_v13, %v1072_v22  ;;  %v457_v16 = vpop.xlane.xlu2 %456  ;;  %v1003_v13 = vmov 0.0  }
 0x109   : > { %v480_v17 = vmul.f32 %v472_v14, %v1072_v22  ;;  %v475_v18 = vmul.f32 %v457_v16, %v1072_v22  ;;  %377 = vst.msk [vmem:[#allocation2] sm:$0xff] %vm376_vm12, %v1003_v13 }
 0x10a   : > { %v963_v19 = vpop.eup %962  ;;  %v1155_v21 = vadd.f32 1e-05, %v479_v15  ;;  %378 = vst.msk [vmem:[#allocation2 + $0x8] sm:$0xff] %vm376_vm12, %v1003_v13 }
 0x10b   : > { %v1157_v23 = vadd.f32 1e-05, %v480_v17  ;;  %v965_v24 = vpop.eup %964  ;;  %v530_v25 = vmul.f32 %v963_v19, %v485_v11  ;;  %v1159_v26 = vadd.f32 1e-05, %v475_v18  ;;  %vm536_vm2 = vweird.f32 %v963_v19  ;;  %379 = vst.msk [vmem:[#allocation2 + $0x10] sm:$0xff] %vm376_vm12, %v1003_v13 }
 0x10c   : > { %v490_v27 = vmul.f32 %v965_v24, %v481_v12  ;;  %966 = vrsqrt.f32 %v1155_v21  ;;  %vm496_vm4 = vweird.f32 %v965_v24  ;;  %vm1180_vm6 = vmor %vm535_vm5, %vm536_vm2  ;;  %vm555_vm7 = vweird.f32 %v1155_v21  ;;  %380 = vst.msk [vmem:[#allocation2 + $0x18] sm:$0xff] %vm376_vm12, %v1003_v13 }
 0x10d   : > { %v531_v31 = vmul.f32 %v963_v19, %v530_v25  ;;  %968 = vrsqrt.f32 %v1159_v26  ;;  %vm497_vm8 = vmor %vm495_vm3, %vm496_vm4  ;;  %vm515_vm9 = vweird.f32 %v1159_v26  ;;  %vm565_vm10 = vweird.f32 %v1157_v23  ;;  %381 = vst.msk [vmem:[#allocation2 + $0x20] sm:$0xff] %vm376_vm12, %v1003_v13 }
 0x10e   : > { %v491_v32 = vmul.f32 %v965_v24, %v490_v27  ;;  %970 = vrsqrt.f32 %v1157_v23  ;;  %382 = vst.msk [vmem:[#allocation2 + $0x28] sm:$0xff] %vm376_vm12, %v1003_v13 }
 0x10f   : > { %v532_v33 = vmul.f32 0.5, %v531_v31  ;;  %v466_v34 = vpop.xlane.xlu0 %465  ;;  %383 = vst.msk [vmem:[#allocation2 + $0x30] sm:$0xff] %vm376_vm12, %v1003_v13 }
 0x110   : > { %v492_v35 = vmul.f32 0.5, %v491_v32  ;;  %v478_v36 = vmul.f32 %v466_v34, %v1072_v22  ;;  %v454_v37 = vpop.xlane.xlu2 %453  ;;  %384 = vst.msk [vmem:[#allocation2 + $0x38] sm:$0xff] %vm376_vm12, %v1003_v13 }
 0x111   : > { %v533_v39 = vsub.f32 1.5, %v532_v33  ;;  %v474_v41 = vmul.f32 %v454_v37, %v1072_v22 }
 0x112   : > { %v1168_v44 = vpop.eup %966  ;;  %v493_v45 = vsub.f32 1.5, %v492_v35  ;;  %v1170_v46 = vadd.f32 1e-05, %v478_v36 }
 0x113   : > { %v1172_v47 = vpop.eup %968  ;;  %v534_v49 = vmul.f32 %v963_v19, %v533_v39  ;;  %v550_v50 = vmul.f32 %v1168_v44, %v1155_v21  ;;  %v1176_v51 = vadd.f32 1e-05, %v474_v41  ;;  %vm556_vm11 = vweird.f32 %v1168_v44 }
 0x114   : > { %v1178_v52 = vpop.eup %970  ;;  %v494_v54 = vmul.f32 %v965_v24, %v493_v45  ;;  %v510_v56 = vmul.f32 %v1172_v47, %v1159_v26  ;;  %972 = vrsqrt.f32 %v1170_v46  ;;  %vm516_vm13 = vweird.f32 %v1172_v47  ;;  %vm557_vm15 = vmor %vm555_vm7, %vm556_vm11 }
 0x115   : > { %v538_v57 = vsel %vm1180_vm6, %v963_v19, %v534_v49  ;;  %v551_v59 = vmul.f32 %v1168_v44, %v550_v50  ;;  %v560_v60 = vmul.f32 %v1178_v52, %v1157_v23  ;;  %974 = vrsqrt.f32 %v1176_v51  ;;  %vm517_vm1 = vmor %vm515_vm9, %vm516_vm13 }
 0x116   : > { %v498_v61 = vsel %vm497_vm8, %v965_v24, %v494_v54  ;;  %v511_v62 = vmul.f32 %v1172_v47, %v510_v56  ;;  %v573_v6 = vmul.f32 %v538_v57, %v1076_v28  ;;  %vm566_vm14 = vweird.f32 %v1178_v52 }
 0x117   : > { %v552_v63 = vmul.f32 0.5, %v551_v59  ;;  %v561_v0 = vmul.f32 %v1178_v52, %v560_v60  ;;  %v460_v1 = vpop.xlane.xlu0 %459  ;;  %v569_v2 = vmul.f32 %v498_v61, %v1078_v29  ;;  %vm567_vm2 = vmor %vm565_vm10, %vm566_vm14  ;;  %vm545_vm4 = vweird.f32 %v1170_v46 }
 0x118   : > { %v512_v4 = vmul.f32 0.5, %v511_v62  ;;  %v476_v5 = vmul.f32 %v460_v1, %v1072_v22  ;;  %v586_v12 = vmul.f32 %v1165_v38, %v573_v6  ;;  %vm505_vm5 = vweird.f32 %v1176_v51  ;;  %v959_v6 = vld [vmem:[%s1331_s4] ss:$0 sm:$0xff] }
 0x119   : > { %v553_v7 = vsub.f32 1.5, %v552_v63  ;;  %v562_v8 = vmul.f32 0.5, %v561_v0  ;;  %v582_v9 = vmul.f32 %v1165_v38, %v569_v2  ;;  %v602_v0 = vld [vmem:[#allocation2] sm:$0xff] }
 0x11a   : > { %v1211_v10 = vpop.eup %972  ;;  %v513_v11 = vsub.f32 1.5, %v512_v4  ;;  %v1214_v29 = vadd.f32 1e-05, %v476_v5  ;;  %v598_v25 = vadd.f32 %v1206_v3, %v586_v12  ;;  %v606_v4 = vld [vmem:[#allocation2 + $0x20] sm:$0xff]  ;;  %v604_v5 = vld [vmem:[#allocation2 + $0x10] sm:$0xff]  ;;  %v603_v12 = vld [vmem:[#allocation2 + $0x8] sm:$0xff] }
 0x11b   : > { %v554_v22 = vmul.f32 %v1168_v44, %v553_v7  ;;  %v563_v28 = vsub.f32 1.5, %v562_v8  ;;  %v540_v14 = vmul.f32 %v1211_v10, %v1170_v46  ;;  %v975_v15 = vpop.eup %974  ;;  %v594_v17 = vadd.f32 %v1206_v3, %v582_v9 }
 0x11c   : > { %v514_v16 = vmul.f32 %v1172_v47, %v513_v11  ;;  %976 = vrsqrt.f32 %v1214_v29  ;;  %v500_v21 = vmul.f32 %v975_v15, %v1176_v51  ;;  %900 = vmatmul.msk.f32.vlgmr.msra.gmra.mxu2 %vm393_vm0, %v598_v25  ;;  %vm546_vm3 = vweird.f32 %v1211_v10 }
 0x11d   : > { %v558_v18 = vsel %vm557_vm15, %v1168_v44, %v554_v22  ;;  %v564_v19 = vmul.f32 %v1178_v52, %v563_v28  ;;  %v541_v20 = vmul.f32 %v1211_v10, %v540_v14  ;;  %896 = vmatmul.msk.f32.vlgmr.msra.gmra.mxu0 %vm393_vm0, %v594_v17  ;;  %vm506_vm6 = vweird.f32 %v975_v15  ;;  %vm547_vm7 = vmor %vm545_vm4, %vm546_vm3  ;;  %v607_v14 = vld [vmem:[#allocation2 + $0x28] sm:$0xff] }
 0x11e   : > { %v518_v24 = vsel %vm517_vm1, %v1172_v47, %v514_v16  ;;  %v575_v26 = vmul.f32 %v558_v18, %v1092_v42  ;;  %v501_v31 = vmul.f32 %v975_v15, %v500_v21  ;;  %vm507_vm8 = vmor %vm505_vm5, %vm506_vm6  ;;  %vm525_vm10 = vweird.f32 %v1214_v29  ;;  %v605_v21 = vld [vmem:[#allocation2 + $0x18] sm:$0xff] }
 0x11f   : > { %v568_v27 = vsel %vm567_vm2, %v1178_v52, %v564_v19  ;;  %v542_v30 = vmul.f32 0.5, %v541_v20  ;;  %v571_v32 = vmul.f32 %v518_v24, %v1094_v43 }
 0x120   : > { %v588_v23 = vmul.f32 %v1165_v38, %v575_v26  ;;  %v576_v33 = vmul.f32 %v568_v27, %v1089_v40  ;;  %v502_v42 = vmul.f32 0.5, %v501_v31 }
 0x121   : > { %v543_v34 = vsub.f32 1.5, %v542_v30  ;;  %v584_v35 = vmul.f32 %v1165_v38, %v571_v32 }
 0x122   : > { %v977_v36 = vpop.eup %976  ;;  %v600_v43 = vadd.f32 %v1206_v3, %v588_v23  ;;  %v589_v37 = vmul.f32 %v1165_v38, %v576_v33  ;;  %v503_v39 = vsub.f32 1.5, %v502_v42 }
 0x123   : > { %v544_v40 = vmul.f32 %v1211_v10, %v543_v34  ;;  %v520_v41 = vmul.f32 %v977_v36, %v1214_v29  ;;  %v596_v44 = vadd.f32 %v1206_v3, %v584_v35  ;;  %vm526_vm9 = vweird.f32 %v977_v36 }
 0x124   : > { %902 = vmatmul.msk.f32.vlgmr.msra.gmra.mxu3 %vm393_vm0, %v600_v43  ;;  %v601_v45 = vadd.f32 %v1206_v3, %v589_v37  ;;  %v504_v47 = vmul.f32 %v975_v15, %v503_v39  ;;  %vm527_vm11 = vmor %vm525_vm10, %vm526_vm9 }
 0x125   : > { %v548_v46 = vsel %vm547_vm7, %v1211_v10, %v544_v40  ;;  %v521_v49 = vmul.f32 %v977_v36, %v520_v41  ;;  %898 = vmatmul.msk.f32.vlgmr.msra.gmra.mxu1 %vm393_vm0, %v596_v44 }
 0x126   : > { %v574_v50 = vmul.f32 %v548_v46, %v1103_v48  ;;  %v508_v51 = vsel %vm507_vm8, %v975_v15, %v504_v47  ;;  %v609_v15 = vld [vmem:[#allocation2 + $0x38] sm:$0xff] }
 0x127   : > { %v522_v52 = vmul.f32 0.5, %v521_v49  ;;  %v570_v53 = vmul.f32 %v508_v51, %v1109_v55 }
 0x128   : > { %v587_v54 = vmul.f32 %v1165_v38, %v574_v50 }
 0x129   : > { %v523_v56 = vsub.f32 1.5, %v522_v52  ;;  %v583_v57 = vmul.f32 %v1165_v38, %v570_v53 }
 0x12a   : > { %v599_v59 = vadd.f32 %v1206_v3, %v587_v54 }
 0x12b   : > { %v524_v60 = vmul.f32 %v977_v36, %v523_v56  ;;  %v595_v61 = vadd.f32 %v1206_v3, %v583_v57 }
 0x12c   : > { %901 = vmatmul.msk.f32.gmra.mxu2 %vm393_vm0, %v599_v59  ;;  %903 = vmatmul.msk.f32.gmra.mxu3 %vm393_vm0, %v601_v45 }
 0x12d   : > { %v528_v48 = vsel %vm527_vm11, %v977_v36, %v524_v60  ;;  %897 = vmatmul.msk.f32.gmra.mxu0 %vm393_vm0, %v595_v61 }
 0x12e   : > { %v572_v55 = vmul.f32 %v528_v48, %v1115_v58 }
 0x130   : > { %v585_v62 = vmul.f32 %v1165_v38, %v572_v55 }
 0x132   : > { %v597_v63 = vadd.f32 %v1206_v3, %v585_v62  ;;  %v608_v3 = vld [vmem:[#allocation2 + $0x30] sm:$0xff] }
 0x134   : > { %899 = vmatmul.msk.f32.gmra.mxu1 %vm393_vm0, %v597_v63 }
 0x19a   : > { %v659_v1 = vpop.f32.mrf.mxu0 }
 0x19b   : > { %v683_v2 = vadd.f32 %v659_v1, %v602_v0 }
 0x19d   : > { %692 = vst.msk [vmem:[#allocation2] sm:$0xff] %vm376_vm12, %v683_v2 }
 0x19f   : > { %v671_v7 = vpop.f32.mrf.mxu2 }
 0x1a0   : > { %v687_v58 = vadd.f32 %v671_v7, %v606_v4 }
 0x1a2   : > { %v665_v8 = vpop.f32.mrf.mxu1  ;;  %696 = vst.msk [vmem:[#allocation2 + $0x20] sm:$0xff] %vm376_vm12, %v687_v58 }
 0x1a3   : > { %v685_v9 = vadd.f32 %v665_v8, %v604_v5 }
 0x1a4   : > { %v703_v38 = vld [vmem:[#allocation2] sm:$0xff] }
 0x1a5   : > { %v715_v10 = vadd.f32 %v959_v6, %v703_v38  ;;  %694 = vst.msk [vmem:[#allocation2 + $0x10] sm:$0xff] %vm376_vm12, %v685_v9 }
 0x1a7   : > { %v677_v11 = vpop.f32.mrf.mxu3  ;;  %723 = vst.msk [vmem:[%s1293_s9] sm:$0xff] %vm376_vm12, %v715_v10 }
 0x1a8   : > { %v689_v29 = vadd.f32 %v677_v11, %v608_v3 }
 0x1a9   : > { %v707_v28 = vld [vmem:[#allocation2 + $0x20] sm:$0xff] }
 0x1aa   : > { %698 = vst.msk [vmem:[#allocation2 + $0x30] sm:$0xff] %vm376_vm12, %v689_v29  ;;  %v662_v13 = vpop.f32.mrf.mxu0  ;;  %v719_v16 = vadd.f32 %v959_v6, %v707_v28 }
 0x1ab   : > { %v684_v22 = vadd.f32 %v662_v13, %v603_v12 }
 0x1ac   : > { %v705_v17 = vld [vmem:[#allocation2 + $0x10] sm:$0xff]  ;;  %727 = vst.msk [vmem:[%s1293_s9 + $0x20] sm:$0xff] %vm376_vm12, %v719_v16 }
 0x1ad   : > { %693 = vst.msk [vmem:[#allocation2 + $0x8] sm:$0xff] %vm376_vm12, %v684_v22  ;;  %v717_v18 = vadd.f32 %v959_v6, %v705_v17 }
 0x1af   : > { %v674_v19 = vpop.f32.mrf.mxu2  ;;  %v680_v20 = vpop.f32.mrf.mxu3  ;;  %725 = vst.msk [vmem:[%s1293_s9 + $0x10] sm:$0xff] %vm376_vm12, %v717_v18 }
 0x1b0   : > { %v688_v24 = vadd.f32 %v674_v19, %v607_v14  ;;  %v690_v25 = vadd.f32 %v680_v20, %v609_v15 }
 0x1b1   : > { %v709_v26 = vld [vmem:[#allocation2 + $0x30] sm:$0xff]  ;;  %v668_v27 = vpop.f32.mrf.mxu1 }
 0x1b2   : > { %v721_v30 = vadd.f32 %v959_v6, %v709_v26  ;;  %697 = vst.msk [vmem:[#allocation2 + $0x28] sm:$0xff] %vm376_vm12, %v688_v24  ;;  %v686_v31 = vadd.f32 %v668_v27, %v605_v21 }
 0x1b3   : > { %699 = vst.msk [vmem:[#allocation2 + $0x38] sm:$0xff] %vm376_vm12, %v690_v25 }
 0x1b4   : > { %729 = vst.msk [vmem:[%s1293_s9 + $0x30] sm:$0xff] %vm376_vm12, %v721_v30  ;;  %v704_v32 = vld [vmem:[#allocation2 + $0x8] sm:$0xff] }
 0x1b5   : > { %695 = vst.msk [vmem:[#allocation2 + $0x18] sm:$0xff] %vm376_vm12, %v686_v31  ;;  %v716_v23 = vadd.f32 %v959_v6, %v704_v32 }
 0x1b7   : > { %724 = vst.msk [vmem:[%s1293_s9 + $0x8] sm:$0xff] %vm376_vm12, %v716_v23 }
 0x1b9   : > { %v708_v33 = vld [vmem:[#allocation2 + $0x28] sm:$0xff] }
 0x1ba   : > { %v720_v34 = vadd.f32 %v959_v6, %v708_v33  ;;  %v710_v42 = vld [vmem:[#allocation2 + $0x38] sm:$0xff] }
 0x1bb   : > { %v722_v35 = vadd.f32 %v959_v6, %v710_v42 }
 0x1bc   : > { %728 = vst.msk [vmem:[%s1293_s9 + $0x28] sm:$0xff] %vm376_vm12, %v720_v34  ;;  %v706_v36 = vld [vmem:[#allocation2 + $0x18] sm:$0xff] }
 0x1bd   : > { %730 = vst.msk [vmem:[%s1293_s9 + $0x38] sm:$0xff] %vm376_vm12, %v722_v35  ;;  %v718_v43 = vadd.f32 %v959_v6, %v706_v36 }
 0x1bf   : > { %726 = vst.msk [vmem:[%s1293_s9 + $0x18] sm:$0xff] %vm376_vm12, %v718_v43 }
 0x1c0 PF: > { %s15_s20 = sadd.s32 1, %s1000_s20   ;;  %s1335_s18 = smov %s996_s19 }
 0x1c1   : > { %p12_p5 = scmp.ge.s32.totalorder %s15_s20, 4   ;;  %s1336_s19 = smov %s1338_s21 }
 0x1c3   :  { %14 = sbr.rel (!%p12_p5) target bundleno = 2 (0x2), region = 90 }

</bundles_post_ra>
